<compile_context>
chip_gen: v5e
topology: v5e:2x2
jax: 0.10.0
libtpu: 0.0.40
codegen_flags: <defaults>
</compile_context>

<pallas_src>
import functools
import math

import jax
import jax.numpy as jnp
import numpy as np
from jax.experimental import pallas as pl
from jax.experimental.pallas import tpu as pltpu


# ------------------------------ Pallas kernel --------------------------------

def _resnet_block_kernel(x_ref, tp_ref,
                         g1w_ref, g1b_ref, gr1_ref, gb1_ref,
                         w1_ref, b1_ref,
                         g2w_ref, g2b_ref, gr2_ref, gb2_ref,
                         w2_ref, b2_ref,
                         *rest, H, W, eps):
    # Trailing refs: [wsc, bsc, o] when a 1x1 nin_shortcut exists, else [o].
    if len(rest) == 3:
        wsc_ref, bsc_ref, o_ref = rest
    else:
        wsc_ref = bsc_ref = None
        (o_ref,) = rest

    HW = H * W
    cin = x_ref.shape[-1]
    cout = o_ref.shape[-1]
    f32 = jnp.float32

    def silu(z):
        # x * sigmoid(x) in f32 (EUP exp + VPU)
        return z * (1.0 / (1.0 + jnp.exp(-z)))

    def group_norm(z, gr_ref, gb_ref, gamma_ref, beta_ref):
        # z: (HW, C) f32.  gr: (C, G) same-group matrix scaled by 1/(gsize*HW),
        # gb: (G, C) 0/1 broadcast matrix.  Two tiny matmuls reduce within the
        # group and broadcast the statistic back (lane-friendly, no reshape).
        s1 = jnp.sum(z, axis=0, keepdims=True)                       # (1, C)
        s2 = jnp.sum(z * z, axis=0, keepdims=True)                   # (1, C)
        mean_g = jnp.dot(s1, gr_ref[...], preferred_element_type=f32)  # (1, G)
        ex2_g = jnp.dot(s2, gr_ref[...], preferred_element_type=f32)   # (1, G)
        mean = jnp.dot(mean_g, gb_ref[...], preferred_element_type=f32)  # (1, C)
        ex2 = jnp.dot(ex2_g, gb_ref[...], preferred_element_type=f32)    # (1, C)
        var = jnp.maximum(ex2 - mean * mean, 0.0)
        inv = jax.lax.rsqrt(var + eps)
        return (z - mean) * inv * gamma_ref[...] + beta_ref[...]

    def rowshift(m, d):
        # t[i, :] = m[i + d, :], zero-filled outside [0, HW); d is static.
        # Static slice + concat along the sublane axis (cheap data movement).
        if d == 0:
            return m
        pad = jnp.zeros((abs(d), m.shape[1]), m.dtype)
        if d > 0:
            return jnp.concatenate([m[d:, :], pad], axis=0)
        return jnp.concatenate([pad, m[:d, :]], axis=0)

    # x-coordinate of every flattened spatial position; shared by both convs.
    xcoord = jax.lax.broadcasted_iota(jnp.int32, (HW, 1), 0) % W
    m_left = (xcoord > 0).astype(f32)          # dx = -1 tap valid
    m_right = (xcoord < (W - 1)).astype(f32)   # dx = +1 tap valid

    def conv3x3(z, w_ref, b_ref):
        # z: (HW, c) f32 -> (HW, cout) f32.
        # w_ref: (3, 3*c, cout) bf16, w_ref[kh][kw*c + ci, co] = W[co,ci,kh,kw].
        zl = rowshift(z, -1) * m_left          # value at x-1 (zero at left edge)
        zr = rowshift(z, 1) * m_right          # value at x+1 (zero at right edge)
        xnb = jnp.concatenate([zl, z, zr], axis=-1).astype(jnp.bfloat16)  # (HW,3c)
        # dy-grouped accumulation: row shift by dy*W also zero-fills the rows
        # that fall outside the image, so no extra y-mask is needed.
        acc = jnp.dot(rowshift(xnb, -W), w_ref[0], preferred_element_type=f32)
        acc = acc + jnp.dot(xnb, w_ref[1], preferred_element_type=f32)
        acc = acc + jnp.dot(rowshift(xnb, W), w_ref[2], preferred_element_type=f32)
        return acc + b_ref[...]

    xs = x_ref[...].reshape(HW, cin)                                  # (HW, Cin)

    # norm1 -> SiLU -> conv1
    h = silu(group_norm(xs, gr1_ref, gb1_ref, g1w_ref, g1b_ref))
    h = conv3x3(h, w1_ref, b1_ref)

    # + temb_proj(SiLU(temb)) : precomputed in the wrapper, (1, Cout) row
    h = h + tp_ref[...]

    # norm2 -> SiLU -> dropout(identity in eval) -> conv2
    h = silu(group_norm(h, gr2_ref, gb2_ref, g2w_ref, g2b_ref))
    # TODO(synk): nn.Dropout train-mode RNG masking not implemented (eval identity).
    h = conv3x3(h, w2_ref, b2_ref)

    # shortcut: 1x1 nin conv (bf16 MXU) or trace-time identity
    if wsc_ref is not None:
        sc = jnp.dot(xs.astype(jnp.bfloat16), wsc_ref[...],
                     preferred_element_type=f32) + bsc_ref[...]
    else:
        sc = xs

    o_ref[...] = (sc + h).reshape(H, W, cout).astype(o_ref.dtype)


# ------------------------------ pallas_call glue ------------------------------

def _const_spec(shape):
    """BlockSpec for a grid-invariant parameter; single-buffer it if supported."""
    idx = lambda b: (0,) * len(shape)
    buffered = getattr(pl, "Buffered", None)
    if buffered is not None:
        try:
            return pl.BlockSpec(shape, idx, pipeline_mode=buffered(1))
        except TypeError:
            pass  # older jax without pipeline_mode: fall back to default buffering
    return pl.BlockSpec(shape, idx)


def _resnet_block_pallas(x_nhwc, tp, kp, *, eps):
    B, H, W, Cin = x_nhwc.shape
    Cout = kp["b1"].shape[-1]
    G = kp["gr1"].shape[-1]
    has_nin = "wsc" in kp

    kernel = functools.partial(_resnet_block_kernel, H=H, W=W, eps=eps)

    in_specs = [
        pl.BlockSpec((None, H, W, Cin), lambda b: (b, 0, 0, 0)),   # x
        pl.BlockSpec((None, 1, Cout), lambda b: (b, 0, 0)),        # temb projection
        _const_spec((1, Cin)), _const_spec((1, Cin)),              # gn1 gamma/beta
        _const_spec((Cin, G)), _const_spec((G, Cin)),              # gn1 reduce/bcast
        _const_spec((3, 3 * Cin, Cout)), _const_spec((1, Cout)),   # conv1 w/b
        _const_spec((1, Cout)), _const_spec((1, Cout)),            # gn2 gamma/beta
        _const_spec((Cout, G)), _const_spec((G, Cout)),            # gn2 reduce/bcast
        _const_spec((3, 3 * Cout, Cout)), _const_spec((1, Cout)),  # conv2 w/b
    ]
    args = [x_nhwc, tp,
            kp["gn1_w"], kp["gn1_b"], kp["gr1"], kp["gb1"], kp["w1"], kp["b1"],
            kp["gn2_w"], kp["gn2_b"], kp["gr2"], kp["gb2"], kp["w2"], kp["b2"]]
    if has_nin:
        in_specs += [_const_spec((Cin, Cout)), _const_spec((1, Cout))]
        args += [kp["wsc"], kp["bsc"]]

    # TODO(synk): at production Cout>=128 the output store is already lane-dense;
    # for small Cout a (B, H, W*Cout) out layout would further reduce masked vst.
    return pl.pallas_call(
        kernel,
        out_shape=jax.ShapeDtypeStruct((B, H, W, Cout), jnp.float32),
        grid=(B,),
        in_specs=in_specs,
        out_specs=pl.BlockSpec((None, H, W, Cout), lambda b: (b, 0, 0, 0)),
        compiler_params=pltpu.CompilerParams(
            dimension_semantics=("parallel",),
            vmem_limit_bytes=32 * 1024 * 1024),
    )(*args)


# ------------------------ parameter preparation (one-time) --------------------

def _group_mats(C, num_groups, HW):
    gsize = C // num_groups
    ids = np.arange(C) // gsize
    same = ids[:, None] == np.arange(num_groups)[None, :]
    reduce_m = same.astype(np.float32) / float(gsize * HW)   # (C, G)
    bcast_m = same.T.astype(np.float32)                      # (G, C)
    return jnp.asarray(reduce_m), jnp.asarray(bcast_m)


def prepare_kernel_params(p, *, num_groups, H, W):
    """One-time conversion from PyTorch-layout params to kernel layout."""
    Cout, Cin = p["conv1_w"].shape[0], p["conv1_w"].shape[1]
    HW = H * W
    kp = {}
    kp["gn1_w"] = p["gn1_w"].reshape(1, Cin).astype(jnp.float32)
    kp["gn1_b"] = p["gn1_b"].reshape(1, Cin).astype(jnp.float32)
    kp["gr1"], kp["gb1"] = _group_mats(Cin, num_groups, HW)
    # OIHW -> (kh, kw, ci, co) -> (3, 3*Cin, Cout), bf16 MXU operand
    kp["w1"] = jnp.transpose(p["conv1_w"], (2, 3, 1, 0)).reshape(
        3, 3 * Cin, Cout).astype(jnp.bfloat16)
    kp["b1"] = p["conv1_b"].reshape(1, Cout).astype(jnp.float32)
    if "temb_w" in p:  # Linear (out,in) -> (in,out); used in the wrapper, not the kernel
        kp["wt"] = jnp.transpose(p["temb_w"]).astype(jnp.float32)
        kp["bt"] = p["temb_b"].reshape(1, Cout).astype(jnp.float32)
    kp["gn2_w"] = p["gn2_w"].reshape(1, Cout).astype(jnp.float32)
    kp["gn2_b"] = p["gn2_b"].reshape(1, Cout).astype(jnp.float32)
    kp["gr2"], kp["gb2"] = _group_mats(Cout, num_groups, HW)
    kp["w2"] = jnp.transpose(p["conv2_w"], (2, 3, 1, 0)).reshape(
        3, 3 * Cout, Cout).astype(jnp.bfloat16)
    kp["b2"] = p["conv2_b"].reshape(1, Cout).astype(jnp.float32)
    if "nin_w" in p:  # nin_shortcut (1x1 conv); identity handled at trace time
        kp["wsc"] = jnp.transpose(p["nin_w"][:, :, 0, 0]).astype(jnp.bfloat16)
        kp["bsc"] = p["nin_b"].reshape(1, Cout).astype(jnp.float32)
    # TODO(synk): conv_shortcut=True (3x3 shortcut) variant not implemented.
    return kp


# --------------------------------- forward -----------------------------------

def resnet_block_forward_nhwc(x_nhwc, temb, kparams, *, eps=1e-6):
    """Native NHWC entry (preferred for production: no layout transposes)."""
    B = x_nhwc.shape[0]
    Cout = kparams["b1"].shape[-1]
    if temb is not None and "wt" in kparams:
        t = temb * jax.nn.sigmoid(temb)
        tp = t @ kparams["wt"] + kparams["bt"]        # (B, Cout), one batched matmul
    else:
        tp = jnp.zeros((B, Cout), jnp.float32)
    return _resnet_block_pallas(x_nhwc, tp[:, None, :], kparams, eps=eps)


@jax.jit
def resnet_block_forward(x_nchw, temb, kparams):
    """x: (B, Cin, H, W) NCHW, temb: (B, Tc) or None. Returns (B, Cout, H, W).
    The NCHW<->NHWC transposes exist only to preserve the PyTorch I/O contract."""
    x_nhwc = jnp.transpose(x_nchw, (0, 2, 3, 1))
    out_nhwc = resnet_block_forward_nhwc(x_nhwc, temb, kparams)
    return jnp.transpose(out_nhwc, (0, 3, 1, 2))


# ------------------------------- init params ---------------------------------

def _uniform_init(key, w_shape, b_shape, fan_in):
    kw, kb = jax.random.split(key)
    bound = 1.0 / math.sqrt(fan_in)
    w = jax.random.uniform(kw, w_shape, jnp.float32, -bound, bound)
    b = jax.random.uniform(kb, b_shape, jnp.float32, -bound, bound)
    return w, b


def init_params(key, *, in_channels, out_channels, temb_channels):
    ks = jax.random.split(key, 8)
    p = {}
    # random affine params (stronger correctness test than torch's ones/zeros init)
    p["gn1_w"] = jax.random.uniform(ks[0], (in_channels,), jnp.float32, 0.5, 1.5)
    p["gn1_b"] = jax.random.uniform(ks[1], (in_channels,), jnp.float32, -0.5, 0.5)
    p["conv1_w"], p["conv1_b"] = _uniform_init(
        ks[2], (out_channels, in_channels, 3, 3), (out_channels,), in_channels * 9)
    p["temb_w"], p["temb_b"] = _uniform_init(
        ks[3], (out_channels, temb_channels), (out_channels,), temb_channels)
    p["gn2_w"] = jax.random.uniform(ks[4], (out_channels,), jnp.float32, 0.5, 1.5)
    p["gn2_b"] = jax.random.uniform(ks[5], (out_channels,), jnp.float32, -0.5, 0.5)
    p["conv2_w"], p["conv2_b"] = _uniform_init(
        ks[6], (out_channels, out_channels, 3, 3), (out_channels,), out_channels * 9)
    if in_channels != out_channels:
        p["nin_w"], p["nin_b"] = _uniform_init(
            ks[7], (out_channels, in_channels, 1, 1), (out_channels,), in_channels)
    return p


# ----------------------------- pure-JAX reference ----------------------------

def _ref_forward(x, temb, p, *, num_groups, eps=1e-6):
    def gn(h, gamma, beta):
        B, C, H, W = h.shape
        hg = h.reshape(B, num_groups, (C // num_groups) * H * W)
        mean = hg.mean(axis=-1, keepdims=True)
        var = hg.var(axis=-1, keepdims=True)
        hn = ((hg - mean) * jax.lax.rsqrt(var + eps)).reshape(B, C, H, W)
        return hn * gamma[None, :, None, None] + beta[None, :, None, None]

    def silu(z):
        return z * jax.nn.sigmoid(z)

    def conv(h, w, b, pad):
        y = jax.lax.conv_general_dilated(
            h, w, (1, 1), ((pad, pad), (pad, pad)),
            dimension_numbers=("NCHW", "OIHW", "NCHW"))
        return y + b[None, :, None, None]

    h = silu(gn(x, p["gn1_w"], p["gn1_b"]))
    h = conv(h, p["conv1_w"], p["conv1_b"], 1)
    tp = silu(temb) @ p["temb_w"].T + p["temb_b"]
    h = h + tp[:, :, None, None]
    h = silu(gn(h, p["gn2_w"], p["gn2_b"]))
    h = conv(h, p["conv2_w"], p["conv2_b"], 1)
    if "nin_w" in p:
        x = conv(x, p["nin_w"], p["nin_b"], 0)
    return x + h


# ----------------------------------- main -------------------------------------

def _run_case(key, *, B, Cin, Cout, H, W, temb_channels, num_groups):
    kx, kt, kp_key = jax.random.split(key, 3)
    x = jax.random.normal(kx, (B, Cin, H, W), jnp.float32)
    temb = jax.random.normal(kt, (B, temb_channels), jnp.float32)
    params = init_params(kp_key, in_channels=Cin, out_channels=Cout,
                         temb_channels=temb_channels)
    kparams = prepare_kernel_params(params, num_groups=num_groups, H=H, W=W)

    out = jax.block_until_ready(resnet_block_forward(x, temb, kparams))
    assert out.shape == (B, Cout, H, W), out.shape
    assert bool(jnp.isfinite(out).all())

    ref = jax.block_until_ready(_ref_forward(x, temb, params, num_groups=num_groups))
    # bf16 MXU operands => slightly looser tolerance than the all-f32 version
    np.testing.assert_allclose(np.asarray(out), np.asarray(ref), atol=3e-2, rtol=3e-2)


if __name__ == "__main__":
    key = jax.random.PRNGKey(0)
    k1, k2 = jax.random.split(key)
    # nin (1x1) shortcut path
    _run_case(k1, B=2, Cin=32, Cout=64, H=16, W=16, temb_channels=512, num_groups=32)
    # identity shortcut path (trace-time specialization, no identity matmul)
    _run_case(k2, B=2, Cin=64, Cout=64, H=8, W=8, temb_channels=512, num_groups=32)
    print("KERNEL_OK")
</pallas_src>

<mosaic_0001>
module attributes {stable_mosaic.version = 11 : i64} {
  func.func @_resnet_block_kernel(%arg0: i32, %arg1: memref<1x16x16x32xf32, #tpu.memory_space<vmem>>, %arg2: memref<1x1x64xf32, #tpu.memory_space<vmem>>, %arg3: memref<1x32xf32, #tpu.memory_space<vmem>>, %arg4: memref<1x32xf32, #tpu.memory_space<vmem>>, %arg5: memref<32x32xf32, #tpu.memory_space<vmem>>, %arg6: memref<32x32xf32, #tpu.memory_space<vmem>>, %arg7: memref<3x96x64xbf16, #tpu.memory_space<vmem>>, %arg8: memref<1x64xf32, #tpu.memory_space<vmem>>, %arg9: memref<1x64xf32, #tpu.memory_space<vmem>>, %arg10: memref<1x64xf32, #tpu.memory_space<vmem>>, %arg11: memref<64x32xf32, #tpu.memory_space<vmem>>, %arg12: memref<32x64xf32, #tpu.memory_space<vmem>>, %arg13: memref<3x192x64xbf16, #tpu.memory_space<vmem>>, %arg14: memref<1x64xf32, #tpu.memory_space<vmem>>, %arg15: memref<32x64xbf16, #tpu.memory_space<vmem>>, %arg16: memref<1x64xf32, #tpu.memory_space<vmem>>, %arg17: memref<1x16x16x64xf32, #tpu.memory_space<vmem>>) attributes {dimension_semantics = [#tpu.dimension_semantics<parallel>], iteration_bounds = array<i64: 2>, scalar_prefetch = 0 : i64, scratch_operands = 0 : i64, tpu.core_type = #tpu.core_type<tc>, window_params = [{transform_indices = @transform_0, window_bounds = array<i64: 1, 16, 16, 32>}, {transform_indices = @transform_1, window_bounds = array<i64: 1, 1, 64>}, {pipeline_mode = #tpu.pipeline_mode<synchronous>, transform_indices = @transform_2, window_bounds = array<i64: 1, 32>}, {pipeline_mode = #tpu.pipeline_mode<synchronous>, transform_indices = @transform_3, window_bounds = array<i64: 1, 32>}, {pipeline_mode = #tpu.pipeline_mode<synchronous>, transform_indices = @transform_4, window_bounds = array<i64: 32, 32>}, {pipeline_mode = #tpu.pipeline_mode<synchronous>, transform_indices = @transform_5, window_bounds = array<i64: 32, 32>}, {pipeline_mode = #tpu.pipeline_mode<synchronous>, transform_indices = @transform_6, window_bounds = array<i64: 3, 96, 64>}, {pipeline_mode = #tpu.pipeline_mode<synchronous>, transform_indices = @transform_7, window_bounds = array<i64: 1, 64>}, {pipeline_mode = #tpu.pipeline_mode<synchronous>, transform_indices = @transform_8, window_bounds = array<i64: 1, 64>}, {pipeline_mode = #tpu.pipeline_mode<synchronous>, transform_indices = @transform_9, window_bounds = array<i64: 1, 64>}, {pipeline_mode = #tpu.pipeline_mode<synchronous>, transform_indices = @transform_10, window_bounds = array<i64: 64, 32>}, {pipeline_mode = #tpu.pipeline_mode<synchronous>, transform_indices = @transform_11, window_bounds = array<i64: 32, 64>}, {pipeline_mode = #tpu.pipeline_mode<synchronous>, transform_indices = @transform_12, window_bounds = array<i64: 3, 192, 64>}, {pipeline_mode = #tpu.pipeline_mode<synchronous>, transform_indices = @transform_13, window_bounds = array<i64: 1, 64>}, {pipeline_mode = #tpu.pipeline_mode<synchronous>, transform_indices = @transform_14, window_bounds = array<i64: 32, 64>}, {pipeline_mode = #tpu.pipeline_mode<synchronous>, transform_indices = @transform_15, window_bounds = array<i64: 1, 64>}, {transform_indices = @transform_16, window_bounds = array<i64: 1, 16, 16, 64>}]} {
    %0 = tpu.iota {dimensions = array<i32: 0>} : vector<256x1xi32>
    %c16_i32 = arith.constant 16 : i32
    %c0_i32 = arith.constant 0 : i32
    %1 = arith.cmpi eq, %c16_i32, %c0_i32 : i32
    %c1_i32 = arith.constant 1 : i32
    %2 = arith.select %1, %c1_i32, %c16_i32 : i32
    %3 = vector.broadcast %2 : i32 to vector<256x1xi32>
    %4 = arith.remsi %0, %3 : vector<256x1xi32>
    %c0_i32_0 = arith.constant 0 : i32
    %5 = vector.broadcast %c0_i32_0 : i32 to vector<256x1xi32>
    %6 = arith.cmpi ne, %4, %5 : vector<256x1xi32>
    %c0_i32_1 = arith.constant 0 : i32
    %7 = vector.broadcast %c0_i32_1 : i32 to vector<256x1xi32>
    %8 = arith.cmpi slt, %4, %7 : vector<256x1xi32>
    %c0_i32_2 = arith.constant 0 : i32
    %9 = arith.cmpi slt, %2, %c0_i32_2 : i32
    %10 = vector.broadcast %9 : i1 to vector<256x1xi1>
    %11 = vector.broadcast %10 : vector<256x1xi1> to vector<256x1xi1>
    %12 = arith.xori %8, %11 : vector<256x1xi1>
    %13 = arith.andi %12, %6 : vector<256x1xi1>
    %14 = vector.broadcast %2 : i32 to vector<256x1xi32>
    %15 = arith.addi %4, %14 : vector<256x1xi32>
    %16 = arith.select %13, %15, %4 : vector<256x1xi1>, vector<256x1xi32>
    %c0_i32_3 = arith.constant 0 : i32
    %17 = vector.broadcast %c0_i32_3 : i32 to vector<256x1xi32>
    %18 = arith.cmpi sgt, %16, %17 : vector<256x1xi32>
    %19 = arith.extui %18 : vector<256x1xi1> to vector<256x1xi32>
    %20 = arith.sitofp %19 : vector<256x1xi32> to vector<256x1xf32>
    %c15_i32 = arith.constant 15 : i32
    %21 = vector.broadcast %c15_i32 : i32 to vector<256x1xi32>
    %22 = arith.cmpi slt, %16, %21 : vector<256x1xi32>
    %23 = arith.extui %22 : vector<256x1xi1> to vector<256x1xi32>
    %24 = arith.sitofp %23 : vector<256x1xi32> to vector<256x1xf32>
    %c0 = arith.constant 0 : index
    %c0_4 = arith.constant 0 : index
    %c0_5 = arith.constant 0 : index
    %c0_6 = arith.constant 0 : index
    %25 = vector.load %arg1[%c0, %c0_4, %c0_5, %c0_6] : memref<1x16x16x32xf32, #tpu.memory_space<vmem>>, vector<1x16x16x32xf32>
    %26 = vector.shape_cast %25 : vector<1x16x16x32xf32> to vector<16x16x32xf32>
    %27 = vector.shape_cast %26 : vector<16x16x32xf32> to vector<256x32xf32>
    %cst = arith.constant dense<0.000000e+00> : vector<32xf32>
    %28 = vector.multi_reduction <add>, %27, %cst [0] : vector<256x32xf32> to vector<32xf32>
    %29 = vector.shape_cast %28 : vector<32xf32> to vector<1x32xf32>
    %30 = arith.mulf %27, %27 : vector<256x32xf32>
    %cst_7 = arith.constant dense<0.000000e+00> : vector<32xf32>
    %31 = vector.multi_reduction <add>, %30, %cst_7 [0] : vector<256x32xf32> to vector<32xf32>
    %32 = vector.shape_cast %31 : vector<32xf32> to vector<1x32xf32>
    %c0_8 = arith.constant 0 : index
    %c0_9 = arith.constant 0 : index
    %33 = vector.load %arg5[%c0_8, %c0_9] : memref<32x32xf32, #tpu.memory_space<vmem>>, vector<32x32xf32>
    %cst_10 = arith.constant dense<0.000000e+00> : vector<1x32xf32>
    %34 = tpu.matmul %29, %33, %cst_10 {dimension_numbers = #tpu.dot_dimension_numbers<[1], [0], [0], [1], [0, 0, 1, 1], [], []>} : vector<1x32xf32>, vector<32x32xf32>, vector<1x32xf32> -> vector<1x32xf32>
    %c0_11 = arith.constant 0 : index
    %c0_12 = arith.constant 0 : index
    %35 = vector.load %arg5[%c0_11, %c0_12] : memref<32x32xf32, #tpu.memory_space<vmem>>, vector<32x32xf32>
    %cst_13 = arith.constant dense<0.000000e+00> : vector<1x32xf32>
    %36 = tpu.matmul %32, %35, %cst_13 {dimension_numbers = #tpu.dot_dimension_numbers<[1], [0], [0], [1], [0, 0, 1, 1], [], []>} : vector<1x32xf32>, vector<32x32xf32>, vector<1x32xf32> -> vector<1x32xf32>
    %c0_14 = arith.constant 0 : index
    %c0_15 = arith.constant 0 : index
    %37 = vector.load %arg6[%c0_14, %c0_15] : memref<32x32xf32, #tpu.memory_space<vmem>>, vector<32x32xf32>
    %cst_16 = arith.constant dense<0.000000e+00> : vector<1x32xf32>
    %38 = tpu.matmul %34, %37, %cst_16 {dimension_numbers = #tpu.dot_dimension_numbers<[1], [0], [0], [1], [0, 0, 1, 1], [], []>} : vector<1x32xf32>, vector<32x32xf32>, vector<1x32xf32> -> vector<1x32xf32>
    %c0_17 = arith.constant 0 : index
    %c0_18 = arith.constant 0 : index
    %39 = vector.load %arg6[%c0_17, %c0_18] : memref<32x32xf32, #tpu.memory_space<vmem>>, vector<32x32xf32>
    %cst_19 = arith.constant dense<0.000000e+00> : vector<1x32xf32>
    %40 = tpu.matmul %36, %39, %cst_19 {dimension_numbers = #tpu.dot_dimension_numbers<[1], [0], [0], [1], [0, 0, 1, 1], [], []>} : vector<1x32xf32>, vector<32x32xf32>, vector<1x32xf32> -> vector<1x32xf32>
    %41 = arith.mulf %38, %38 : vector<1x32xf32>
    %42 = arith.subf %40, %41 : vector<1x32xf32>
    %cst_20 = arith.constant 0.000000e+00 : f32
    %43 = vector.broadcast %cst_20 : f32 to vector<1x32xf32>
    %44 = arith.maximumf %42, %43 : vector<1x32xf32>
    %cst_21 = arith.constant 9.99999997E-7 : f32
    %45 = vector.broadcast %cst_21 : f32 to vector<1x32xf32>
    %46 = arith.addf %44, %45 : vector<1x32xf32>
    %47 = math.rsqrt %46 : vector<1x32xf32>
    %48 = vector.broadcast %38 : vector<1x32xf32> to vector<256x32xf32>
    %49 = arith.subf %27, %48 : vector<256x32xf32>
    %50 = vector.broadcast %47 : vector<1x32xf32> to vector<256x32xf32>
    %51 = arith.mulf %49, %50 : vector<256x32xf32>
    %c0_22 = arith.constant 0 : index
    %c0_23 = arith.constant 0 : index
    %52 = vector.load %arg3[%c0_22, %c0_23] : memref<1x32xf32, #tpu.memory_space<vmem>>, vector<1x32xf32>
    %53 = vector.broadcast %52 : vector<1x32xf32> to vector<256x32xf32>
    %54 = arith.mulf %51, %53 : vector<256x32xf32>
    %c0_24 = arith.constant 0 : index
    %c0_25 = arith.constant 0 : index
    %55 = vector.load %arg4[%c0_24, %c0_25] : memref<1x32xf32, #tpu.memory_space<vmem>>, vector<1x32xf32>
    %56 = vector.broadcast %55 : vector<1x32xf32> to vector<256x32xf32>
    %57 = arith.addf %54, %56 : vector<256x32xf32>
    %cst_26 = arith.constant 0.000000e+00 : f32
    %58 = vector.broadcast %cst_26 : f32 to vector<256x32xf32>
    %59 = arith.subf %58, %57 : vector<256x32xf32>
    %60 = math.exp %59 : vector<256x32xf32>
    %cst_27 = arith.constant 1.000000e+00 : f32
    %61 = vector.broadcast %cst_27 : f32 to vector<256x32xf32>
    %62 = arith.addf %61, %60 : vector<256x32xf32>
    %cst_28 = arith.constant 1.000000e+00 : f32
    %63 = vector.broadcast %cst_28 : f32 to vector<256x32xf32>
    %64 = arith.divf %63, %62 : vector<256x32xf32>
    %65 = arith.mulf %57, %64 : vector<256x32xf32>
    %cst_29 = arith.constant 0.000000e+00 : f32
    %66 = vector.broadcast %cst_29 : f32 to vector<1x32xf32>
    %67 = vector.extract_strided_slice %65 {offsets = [0, 0], sizes = [255, 32], strides = [1, 1]} : vector<256x32xf32> to vector<255x32xf32>
    %68 = tpu.concatenate %66, %67 in 0 : vector<1x32xf32>, vector<255x32xf32> -> vector<256x32xf32>
    %69 = vector.broadcast %20 : vector<256x1xf32> to vector<256x32xf32>
    %70 = arith.mulf %68, %69 : vector<256x32xf32>
    %cst_30 = arith.constant 0.000000e+00 : f32
    %71 = vector.broadcast %cst_30 : f32 to vector<1x32xf32>
    %72 = vector.extract_strided_slice %65 {offsets = [1, 0], sizes = [255, 32], strides = [1, 1]} : vector<256x32xf32> to vector<255x32xf32>
    %73 = tpu.concatenate %72, %71 in 0 : vector<255x32xf32>, vector<1x32xf32> -> vector<256x32xf32>
    %74 = vector.broadcast %24 : vector<256x1xf32> to vector<256x32xf32>
    %75 = arith.mulf %73, %74 : vector<256x32xf32>
    %76 = tpu.concatenate %70, %65, %75 in 1 : vector<256x32xf32>, vector<256x32xf32>, vector<256x32xf32> -> vector<256x96xf32>
    %77 = arith.truncf %76 : vector<256x96xf32> to vector<256x96xbf16>
    %cst_31 = arith.constant 0.000000e+00 : bf16
    %78 = vector.broadcast %cst_31 : bf16 to vector<16x96xbf16>
    %79 = vector.extract_strided_slice %77 {offsets = [0, 0], sizes = [240, 96], strides = [1, 1]} : vector<256x96xbf16> to vector<240x96xbf16>
    %80 = tpu.concatenate %78, %79 in 0 : vector<16x96xbf16>, vector<240x96xbf16> -> vector<256x96xbf16>
    %c0_32 = arith.constant 0 : index
    %c0_33 = arith.constant 0 : index
    %c0_34 = arith.constant 0 : index
    %81 = vector.load %arg7[%c0_32, %c0_33, %c0_34] : memref<3x96x64xbf16, #tpu.memory_space<vmem>>, vector<1x96x64xbf16>
    %82 = vector.shape_cast %81 : vector<1x96x64xbf16> to vector<96x64xbf16>
    %cst_35 = arith.constant dense<0.000000e+00> : vector<256x64xf32>
    %83 = tpu.matmul %80, %82, %cst_35 {dimension_numbers = #tpu.dot_dimension_numbers<[1], [0], [0], [1], [0, 0, 1, 1], [], []>} : vector<256x96xbf16>, vector<96x64xbf16>, vector<256x64xf32> -> vector<256x64xf32>
    %c1 = arith.constant 1 : index
    %c0_36 = arith.constant 0 : index
    %c0_37 = arith.constant 0 : index
    %84 = vector.load %arg7[%c1, %c0_36, %c0_37] : memref<3x96x64xbf16, #tpu.memory_space<vmem>>, vector<1x96x64xbf16>
    %85 = vector.shape_cast %84 : vector<1x96x64xbf16> to vector<96x64xbf16>
    %cst_38 = arith.constant dense<0.000000e+00> : vector<256x64xf32>
    %86 = tpu.matmul %77, %85, %cst_38 {dimension_numbers = #tpu.dot_dimension_numbers<[1], [0], [0], [1], [0, 0, 1, 1], [], []>} : vector<256x96xbf16>, vector<96x64xbf16>, vector<256x64xf32> -> vector<256x64xf32>
    %87 = arith.addf %83, %86 : vector<256x64xf32>
    %cst_39 = arith.constant 0.000000e+00 : bf16
    %88 = vector.broadcast %cst_39 : bf16 to vector<16x96xbf16>
    %89 = vector.extract_strided_slice %77 {offsets = [16, 0], sizes = [240, 96], strides = [1, 1]} : vector<256x96xbf16> to vector<240x96xbf16>
    %90 = tpu.concatenate %89, %88 in 0 : vector<240x96xbf16>, vector<16x96xbf16> -> vector<256x96xbf16>
    %c2 = arith.constant 2 : index
    %c0_40 = arith.constant 0 : index
    %c0_41 = arith.constant 0 : index
    %91 = vector.load %arg7[%c2, %c0_40, %c0_41] : memref<3x96x64xbf16, #tpu.memory_space<vmem>>, vector<1x96x64xbf16>
    %92 = vector.shape_cast %91 : vector<1x96x64xbf16> to vector<96x64xbf16>
    %cst_42 = arith.constant dense<0.000000e+00> : vector<256x64xf32>
    %93 = tpu.matmul %90, %92, %cst_42 {dimension_numbers = #tpu.dot_dimension_numbers<[1], [0], [0], [1], [0, 0, 1, 1], [], []>} : vector<256x96xbf16>, vector<96x64xbf16>, vector<256x64xf32> -> vector<256x64xf32>
    %94 = arith.addf %87, %93 : vector<256x64xf32>
    %c0_43 = arith.constant 0 : index
    %c0_44 = arith.constant 0 : index
    %95 = vector.load %arg8[%c0_43, %c0_44] : memref<1x64xf32, #tpu.memory_space<vmem>>, vector<1x64xf32>
    %96 = vector.broadcast %95 : vector<1x64xf32> to vector<256x64xf32>
    %97 = arith.addf %94, %96 : vector<256x64xf32>
    %c0_45 = arith.constant 0 : index
    %c0_46 = arith.constant 0 : index
    %c0_47 = arith.constant 0 : index
    %98 = vector.load %arg2[%c0_45, %c0_46, %c0_47] : memref<1x1x64xf32, #tpu.memory_space<vmem>>, vector<1x1x64xf32>
    %99 = vector.shape_cast %98 : vector<1x1x64xf32> to vector<1x64xf32>
    %100 = vector.broadcast %99 : vector<1x64xf32> to vector<256x64xf32>
    %101 = arith.addf %97, %100 : vector<256x64xf32>
    %cst_48 = arith.constant dense<0.000000e+00> : vector<64xf32>
    %102 = vector.multi_reduction <add>, %101, %cst_48 [0] : vector<256x64xf32> to vector<64xf32>
    %103 = vector.shape_cast %102 : vector<64xf32> to vector<1x64xf32>
    %104 = arith.mulf %101, %101 : vector<256x64xf32>
    %cst_49 = arith.constant dense<0.000000e+00> : vector<64xf32>
    %105 = vector.multi_reduction <add>, %104, %cst_49 [0] : vector<256x64xf32> to vector<64xf32>
    %106 = vector.shape_cast %105 : vector<64xf32> to vector<1x64xf32>
    %c0_50 = arith.constant 0 : index
    %c0_51 = arith.constant 0 : index
    %107 = vector.load %arg11[%c0_50, %c0_51] : memref<64x32xf32, #tpu.memory_space<vmem>>, vector<64x32xf32>
    %cst_52 = arith.constant dense<0.000000e+00> : vector<1x32xf32>
    %108 = tpu.matmul %103, %107, %cst_52 {dimension_numbers = #tpu.dot_dimension_numbers<[1], [0], [0], [1], [0, 0, 1, 1], [], []>} : vector<1x64xf32>, vector<64x32xf32>, vector<1x32xf32> -> vector<1x32xf32>
    %c0_53 = arith.constant 0 : index
    %c0_54 = arith.constant 0 : index
    %109 = vector.load %arg11[%c0_53, %c0_54] : memref<64x32xf32, #tpu.memory_space<vmem>>, vector<64x32xf32>
    %cst_55 = arith.constant dense<0.000000e+00> : vector<1x32xf32>
    %110 = tpu.matmul %106, %109, %cst_55 {dimension_numbers = #tpu.dot_dimension_numbers<[1], [0], [0], [1], [0, 0, 1, 1], [], []>} : vector<1x64xf32>, vector<64x32xf32>, vector<1x32xf32> -> vector<1x32xf32>
    %c0_56 = arith.constant 0 : index
    %c0_57 = arith.constant 0 : index
    %111 = vector.load %arg12[%c0_56, %c0_57] : memref<32x64xf32, #tpu.memory_space<vmem>>, vector<32x64xf32>
    %cst_58 = arith.constant dense<0.000000e+00> : vector<1x64xf32>
    %112 = tpu.matmul %108, %111, %cst_58 {dimension_numbers = #tpu.dot_dimension_numbers<[1], [0], [0], [1], [0, 0, 1, 1], [], []>} : vector<1x32xf32>, vector<32x64xf32>, vector<1x64xf32> -> vector<1x64xf32>
    %c0_59 = arith.constant 0 : index
    %c0_60 = arith.constant 0 : index
    %113 = vector.load %arg12[%c0_59, %c0_60] : memref<32x64xf32, #tpu.memory_space<vmem>>, vector<32x64xf32>
    %cst_61 = arith.constant dense<0.000000e+00> : vector<1x64xf32>
    %114 = tpu.matmul %110, %113, %cst_61 {dimension_numbers = #tpu.dot_dimension_numbers<[1], [0], [0], [1], [0, 0, 1, 1], [], []>} : vector<1x32xf32>, vector<32x64xf32>, vector<1x64xf32> -> vector<1x64xf32>
    %115 = arith.mulf %112, %112 : vector<1x64xf32>
    %116 = arith.subf %114, %115 : vector<1x64xf32>
    %cst_62 = arith.constant 0.000000e+00 : f32
    %117 = vector.broadcast %cst_62 : f32 to vector<1x64xf32>
    %118 = arith.maximumf %116, %117 : vector<1x64xf32>
    %cst_63 = arith.constant 9.99999997E-7 : f32
    %119 = vector.broadcast %cst_63 : f32 to vector<1x64xf32>
    %120 = arith.addf %118, %119 : vector<1x64xf32>
    %121 = math.rsqrt %120 : vector<1x64xf32>
    %122 = vector.broadcast %112 : vector<1x64xf32> to vector<256x64xf32>
    %123 = arith.subf %101, %122 : vector<256x64xf32>
    %124 = vector.broadcast %121 : vector<1x64xf32> to vector<256x64xf32>
    %125 = arith.mulf %123, %124 : vector<256x64xf32>
    %c0_64 = arith.constant 0 : index
    %c0_65 = arith.constant 0 : index
    %126 = vector.load %arg9[%c0_64, %c0_65] : memref<1x64xf32, #tpu.memory_space<vmem>>, vector<1x64xf32>
    %127 = vector.broadcast %126 : vector<1x64xf32> to vector<256x64xf32>
    %128 = arith.mulf %125, %127 : vector<256x64xf32>
    %c0_66 = arith.constant 0 : index
    %c0_67 = arith.constant 0 : index
    %129 = vector.load %arg10[%c0_66, %c0_67] : memref<1x64xf32, #tpu.memory_space<vmem>>, vector<1x64xf32>
    %130 = vector.broadcast %129 : vector<1x64xf32> to vector<256x64xf32>
    %131 = arith.addf %128, %130 : vector<256x64xf32>
    %cst_68 = arith.constant 0.000000e+00 : f32
    %132 = vector.broadcast %cst_68 : f32 to vector<256x64xf32>
    %133 = arith.subf %132, %131 : vector<256x64xf32>
    %134 = math.exp %133 : vector<256x64xf32>
    %cst_69 = arith.constant 1.000000e+00 : f32
    %135 = vector.broadcast %cst_69 : f32 to vector<256x64xf32>
    %136 = arith.addf %135, %134 : vector<256x64xf32>
    %cst_70 = arith.constant 1.000000e+00 : f32
    %137 = vector.broadcast %cst_70 : f32 to vector<256x64xf32>
    %138 = arith.divf %137, %136 : vector<256x64xf32>
    %139 = arith.mulf %131, %138 : vector<256x64xf32>
    %cst_71 = arith.constant 0.000000e+00 : f32
    %140 = vector.broadcast %cst_71 : f32 to vector<1x64xf32>
    %141 = vector.extract_strided_slice %139 {offsets = [0, 0], sizes = [255, 64], strides = [1, 1]} : vector<256x64xf32> to vector<255x64xf32>
    %142 = tpu.concatenate %140, %141 in 0 : vector<1x64xf32>, vector<255x64xf32> -> vector<256x64xf32>
    %143 = vector.broadcast %20 : vector<256x1xf32> to vector<256x64xf32>
    %144 = arith.mulf %142, %143 : vector<256x64xf32>
    %cst_72 = arith.constant 0.000000e+00 : f32
    %145 = vector.broadcast %cst_72 : f32 to vector<1x64xf32>
    %146 = vector.extract_strided_slice %139 {offsets = [1, 0], sizes = [255, 64], strides = [1, 1]} : vector<256x64xf32> to vector<255x64xf32>
    %147 = tpu.concatenate %146, %145 in 0 : vector<255x64xf32>, vector<1x64xf32> -> vector<256x64xf32>
    %148 = vector.broadcast %24 : vector<256x1xf32> to vector<256x64xf32>
    %149 = arith.mulf %147, %148 : vector<256x64xf32>
    %150 = tpu.concatenate %144, %139, %149 in 1 : vector<256x64xf32>, vector<256x64xf32>, vector<256x64xf32> -> vector<256x192xf32>
    %151 = arith.truncf %150 : vector<256x192xf32> to vector<256x192xbf16>
    %cst_73 = arith.constant 0.000000e+00 : bf16
    %152 = vector.broadcast %cst_73 : bf16 to vector<16x192xbf16>
    %153 = vector.extract_strided_slice %151 {offsets = [0, 0], sizes = [240, 192], strides = [1, 1]} : vector<256x192xbf16> to vector<240x192xbf16>
    %154 = tpu.concatenate %152, %153 in 0 : vector<16x192xbf16>, vector<240x192xbf16> -> vector<256x192xbf16>
    %c0_74 = arith.constant 0 : index
    %c0_75 = arith.constant 0 : index
    %c0_76 = arith.constant 0 : index
    %155 = vector.load %arg13[%c0_74, %c0_75, %c0_76] : memref<3x192x64xbf16, #tpu.memory_space<vmem>>, vector<1x192x64xbf16>
    %156 = vector.shape_cast %155 : vector<1x192x64xbf16> to vector<192x64xbf16>
    %cst_77 = arith.constant dense<0.000000e+00> : vector<256x64xf32>
    %157 = tpu.matmul %154, %156, %cst_77 {dimension_numbers = #tpu.dot_dimension_numbers<[1], [0], [0], [1], [0, 0, 1, 1], [], []>} : vector<256x192xbf16>, vector<192x64xbf16>, vector<256x64xf32> -> vector<256x64xf32>
    %c1_78 = arith.constant 1 : index
    %c0_79 = arith.constant 0 : index
    %c0_80 = arith.constant 0 : index
    %158 = vector.load %arg13[%c1_78, %c0_79, %c0_80] : memref<3x192x64xbf16, #tpu.memory_space<vmem>>, vector<1x192x64xbf16>
    %159 = vector.shape_cast %158 : vector<1x192x64xbf16> to vector<192x64xbf16>
    %cst_81 = arith.constant dense<0.000000e+00> : vector<256x64xf32>
    %160 = tpu.matmul %151, %159, %cst_81 {dimension_numbers = #tpu.dot_dimension_numbers<[1], [0], [0], [1], [0, 0, 1, 1], [], []>} : vector<256x192xbf16>, vector<192x64xbf16>, vector<256x64xf32> -> vector<256x64xf32>
    %161 = arith.addf %157, %160 : vector<256x64xf32>
    %cst_82 = arith.constant 0.000000e+00 : bf16
    %162 = vector.broadcast %cst_82 : bf16 to vector<16x192xbf16>
    %163 = vector.extract_strided_slice %151 {offsets = [16, 0], sizes = [240, 192], strides = [1, 1]} : vector<256x192xbf16> to vector<240x192xbf16>
    %164 = tpu.concatenate %163, %162 in 0 : vector<240x192xbf16>, vector<16x192xbf16> -> vector<256x192xbf16>
    %c2_83 = arith.constant 2 : index
    %c0_84 = arith.constant 0 : index
    %c0_85 = arith.constant 0 : index
    %165 = vector.load %arg13[%c2_83, %c0_84, %c0_85] : memref<3x192x64xbf16, #tpu.memory_space<vmem>>, vector<1x192x64xbf16>
    %166 = vector.shape_cast %165 : vector<1x192x64xbf16> to vector<192x64xbf16>
    %cst_86 = arith.constant dense<0.000000e+00> : vector<256x64xf32>
    %167 = tpu.matmul %164, %166, %cst_86 {dimension_numbers = #tpu.dot_dimension_numbers<[1], [0], [0], [1], [0, 0, 1, 1], [], []>} : vector<256x192xbf16>, vector<192x64xbf16>, vector<256x64xf32> -> vector<256x64xf32>
    %168 = arith.addf %161, %167 : vector<256x64xf32>
    %c0_87 = arith.constant 0 : index
    %c0_88 = arith.constant 0 : index
    %169 = vector.load %arg14[%c0_87, %c0_88] : memref<1x64xf32, #tpu.memory_space<vmem>>, vector<1x64xf32>
    %170 = vector.broadcast %169 : vector<1x64xf32> to vector<256x64xf32>
    %171 = arith.addf %168, %170 : vector<256x64xf32>
    %172 = arith.truncf %27 : vector<256x32xf32> to vector<256x32xbf16>
    %c0_89 = arith.constant 0 : index
    %c0_90 = arith.constant 0 : index
    %173 = vector.load %arg15[%c0_89, %c0_90] : memref<32x64xbf16, #tpu.memory_space<vmem>>, vector<32x64xbf16>
    %cst_91 = arith.constant dense<0.000000e+00> : vector<256x64xf32>
    %174 = tpu.matmul %172, %173, %cst_91 {dimension_numbers = #tpu.dot_dimension_numbers<[1], [0], [0], [1], [0, 0, 1, 1], [], []>} : vector<256x32xbf16>, vector<32x64xbf16>, vector<256x64xf32> -> vector<256x64xf32>
    %c0_92 = arith.constant 0 : index
    %c0_93 = arith.constant 0 : index
    %175 = vector.load %arg16[%c0_92, %c0_93] : memref<1x64xf32, #tpu.memory_space<vmem>>, vector<1x64xf32>
    %176 = vector.broadcast %175 : vector<1x64xf32> to vector<256x64xf32>
    %177 = arith.addf %174, %176 : vector<256x64xf32>
    %178 = arith.addf %177, %171 : vector<256x64xf32>
    %179 = vector.shape_cast %178 : vector<256x64xf32> to vector<16x16x64xf32>
    %c0_94 = arith.constant 0 : index
    %c0_95 = arith.constant 0 : index
    %c0_96 = arith.constant 0 : index
    %c0_97 = arith.constant 0 : index
    %180 = vector.load %arg17[%c0_94, %c0_95, %c0_96, %c0_97] : memref<1x16x16x64xf32, #tpu.memory_space<vmem>>, vector<1x16x16x64xf32>
    %181 = vector.shape_cast %180 : vector<1x16x16x64xf32> to vector<16x16x64xf32>
    %182 = vector.shape_cast %179 : vector<16x16x64xf32> to vector<1x16x16x64xf32>
    tpu.vector_store %arg17[%c0_94, %c0_95, %c0_96, %c0_97], %182 {strides = array<i32>} : memref<1x16x16x64xf32, #tpu.memory_space<vmem>>, vector<1x16x16x64xf32>,
    return
  }
  func.func @transform_0(%arg0: i32) -> (i32, i32, i32, i32) {
    %c0_i32 = arith.constant 0 : i32
    %c0_i32_0 = arith.constant 0 : i32
    %c0_i32_1 = arith.constant 0 : i32
    %c0_i32_2 = arith.constant 0 : i32
    return %arg0, %c0_i32, %c0_i32_0, %c0_i32_1 : i32, i32, i32, i32
  }
  func.func @transform_1(%arg0: i32) -> (i32, i32, i32) {
    %c0_i32 = arith.constant 0 : i32
    %c0_i32_0 = arith.constant 0 : i32
    %c0_i32_1 = arith.constant 0 : i32
    return %arg0, %c0_i32, %c0_i32_0 : i32, i32, i32
  }
  func.func @transform_2(%arg0: i32) -> (i32, i32) {
    %c0_i32 = arith.constant 0 : i32
    %c0_i32_0 = arith.constant 0 : i32
    %c0_i32_1 = arith.constant 0 : i32
    return %c0_i32, %c0_i32_0 : i32, i32
  }
  func.func @transform_3(%arg0: i32) -> (i32, i32) {
    %c0_i32 = arith.constant 0 : i32
    %c0_i32_0 = arith.constant 0 : i32
    %c0_i32_1 = arith.constant 0 : i32
    return %c0_i32, %c0_i32_0 : i32, i32
  }
  func.func @transform_4(%arg0: i32) -> (i32, i32) {
    %c0_i32 = arith.constant 0 : i32
    %c0_i32_0 = arith.constant 0 : i32
    %c0_i32_1 = arith.constant 0 : i32
    return %c0_i32, %c0_i32_0 : i32, i32
  }
  func.func @transform_5(%arg0: i32) -> (i32, i32) {
    %c0_i32 = arith.constant 0 : i32
    %c0_i32_0 = arith.constant 0 : i32
    %c0_i32_1 = arith.constant 0 : i32
    return %c0_i32, %c0_i32_0 : i32, i32
  }
  func.func @transform_6(%arg0: i32) -> (i32, i32, i32) {
    %c0_i32 = arith.constant 0 : i32
    %c0_i32_0 = arith.constant 0 : i32
    %c0_i32_1 = arith.constant 0 : i32
    %c0_i32_2 = arith.constant 0 : i32
    return %c0_i32, %c0_i32_0, %c0_i32_1 : i32, i32, i32
  }
  func.func @transform_7(%arg0: i32) -> (i32, i32) {
    %c0_i32 = arith.constant 0 : i32
    %c0_i32_0 = arith.constant 0 : i32
    %c0_i32_1 = arith.constant 0 : i32
    return %c0_i32, %c0_i32_0 : i32, i32
  }
  func.func @transform_8(%arg0: i32) -> (i32, i32) {
    %c0_i32 = arith.constant 0 : i32
    %c0_i32_0 = arith.constant 0 : i32
    %c0_i32_1 = arith.constant 0 : i32
    return %c0_i32, %c0_i32_0 : i32, i32
  }
  func.func @transform_9(%arg0: i32) -> (i32, i32) {
    %c0_i32 = arith.constant 0 : i32
    %c0_i32_0 = arith.constant 0 : i32
    %c0_i32_1 = arith.constant 0 : i32
    return %c0_i32, %c0_i32_0 : i32, i32
  }
  func.func @transform_10(%arg0: i32) -> (i32, i32) {
    %c0_i32 = arith.constant 0 : i32
    %c0_i32_0 = arith.constant 0 : i32
    %c0_i32_1 = arith.constant 0 : i32
    return %c0_i32, %c0_i32_0 : i32, i32
  }
  func.func @transform_11(%arg0: i32) -> (i32, i32) {
    %c0_i32 = arith.constant 0 : i32
    %c0_i32_0 = arith.constant 0 : i32
    %c0_i32_1 = arith.constant 0 : i32
    return %c0_i32, %c0_i32_0 : i32, i32
  }
  func.func @transform_12(%arg0: i32) -> (i32, i32, i32) {
    %c0_i32 = arith.constant 0 : i32
    %c0_i32_0 = arith.constant 0 : i32
    %c0_i32_1 = arith.constant 0 : i32
    %c0_i32_2 = arith.constant 0 : i32
    return %c0_i32, %c0_i32_0, %c0_i32_1 : i32, i32, i32
  }
  func.func @transform_13(%arg0: i32) -> (i32, i32) {
    %c0_i32 = arith.constant 0 : i32
    %c0_i32_0 = arith.constant 0 : i32
    %c0_i32_1 = arith.constant 0 : i32
    return %c0_i32, %c0_i32_0 : i32, i32
  }
  func.func @transform_14(%arg0: i32) -> (i32, i32) {
    %c0_i32 = arith.constant 0 : i32
    %c0_i32_0 = arith.constant 0 : i32
    %c0_i32_1 = arith.constant 0 : i32
    return %c0_i32, %c0_i32_0 : i32, i32
  }
  func.func @transform_15(%arg0: i32) -> (i32, i32) {
    %c0_i32 = arith.constant 0 : i32
    %c0_i32_0 = arith.constant 0 : i32
    %c0_i32_1 = arith.constant 0 : i32
    return %c0_i32, %c0_i32_0 : i32, i32
  }
  func.func @transform_16(%arg0: i32) -> (i32, i32, i32, i32) {
    %c0_i32 = arith.constant 0 : i32
    %c0_i32_0 = arith.constant 0 : i32
    %c0_i32_1 = arith.constant 0 : i32
    %c0_i32_2 = arith.constant 0 : i32
    return %arg0, %c0_i32, %c0_i32_0, %c0_i32_1 : i32, i32, i32, i32
  }
}

</mosaic_0001>

<bundles_post_ra>
// kernel: resnet_block_forward.1
= control target key start
LH: loop header
LB: loop body
LE: loop exit
PB: predicated region body
PF: predicated region fallthrough
CT: control target
= control target key end

     0   :  { %s11999_s0 = inlined_call_operand.vmem [shape: f32[2,16,16,32], index: 0, kind: input, shape index: {}]   ;;  %s12000_s1 = inlined_call_operand.vmem [shape: f32[2,1,64], index: 1, kind: input, shape index: {}]   ;;  %s12001_s2 = inlined_call_operand.vmem [shape: f32[1,32], index: 2, kind: input, shape index: {}]   ;;  %s12002_s3 = inlined_call_operand.vmem [shape: f32[1,32], index: 3, kind: input, shape index: {}]   ;;  %s12003_s4 = inlined_call_operand.vmem [shape: f32[32,32], index: 4, kind: input, shape index: {}]   ;;  %s12004_s5 = inlined_call_operand.vmem [shape: f32[32,32], index: 5, kind: input, shape index: {}]   ;;  %s12005_s6 = inlined_call_operand.vmem [shape: bf16[3,96,64], index: 6, kind: input, shape index: {}]   ;;  %s12006_s7 = inlined_call_operand.vmem [shape: f32[1,64], index: 7, kind: input, shape index: {}]   ;;  %s12007_s8 = inlined_call_operand.vmem [shape: f32[1,64], index: 8, kind: input, shape index: {}]   ;;  %s12008_s9 = inlined_call_operand.vmem [shape: f32[1,64], index: 9, kind: input, shape index: {}]   ;;  %s12009_s10 = inlined_call_operand.vmem [shape: f32[64,32], index: 10, kind: input, shape index: {}]   ;;  %s12010_s11 = inlined_call_operand.vmem [shape: f32[32,64], index: 11, kind: input, shape index: {}]   ;;  %s12011_s12 = inlined_call_operand.vmem [shape: bf16[3,192,64], index: 12, kind: input, shape index: {}]   ;;  %s12012_s13 = inlined_call_operand.vmem [shape: f32[1,64], index: 13, kind: input, shape index: {}]   ;;  %s12013_s14 = inlined_call_operand.vmem [shape: bf16[32,64], index: 14, kind: input, shape index: {}]   ;;  %s12014_s15 = inlined_call_operand.vmem [shape: f32[1,64], index: 15, kind: input, shape index: {}]   ;;  %s12015_s16 = inlined_call_operand.hbm [shape: f32[2,16,16,64], index: 16, kind: output, shape index: {}]  }
   0x1   :  { %12084 = sst [smem:[#allocation45_spill]] %s11999_s0 }
   0x2   :  { %12085 = sst [smem:[#allocation46_spill]] %s12000_s1 }
   0x3   :  { %12086 = sst [smem:[#allocation47_spill]] %s12001_s2 }
   0x4   :  { %21 = vsyncpa [#allocation3], 0 }
   0x5   :  { %23 = vsyncpa [#allocation3 + $0x1], 0  ;;  %s7712_s21 = smov 0   ;;  %s7714_s22 = smov 0  }
   0x6   :  { %s7716_s23 = smov 0   ;;  %s7718_s24 = smov 0  }
   0x7 LB: > { %12087 = sst [smem:[#allocation5_spill]] %s7607_s21  ;;  %s7733_s25 = sadd.s32 4294967295, %s7619_s24   ;;  %s7619_s24 = sphi %s7718_s24, %s12371_s24   ;;  %s7615_s23 = sphi %s7716_s23, %s12373_s23   ;;  %s7611_s22 = sphi %s7714_s22, %s12375_s22   ;;  %s7607_s21 = sphi %s7712_s21, %s12374_s21  }
   0x8   : > { %12088 = sst [smem:[#allocation6_spill]] %s7615_s23  ;;  %s6423_s26 = sadd.s32 4294967294, %s7619_s24  }
   0x9   : > { %s7737_s27 = sadd.s32 1, %s7619_s24   ;;  %s382_s28 = sadd.s32 1, %s7615_s23 }
   0xa   : > { %12089 = sst [smem:[#allocation7_spill]] %s7737_s27  ;;  %s379_s29 = ssub.s32 %s7619_s24, %s7737_s27 }
   0xb   : > { %p392_p0 = scmp.ne.s32.totalorder %s7615_s23, %s7611_s22  ;;  %p380_p1 = scmp.eq.s32.totalorder %s379_s29, 0 }
   0xc   : > { %p393_p2 = scmp.eq.s32.totalorder %s7733_s25, 1  ;;  %p398_p3 = scmp.ne.s32.totalorder %s7611_s22, %s7607_s21 }
   0xd   : > { %p399_p4 = scmp.eq.s32.totalorder %s6423_s26, 1  ;;  %p6426_p7 = scmp.ge.s32.totalorder %s7619_s24, 1 }
   0xe   : > { %s7748_s30 = scalar_select %p380_p1, %s7615_s23, %s382_s28  }
   0xf   : > { %p7750_p5 = por %p393_p2, %p392_p0  ;;  %p7754_p6 = por %p399_p4, %p398_p3 }
  0x10   : > { %12090 = sst [smem:[#allocation8_spill]] %s7748_s30  ;;  %p473_p8 = scmp.lt.s32.totalorder %s7619_s24, 3 }
  0x11   : > { %s12092_s17 = scalar_select %p7754_p6, 1, 0 }
  0x12   : > { %p474_p9 = pnand %p6426_p7, %p473_p8 }
  0x13   : > { %12093 = sst [smem:[#allocation9_spill]] %s12092_s17 }
  0x14   : > { %477 = sbr.rel (%p474_p9) target bundleno = 2458 (0x99a), region = 84 }
  0x19   : > { %v1350_v0 = vld [vmem:[%s12003_s4 + $0x18] sm:$0xff]  ;;  %v1349_v1 = vld [vmem:[%s12003_s4 + $0x10] sm:$0xff]  ;;  %p526_p10 = scmp.lt.s32.totalorder %s7733_s25, 1  ;;  %v1348_v2 = vld [vmem:[%s12003_s4 + $0x8] sm:$0xff]  ;;  %s12094_s1 = sld [smem:[#allocation46_spill]]  ;;  %vm12021_vm0 = vcmask 261120  }
  0x1a   : > { %1366 = vmatpush.msra.mxu0 %v1350_v0  ;;  %1389 = vmatpush.msra.mxu1 %v1350_v0  ;;  %v1347_v3 = vld [vmem:[%s12003_s4] sm:$0xff]  ;;  %s12095_s29 = sld [smem:[#allocation45_spill]]  ;;  %s7621_s20 = smov 32  }
  0x1b   : > { %s7771_s30 = scalar_select %p526_p10, %s7733_s25, 1 }
  0x1c   : > { %1367 = vmatpush.msra.mxu0 %v1349_v1  ;;  %1390 = vmatpush.msra.mxu1 %v1349_v1  ;;  %s12096_s2 = sld [smem:[#allocation47_spill]]  ;;  %s7623_s26 = smov 64  }
  0x1d   : > { %s6879_s23 = sshll.u32 %s7771_s30, 8 }
  0x1e   : > { %1368 = vmatpush.msra.mxu0 %v1348_v2  ;;  %1391 = vmatpush.msra.mxu1 %v1348_v2 }
  0x1f   : > { %s533_s27 = scalar_lea.vmem %s12094_s1, %s7771_s30  ;;  %s7577_s30 = scalar_lea.hbm %s12015_s16, 512 }
  0x20   : > { %s7784_s21 = scalar_lea.vmem %s12095_s29, %s6879_s23  ;;  %1369 = vmatpush.msra.mxu0 %v1347_v3  ;;  %1392 = vmatpush.msra.mxu1 %v1347_v3 }
  0x21   : > { %v1144_v4 = vld [vmem:[%s7784_s21] sm:$0xff]  ;;  %v1145_v5 = vld [vmem:[%s7784_s21 + $0x8] sm:$0xff]  ;;  %v7789_v6 = vld [vmem:[%s7784_s21 + $0x10] sm:$0xff] }
  0x22   : > { %v1147_v7 = vld [vmem:[%s7784_s21 + $0x18] sm:$0xff]  ;;  %v1177_v8 = vsel %vm12021_vm0, %v1144_v4, 0.0  ;;  %v1178_v9 = vsel %vm12021_vm0, %v1145_v5, 0.0  ;;  %v1180_v10 = vsel %vm12021_vm0, %v7789_v6, 0.0  ;;  %v1148_v11 = vld [vmem:[%s7784_s21 + $0x20] sm:$0xff]  ;;  %v1149_v14 = vld [vmem:[%s7784_s21 + $0x28] sm:$0xff]  ;;  %v1246_v23 = vmul.f32 %v1144_v4, %v1144_v4 }
  0x23   : > { %v1179_v12 = vadd.f32 %v1178_v9, %v1177_v8  ;;  %v1182_v13 = vsel %vm12021_vm0, %v1147_v7, 0.0  ;;  %v1184_v16 = vsel %vm12021_vm0, %v1148_v11, 0.0  ;;  %v1150_v17 = vld [vmem:[%s7784_s21 + $0x30] sm:$0xff]  ;;  %v1186_v19 = vsel %vm12021_vm0, %v1149_v14, 0.0  ;;  %v1151_v20 = vld [vmem:[%s7784_s21 + $0x38] sm:$0xff]  ;;  %v1152_v24 = vld [vmem:[%s7784_s21 + $0x40] sm:$0xff] }
  0x24   : > { %v1188_v22 = vsel %vm12021_vm0, %v1150_v17, 0.0  ;;  %v1247_v26 = vmul.f32 %v1145_v5, %v1145_v5  ;;  %v1248_v27 = vmul.f32 %v7789_v6, %v7789_v6  ;;  %v1190_v28 = vsel %vm12021_vm0, %v1151_v20, 0.0  ;;  %v1153_v29 = vld [vmem:[%s7784_s21 + $0x48] sm:$0xff]  ;;  %v1154_v34 = vld [vmem:[%s7784_s21 + $0x50] sm:$0xff]  ;;  %v1155_v41 = vld [vmem:[%s7784_s21 + $0x58] sm:$0xff] }
  0x25   : > { %v1181_v15 = vadd.f32 %v1180_v10, %v1179_v12  ;;  %v1249_v31 = vmul.f32 %v1147_v7, %v1147_v7  ;;  %v1192_v32 = vsel %vm12021_vm0, %v1152_v24, 0.0  ;;  %v1278_v33 = vsel %vm12021_vm0, %v1246_v23, 0.0  ;;  %v1156_v47 = vld [vmem:[%s7784_s21 + $0x60] sm:$0xff]  ;;  %v1157_v53 = vld [vmem:[%s7784_s21 + $0x68] sm:$0xff]  ;;  %v1158_v59 = vld [vmem:[%s7784_s21 + $0x70] sm:$0xff] }
  0x26   : > { %v1250_v36 = vmul.f32 %v1148_v11, %v1148_v11  ;;  %v1279_v37 = vsel %vm12021_vm0, %v1247_v26, 0.0  ;;  %v1281_v38 = vsel %vm12021_vm0, %v1248_v27, 0.0  ;;  %v1194_v39 = vsel %vm12021_vm0, %v1153_v29, 0.0  ;;  %v1159_v1 = vld [vmem:[%s7784_s21 + $0x78] sm:$0xff]  ;;  %v1160_v8 = vld [vmem:[%s7784_s21 + $0x80] sm:$0xff] }
  0x27   : > { %v1183_v18 = vadd.f32 %v1182_v13, %v1181_v15  ;;  %v1280_v40 = vadd.f32 %v1279_v37, %v1278_v33  ;;  %v1251_v43 = vmul.f32 %v1149_v14, %v1149_v14  ;;  %v1283_v44 = vsel %vm12021_vm0, %v1249_v31, 0.0  ;;  %v1161_v14 = vld [vmem:[%s7784_s21 + $0x88] sm:$0xff]  ;;  %v7842_v26 = vld [vmem:[%s7784_s21 + $0x98] sm:$0xff] }
  0x28   : > { %v1196_v45 = vsel %vm12021_vm0, %v1154_v34, 0.0  ;;  %v1252_v49 = vmul.f32 %v1150_v17, %v1150_v17  ;;  %v1285_v50 = vsel %vm12021_vm0, %v1250_v36, 0.0  ;;  %v1198_v51 = vsel %vm12021_vm0, %v1155_v41, 0.0 }
  0x29   : > { %v1185_v21 = vadd.f32 %v1184_v16, %v1183_v18  ;;  %v1282_v46 = vadd.f32 %v1281_v38, %v1280_v40  ;;  %v1253_v55 = vmul.f32 %v1151_v20, %v1151_v20  ;;  %v1287_v56 = vsel %vm12021_vm0, %v1251_v43, 0.0  ;;  %v7837_v20 = vld [vmem:[%s7784_s21 + $0x90] sm:$0xff]  ;;  %v7854_v38 = vld [vmem:[%s7784_s21 + $0xa8] sm:$0xff] }
  0x2a   : > { %v1200_v57 = vsel %vm12021_vm0, %v1156_v47, 0.0  ;;  %v1254_v61 = vmul.f32 %v1152_v24, %v1152_v24  ;;  %v1289_v62 = vsel %vm12021_vm0, %v1252_v49, 0.0  ;;  %v1202_v63 = vsel %vm12021_vm0, %v1157_v53, 0.0 }
  0x2b   : > { %v1187_v25 = vadd.f32 %v1186_v19, %v1185_v21  ;;  %v1284_v52 = vadd.f32 %v1283_v44, %v1282_v46  ;;  %v1255_v3 = vmul.f32 %v1153_v29, %v1153_v29  ;;  %v1291_v4 = vsel %vm12021_vm0, %v1253_v55, 0.0  ;;  %v7860_v44 = vld [vmem:[%s7784_s21 + $0xb0] sm:$0xff] }
  0x2c   : > { %v1204_v5 = vsel %vm12021_vm0, %v1158_v59, 0.0  ;;  %v1256_v10 = vmul.f32 %v1154_v34, %v1154_v34  ;;  %v1293_v11 = vsel %vm12021_vm0, %v1254_v61, 0.0  ;;  %v1206_v12 = vsel %vm12021_vm0, %v1159_v1, 0.0 }
  0x2d   : > { %v1189_v30 = vadd.f32 %v1188_v22, %v1187_v25  ;;  %v1286_v58 = vadd.f32 %v1285_v50, %v1284_v52  ;;  %v1257_v16 = vmul.f32 %v1155_v41, %v1155_v41  ;;  %v1295_v17 = vsel %vm12021_vm0, %v1255_v3, 0.0  ;;  %v7866_v50 = vld [vmem:[%s7784_s21 + $0xb8] sm:$0xff] }
  0x2e   : > { %v1208_v18 = vsel %vm12021_vm0, %v1160_v8, 0.0  ;;  %v1258_v22 = vmul.f32 %v1156_v47, %v1156_v47  ;;  %v1297_v23 = vsel %vm12021_vm0, %v1256_v10, 0.0  ;;  %v1210_v24 = vsel %vm12021_vm0, %v1161_v14, 0.0 }
  0x2f   : > { %v1191_v35 = vadd.f32 %v1190_v28, %v1189_v30  ;;  %v1288_v0 = vadd.f32 %v1287_v56, %v1286_v58  ;;  %v1259_v28 = vmul.f32 %v1157_v53, %v1157_v53  ;;  %v1299_v29 = vsel %vm12021_vm0, %v1257_v16, 0.0  ;;  %v7872_v56 = vld [vmem:[%s7784_s21 + $0xc0] sm:$0xff] }
  0x30   : > { %v1212_v30 = vsel %vm12021_vm0, %v7837_v20, 0.0  ;;  %v1260_v34 = vmul.f32 %v1158_v59, %v1158_v59  ;;  %v1214_v36 = vsel %vm12021_vm0, %v7842_v26, 0.0  ;;  %v1261_v40 = vmul.f32 %v1159_v1, %v1159_v1 }
  0x31   : > { %v1193_v42 = vadd.f32 %v1192_v32, %v1191_v35  ;;  %v1290_v7 = vadd.f32 %v1289_v62, %v1288_v0  ;;  %v7848_v32 = vld [vmem:[%s7784_s21 + $0xa0] sm:$0xff]  ;;  %v1301_v35 = vsel %vm12021_vm0, %v1258_v22, 0.0  ;;  %v1303_v41 = vsel %vm12021_vm0, %v1259_v28, 0.0  ;;  %v7880_v62 = vld [vmem:[%s7784_s21 + $0xc8] sm:$0xff] }
  0x32   : > { %v1262_v46 = vmul.f32 %v1160_v8, %v1160_v8  ;;  %v1305_v47 = vsel %vm12021_vm0, %v1260_v34, 0.0  ;;  %v1263_v52 = vmul.f32 %v1161_v14, %v1161_v14  ;;  %v1307_v53 = vsel %vm12021_vm0, %v1261_v40, 0.0 }
  0x33   : > { %v1195_v48 = vadd.f32 %v1194_v39, %v1193_v42  ;;  %v1292_v13 = vadd.f32 %v1291_v4, %v1290_v7  ;;  %v1216_v42 = vsel %vm12021_vm0, %v7848_v32, 0.0  ;;  %v1264_v58 = vmul.f32 %v7837_v20, %v7837_v20  ;;  %v7888_v4 = vld [vmem:[%s7784_s21 + $0xd0] sm:$0xff] }
  0x34   : > { %v1309_v59 = vsel %vm12021_vm0, %v1262_v46, 0.0  ;;  %v1265_v0 = vmul.f32 %v7842_v26, %v7842_v26  ;;  %v1311_v1 = vsel %vm12021_vm0, %v1263_v52, 0.0  ;;  %v1266_v7 = vmul.f32 %v7848_v32, %v7848_v32  ;;  %v1400_v46 = vld [vmem:[%s12004_s5 + $0x18] sm:$0xff] }
  0x35   : > { %v1197_v54 = vadd.f32 %v1196_v45, %v1195_v48  ;;  %v1294_v19 = vadd.f32 %v1293_v11, %v1292_v13  ;;  %v1218_v48 = vsel %vm12021_vm0, %v7854_v38, 0.0  ;;  %v1313_v8 = vsel %vm12021_vm0, %v1264_v58, 0.0  ;;  %v7896_v11 = vld [vmem:[%s7784_s21 + $0xd8] sm:$0xff]  ;;  %1416 = vmatpush.msra.mxu2 %v1400_v46 }
  0x36   : > { %v1267_v13 = vmul.f32 %v7854_v38, %v7854_v38  ;;  %v1315_v14 = vsel %vm12021_vm0, %v1265_v0, 0.0  ;;  %v1230_v22 = vsel %vm12021_vm0, %v7896_v11, 0.0  ;;  %v1270_v34 = vmul.f32 %v7872_v56, %v7872_v56 }
  0x37   : > { %v1199_v60 = vadd.f32 %v1198_v51, %v1197_v54  ;;  %v1296_v25 = vadd.f32 %v1295_v17, %v1294_v19  ;;  %v1220_v54 = vsel %vm12021_vm0, %v7860_v44, 0.0  ;;  %v7904_v17 = vld [vmem:[%s7784_s21 + $0xe0] sm:$0xff]  ;;  %v1268_v19 = vmul.f32 %v7860_v44, %v7860_v44 }
  0x38   : > { %v1319_v28 = vsel %vm12021_vm0, %v1267_v13, 0.0 }
  0x39   : > { %v1201_v2 = vadd.f32 %v1200_v57, %v1199_v60  ;;  %v1298_v31 = vadd.f32 %v1297_v23, %v1296_v25  ;;  %v1222_v60 = vsel %vm12021_vm0, %v7866_v50, 0.0 }
  0x3b   : > { %v1203_v9 = vadd.f32 %v1202_v63, %v1201_v2  ;;  %v1300_v37 = vadd.f32 %v1299_v29, %v1298_v31  ;;  %v1224_v2 = vsel %vm12021_vm0, %v7872_v56, 0.0  ;;  %v1232_v29 = vsel %vm12021_vm0, %v7904_v17, 0.0  ;;  %v7920_v31 = vld [vmem:[%s7784_s21 + $0xf0] sm:$0xff] }
  0x3d   : > { %v1205_v15 = vadd.f32 %v1204_v5, %v1203_v9  ;;  %v1302_v43 = vadd.f32 %v1301_v35, %v1300_v37  ;;  %v1226_v9 = vsel %vm12021_vm0, %v7880_v62, 0.0  ;;  %v1321_v35 = vsel %vm12021_vm0, %v1268_v19, 0.0 }
  0x3f   : > { %v1207_v21 = vadd.f32 %v1206_v12, %v1205_v15  ;;  %v1304_v49 = vadd.f32 %v1303_v41, %v1302_v43  ;;  %v1228_v15 = vsel %vm12021_vm0, %v7888_v4, 0.0  ;;  %v1271_v41 = vmul.f32 %v7880_v62, %v7880_v62 }
  0x40   : > { %v1236_v43 = vsel %vm12021_vm0, %v7920_v31, 0.0 }
  0x41   : > { %v1209_v27 = vadd.f32 %v1208_v18, %v1207_v21  ;;  %v1306_v55 = vadd.f32 %v1305_v47, %v1304_v49  ;;  %v1317_v21 = vsel %vm12021_vm0, %v1266_v7, 0.0  ;;  %v1399_v47 = vld [vmem:[%s12004_s5 + $0x10] sm:$0xff]  ;;  %v1272_v49 = vmul.f32 %v7888_v4, %v7888_v4 }
  0x42   : > { %v1327_v58 = vsel %vm12021_vm0, %v1271_v41, 0.0  ;;  %1417 = vmatpush.msra.mxu2 %v1399_v47 }
  0x43   : > { %v1211_v33 = vadd.f32 %v1210_v24, %v1209_v27  ;;  %v1308_v61 = vadd.f32 %v1307_v53, %v1306_v55  ;;  %v7912_v24 = vld [vmem:[%s7784_s21 + $0xe8] sm:$0xff]  ;;  %v1269_v27 = vmul.f32 %v7866_v50, %v7866_v50 }
  0x45   : > { %v1213_v39 = vadd.f32 %v1212_v30, %v1211_v33  ;;  %v1310_v3 = vadd.f32 %v1309_v59, %v1308_v61  ;;  %v1274_v61 = vmul.f32 %v7904_v17, %v7904_v17 }
  0x47   : > { %v1215_v45 = vadd.f32 %v1214_v36, %v1213_v39  ;;  %v1312_v10 = vadd.f32 %v1311_v1, %v1310_v3  ;;  %v1234_v36 = vsel %vm12021_vm0, %v7912_v24, 0.0  ;;  %v7928_v39 = vld [vmem:[%s7784_s21 + $0xf8] sm:$0xff] }
  0x48   : > { %v1238_v52 = vsel %vm12021_vm0, %v7928_v39, 0.0  ;;  %v1277_v13 = vmul.f32 %v7928_v39, %v7928_v39 }
  0x49   : > { %v1217_v51 = vadd.f32 %v1216_v42, %v1215_v45  ;;  %v1314_v16 = vadd.f32 %v1313_v8, %v1312_v10  ;;  %v1323_v42 = vsel %vm12021_vm0, %v1269_v27, 0.0  ;;  %v1276_v8 = vmul.f32 %v7920_v31, %v7920_v31 }
  0x4b   : > { %v1219_v57 = vadd.f32 %v1218_v48, %v1217_v51  ;;  %v1316_v23 = vadd.f32 %v1315_v14, %v1314_v16  ;;  %v1325_v51 = vsel %vm12021_vm0, %v1270_v34, 0.0 }
  0x4d   : > { %v1221_v63 = vadd.f32 %v1220_v54, %v1219_v57  ;;  %v1318_v30 = vadd.f32 %v1317_v21, %v1316_v23  ;;  %v1398_v54 = vld [vmem:[%s12004_s5 + $0x8] sm:$0xff]  ;;  %v1273_v57 = vmul.f32 %v7896_v11, %v7896_v11 }
  0x4e   : > { %1418 = vmatpush.msra.mxu2 %v1398_v54 }
  0x4f   : > { %v1223_v5 = vadd.f32 %v1222_v60, %v1221_v63  ;;  %v1320_v37 = vadd.f32 %v1319_v28, %v1318_v30  ;;  %v1329_v63 = vsel %vm12021_vm0, %v1272_v49, 0.0  ;;  %v1331_v3 = vsel %vm12021_vm0, %v1273_v57, 0.0 }
  0x51   : > { %v1225_v12 = vadd.f32 %v1224_v2, %v1223_v5  ;;  %v1322_v45 = vadd.f32 %v1321_v35, %v1320_v37  ;;  %v1275_v2 = vmul.f32 %v7912_v24, %v7912_v24 }
  0x53   : > { %v1227_v18 = vadd.f32 %v1226_v9, %v1225_v12  ;;  %v1324_v53 = vadd.f32 %v1323_v42, %v1322_v45  ;;  %v1333_v9 = vsel %vm12021_vm0, %v1274_v61, 0.0  ;;  %v1335_v14 = vsel %vm12021_vm0, %v1275_v2, 0.0  ;;  %v7984_v61 = vld [vmem:[%s12096_s2] ss:$0 sm:$0xff] }
  0x55   : > { %v1229_v25 = vadd.f32 %v1228_v15, %v1227_v18  ;;  %v1326_v59 = vadd.f32 %v1325_v51, %v1324_v53  ;;  %v1337_v18 = vsel %vm12021_vm0, %v1276_v8, 0.0 }
  0x57   : > { %v1231_v33 = vadd.f32 %v1230_v22, %v1229_v25  ;;  %v1328_v0 = vadd.f32 %v1327_v58, %v1326_v59  ;;  %v1339_v22 = vsel %vm12021_vm0, %v1277_v13, 0.0 }
  0x59   : > { %v1233_v40 = vadd.f32 %v1232_v29, %v1231_v33  ;;  %v1330_v5 = vadd.f32 %v1329_v63, %v1328_v0 }
  0x5b   : > { %v1235_v48 = vadd.f32 %v1234_v36, %v1233_v40  ;;  %v1332_v10 = vadd.f32 %v1331_v3, %v1330_v5  ;;  %v1397_v36 = vld [vmem:[%s12004_s5] sm:$0xff] }
  0x5c   : > { %1419 = vmatpush.msra.mxu2 %v1397_v36 }
  0x5d   : > { %v1237_v55 = vadd.f32 %v1236_v43, %v1235_v48  ;;  %v1334_v15 = vadd.f32 %v1333_v9, %v1332_v10 }
  0x5e   : > { %1439 = vmatpush.msrb.mxu2 %v1400_v46 }
  0x5f   : > { %v1239_v60 = vadd.f32 %v1238_v52, %v1237_v55  ;;  %v1336_v19 = vadd.f32 %v1335_v14, %v1334_v15 }
  0x60   : > { %1440 = vmatpush.msrb.mxu2 %v1399_v47 }
  0x61   : > { %v1240_v1 = vrot.slane %v1239_v60, 4  ;;  %v1338_v23 = vadd.f32 %v1337_v18, %v1336_v19 }
  0x62   : > { %1441 = vmatpush.msrb.mxu2 %v1398_v54 }
  0x63   : > { %v1241_v7 = vadd.f32 %v1240_v1, %v1239_v60  ;;  %v1340_v27 = vadd.f32 %v1339_v22, %v1338_v23 }
  0x64   : > { %1442 = vmatpush.msrb.mxu2 %v1397_v36 }
  0x65   : > { %v1242_v12 = vrot.slane %v1241_v7, 2  ;;  %v1341_v28 = vrot.slane %v1340_v27, 4 }
  0x67   : > { %v1243_v16 = vadd.f32 %v1242_v12, %v1241_v7  ;;  %v1342_v29 = vadd.f32 %v1341_v28, %v1340_v27 }
  0x69   : > { %v1244_v21 = vrot.slane %v1243_v16, 1  ;;  %v1343_v30 = vrot.slane %v1342_v29, 2 }
  0x6b   : > { %v1245_v25 = vadd.f32 %v1244_v21, %v1243_v16  ;;  %v1344_v33 = vadd.f32 %v1343_v30, %v1342_v29 }
  0x6d   : > { %6462 = vmatmul.msk.f32.vlgmr.msra.gmra.mxu0 %vm12021_vm0, %v1245_v25  ;;  %v1345_v34 = vrot.slane %v1344_v33, 1 }
  0x6f   : > { %v1346_v35 = vadd.f32 %v1345_v34, %v1344_v33 }
  0x71   : > { %6463 = vmatmul.msk.f32.vlgmr.msra.gmra.mxu1 %vm12021_vm0, %v1346_v35 }
  0xea   : > { %v1371_v37 = vpop.f32.mrf.mxu0 }
  0xeb   : > { %6464 = vmatmul.msk.f32.vlgmr.msra.gmra.mxu2 %vm12021_vm0, %v1371_v37 }
  0xee   : > { %v1394_v40 = vpop.f32.mrf.mxu1 }
  0xf3   : > { %6465 = vmatmul.msk.f32.vlgmr.msrb.gmra.mxu2 %vm12021_vm0, %v1394_v40 }
 0x16e   : > { %v1421_v41 = vpop.f32.mrf.mxu2 }
 0x16f   : > { %v1447_v42 = vmul.f32 %v1421_v41, %v1421_v41  ;;  %v7973_v47 = vperm.slane %v1421_v41, 0 }
 0x171   : > { %v1484_v58 = vsub.f32 %v7860_v44, %v7973_v47  ;;  %v1485_v60 = vsub.f32 %v7866_v50, %v7973_v47  ;;  %v1482_v63 = vsub.f32 %v7848_v32, %v7973_v47  ;;  %v1483_v0 = vsub.f32 %v7854_v38, %v7973_v47  ;;  %v8003_v32 = vld [vmem:[%s12002_s3] ss:$0 sm:$0xff] }
 0x172   : > { %v1480_v1 = vsub.f32 %v7837_v20, %v7973_v47  ;;  %v1481_v44 = vsub.f32 %v7842_v26, %v7973_v47  ;;  %v1486_v50 = vsub.f32 %v7872_v56, %v7973_v47  ;;  %v1488_v2 = vsub.f32 %v7888_v4, %v7973_v47 }
 0x173   : > { %v1489_v15 = vsub.f32 %v7896_v11, %v7973_v47 }
 0x176   : > { %v1444_v43 = vpop.f32.mrf.mxu2 }
 0x177   : > { %v1448_v45 = vsub.f32 %v1444_v43, %v1447_v42 }
 0x179   : > { %v1449_v48 = vmax.f32 %v1448_v45, 0.0 }
 0x17b   : > { %v1450_v49 = vadd.f32 1e-06, %v1449_v48 }
 0x17d   : > { %7244 = vrsqrt.f32 %v1450_v49  ;;  %vm1457_vm2 = vweird.f32 %v1450_v49 }
 0x183   : > { %v7245_v51 = vpop.eup %7244 }
 0x184   : > { %v1452_v52 = vmul.f32 %v7245_v51, %v1450_v49  ;;  %vm1458_vm1 = vweird.f32 %v7245_v51 }
 0x185   : > { %vm1459_vm3 = vmor %vm1457_vm2, %vm1458_vm1 }
 0x186   : > { %v1453_v53 = vmul.f32 %v7245_v51, %v1452_v52 }
 0x188   : > { %v1454_v46 = vmul.f32 0.5, %v1453_v53  ;;  %v1487_v53 = vsub.f32 %v7880_v62, %v7973_v47  ;;  %v1492_v62 = vsub.f32 %v7920_v31, %v7973_v47 }
 0x18a   : > { %v1455_v54 = vsub.f32 1.5, %v1454_v46 }
 0x18c   : > { %v1456_v55 = vmul.f32 %v7245_v51, %v1455_v54 }
 0x18e   : > { %v1460_v57 = vsel %vm1459_vm3, %v7245_v51, %v1456_v55  ;;  %v535_v55 = vlaneseq }
 0x18f   : > { %v7977_v59 = vperm.slane %v1460_v57, 0 }
 0x191   : > { %v1517_v3 = vmul.f32 %v7977_v59, %v1484_v58  ;;  %v1518_v5 = vmul.f32 %v7977_v59, %v1485_v60  ;;  %v1515_v20 = vmul.f32 %v7977_v59, %v1482_v63  ;;  %v1516_v38 = vmul.f32 %v7977_v59, %v1483_v0 }
 0x192   : > { %v1513_v26 = vmul.f32 %v7977_v59, %v1480_v1  ;;  %v1514_v56 = vmul.f32 %v7977_v59, %v1481_v44  ;;  %v1519_v7 = vmul.f32 %v7977_v59, %v1486_v50  ;;  %v1521_v4 = vmul.f32 %v7977_v59, %v1488_v2 }
 0x193   : > { %v1553_v8 = vmul.f32 %v7984_v61, %v1517_v3  ;;  %v1554_v9 = vmul.f32 %v7984_v61, %v1518_v5  ;;  %v1551_v10 = vmul.f32 %v7984_v61, %v1515_v20  ;;  %v1552_v12 = vmul.f32 %v7984_v61, %v1516_v38 }
 0x194   : > { %v1549_v13 = vmul.f32 %v7984_v61, %v1513_v26  ;;  %v1550_v14 = vmul.f32 %v7984_v61, %v1514_v56  ;;  %v1555_v11 = vmul.f32 %v7984_v61, %v1519_v7  ;;  %v1557_v25 = vmul.f32 %v7984_v61, %v1521_v4 }
 0x195   : > { %v8020_v16 = vadd.f32 %v8003_v32, %v1553_v8  ;;  %v8023_v18 = vadd.f32 %v8003_v32, %v1554_v9  ;;  %v8026_v19 = vadd.f32 %v8003_v32, %v1551_v10  ;;  %v8029_v21 = vadd.f32 %v8003_v32, %v1552_v12 }
 0x196   : > { %v8032_v22 = vadd.f32 %v8003_v32, %v1549_v13  ;;  %v8035_v23 = vadd.f32 %v8003_v32, %v1550_v14  ;;  %v1522_v35 = vmul.f32 %v7977_v59, %v1489_v15  ;;  %v8047_v42 = vadd.f32 %v8003_v32, %v1555_v11 }
 0x197   : > { %v1621_v27 = vsub.f32 0.0, %v8020_v16  ;;  %v1622_v28 = vsub.f32 0.0, %v8023_v18  ;;  %v1619_v29 = vsub.f32 0.0, %v8026_v19  ;;  %v1620_v30 = vsub.f32 0.0, %v8029_v21 }
 0x198   : > { %v1617_v33 = vsub.f32 0.0, %v8032_v22  ;;  %v1618_v34 = vsub.f32 0.0, %v8035_v23  ;;  %v8050_v45 = vadd.f32 %v8003_v32, %v1557_v25  ;;  %v1558_v49 = vmul.f32 %v7984_v61, %v1522_v35 }
 0x199   : > { %v1675_v36 = vmul.f32 1.442695, %v1621_v27  ;;  %v1677_v37 = vmul.f32 1.442695, %v1622_v28  ;;  %v1671_v40 = vmul.f32 1.442695, %v1619_v29  ;;  %v1520_v57 = vmul.f32 %v7977_v59, %v1487_v53 }
 0x19a   : > { %v1673_v41 = vmul.f32 1.442695, %v1620_v30  ;;  %v1667_v43 = vmul.f32 1.442695, %v1617_v33  ;;  %v1669_v48 = vmul.f32 1.442695, %v1618_v34  ;;  %v8058_v46 = vadd.f32 %v8003_v32, %v1558_v49 }
 0x19b   : > { %7246 = vpow2.f32 %v1675_v36  ;;  %v1623_v51 = vsub.f32 0.0, %v8047_v42  ;;  %v1625_v52 = vsub.f32 0.0, %v8050_v45  ;;  %v1493_v5 = vsub.f32 %v7928_v39, %v7973_v47 }
 0x19c   : > { %7248 = vpow2.f32 %v1677_v37  ;;  %v1626_v2 = vsub.f32 0.0, %v8058_v46  ;;  %v8072_v20 = vshrl.u32 %v535_v55, 7  ;;  %v1556_v38 = vmul.f32 %v7984_v61, %v1520_v57 }
 0x19d   : > { %7250 = vpow2.f32 %v1671_v40  ;;  %v1679_v63 = vmul.f32 1.442695, %v1623_v51  ;;  %v1683_v44 = vmul.f32 1.442695, %v1625_v52  ;;  %v1490_v4 = vsub.f32 %v7904_v17, %v7973_v47 }
 0x19e   : > { %7252 = vpow2.f32 %v1673_v41  ;;  %v8088_v14 = vmul.f32 1.442695, %v1626_v2  ;;  %v8094_v11 = vadd.s32 184, %v8072_v20  ;;  %v8097_v25 = vadd.f32 %v8003_v32, %v1556_v38 }
 0x19f   : > { %7254 = vpow2.f32 %v1667_v43  ;;  %v1525_v17 = vmul.f32 %v7977_v59, %v1492_v62 }
 0x1a0   : > { %7256 = vpow2.f32 %v1669_v48  ;;  %v1624_v38 = vsub.f32 0.0, %v8097_v25 }
 0x1a1   : > { %v7247_v54 = vpop.eup %7246 }
 0x1a2   : > { %v7249_v58 = vpop.eup %7248  ;;  %v8061_v60 = vadd.f32 1.0, %v7247_v54 }
 0x1a3   : > { %v7251_v0 = vpop.eup %7250  ;;  %v8063_v1 = vadd.f32 1.0, %v7249_v58 }
 0x1a4   : > { %v7253_v50 = vpop.eup %7252  ;;  %7258 = vrcp.f32 %v8061_v60  ;;  %v8075_v56 = vadd.f32 1.0, %v7251_v0  ;;  %v2066_v8 = vand.u32 2147483647, %v8061_v60  ;;  %v2068_v9 = vand.u32 2147483648, %v8061_v60 }
 0x1a5   : > { %v7255_v3 = vpop.eup %7254  ;;  %7260 = vrcp.f32 %v8063_v1  ;;  %v8077_v7 = vadd.f32 1.0, %v7253_v50  ;;  %v2081_v12 = vand.u32 2147483647, %v8063_v1  ;;  %v2083_v13 = vand.u32 2147483648, %v8063_v1 }
 0x1a6   : > { %v7257_v26 = vpop.eup %7256  ;;  %7262 = vpow2.f32 %v1679_v63  ;;  %v8083_v10 = vadd.f32 1.0, %v7255_v3  ;;  %vm2062_vm4 = vweird.f32 %v8061_v60  ;;  %vm2077_vm5 = vweird.f32 %v8063_v1 }
 0x1a7   : > { %7264 = vpow2.f32 %v1683_v44  ;;  %v8091_v15 = vadd.f32 1.0, %v7257_v26  ;;  %v2038_v28 = vand.u32 2147483648, %v8075_v56  ;;  %vm8104_vm6 = vcmp.eq.f32.partialorder %v2066_v8, 8.507059e+37 }
 0x1a8   : > { %7266 = vrcp.f32 %v8075_v56  ;;  %v2069_v34 = vor.u32 1.1754944e-38, %v2068_v9  ;;  %v2036_v35 = vand.u32 2147483647, %v8075_v56  ;;  %v2053_v36 = vand.u32 2147483648, %v8077_v7 }
 0x1a9   : > { %7268 = vrcp.f32 %v8077_v7  ;;  %vm8111_vm7 = vcmp.eq.f32.partialorder %v2081_v12, 8.507059e+37  ;;  %v2084_v43 = vor.u32 1.1754944e-38, %v2083_v13  ;;  %v2051_v48 = vand.u32 2147483647, %v8077_v7 }
 0x1aa   : > { %v7259_v27 = vpop.eup %7258  ;;  %7270 = vrcp.f32 %v8083_v10  ;;  %vm2032_vm8 = vweird.f32 %v8075_v56  ;;  %v2006_v52 = vand.u32 2147483647, %v8083_v10  ;;  %v2039_v55 = vor.u32 1.1754944e-38, %v2038_v28 }
 0x1ab   : > { %v7261_v29 = vpop.eup %7260  ;;  %v2058_v30 = vmul.f32 %v7259_v27, %v8061_v60  ;;  %7272 = vrcp.f32 %v8091_v15  ;;  %vm2063_vm9 = vweird.f32 %v7259_v27  ;;  %vm2047_vm10 = vweird.f32 %v8077_v7 }
 0x1ac   : > { %v7263_v37 = vpop.eup %7262  ;;  %v2073_v40 = vmul.f32 %v7261_v29, %v8063_v1  ;;  %vm2078_vm11 = vweird.f32 %v7261_v29  ;;  %vm8123_vm12 = vcmp.eq.f32.partialorder %v2036_v35, 8.507059e+37  ;;  %v2054_v44 = vor.u32 1.1754944e-38, %v2053_v36  ;;  %vm2064_vm2 = vmor %vm2062_vm4, %vm2063_vm9 }
 0x1ad   : > { %v8116_v49 = vpop.eup %7264  ;;  %v2059_v51 = vsub.f32 1.0, %v2058_v30  ;;  %vm8129_vm14 = vcmp.eq.f32.partialorder %v2051_v48, 8.507059e+37  ;;  %v2008_v26 = vand.u32 2147483648, %v8083_v10  ;;  %v2021_v8 = vand.u32 2147483647, %v8091_v15  ;;  %vm2079_vm13 = vmor %vm2077_vm5, %vm2078_vm11 }
 0x1ae   : > { %v7267_v53 = vpop.eup %7266  ;;  %v2074_v54 = vsub.f32 1.0, %v2073_v40  ;;  %vm8136_vm1 = vcmp.eq.f32.partialorder %v2006_v52, 8.507059e+37  ;;  %v8146_v52 = vadd.f32 1.0, %v7263_v37  ;;  %vm2400_vm11 = vcmask 1046528  }
 0x1af   : > { %v7269_v57 = vpop.eup %7268  ;;  %v2060_v58 = vmul.f32 %v7259_v27, %v2059_v51  ;;  %v2028_v63 = vmul.f32 %v7267_v53, %v8075_v56  ;;  %vm2033_vm15 = vweird.f32 %v7267_v53 }
 0x1b0   : > { %v7271_v50 = vpop.eup %7270  ;;  %v2075_v2 = vmul.f32 %v7261_v29, %v2074_v54  ;;  %v2043_v3 = vmul.f32 %v7269_v57, %v8077_v7  ;;  %vm2048_vm3 = vweird.f32 %v7269_v57  ;;  %vm2034_vm4 = vmor %vm2032_vm8, %vm2033_vm15  ;;  %7274 = vrcp.f32 %v8146_v52 }
 0x1b1   : > { %v2061_v9 = vadd.f32 %v7259_v27, %v2060_v58  ;;  %v2029_v12 = vsub.f32 1.0, %v2028_v63  ;;  %v1998_v13 = vmul.f32 %v7271_v50, %v8083_v10  ;;  %vm2003_vm0 = vweird.f32 %v7271_v50  ;;  %v7273_v36 = vpop.eup %7272  ;;  %vm2049_vm5 = vmor %vm2047_vm10, %vm2048_vm3 }
 0x1b2   : > { %v2076_v30 = vadd.f32 %v7261_v29, %v2075_v2  ;;  %v2044_v35 = vsub.f32 1.0, %v2043_v3  ;;  %v2013_v63 = vmul.f32 %v7273_v36, %v8091_v15  ;;  %vm2018_vm8 = vweird.f32 %v7273_v36 }
 0x1b3   : > { %v2065_v40 = vsel %vm2064_vm2, %v7259_v27, %v2061_v9  ;;  %v2030_v48 = vmul.f32 %v7267_v53, %v2029_v12  ;;  %v1999_v51 = vsub.f32 1.0, %v1998_v13  ;;  %7276 = vpow2.f32 %v8088_v14 }
 0x1b4   : > { %v2070_v54 = vsel %vm8104_vm6, %v2069_v34, %v2065_v40  ;;  %v2080_v58 = vsel %vm2079_vm13, %v7261_v29, %v2076_v30  ;;  %v2045_v60 = vmul.f32 %v7269_v57, %v2044_v35  ;;  %v2009_v29 = vor.u32 1.1754944e-38, %v2008_v26 }
 0x1b5   : > { %v2085_v2 = vsel %vm8111_vm7, %v2084_v43, %v2080_v58  ;;  %v8154_v27 = vmul.f32 %v2070_v54, %v8020_v16  ;;  %v2031_v3 = vadd.f32 %v7267_v53, %v2030_v48  ;;  %v2000_v1 = vmul.f32 %v7271_v50, %v1999_v51 }
 0x1b6   : > { %v8157_v9 = vmul.f32 %v2085_v2, %v8023_v18  ;;  %v2046_v33 = vadd.f32 %v7269_v57, %v2045_v60  ;;  %v2014_v34 = vsub.f32 1.0, %v2013_v63  ;;  %v2023_v16 = vand.u32 2147483648, %v8091_v15  ;;  %v7275_v14 = vpop.eup %7274 }
 0x1b7   : > { %v2035_v37 = vsel %vm2034_vm4, %v7267_v53, %v2031_v3  ;;  %v2001_v41 = vadd.f32 %v7271_v50, %v2000_v1  ;;  %vm12107_vm6 = vweird.f32 %v8083_v10  ;;  %v1491_v10 = vsub.f32 %v7912_v24, %v7973_v47 }
 0x1b8   : > { %v7016_v18 = vpack.i.bf16 %v8157_v9, %v8154_v27  ;;  %v2040_v56 = vsel %vm8123_vm12, %v2039_v55, %v2035_v37  ;;  %v2050_v43 = vsel %vm2049_vm5, %v7269_v57, %v2046_v33  ;;  %vm2004_vm7 = vmor %vm12107_vm6, %vm2003_vm0  ;;  %v2015_v12 = vmul.f32 %v7273_v36, %v2014_v34 }
 0x1b9   : > { %v2055_v7 = vsel %vm8129_vm14, %v2054_v44, %v2050_v43  ;;  %v8177_v53 = vmul.f32 %v2040_v56, %v8026_v19  ;;  %v2005_v26 = vsel %vm2004_vm7, %v7271_v50, %v2001_v41  ;;  %vm2017_vm0 = vweird.f32 %v8091_v15 }
 0x1ba   : > { %7017 = vrot.lane.b32.xlu2 %v7016_v18, %s7621_s20  ;;  %v8181_v0 = vmul.f32 %v2055_v7, %v8029_v21  ;;  %v2010_v55 = vsel %vm8136_vm1, %v2009_v29, %v2005_v26  ;;  %v2016_v57 = vadd.f32 %v7273_v36, %v2015_v12  ;;  %v733_v19 = vand.u32 15, %v8094_v11  ;;  %vm2019_vm9 = vmor %vm2017_vm0, %vm2018_vm8 }
 0x1bb   : > { %v1464_v44 = vsub.f32 %v7789_v6, %v7973_v47  ;;  %v2024_v50 = vor.u32 1.1754944e-38, %v2023_v16  ;;  %vm2022_vm10 = vcmp.eq.f32.partialorder %v2021_v8, 8.507059e+37  ;;  %v8197_v28 = vmul.f32 %v2010_v55, %v8032_v22 }
 0x1bc   : > { %v7006_v21 = vpack.i.bf16 %v8181_v0, %v8177_v53  ;;  %v2020_v13 = vsel %vm2019_vm9, %v7273_v36, %v2016_v57  ;;  %v2444_v15 = vrot.slane %v8154_v27, 1  ;;  %v2088_v30 = vmul.f32 %v7275_v14, %v8146_v52  ;;  %v7277_v36 = vpop.eup %7276 }
 0x1bd   : > { %v2025_v11 = vsel %vm2022_vm10, %v2024_v50, %v2020_v13  ;;  %v557_v35 = vadd.s32 168, %v8072_v20  ;;  %vm2092_vm12 = vweird.f32 %v8146_v52  ;;  %v2098_v8 = vand.u32 2147483648, %v8146_v52 }
 0x1be   : > { %7007 = vrot.lane.b32.xlu1 %v7006_v21, %s7621_s20  ;;  %v8204_v40 = vmul.f32 %v2025_v11, %v8035_v23  ;;  %v2442_v22 = vrot.slane %v8181_v0, 1  ;;  %v2089_v48 = vsub.f32 1.0, %v2088_v30  ;;  %v2096_v51 = vand.u32 2147483647, %v8146_v52 }
 0x1bf   : > { %v719_v54 = vand.u32 15, %v557_v35  ;;  %v555_v58 = vadd.s32 152, %v8072_v20  ;;  %vm2093_vm13 = vweird.f32 %v7275_v14  ;;  %v2440_v23 = vrot.slane %v8177_v53, 1 }
 0x1c0   : > { %v6996_v60 = vpack.i.bf16 %v8204_v40, %v8197_v28  ;;  %v2445_v63 = vsel %vm2400_vm11, %v2442_v22, %v2444_v15  ;;  %v2090_v2 = vmul.f32 %v7275_v14, %v2089_v48  ;;  %v2438_v1 = vrot.slane %v8204_v40, 1  ;;  %vm2094_vm1 = vmor %vm2092_vm12, %vm2093_vm13 }
 0x1c1   : > { %vm1069_vm14 = vcmp.lt.s32.totalorder %v719_v54, 15  ;;  %v705_v3 = vand.u32 15, %v555_v58  ;;  %v2099_v33 = vor.u32 1.1754944e-38, %v2098_v8  ;;  %v12026_v29 = vmov 0.0  }
 0x1c2   : > { %6997 = vrot.lane.b32.xlu0 %v6996_v60, %s7621_s20  ;;  %v8218_v34 = vsel %vm1069_vm14, 1.0, %v12026_v29  ;;  %v8221_v37 = vadd.f32 1.0, %v8116_v49  ;;  %v8223_v41 = vadd.f32 1.0, %v7277_v36  ;;  %v2091_v16 = vadd.f32 %v7275_v14, %v2090_v2 }
 0x1c3   : > { %12108 = vst [vmem:[#allocation10_spill] sm:$0xff] %v8218_v34  ;;  %v2518_v18 = vmul.f32 %v8218_v34, %v2445_v63  ;;  %vm1067_vm15 = vcmp.lt.s32.totalorder %v705_v3, 15  ;;  %v12022_v56 = vrot.slane %v8197_v28, 1  ;;  %v2443_v43 = vsel %vm2400_vm11, %v2440_v23, %v2442_v22 }
 0x1c4   : > { %v8232_v7 = vsel %vm1067_vm15, 1.0, %v12026_v29  ;;  %v2441_v49 = vsel %vm2400_vm11, %v2438_v1, %v2440_v23  ;;  %7278 = vrcp.f32 %v8221_v37  ;;  %v2095_v26 = vsel %vm2094_vm1, %v7275_v14, %v2091_v16 }
 0x1c5   : > { %12109 = vst [vmem:[#allocation11_spill] sm:$0xff] %v8232_v7  ;;  %vm2097_vm2 = vcmp.eq.f32.partialorder %v2096_v51, 8.507059e+37  ;;  %v7011_v12 = vpack.i.bf16 %v2518_v18, %v2443_v43  ;;  %v2516_v55 = vmul.f32 %v8232_v7, %v2441_v49  ;;  %vm1071_vm3 = vcmp.lt.s32.totalorder %v733_v19, 15 }
 0x1c6   : > { %v2100_v57 = vsel %vm2097_vm2, %v2099_v33, %v2095_v26  ;;  %v2446_v21 = vrot.slane %v8157_v9, 1  ;;  %7280 = vrcp.f32 %v8223_v41  ;;  %v2439_v50 = vsel %vm2400_vm11, %v12022_v56, %v2438_v1 }
 0x1c7   : > { %v8240_v52 = vmul.f32 %v2100_v57, %v8047_v42  ;;  %7012 = vrot.lane.b32.xlu1 %v7011_v12, %s7623_s26  ;;  %v2126_v14 = vand.u32 2147483647, %v8221_v37  ;;  %v2128_v13 = vand.u32 2147483648, %v8221_v37  ;;  %v7001_v19 = vpack.i.bf16 %v2516_v55, %v2439_v50 }
 0x1c8   : > { %v561_v11 = vadd.s32 200, %v8072_v20  ;;  %v1681_v30 = vmul.f32 1.442695, %v1624_v38  ;;  %v1523_v42 = vmul.f32 %v7977_v59, %v1490_v4  ;;  %v8254_v35 = vsel %vm1071_vm3, 1.0, %v12026_v29 }
 0x1c9   : > { %12110 = vst [vmem:[#allocation12_spill] sm:$0xff] %v8254_v35  ;;  %v2448_v8 = vrot.slane %v8240_v52, 1  ;;  %v2141_v22 = vand.u32 2147483647, %v8223_v41  ;;  %v1524_v36 = vmul.f32 %v7977_v59, %v1491_v10  ;;  %v2447_v38 = vsel %vm2400_vm11, %v2444_v15, %v2446_v21 }
 0x1ca   : > { %v7279_v48 = vpop.eup %7278  ;;  %7002 = vrot.lane.b32.xlu0 %v7001_v19, %s7623_s26  ;;  %vm2122_vm4 = vweird.f32 %v8221_v37  ;;  %7282 = vpow2.f32 %v1681_v30  ;;  %vm8273_vm5 = vcmp.eq.f32.partialorder %v2126_v14, 8.507059e+37  ;;  %v2129_v15 = vor.u32 1.1754944e-38, %v2128_v13 }
 0x1cb   : > { %v2449_v4 = vsel %vm2400_vm11, %v2446_v21, %v2448_v8  ;;  %v2118_v24 = vmul.f32 %v7279_v48, %v8221_v37  ;;  %vm2137_vm6 = vweird.f32 %v8223_v41  ;;  %v2143_v51 = vand.u32 2147483648, %v8223_v41 }
 0x1cc   : > { %v7281_v54 = vpop.eup %7280  ;;  %v2520_v31 = vmul.f32 %v8254_v35, %v2449_v4  ;;  %v747_v58 = vand.u32 15, %v561_v11  ;;  %v1559_v62 = vmul.f32 %v7984_v61, %v1523_v42  ;;  %v1560_v60 = vmul.f32 %v7984_v61, %v1524_v36 }
 0x1cd   : > { %v2119_v23 = vsub.f32 1.0, %v2118_v24  ;;  %v2133_v63 = vmul.f32 %v7281_v54, %v8223_v41  ;;  %vm8283_vm7 = vcmp.eq.f32.partialorder %v2141_v22, 8.507059e+37  ;;  %v1561_v3 = vmul.f32 %v7984_v61, %v1525_v17  ;;  %v7504_v41 = vld [vmem:[%s7784_s21 + $0x18] sm:$0xff] }
 0x1ce   : > { %v7021_v1 = vpack.i.bf16 %v2520_v31, %v2447_v38  ;;  %v565_v33 = vadd.s32 232, %v8072_v20  ;;  %v8290_v16 = vadd.f32 %v8003_v32, %v1559_v62  ;;  %v8293_v18 = vadd.f32 %v8003_v32, %v1560_v60 }
 0x1cf   : > { %v2120_v43 = vmul.f32 %v7279_v48, %v2119_v23  ;;  %vm2123_vm8 = vweird.f32 %v7279_v48  ;;  %v2134_v49 = vsub.f32 1.0, %v2133_v63  ;;  %v8296_v26 = vadd.f32 %v8003_v32, %v1561_v3 }
 0x1d0   : > { %v7283_v12 = vpop.eup %7282  ;;  %7022 = vrot.lane.b32.xlu2 %v7021_v1, %s7623_s26  ;;  %vm2138_vm0 = vweird.f32 %v7281_v54  ;;  %v2144_v55 = vor.u32 1.1754944e-38, %v2143_v51  ;;  %v1627_v57 = vsub.f32 0.0, %v8290_v16  ;;  %v1628_v21 = vsub.f32 0.0, %v8293_v18  ;;  %vm2124_vm9 = vmor %vm2122_vm4, %vm2123_vm8 }
 0x1d1   : > { %v2121_v50 = vadd.f32 %v7279_v48, %v2120_v43  ;;  %v2135_v14 = vmul.f32 %v7281_v54, %v2134_v49  ;;  %v8301_v13 = vadd.f32 1.0, %v7283_v12  ;;  %v1629_v19 = vsub.f32 0.0, %v8296_v26  ;;  %vm2139_vm12 = vmor %vm2137_vm6, %vm2138_vm0 }
 0x1d2   : > { %vm8306_vm10 = vcmp.lt.s32.totalorder %v747_v58, 15  ;;  %v775_v30 = vand.u32 15, %v565_v33  ;;  %v1687_v42 = vmul.f32 1.442695, %v1627_v57  ;;  %v1689_v22 = vmul.f32 1.442695, %v1628_v21 }
 0x1d3   : > { %v2125_v36 = vsel %vm2124_vm9, %v7279_v48, %v2121_v50  ;;  %v2136_v38 = vadd.f32 %v7281_v54, %v2135_v14  ;;  %7284 = vrcp.f32 %v8301_v13  ;;  %v563_v17 = vadd.s32 216, %v8072_v20 }
 0x1d4   : > { %v2130_v4 = vsel %vm8273_vm5, %v2129_v15, %v2125_v36  ;;  %7286 = vpow2.f32 %v1687_v42  ;;  %v567_v37 = vadd.s32 248, %v8072_v20  ;;  %v1526_v48 = vmul.f32 %v7977_v59, %v1493_v5 }
 0x1d5   : > { %v2140_v24 = vsel %vm2139_vm12, %v7281_v54, %v2136_v38  ;;  %v8323_v51 = vmul.f32 %v2130_v4, %v8050_v45  ;;  %7288 = vpow2.f32 %v1689_v22  ;;  %v1691_v31 = vmul.f32 1.442695, %v1629_v19 }
 0x1d6   : > { %v2145_v10 = vsel %vm8283_vm7, %v2144_v55, %v2140_v24  ;;  %vm1077_vm13 = vcmp.lt.s32.totalorder %v775_v30, 15  ;;  %v1465_v15 = vsub.f32 %v7504_v41, %v7973_v47  ;;  %v1497_v39 = vmul.f32 %v7977_v59, %v1464_v44 }
 0x1d7   : > { %v8334_v5 = vmul.f32 %v2145_v10, %v8058_v46  ;;  %v2111_v45 = vand.u32 2147483647, %v8301_v13  ;;  %7290 = vpow2.f32 %v1691_v31  ;;  %v761_v54 = vand.u32 15, %v563_v17 }
 0x1d8   : > { %v8340_v58 = vsel %vm8306_vm10, 1.0, %v12026_v29  ;;  %v789_v62 = vand.u32 15, %v567_v37  ;;  %v1562_v60 = vmul.f32 %v7984_v61, %v1526_v48  ;;  %vm2107_vm14 = vweird.f32 %v8301_v13 }
 0x1d9   : > { %12117 = vst [vmem:[#allocation13_spill] sm:$0xff] %v8340_v58  ;;  %v7285_v23 = vpop.eup %7284  ;;  %v7036_v6 = vpack.i.bf16 %v8334_v5, %v8323_v51  ;;  %v8347_v46 = vsel %vm1077_vm13, 1.0, %v12026_v29  ;;  %v1498_v44 = vmul.f32 %v7977_v59, %v1465_v15  ;;  %v2113_v3 = vand.u32 2147483648, %v8301_v13 }
 0x1da   : > { %12118 = vst [vmem:[#allocation14_spill] sm:$0xff] %v8347_v46  ;;  %v7287_v63 = vpop.eup %7286  ;;  %v2103_v2 = vmul.f32 %v7285_v23, %v8301_v13  ;;  %v8353_v1 = vadd.f32 %v8003_v32, %v1562_v60  ;;  %v1533_v33 = vmul.f32 %v7984_v61, %v1497_v39  ;;  %vm8357_vm15 = vcmp.eq.f32.partialorder %v2111_v45, 8.507059e+37  ;;  %v7505_v39 = vld [vmem:[%s7784_s21 + $0x20] sm:$0xff] }
 0x1db   : > { %v7289_v43 = vpop.eup %7288  ;;  %7037 = vrot.lane.b32.xlu2 %v7036_v6, %s7621_s20  ;;  %v2452_v12 = vrot.slane %v8323_v51, 1  ;;  %v8362_v55 = vadd.f32 1.0, %v7287_v63  ;;  %vm8364_vm1 = vcmp.lt.s32.totalorder %v761_v54, 15  ;;  %v2454_v14 = vrot.slane %v8334_v5, 1 }
 0x1dc   : > { %v2104_v21 = vsub.f32 1.0, %v2103_v2  ;;  %v8368_v50 = vadd.f32 1.0, %v7289_v43  ;;  %vm1079_vm2 = vcmp.lt.s32.totalorder %v789_v62, 15  ;;  %vm2108_vm3 = vweird.f32 %v7285_v23 }
 0x1dd   : > { %v7291_v19 = vpop.eup %7290  ;;  %7292 = vrcp.f32 %v8362_v55  ;;  %v1630_v11 = vsub.f32 0.0, %v8353_v1  ;;  %v1534_v30 = vmul.f32 %v7984_v61, %v1498_v44  ;;  %v8378_v36 = vadd.f32 %v8003_v32, %v1533_v33  ;;  %vm2109_vm4 = vmor %vm2107_vm14, %vm2108_vm3 }
 0x1de   : > { %v2105_v42 = vmul.f32 %v7285_v23, %v2104_v21  ;;  %v8374_v22 = vadd.f32 1.0, %v7291_v19  ;;  %7294 = vrcp.f32 %v8368_v50  ;;  %v2114_v38 = vor.u32 1.1754944e-38, %v2113_v3 }
 0x1df   : > { %v2158_v17 = vand.u32 2147483648, %v8362_v55  ;;  %v8384_v4 = vsel %vm8364_vm1, 1.0, %v12026_v29  ;;  %v8387_v37 = vsel %vm1079_vm2, 1.0, %v12026_v29  ;;  %v2156_v24 = vand.u32 2147483647, %v8362_v55 }
 0x1e0   : > { %12123 = vst [vmem:[#allocation15_spill] sm:$0xff] %v8384_v4  ;;  %v2106_v48 = vadd.f32 %v7285_v23, %v2105_v42  ;;  %7296 = vrcp.f32 %v8374_v22  ;;  %v8394_v31 = vsel %vm2400_vm11, %v2452_v12, %v2454_v14  ;;  %v2171_v10 = vand.u32 2147483647, %v8368_v50 }
 0x1e1   : > { %12124 = vst [vmem:[#allocation16_spill] sm:$0xff] %v8387_v37  ;;  %v2173_v41 = vand.u32 2147483648, %v8368_v50  ;;  %v1693_v15 = vmul.f32 1.442695, %v1630_v11  ;;  %v1466_v45 = vsub.f32 %v7505_v39, %v7973_v47  ;;  %vm2152_vm5 = vweird.f32 %v8362_v55 }
 0x1e2   : > { %v2110_v54 = vsel %vm2109_vm4, %v7285_v23, %v2106_v48  ;;  %v8405_v62 = vadd.f32 %v8003_v32, %v1534_v30  ;;  %v1601_v60 = vsub.f32 0.0, %v8378_v36  ;;  %v2159_v44 = vor.u32 1.1754944e-38, %v2158_v17 }
 0x1e3   : > { %v7293_v6 = vpop.eup %7292  ;;  %v2115_v13 = vsel %vm8357_vm15, %v2114_v38, %v2110_v54  ;;  %vm2167_vm6 = vweird.f32 %v8368_v50  ;;  %7298 = vpow2.f32 %v1693_v15  ;;  %vm8415_vm7 = vcmp.eq.f32.partialorder %v2156_v24, 8.507059e+37 }
 0x1e4   : > { %v7295_v63 = vpop.eup %7294  ;;  %v8412_v2 = vmul.f32 %v2115_v13, %v8097_v25  ;;  %v2148_v23 = vmul.f32 %v7293_v6, %v8362_v55  ;;  %v2186_v33 = vand.u32 2147483647, %v8374_v22  ;;  %v1602_v43 = vsub.f32 0.0, %v8405_v62 }
 0x1e5   : > { %v2163_v49 = vmul.f32 %v7295_v63, %v8368_v50  ;;  %vm8422_vm8 = vcmp.eq.f32.partialorder %v2171_v10, 8.507059e+37  ;;  %v2174_v21 = vor.u32 1.1754944e-38, %v2173_v41  ;;  %vm2182_vm0 = vweird.f32 %v8374_v22  ;;  %v7506_v10 = vld [vmem:[%s7784_s21 + $0x28] sm:$0xff] }
 0x1e6   : > { %v2188_v25 = vand.u32 2147483648, %v8374_v22  ;;  %v1635_v19 = vmul.f32 1.442695, %v1601_v60  ;;  %v7297_v11 = vpop.eup %7296  ;;  %v2450_v30 = vrot.slane %v8412_v2, 1  ;;  %v7026_v42 = vpack.i.bf16 %v8412_v2, %v8240_v52 }
 0x1e7   : > { %v2149_v38 = vsub.f32 1.0, %v2148_v23  ;;  %v1637_v17 = vmul.f32 1.442695, %v1602_v43  ;;  %v2164_v48 = vsub.f32 1.0, %v2163_v49  ;;  %v2178_v24 = vmul.f32 %v7297_v11, %v8374_v22 }
 0x1e8   : > { %7300 = vpow2.f32 %v1635_v19  ;;  %v1467_v41 = vsub.f32 %v7506_v10, %v7973_v47  ;;  %v2453_v15 = vsel %vm2400_vm11, %v2450_v30, %v2452_v12  ;;  %7027 = vrot.lane.b32.xlu0 %v7026_v42, %s7621_s20  ;;  %vm2153_vm9 = vweird.f32 %v7293_v6 }
 0x1e9   : > { %v2150_v39 = vmul.f32 %v7293_v6, %v2149_v38  ;;  %7302 = vpow2.f32 %v1637_v17  ;;  %v7299_v54 = vpop.eup %7298  ;;  %v2522_v60 = vmul.f32 %v8340_v58, %v2453_v15  ;;  %v2165_v13 = vmul.f32 %v7295_v63, %v2164_v48  ;;  %vm2154_vm12 = vmor %vm2152_vm5, %vm2153_vm9 }
 0x1ea   : > { %vm2168_vm10 = vweird.f32 %v7295_v63  ;;  %v2179_v23 = vsub.f32 1.0, %v2178_v24  ;;  %v2451_v43 = vsel %vm2400_vm11, %v2448_v8, %v2450_v30  ;;  %v8440_v19 = vadd.f32 1.0, %v7299_v54  ;;  %v7507_v54 = vld [vmem:[%s7784_s21 + $0x30] sm:$0xff] }
 0x1eb   : > { %v2151_v49 = vadd.f32 %v7293_v6, %v2150_v39  ;;  %v1499_v12 = vmul.f32 %v7977_v59, %v1466_v45  ;;  %v7031_v10 = vpack.i.bf16 %v2522_v60, %v2451_v43  ;;  %v2166_v42 = vadd.f32 %v7295_v63, %v2165_v13  ;;  %vm2169_vm14 = vmor %vm2167_vm6, %vm2168_vm10 }
 0x1ec   : > { %v2180_v38 = vmul.f32 %v7297_v11, %v2179_v23  ;;  %vm2183_vm13 = vweird.f32 %v7297_v11  ;;  %vm8447_vm15 = vcmp.eq.f32.partialorder %v2186_v33, 8.507059e+37  ;;  %v2189_v8 = vor.u32 1.1754944e-38, %v2188_v25 }
 0x1ed   : > { %v2155_v17 = vsel %vm2154_vm12, %v7293_v6, %v2151_v49  ;;  %7304 = vrcp.f32 %v8440_v19  ;;  %7032 = vrot.lane.b32.xlu1 %v7031_v10, %s7623_s26  ;;  %v2170_v45 = vsel %vm2169_vm14, %v7295_v63, %v2166_v42  ;;  %v1500_v6 = vmul.f32 %v7977_v59, %v1467_v41  ;;  %vm2184_vm1 = vmor %vm2182_vm0, %vm2183_vm13 }
 0x1ee   : > { %v7301_v30 = vpop.eup %7300  ;;  %v2160_v55 = vsel %vm8415_vm7, %v2159_v44, %v2155_v17  ;;  %v2181_v24 = vadd.f32 %v7297_v11, %v2180_v38  ;;  %v2175_v50 = vsel %vm8422_vm8, %v2174_v21, %v2170_v45  ;;  %v1535_v3 = vmul.f32 %v7984_v61, %v1499_v12 }
 0x1ef   : > { %v7303_v15 = vpop.eup %7302  ;;  %v8461_v33 = vmul.f32 %v2160_v55, %v8290_v16  ;;  %v8463_v25 = vadd.f32 1.0, %v7301_v30  ;;  %v8467_v63 = vmul.f32 %v2175_v50, %v8293_v18  ;;  %v2201_v41 = vand.u32 2147483647, %v8440_v19 }
 0x1f0   : > { %v2185_v44 = vsel %vm2184_vm1, %v7297_v11, %v2181_v24  ;;  %v8470_v39 = vadd.f32 1.0, %v7303_v15  ;;  %v2203_v16 = vand.u32 2147483648, %v8440_v19  ;;  %v1536_v18 = vmul.f32 %v7984_v61, %v1500_v6 }
 0x1f1   : > { %v2190_v22 = vsel %vm8447_vm15, %v2189_v8, %v2185_v44  ;;  %v2456_v57 = vrot.slane %v8461_v33, 1  ;;  %7306 = vrcp.f32 %v8463_v25  ;;  %v2458_v11 = vrot.slane %v8467_v63, 1 }
 0x1f2   : > { %v8478_v21 = vmul.f32 %v2190_v22, %v8296_v26  ;;  %v1468_v60 = vsub.f32 %v7507_v54, %v7973_v47  ;;  %v7046_v23 = vpack.i.bf16 %v8467_v63, %v8461_v33  ;;  %vm2197_vm2 = vweird.f32 %v8440_v19 }
 0x1f3   : > { %v7305_v13 = vpop.eup %7304  ;;  %v2457_v43 = vsel %vm2400_vm11, %v2454_v14, %v2456_v57  ;;  %7308 = vrcp.f32 %v8470_v39  ;;  %v1766_v10 = vand.u32 2147483647, %v8463_v25  ;;  %v2459_v42 = vsel %vm2400_vm11, %v2456_v57, %v2458_v11 }
 0x1f4   : > { %v2460_v26 = vrot.slane %v8478_v21, 1  ;;  %v2524_v49 = vmul.f32 %v8384_v4, %v2457_v43  ;;  %v2193_v12 = vmul.f32 %v7305_v13, %v8440_v19  ;;  %vm8496_vm3 = vcmp.eq.f32.partialorder %v2201_v41, 8.507059e+37 }
 0x1f5   : > { %v2204_v17 = vor.u32 1.1754944e-38, %v2203_v16  ;;  %v1768_v14 = vand.u32 2147483648, %v8463_v25  ;;  %7047 = vrot.lane.b32.xlu1 %v7046_v23, %s7621_s20  ;;  %vm2198_vm4 = vweird.f32 %v7305_v13  ;;  %vm1762_vm5 = vweird.f32 %v8463_v25 }
 0x1f6   : > { %v2461_v48 = vsel %vm2400_vm11, %v2458_v11, %v2460_v26  ;;  %v7041_v8 = vpack.i.bf16 %v2524_v49, %v8394_v31  ;;  %v2194_v30 = vsub.f32 1.0, %v2193_v12  ;;  %v1781_v24 = vand.u32 2147483647, %v8470_v39  ;;  %vm2199_vm9 = vmor %vm2197_vm2, %vm2198_vm4 }
 0x1f7   : > { %v7307_v55 = vpop.eup %7306  ;;  %v2526_v45 = vmul.f32 %v8347_v46, %v2461_v48  ;;  %v8510_v6 = vadd.f32 %v8003_v32, %v1535_v3  ;;  %v8513_v15 = vadd.f32 %v8003_v32, %v1536_v18  ;;  %vm8517_vm7 = vcmp.eq.f32.partialorder %v1766_v10, 8.507059e+37  ;;  %v7508_v10 = vld [vmem:[%s7784_s21 + $0x38] sm:$0xff] }
 0x1f8   : > { %7042 = vrot.lane.b32.xlu0 %v7041_v8, %s7623_s26  ;;  %v2195_v50 = vmul.f32 %v7305_v13, %v2194_v30  ;;  %v1758_v31 = vmul.f32 %v7307_v55, %v8463_v25  ;;  %vm1763_vm6 = vweird.f32 %v7307_v55  ;;  %vm1777_vm8 = vweird.f32 %v8470_v39 }
 0x1f9   : > { %v1783_v41 = vand.u32 2147483648, %v8470_v39  ;;  %v7309_v3 = vpop.eup %7308  ;;  %v7051_v22 = vpack.i.bf16 %v2526_v45, %v2459_v42  ;;  %v1603_v57 = vsub.f32 0.0, %v8510_v6  ;;  %v1604_v16 = vsub.f32 0.0, %v8513_v15  ;;  %vm1764_vm10 = vmor %vm1762_vm5, %vm1763_vm6 }
 0x1fa   : > { %v1501_v11 = vmul.f32 %v7977_v59, %v1468_v60  ;;  %v2196_v18 = vadd.f32 %v7305_v13, %v2195_v50  ;;  %v1759_v54 = vsub.f32 1.0, %v1758_v31  ;;  %v1773_v23 = vmul.f32 %v7309_v3, %v8470_v39 }
 0x1fb   : > { %vm1778_vm0 = vweird.f32 %v7309_v3  ;;  %7052 = vrot.lane.b32.xlu2 %v7051_v22, %s7623_s26  ;;  %v1639_v43 = vmul.f32 1.442695, %v1603_v57  ;;  %v1641_v49 = vmul.f32 1.442695, %v1604_v16  ;;  %v1469_v42 = vsub.f32 %v7508_v10, %v7973_v47 }
 0x1fc   : > { %v1537_v12 = vmul.f32 %v7984_v61, %v1501_v11  ;;  %v2200_v48 = vsel %vm2199_vm9, %v7305_v13, %v2196_v18  ;;  %v1760_v60 = vmul.f32 %v7307_v55, %v1759_v54  ;;  %v1774_v8 = vsub.f32 1.0, %v1773_v23  ;;  %vm1779_vm13 = vmor %vm1777_vm8, %vm1778_vm0 }
 0x1fd   : > { %v541_v30 = vadd.s32 40, %v8072_v20  ;;  %v2205_v45 = vsel %vm8496_vm3, %v2204_v17, %v2200_v48  ;;  %7310 = vpow2.f32 %v1639_v43  ;;  %v1502_v19 = vmul.f32 %v7977_v59, %v1469_v42 }
 0x1fe   : > { %v8538_v50 = vadd.f32 %v8003_v32, %v1537_v12  ;;  %v8542_v31 = vmul.f32 %v2205_v45, %v8353_v1  ;;  %v1761_v22 = vadd.f32 %v7307_v55, %v1760_v60  ;;  %v1775_v57 = vmul.f32 %v7309_v3, %v1774_v8  ;;  %v7509_v60 = vld [vmem:[%s7784_s21] sm:$0xff] }
 0x1ff   : > { %7312 = vpow2.f32 %v1641_v49  ;;  %v1769_v13 = vor.u32 1.1754944e-38, %v1768_v14  ;;  %vm8547_vm12 = vcmp.eq.f32.partialorder %v1781_v24, 8.507059e+37  ;;  %v1538_v16 = vmul.f32 %v7984_v61, %v1502_v19 }
 0x200   : > { %12135 = vst [vmem:[#allocation17_spill] sm:$0xff] %v8542_v31  ;;  %v1605_v17 = vsub.f32 0.0, %v8538_v50  ;;  %v2462_v11 = vrot.slane %v8542_v31, 1  ;;  %v7056_v1 = vpack.i.bf16 %v8542_v31, %v8478_v21  ;;  %v1765_v18 = vsel %vm1764_vm10, %v7307_v55, %v1761_v22 }
 0x201   : > { %v1776_v54 = vadd.f32 %v7309_v3, %v1775_v57  ;;  %v1770_v25 = vsel %vm8517_vm7, %v1769_v13, %v1765_v18  ;;  %v1784_v14 = vor.u32 1.1754944e-38, %v1783_v41  ;;  %v8562_v23 = vadd.f32 %v8003_v32, %v1538_v16  ;;  %v8607_v18 = vld [vmem:[%s12096_s2] ss:$0 sm:$0xff] }
 0x202   : > { %v1643_v24 = vmul.f32 1.442695, %v1605_v17  ;;  %v2496_v61 = vsel %vm2400_vm11, %v2462_v11, 0.0  ;;  %7057 = vrot.lane.b32.xlu0 %v7056_v1, %s7621_s20  ;;  %v8567_v55 = vmul.f32 %v1770_v25, %v8378_v36  ;;  %v607_v44 = vand.u32 15, %v541_v30  ;;  %v7512_v25 = vld [vmem:[%s7784_s21 + $0x40] sm:$0xff] }
 0x203   : > { %v1780_v43 = vsel %vm1779_vm13, %v7309_v3, %v1776_v54  ;;  %v7311_v49 = vpop.eup %7310  ;;  %v2528_v12 = vmul.f32 %v8387_v37, %v2496_v61  ;;  %v2463_v32 = vsel %vm2400_vm11, %v2460_v26, %v2462_v11  ;;  %v1606_v48 = vsub.f32 0.0, %v8562_v23  ;;  %v7510_v26 = vld [vmem:[%s7784_s21 + $0x8] sm:$0xff] }
 0x204   : > { %v1785_v39 = vsel %vm8547_vm12, %v1784_v14, %v1780_v43  ;;  %7314 = vpow2.f32 %v1643_v24  ;;  %v8578_v3 = vadd.f32 1.0, %v7311_v49  ;;  %v1462_v8 = vsub.f32 %v7509_v60, %v7973_v47 }
 0x205   : > { %v7313_v41 = vpop.eup %7312  ;;  %v8576_v10 = vmul.f32 %v1785_v39, %v8405_v62  ;;  %v7061_v36 = vpack.i.bf16 %v2528_v12, %v2463_v32  ;;  %vm1053_vm14 = vcmp.lt.s32.totalorder %v607_v44, 15  ;;  %v1463_v45 = vsub.f32 %v7510_v26, %v7973_v47 }
 0x206   : > { %v8580_v42 = vadd.f32 1.0, %v7313_v41  ;;  %7316 = vrcp.f32 %v8578_v3  ;;  %v1495_v62 = vmul.f32 %v7977_v59, %v1462_v8  ;;  %v1796_v22 = vand.u32 2147483647, %v8578_v3 }
 0x207   : > { %v7066_v30 = vpack.i.bf16 %v8576_v10, %v8567_v55  ;;  %7062 = vrot.lane.b32.xlu1 %v7061_v36, %s7623_s26  ;;  %v8596_v57 = vsel %vm1053_vm14, 1.0, %v12026_v29  ;;  %v1645_v13 = vmul.f32 1.442695, %v1606_v48  ;;  %v1798_v38 = vand.u32 2147483648, %v8578_v3 }
 0x208   : > { %7318 = vrcp.f32 %v8580_v42  ;;  %12138 = vst [vmem:[#allocation18_spill] sm:$0xff] %v8596_v57  ;;  %v1811_v17 = vand.u32 2147483647, %v8580_v42  ;;  %v1496_v11 = vmul.f32 %v7977_v59, %v1463_v45  ;;  %v1813_v1 = vand.u32 2147483648, %v8580_v42 }
 0x209   : > { %7067 = vrot.lane.b32.xlu2 %v7066_v30, %s7621_s20  ;;  %7320 = vpow2.f32 %v1645_v13  ;;  %v1531_v54 = vmul.f32 %v8607_v18, %v1495_v62  ;;  %v1470_v14 = vsub.f32 %v7512_v25, %v7973_v47  ;;  %v539_v61 = vadd.s32 24, %v8072_v20  ;;  %v8632_v30 = vld [vmem:[%s12002_s3] ss:$0 sm:$0xff]  ;;  %v7514_v13 = vld [vmem:[%s7784_s21 + $0x48] sm:$0xff] }
 0x20a   : > { %v7315_v19 = vpop.eup %7314  ;;  %v12023_v43 = vrot.slane %v8567_v55, 1  ;;  %v12024_v44 = vrot.slane %v8576_v10, 1  ;;  %vm1792_vm15 = vweird.f32 %v8578_v3  ;;  %vm1807_vm1 = vweird.f32 %v8580_v42 }
 0x20b   : > { %v8600_v16 = vadd.f32 1.0, %v7315_v19  ;;  %v1532_v39 = vmul.f32 %v8607_v18, %v1496_v11  ;;  %vm8620_vm2 = vcmp.eq.f32.partialorder %v1796_v22, 8.507059e+37  ;;  %v1799_v32 = vor.u32 1.1754944e-38, %v1798_v38 }
 0x20c   : > { %v7317_v24 = vpop.eup %7316  ;;  %vm8625_vm3 = vcmp.eq.f32.partialorder %v1811_v17, 8.507059e+37  ;;  %v1814_v8 = vor.u32 1.1754944e-38, %v1813_v1  ;;  %v8635_v62 = vadd.f32 %v8632_v30, %v1531_v54  ;;  %v593_v19 = vand.u32 15, %v539_v61 }
 0x20d   : > { %7322 = vrcp.f32 %v8600_v16  ;;  %v1788_v12 = vmul.f32 %v7317_v24, %v8578_v3  ;;  %v8638_v26 = vadd.f32 %v8632_v30, %v1532_v39  ;;  %v8645_v22 = vsel %vm2400_vm11, %v12023_v43, %v12024_v44 }
 0x20e   : > { %v7319_v49 = vpop.eup %7318  ;;  %v1471_v38 = vsub.f32 %v7514_v13, %v7973_v47  ;;  %vm1793_vm4 = vweird.f32 %v7317_v24  ;;  %v1826_v1 = vand.u32 2147483647, %v8600_v16  ;;  %v1599_v54 = vsub.f32 0.0, %v8635_v62 }
 0x20f   : > { %v1803_v36 = vmul.f32 %v7319_v49, %v8580_v42  ;;  %v1789_v60 = vsub.f32 1.0, %v1788_v12  ;;  %v7321_v17 = vpop.eup %7320  ;;  %vm1808_vm5 = vweird.f32 %v7319_v49  ;;  %v1600_v39 = vsub.f32 0.0, %v8638_v26  ;;  %vm1794_vm7 = vmor %vm1792_vm15, %vm1793_vm4 }
 0x210   : > { %v8651_v61 = vadd.f32 1.0, %v7321_v17  ;;  %vm1822_vm6 = vweird.f32 %v8600_v16  ;;  %v1631_v13 = vmul.f32 1.442695, %v1599_v54  ;;  %v1828_v43 = vand.u32 2147483648, %v8600_v16  ;;  %vm1809_vm0 = vmor %vm1807_vm1, %vm1808_vm5 }
 0x211   : > { %v1804_v45 = vsub.f32 1.0, %v1803_v36  ;;  %v1790_v11 = vmul.f32 %v7317_v24, %v1789_v60  ;;  %vm8659_vm8 = vcmp.lt.s32.totalorder %v593_v19, 15  ;;  %vm8666_vm9 = vcmp.eq.f32.partialorder %v1826_v1, 8.507059e+37 }
 0x212   : > { %7324 = vrcp.f32 %v8651_v61  ;;  %v1633_v54 = vmul.f32 1.442695, %v1600_v39  ;;  %v1829_v1 = vor.u32 1.1754944e-38, %v1828_v43  ;;  %v1841_v43 = vand.u32 2147483647, %v8651_v61 }
 0x213   : > { %v7323_v25 = vpop.eup %7322  ;;  %v1805_v12 = vmul.f32 %v7319_v49, %v1804_v45  ;;  %v1791_v36 = vadd.f32 %v7317_v24, %v1790_v11  ;;  %7326 = vpow2.f32 %v1631_v13  ;;  %v7515_v13 = vld [vmem:[%s7784_s21 + $0x50] sm:$0xff]  ;;  %v12148_v44 = vrot.slane %v8576_v10, 1 }
 0x214   : > { %v1818_v56 = vmul.f32 %v7323_v25, %v8600_v16  ;;  %vm1823_vm10 = vweird.f32 %v7323_v25  ;;  %7328 = vpow2.f32 %v1633_v54  ;;  %v1472_v41 = vsub.f32 %v7515_v13, %v7973_v47 }
 0x215   : > { %v1806_v60 = vadd.f32 %v7319_v49, %v1805_v12  ;;  %v1795_v45 = vsel %vm1794_vm7, %v7317_v24, %v1791_v36  ;;  %v1503_v12 = vmul.f32 %v7977_v59, %v1470_v14  ;;  %v8687_v14 = vsel %vm8659_vm8, 1.0, %v12026_v29  ;;  %vm1824_vm12 = vmor %vm1822_vm6, %vm1823_vm10 }
 0x216   : > { %v1819_v17 = vsub.f32 1.0, %v1818_v56  ;;  %v1800_v3 = vsel %vm8620_vm2, %v1799_v32, %v1795_v45  ;;  %12147 = vst [vmem:[#allocation19_spill] sm:$0xff] %v8687_v14  ;;  %vm1837_vm14 = vweird.f32 %v8651_v61  ;;  %vm1842_vm1 = vcmp.eq.f32.partialorder %v1841_v43, 8.507059e+37  ;;  %v7516_v43 = vld [vmem:[%s7784_s21 + $0x60] sm:$0xff] }
 0x217   : > { %v1810_v19 = vsel %vm1809_vm0, %v7319_v49, %v1806_v60  ;;  %v8676_v42 = vmul.f32 %v1800_v3, %v8510_v6  ;;  %v1504_v6 = vmul.f32 %v7977_v59, %v1471_v38  ;;  %v1539_v39 = vmul.f32 %v8607_v18, %v1503_v12 }
 0x218   : > { %v1815_v24 = vsel %vm8625_vm3, %v1814_v8, %v1810_v19  ;;  %v1820_v36 = vmul.f32 %v7323_v25, %v1819_v17  ;;  %v7325_v48 = vpop.eup %7324  ;;  %v1505_v8 = vmul.f32 %v7977_v59, %v1472_v41  ;;  %v1843_v3 = vand.u32 2147483648, %v8651_v61 }
 0x219   : > { %v8679_v56 = vmul.f32 %v1815_v24, %v8513_v15  ;;  %v2408_v32 = vrot.slane %v8676_v42, 1  ;;  %v7327_v60 = vpop.eup %7326  ;;  %v1833_v38 = vmul.f32 %v7325_v48, %v8651_v61  ;;  %v537_v12 = vadd.s32 8, %v8072_v20 }
 0x21a   : > { %v1821_v49 = vadd.f32 %v7323_v25, %v1820_v36  ;;  %v8706_v54 = vadd.f32 1.0, %v7327_v60  ;;  %v1540_v13 = vmul.f32 %v8607_v18, %v1504_v6  ;;  %v7329_v41 = vpop.eup %7328  ;;  %v1541_v11 = vmul.f32 %v8607_v18, %v1505_v8 }
 0x21b   : > { %v7076_v15 = vpack.i.bf16 %v8679_v56, %v8676_v42  ;;  %v2409_v17 = vsel %vm2400_vm11, %v12148_v44, %v2408_v32  ;;  %v2410_v24 = vrot.slane %v8679_v56, 1  ;;  %v1834_v36 = vsub.f32 1.0, %v1833_v38 }
 0x21c   : > { %v1825_v45 = vsel %vm1824_vm12, %v7323_v25, %v1821_v49  ;;  %v2500_v19 = vmul.f32 %v8687_v14, %v2409_v17  ;;  %7330 = vrcp.f32 %v8706_v54  ;;  %vm1838_vm13 = vweird.f32 %v7325_v48 }
 0x21d   : > { %7077 = vrot.lane.b32.xlu1 %v7076_v15, %s7621_s20  ;;  %v1830_v16 = vsel %vm8666_vm9, %v1829_v1, %v1825_v45  ;;  %v8718_v1 = vadd.f32 %v8632_v30, %v1539_v39  ;;  %v1835_v60 = vmul.f32 %v7325_v48, %v1834_v36  ;;  %v579_v45 = vand.u32 15, %v537_v12  ;;  %vm1839_vm15 = vmor %vm1837_vm14, %vm1838_vm13 }
 0x21e   : > { %v8710_v25 = vmul.f32 %v1830_v16, %v8538_v50  ;;  %v7071_v49 = vpack.i.bf16 %v2500_v19, %v8645_v22  ;;  %v8721_v50 = vadd.f32 1.0, %v7329_v41  ;;  %v1844_v39 = vor.u32 1.1754944e-38, %v1843_v3 }
 0x21f   : > { %v1836_v6 = vadd.f32 %v7325_v48, %v1835_v60  ;;  %v8731_v44 = vadd.f32 %v8632_v30, %v1540_v13  ;;  %v2411_v17 = vsel %vm2400_vm11, %v2408_v32, %v2410_v24  ;;  %v8735_v16 = vadd.f32 %v8632_v30, %v1541_v11 }
 0x220   : > { %v12025_v15 = vrot.slane %v8710_v25, 1  ;;  %7072 = vrot.lane.b32.xlu0 %v7071_v49, %s7623_s26  ;;  %7332 = vrcp.f32 %v8721_v50  ;;  %v1607_v19 = vsub.f32 0.0, %v8718_v1  ;;  %vm8738_vm2 = vcmp.lt.s32.totalorder %v579_v45, 15 }
 0x221   : > { %v1840_v38 = vsel %vm1839_vm15, %v7325_v48, %v1836_v6  ;;  %v1474_v3 = vsub.f32 %v7516_v43, %v7973_v47  ;;  %vm1732_vm3 = vweird.f32 %v8706_v54  ;;  %v1736_v32 = vand.u32 2147483647, %v8706_v54 }
 0x222   : > { %v2413_v22 = vsel %vm2400_vm11, %v2410_v24, %v12025_v15  ;;  %v7331_v12 = vpop.eup %7330  ;;  %v1845_v36 = vsel %vm1842_vm1, %v1844_v39, %v1840_v38  ;;  %v8748_v48 = vadd.s32 72, %v8072_v20  ;;  %v1738_v24 = vand.u32 2147483648, %v8706_v54  ;;  %v7517_v38 = vld [vmem:[%s7784_s21 + $0x68] sm:$0xff] }
 0x223   : > { %v2502_v8 = vmul.f32 %v8596_v57, %v2413_v22  ;;  %v1728_v13 = vmul.f32 %v7331_v12, %v8706_v54  ;;  %v1608_v49 = vsub.f32 0.0, %v8731_v44  ;;  %v1609_v11 = vsub.f32 0.0, %v8735_v16 }
 0x224   : > { %v1647_v60 = vmul.f32 1.442695, %v1607_v19  ;;  %v8755_v22 = vmul.f32 %v1845_v36, %v8562_v23  ;;  %vm1733_vm4 = vweird.f32 %v7331_v12  ;;  %v7518_v19 = vld [vmem:[%s7784_s21 + $0x58] sm:$0xff]  ;;  %v1739_v23 = vor.u32 1.1754944e-38, %v1738_v24 }
 0x225   : > { %v7081_v61 = vpack.i.bf16 %v2502_v8, %v2411_v17  ;;  %v1729_v6 = vsub.f32 1.0, %v1728_v13  ;;  %v1507_v8 = vmul.f32 %v7977_v59, %v1474_v3  ;;  %v1649_v17 = vmul.f32 1.442695, %v1608_v49  ;;  %vm1734_vm5 = vmor %vm1732_vm3, %vm1733_vm4 }
 0x226   : > { %v7333_v45 = vpop.eup %7332  ;;  %7334 = vpow2.f32 %v1647_v60  ;;  %v1651_v15 = vmul.f32 1.442695, %v1609_v11  ;;  %v1473_v35 = vsub.f32 %v7518_v19, %v7973_v47  ;;  %v1753_v13 = vand.u32 2147483648, %v8721_v50 }
 0x227   : > { %7082 = vrot.lane.b32.xlu2 %v7081_v61, %s7623_s26  ;;  %v1743_v39 = vmul.f32 %v7333_v45, %v8721_v50  ;;  %v1475_v61 = vsub.f32 %v7517_v38, %v7973_v47  ;;  %v1730_v43 = vmul.f32 %v7331_v12, %v1729_v6  ;;  %v1543_v29 = vmul.f32 %v8607_v18, %v1507_v8 }
 0x228   : > { %7336 = vpow2.f32 %v1649_v17  ;;  %v1506_v49 = vmul.f32 %v7977_v59, %v1473_v35  ;;  %v7096_v6 = vpack.i.bf16 %v8755_v22, %v8710_v25  ;;  %vm1748_vm6 = vweird.f32 %v7333_v45 }
 0x229   : > { %v1744_v36 = vsub.f32 1.0, %v1743_v39  ;;  %v1731_v3 = vadd.f32 %v7331_v12, %v1730_v43  ;;  %7338 = vpow2.f32 %v1651_v15  ;;  %v1508_v60 = vmul.f32 %v7977_v59, %v1475_v61 }
 0x22a   : > { %v1751_v24 = vand.u32 2147483647, %v8721_v50  ;;  %vm1737_vm7 = vcmp.eq.f32.partialorder %v1736_v32, 8.507059e+37  ;;  %v12151_v39 = vmov 0.0   ;;  %v8779_v35 = vadd.f32 %v8632_v30, %v1543_v29 }
 0x22b   : > { %v1745_v11 = vmul.f32 %v7333_v45, %v1744_v36  ;;  %v1735_v8 = vsel %vm1734_vm5, %v7331_v12, %v1731_v3  ;;  %v8776_v15 = vsel %vm8738_vm2, 1.0, %v12151_v39  ;;  %vm1747_vm8 = vweird.f32 %v8721_v50  ;;  %v7519_v36 = vld [vmem:[%s7784_s21 + $0x70] sm:$0xff] }
 0x22c   : > { %12152 = vst [vmem:[#allocation20_spill] sm:$0xff] %v8776_v15  ;;  %v7335_v17 = vpop.eup %7334  ;;  %v1740_v54 = vsel %vm1737_vm7, %v1739_v23, %v1735_v8  ;;  %vm1749_vm0 = vmor %vm1747_vm8, %vm1748_vm6  ;;  %v1754_v12 = vor.u32 1.1754944e-38, %v1753_v13  ;;  %v1544_v41 = vmul.f32 %v8607_v18, %v1508_v60  ;;  %v1542_v29 = vmul.f32 %v8607_v18, %v1506_v49 }
 0x22d   : > { %v1746_v38 = vadd.f32 %v7333_v45, %v1745_v11  ;;  %v8784_v32 = vadd.f32 1.0, %v7335_v17  ;;  %vm1752_vm9 = vcmp.eq.f32.partialorder %v1751_v24, 8.507059e+37  ;;  %v8789_v23 = vmul.f32 %v1740_v54, %v8635_v62  ;;  %v7521_v24 = vld [vmem:[%s7784_s21 + $0x80] sm:$0xff] }
 0x22e   : > { %v7337_v43 = vpop.eup %7336  ;;  %v1476_v50 = vsub.f32 %v7519_v36, %v7973_v47  ;;  %v1611_v60 = vsub.f32 0.0, %v8779_v35  ;;  %v1478_v8 = vsub.f32 %v7521_v24, %v7973_v47  ;;  %v8808_v17 = vadd.f32 %v8632_v30, %v1544_v41 }
 0x22f   : > { %7097 = vrot.lane.b32.xlu2 %v7096_v6, %s7621_s20  ;;  %v1750_v19 = vsel %vm1749_vm0, %v7333_v45, %v1746_v38  ;;  %v7339_v3 = vpop.eup %7338  ;;  %v8793_v13 = vadd.f32 1.0, %v7337_v43  ;;  %7340 = vrcp.f32 %v8784_v32  ;;  %v7520_v45 = vld [vmem:[%s7784_s21 + $0x78] sm:$0xff]  ;;  %v8811_v54 = vadd.f32 %v8632_v30, %v1542_v29 }
 0x230   : > { %v1755_v6 = vsel %vm1752_vm9, %v1754_v12, %v1750_v19  ;;  %v8800_v11 = vadd.f32 1.0, %v7339_v3  ;;  %v1477_v62 = vsub.f32 %v7520_v45, %v7973_v47  ;;  %v1509_v38 = vmul.f32 %v7977_v59, %v1476_v50 }
 0x231   : > { %v8798_v49 = vmul.f32 %v1755_v6, %v8638_v26  ;;  %7342 = vrcp.f32 %v8793_v13  ;;  %v2401_v12 = vrot.slane %v8789_v23, 1  ;;  %v1856_v19 = vand.u32 2147483647, %v8784_v32 }
 0x232   : > { %v1858_v36 = vand.u32 2147483648, %v8784_v32  ;;  %7344 = vrcp.f32 %v8800_v11  ;;  %v1655_v41 = vmul.f32 1.442695, %v1611_v60  ;;  %v1510_v3 = vmul.f32 %v7977_v59, %v1477_v62 }
 0x233   : > { %v7086_v26 = vpack.i.bf16 %v8798_v49, %v8789_v23  ;;  %v2402_v43 = vrot.slane %v8798_v49, 1  ;;  %v12153_v29 = vrot.slane %v8567_v55, 1  ;;  %v1871_v6 = vand.u32 2147483647, %v8793_v13 }
 0x234   : > { %v543_v45 = vadd.s32 56, %v8072_v20  ;;  %vm1852_vm10 = vweird.f32 %v8784_v32  ;;  %v1612_v60 = vsub.f32 0.0, %v8808_v17  ;;  %v1610_v62 = vsub.f32 0.0, %v8811_v54 }
 0x235   : > { %7087 = vrot.lane.b32.xlu0 %v7086_v26, %s7621_s20  ;;  %v2405_v50 = vsel %vm2400_vm11, %v2402_v43, %v12153_v29  ;;  %v7341_v61 = vpop.eup %7340  ;;  %v2403_v26 = vsel %vm2400_vm11, %v2401_v12, %v2402_v43  ;;  %vm8835_vm12 = vcmp.eq.f32.partialorder %v1856_v19, 8.507059e+37  ;;  %vm1867_vm13 = vweird.f32 %v8793_v13 }
 0x236   : > { %v2498_v34 = vmul.f32 %v8776_v15, %v2405_v50  ;;  %v1848_v46 = vmul.f32 %v7341_v61, %v8784_v32  ;;  %v1859_v37 = vor.u32 1.1754944e-38, %v1858_v36  ;;  %v1873_v50 = vand.u32 2147483648, %v8793_v13 }
 0x237   : > { %v7343_v24 = vpop.eup %7342  ;;  %7346 = vpow2.f32 %v1655_v41  ;;  %vm8842_vm14 = vcmp.eq.f32.partialorder %v1871_v6, 8.507059e+37  ;;  %v1886_v12 = vand.u32 2147483647, %v8800_v11  ;;  %vm1882_vm15 = vweird.f32 %v8800_v11 }
 0x238   : > { %v7091_v4 = vpack.i.bf16 %v2498_v34, %v2403_v26  ;;  %v1849_v58 = vsub.f32 1.0, %v1848_v46  ;;  %v1863_v57 = vmul.f32 %v7343_v24, %v8793_v13  ;;  %v7345_v43 = vpop.eup %7344  ;;  %v621_v19 = vand.u32 15, %v543_v45 }
 0x239   : > { %v1657_v34 = vmul.f32 1.442695, %v1612_v60  ;;  %v1653_v36 = vmul.f32 1.442695, %v1610_v62  ;;  %v12158_v26 = vand.u32 15, %v8748_v48  ;;  %vm1853_vm2 = vweird.f32 %v7341_v61 }
 0x23a   : > { %7092 = vrot.lane.b32.xlu1 %v7091_v4, %s7623_s26  ;;  %v1850_v41 = vmul.f32 %v7341_v61, %v1849_v58  ;;  %v1864_v6 = vsub.f32 1.0, %v1863_v57  ;;  %v1878_v14 = vmul.f32 %v7345_v43, %v8800_v11  ;;  %vm1868_vm3 = vweird.f32 %v7343_v24  ;;  %vm1854_vm4 = vmor %vm1852_vm10, %vm1853_vm2 }
 0x23b   : > { %vm8851_vm1 = vcmp.lt.s32.totalorder %v12158_v26, 15  ;;  %v1874_v15 = vor.u32 1.1754944e-38, %v1873_v50  ;;  %v1888_v4 = vand.u32 2147483648, %v8800_v11  ;;  %7348 = vpow2.f32 %v1657_v34  ;;  %vm1869_vm7 = vmor %vm1867_vm13, %vm1868_vm3 }
 0x23c   : > { %v1851_v31 = vadd.f32 %v7341_v61, %v1850_v41  ;;  %v1865_v45 = vmul.f32 %v7343_v24, %v1864_v6  ;;  %v1879_v60 = vsub.f32 1.0, %v1878_v14  ;;  %7350 = vpow2.f32 %v1653_v36 }
 0x23d   : > { %v7347_v62 = vpop.eup %7346  ;;  %vm1883_vm5 = vweird.f32 %v7345_v43  ;;  %vm8859_vm6 = vcmp.lt.s32.totalorder %v621_v19, 15  ;;  %v1511_v57 = vmul.f32 %v7977_v59, %v1478_v8  ;;  %v1545_v48 = vmul.f32 %v8607_v18, %v1509_v38 }
 0x23e   : > { %v1855_v50 = vsel %vm1854_vm4, %v7341_v61, %v1851_v31  ;;  %v1866_v26 = vadd.f32 %v7343_v24, %v1865_v45  ;;  %v1880_v34 = vmul.f32 %v7345_v43, %v1879_v60  ;;  %v8865_v41 = vadd.f32 1.0, %v7347_v62  ;;  %vm1884_vm0 = vmor %vm1882_vm15, %vm1883_vm5 }
 0x23f   : > { %v1860_v14 = vsel %vm8835_vm12, %v1859_v37, %v1855_v50  ;;  %vm8872_vm8 = vcmp.eq.f32.partialorder %v1886_v12, 8.507059e+37  ;;  %v1889_v19 = vor.u32 1.1754944e-38, %v1888_v4  ;;  %v1546_v8 = vmul.f32 %v8607_v18, %v1510_v3 }
 0x240   : > { %v1870_v38 = vsel %vm1869_vm7, %v7343_v24, %v1866_v26  ;;  %v1881_v31 = vadd.f32 %v7345_v43, %v1880_v34  ;;  %v8878_v61 = vmul.f32 %v1860_v14, %v8718_v1  ;;  %7352 = vrcp.f32 %v8865_v41 }
 0x241   : > { %v7349_v29 = vpop.eup %7348  ;;  %v1875_v37 = vsel %vm8842_vm14, %v1874_v15, %v1870_v38  ;;  %v8889_v13 = vsel %vm8859_vm6, 1.0, %v12151_v39  ;;  %v1547_v3 = vmul.f32 %v8607_v18, %v1511_v57  ;;  %v8893_v1 = vadd.f32 %v8632_v30, %v1545_v48 }
 0x242   : > { %12165 = vst [vmem:[#allocation21_spill] sm:$0xff] %v8889_v13  ;;  %v7351_v24 = vpop.eup %7350  ;;  %v1885_v12 = vsel %vm1884_vm0, %v7345_v43, %v1881_v31  ;;  %v8896_v36 = vmul.f32 %v1875_v37, %v8731_v44  ;;  %v2416_v7 = vrot.slane %v8878_v61, 1  ;;  %v8899_v15 = vadd.f32 1.0, %v7349_v29 }
 0x243   : > { %v1890_v11 = vsel %vm8872_vm8, %v1889_v19, %v1885_v12  ;;  %v8903_v6 = vadd.f32 1.0, %v7351_v24  ;;  %v8906_v4 = vadd.f32 %v8632_v30, %v1546_v8  ;;  %v12166_v44 = vrot.slane %v8755_v22, 1 }
 0x244   : > { %v8909_v45 = vmul.f32 %v1890_v11, %v8735_v16  ;;  %v2418_v43 = vrot.slane %v8896_v36, 1  ;;  %v7106_v62 = vpack.i.bf16 %v8896_v36, %v8878_v61  ;;  %v8920_v58 = vsel %vm8851_vm1, 1.0, %v12151_v39 }
 0x245   : > { %v2417_v60 = vsel %vm2400_vm11, %v12166_v44, %v2416_v7  ;;  %12167 = vst [vmem:[#allocation22_spill] sm:$0xff] %v8920_v58  ;;  %v12168_v57 = vmov %v12166_v44  ;;  %v12169_v48 = vrot.slane %v8710_v25, 1  ;;  %7354 = vrcp.f32 %v8899_v15 }
 0x246   : > { %v2504_v50 = vmul.f32 %v8889_v13, %v2417_v60  ;;  %v7353_v26 = vpop.eup %7352  ;;  %v2420_v34 = vrot.slane %v8909_v45, 1  ;;  %7107 = vrot.lane.b32.xlu1 %v7106_v62, %s7621_s20  ;;  %7356 = vrcp.f32 %v8903_v6  ;;  %v8933_v46 = vadd.f32 %v8632_v30, %v1547_v3 }
 0x247   : > { %v2415_v16 = vsel %vm2400_vm11, %v12169_v48, %v12168_v57  ;;  %v1613_v14 = vsub.f32 0.0, %v8893_v1  ;;  %v1908_v19 = vmul.f32 %v7353_v26, %v8865_v41  ;;  %v1614_v8 = vsub.f32 0.0, %v8906_v4 }
 0x248   : > { %v7101_v32 = vpack.i.bf16 %v2504_v50, %v2415_v16  ;;  %v2421_v38 = vsel %vm2400_vm11, %v2418_v43, %v2420_v34  ;;  %v1916_v31 = vand.u32 2147483647, %v8865_v41  ;;  %v1918_v3 = vand.u32 2147483648, %v8865_v41 }
 0x249   : > { %v2506_v29 = vmul.f32 %v8920_v58, %v2421_v38  ;;  %v1909_v37 = vsub.f32 1.0, %v1908_v19  ;;  %v2419_v24 = vsel %vm2400_vm11, %v2416_v7, %v2418_v43  ;;  %v547_v12 = vadd.s32 88, %v8072_v20 }
 0x24a   : > { %7102 = vrot.lane.b32.xlu0 %v7101_v32, %s7623_s26  ;;  %v1615_v11 = vsub.f32 0.0, %v8933_v46  ;;  %v1659_v44 = vmul.f32 1.442695, %v1613_v14  ;;  %vm1913_vm9 = vweird.f32 %v7353_v26  ;;  %v1661_v48 = vmul.f32 1.442695, %v1614_v8 }
 0x24b   : > { %v7355_v60 = vpop.eup %7354  ;;  %v7111_v62 = vpack.i.bf16 %v2506_v29, %v2419_v24  ;;  %v1910_v57 = vmul.f32 %v7353_v26, %v1909_v37  ;;  %vm1912_vm10 = vweird.f32 %v8865_v41  ;;  %vm8949_vm12 = vcmp.eq.f32.partialorder %v1916_v31, 8.507059e+37 }
 0x24c   : > { %v7357_v16 = vpop.eup %7356  ;;  %v1923_v32 = vmul.f32 %v7355_v60, %v8899_v15  ;;  %7358 = vpow2.f32 %v1659_v44  ;;  %v1919_v43 = vor.u32 1.1754944e-38, %v1918_v3  ;;  %vm1914_vm13 = vmor %vm1912_vm10, %vm1913_vm9  ;;  %v1931_v8 = vand.u32 2147483647, %v8899_v15 }
 0x24d   : > { %7112 = vrot.lane.b32.xlu2 %v7111_v62, %s7623_s26  ;;  %v1911_v7 = vadd.f32 %v7353_v26, %v1910_v57  ;;  %v1893_v14 = vmul.f32 %v7357_v16, %v8903_v6  ;;  %7360 = vpow2.f32 %v1661_v48  ;;  %v1933_v41 = vand.u32 2147483648, %v8899_v15 }
 0x24e   : > { %v1924_v19 = vsub.f32 1.0, %v1923_v32  ;;  %v1663_v38 = vmul.f32 1.442695, %v1615_v11  ;;  %v1901_v37 = vand.u32 2147483647, %v8903_v6  ;;  %v1903_v24 = vand.u32 2147483648, %v8903_v6 }
 0x24f   : > { %v1915_v31 = vsel %vm1914_vm13, %v7353_v26, %v1911_v7  ;;  %v1894_v29 = vsub.f32 1.0, %v1893_v14  ;;  %vm1928_vm14 = vweird.f32 %v7355_v60  ;;  %vm1927_vm15 = vweird.f32 %v8899_v15  ;;  %v7522_v14 = vld [vmem:[%s7784_s21 + $0x88] sm:$0xff] }
 0x250   : > { %v1920_v44 = vsel %vm8949_vm12, %v1919_v43, %v1915_v31  ;;  %v1925_v3 = vmul.f32 %v7355_v60, %v1924_v19  ;;  %7362 = vpow2.f32 %v1663_v38  ;;  %vm1898_vm1 = vweird.f32 %v7357_v16  ;;  %vm1929_vm4 = vmor %vm1927_vm15, %vm1928_vm14 }
 0x251   : > { %v1895_v62 = vmul.f32 %v7357_v16, %v1894_v29  ;;  %v649_v57 = vand.u32 15, %v547_v12  ;;  %vm1932_vm2 = vcmp.eq.f32.partialorder %v1931_v8, 8.507059e+37  ;;  %v1934_v26 = vor.u32 1.1754944e-38, %v1933_v41 }
 0x252   : > { %v7359_v48 = vpop.eup %7358  ;;  %v1926_v11 = vadd.f32 %v7355_v60, %v1925_v3  ;;  %vm1897_vm3 = vweird.f32 %v8903_v6  ;;  %v8965_v50 = vmul.f32 %v1920_v44, %v8779_v35  ;;  %v1479_v15 = vsub.f32 %v7522_v14, %v7973_v47 }
 0x253   : > { %v7361_v32 = vpop.eup %7360  ;;  %v1896_v7 = vadd.f32 %v7357_v16, %v1895_v62  ;;  %v8967_v43 = vadd.f32 1.0, %v7359_v48  ;;  %vm1899_vm5 = vmor %vm1897_vm3, %vm1898_vm1  ;;  %vm1902_vm6 = vcmp.eq.f32.partialorder %v1901_v37, 8.507059e+37  ;;  %v1904_v12 = vor.u32 1.1754944e-38, %v1903_v24 }
 0x254   : > { %v1930_v19 = vsel %vm1929_vm4, %v7355_v60, %v1926_v11  ;;  %v8972_v8 = vadd.f32 1.0, %v7361_v32  ;;  %v1512_v35 = vmul.f32 %v7977_v59, %v1479_v15  ;;  %vm1059_vm7 = vcmp.lt.s32.totalorder %v649_v57, 15 }
 0x255   : > { %v1935_v41 = vsel %vm1932_vm2, %v1934_v26, %v1930_v19  ;;  %v1900_v6 = vsel %vm1899_vm5, %v7357_v16, %v1896_v7  ;;  %7364 = vrcp.f32 %v8967_v43  ;;  %v549_v47 = vadd.s32 104, %v8072_v20 }
 0x256   : > { %v7363_v38 = vpop.eup %7362  ;;  %v8977_v31 = vmul.f32 %v1935_v41, %v8808_v17  ;;  %v1905_v29 = vsel %vm1902_vm6, %v1904_v12, %v1900_v6  ;;  %v2424_v37 = vrot.slane %v8965_v50, 1  ;;  %7366 = vrcp.f32 %v8972_v8 }
 0x257   : > { %v8981_v60 = vmul.f32 %v1905_v29, %v8811_v54  ;;  %v8984_v24 = vadd.f32 1.0, %v7363_v38  ;;  %v8992_v16 = vsel %vm1059_vm7, 1.0, %v12151_v39  ;;  %v1548_v54 = vmul.f32 %v8607_v18, %v1512_v35 }
 0x258   : > { %v7126_v59 = vpack.i.bf16 %v8977_v31, %v8965_v50  ;;  %12172 = vst [vmem:[#allocation23_spill] sm:$0xff] %v8992_v16  ;;  %v8998_v3 = vadd.s32 120, %v8072_v20  ;;  %v663_v48 = vand.u32 15, %v549_v47  ;;  %v2315_v11 = vrot.slane %v8154_v27, 7  ;;  %v6890_v47 = vld [vmem:[%s12005_s6 + $0x50] sm:$0xff] }
 0x259   : > { %v7116_v17 = vpack.i.bf16 %v8981_v60, %v8909_v45  ;;  %v2422_v44 = vrot.slane %v8981_v60, 1  ;;  %7368 = vrcp.f32 %v8984_v24  ;;  %v2313_v14 = vrot.slane %v8181_v0, 7 }
 0x25a   : > { %7127 = vrot.lane.b32.xlu2 %v7126_v59, %s7621_s20  ;;  %v9014_v19 = vadd.f32 %v8632_v30, %v1548_v54  ;;  %v677_v41 = vand.u32 15, %v8998_v3  ;;  %v1946_v38 = vand.u32 2147483647, %v8967_v43  ;;  %v1948_v29 = vand.u32 2147483648, %v8967_v43 }
 0x25b   : > { %v7365_v62 = vpop.eup %7364  ;;  %7117 = vrot.lane.b32.xlu0 %v7116_v17, %s7621_s20  ;;  %v2425_v57 = vsel %vm2400_vm11, %v2422_v44, %v2424_v37  ;;  %v2423_v15 = vsel %vm2400_vm11, %v2420_v34, %v2422_v44  ;;  %vm9020_vm8 = vcmp.lt.s32.totalorder %v663_v48, 15  ;;  %vm1942_vm0 = vweird.f32 %v8967_v43 }
 0x25c   : > { %v2508_v26 = vmul.f32 %v8992_v16, %v2425_v57  ;;  %v1938_v18 = vmul.f32 %v7365_v62, %v8967_v43  ;;  %v7367_v32 = vpop.eup %7366  ;;  %v1616_v59 = vsub.f32 0.0, %v9014_v19  ;;  %vm1943_vm9 = vweird.f32 %v7365_v62 }
 0x25d   : > { %v1953_v35 = vmul.f32 %v7367_v32, %v8972_v8  ;;  %vm1957_vm10 = vweird.f32 %v8972_v8  ;;  %v1963_v44 = vand.u32 2147483648, %v8972_v8  ;;  %vm1958_vm12 = vweird.f32 %v7367_v32  ;;  %vm1944_vm13 = vmor %vm1942_vm0, %vm1943_vm9 }
 0x25e   : > { %v7121_v12 = vpack.i.bf16 %v2508_v26, %v2423_v15  ;;  %v1939_v6 = vsub.f32 1.0, %v1938_v18  ;;  %v1665_v3 = vmul.f32 1.442695, %v1616_v59  ;;  %v1961_v26 = vand.u32 2147483647, %v8972_v8  ;;  %vm1959_vm15 = vmor %vm1957_vm10, %vm1958_vm12  ;;  %v6891_v8 = vld [vmem:[%s12005_s6 + $0x58] sm:$0xff] }
 0x25f   : > { %v7369_v34 = vpop.eup %7368  ;;  %v1954_v17 = vsub.f32 1.0, %v1953_v35  ;;  %vm1947_vm14 = vcmp.eq.f32.partialorder %v1946_v38, 8.507059e+37  ;;  %v1949_v18 = vor.u32 1.1754944e-38, %v1948_v29  ;;  %v1978_v35 = vand.u32 2147483648, %v8984_v24  ;;  %6937 = vmatpush.bf16.msra.mxu2 %v6891_v8  ;;  %3042 = vmatpush.bf16.msrb.mxu0 %v6891_v8  ;;  %v6888_v8 = vld [vmem:[%s12005_s6 + $0x40] sm:$0xff] }
 0x260   : > { %7122 = vrot.lane.b32.xlu1 %v7121_v12, %s7623_s26  ;;  %v1940_v30 = vmul.f32 %v7365_v62, %v1939_v6  ;;  %v1968_v54 = vmul.f32 %v7369_v34, %v8984_v24  ;;  %7370 = vpow2.f32 %v1665_v3  ;;  %v1976_v6 = vand.u32 2147483647, %v8984_v24 }
 0x261   : > { %v1955_v48 = vmul.f32 %v7367_v32, %v1954_v17  ;;  %v1964_v59 = vor.u32 1.1754944e-38, %v1963_v44  ;;  %vm1973_vm1 = vweird.f32 %v7369_v34  ;;  %vm1962_vm2 = vcmp.eq.f32.partialorder %v1961_v26, 8.507059e+37 }
 0x262   : > { %v1941_v57 = vadd.f32 %v7365_v62, %v1940_v30  ;;  %v1969_v15 = vsub.f32 1.0, %v1968_v54  ;;  %v2426_v29 = vrot.slane %v8977_v31, 1  ;;  %vm1972_vm3 = vweird.f32 %v8984_v24 }
 0x263   : > { %v1956_v12 = vadd.f32 %v7367_v32, %v1955_v48  ;;  %v9043_v3 = vsel %vm9020_vm8, 1.0, %v12151_v39  ;;  %vm1974_vm4 = vmor %vm1972_vm3, %vm1973_vm1  ;;  %vm2271_vm5 = vcmask 1040384   ;;  %vm1977_vm6 = vcmp.eq.f32.partialorder %v1976_v6, 8.507059e+37  ;;  %6938 = vmatpush.bf16.msra.mxu2 %v6890_v47  ;;  %3043 = vmatpush.bf16.msrb.mxu0 %v6890_v47 }
 0x264   : > { %v1945_v43 = vsel %vm1944_vm13, %v7365_v62, %v1941_v57  ;;  %v1970_v30 = vmul.f32 %v7369_v34, %v1969_v15  ;;  %12175 = vst [vmem:[#allocation24_spill] sm:$0xff] %v9043_v3  ;;  %v9057_v24 = vsel %vm2271_vm5, %v2313_v14, %v2315_v11  ;;  %vm1063_vm7 = vcmp.lt.s32.totalorder %v677_v41, 15 }
 0x265   : > { %v1950_v7 = vsel %vm1947_vm14, %v1949_v18, %v1945_v43  ;;  %v1960_v17 = vsel %vm1959_vm15, %v7367_v32, %v1956_v12  ;;  %v1979_v32 = vor.u32 1.1754944e-38, %v1978_v35  ;;  %v2427_v12 = vsel %vm2400_vm11, %v2424_v37, %v2426_v29  ;;  %v6889_v37 = vld [vmem:[%s12005_s6 + $0x48] sm:$0xff] }
 0x266   : > { %v9036_v38 = vmul.f32 %v1950_v7, %v8893_v1  ;;  %v1965_v62 = vsel %vm1962_vm2, %v1964_v59, %v1960_v17  ;;  %v1971_v54 = vadd.f32 %v7369_v34, %v1970_v30  ;;  %v7371_v44 = vpop.eup %7370  ;;  %v12176_v41 = vrot.slane %v8157_v9, 7  ;;  %v6885_v17 = vld [vmem:[%s12005_s6 + $0x28] sm:$0xff] }
 0x267   : > { %v9049_v1 = vmul.f32 %v1965_v62, %v8906_v4  ;;  %v1712_v43 = vadd.f32 1.0, %v7371_v44  ;;  %v2309_v62 = vrot.slane %v8204_v40, 7  ;;  %6939 = vmatpush.bf16.msra.mxu2 %v6889_v37  ;;  %3044 = vmatpush.bf16.msrb.mxu0 %v6889_v37  ;;  %v6884_v44 = vld [vmem:[%s12005_s6 + $0x20] sm:$0xff]  ;;  %v2307_v47 = vrot.slane %v8197_v28, 7  ;;  %v9109_v40 = vpop.permute.xlu1 %7007 }
 0x268   : > { %v2428_v7 = vrot.slane %v9036_v38, 1  ;;  %v1975_v57 = vsel %vm1974_vm4, %v7369_v34, %v1971_v54  ;;  %v9079_v6 = vsel %vm2271_vm5, %v2315_v11, %v12176_v41  ;;  %v9092_v11 = vpop.permute.xlu0 %6997  ;;  %3170 = vmatpush.bf16.msrb.mxu1 %v6885_v17  ;;  %vm2785_vm14 = vcmask 523264  }
 0x269   : > { %v1980_v4 = vsel %vm1977_vm6, %v1979_v32, %v1975_v57  ;;  %v7136_v34 = vpack.i.bf16 %v9049_v1, %v9036_v38  ;;  %v2430_v18 = vrot.slane %v9049_v1, 1  ;;  %7372 = vrcp.f32 %v1712_v43 }
 0x26a   : > { %v2429_v48 = vsel %vm2400_vm11, %v2426_v29, %v2428_v7  ;;  %v9066_v26 = vmul.f32 %v1980_v4, %v8933_v46  ;;  %v9082_v46 = vsel %vm1063_vm7, 1.0, %v12151_v39  ;;  %v2311_v29 = vrot.slane %v8177_v53, 7 }
 0x26b   : > { %v2510_v15 = vmul.f32 %v9043_v3, %v2429_v48  ;;  %7137 = vrot.lane.b32.xlu1 %v7136_v34, %s7621_s20  ;;  %12177 = vst [vmem:[#allocation25_spill] sm:$0xff] %v9082_v46  ;;  %v2431_v54 = vsel %vm2400_vm11, %v2428_v7, %v2430_v18  ;;  %v553_v53 = vadd.s32 136, %v8072_v20  ;;  %6940 = vmatpush.bf16.msra.mxu2 %v6888_v8  ;;  %v6887_v34 = vld [vmem:[%s12005_s6 + $0x38] sm:$0xff]  ;;  %v1991_v0 = vand.u32 2147483647, %v1712_v43 }
 0x26c   : > { %v2432_v35 = vrot.slane %v9066_v26, 1  ;;  %v9113_v4 = vsel %vm2271_vm5, %v2309_v62, %v2311_v29  ;;  %v9118_v48 = vsel %vm2271_vm5, %v2311_v29, %v2313_v14  ;;  %3045 = vmatpush.bf16.msrb.mxu0 %v6888_v8  ;;  %3171 = vmatpush.bf16.msrb.mxu1 %v6884_v44  ;;  %vm1987_vm0 = vweird.f32 %v1712_v43  ;;  %v6897_v29 = vld [vmem:[%s12005_s6 + $0x88] sm:$0xff] }
 0x26d   : > { %v7131_v59 = vpack.i.bf16 %v2510_v15, %v2427_v12  ;;  %v554_v15 = vadd.s32 144, %v8072_v20  ;;  %v1993_v12 = vand.u32 2147483648, %v1712_v43  ;;  %v691_v41 = vand.u32 15, %v553_v53 }
 0x26e   : > { %v2433_v27 = vsel %vm2400_vm11, %v2430_v18, %v2432_v35  ;;  %v7000_v8 = vunpack.i.h.bf16 %v9092_v11  ;;  %vm1992_vm12 = vcmp.eq.f32.partialorder %v1991_v0, 8.507059e+37  ;;  %vm12180_vm15 = vcmask 261120  }
 0x26f   : > { %7132 = vrot.lane.b32.xlu0 %v7131_v59, %s7623_s26  ;;  %v2512_v30 = vmul.f32 %v9082_v46, %v2433_v27  ;;  %v7373_v57 = vpop.eup %7372  ;;  %v2310_v59 = vsel %vm2271_vm5, %v2307_v47, %v2309_v62  ;;  %v698_v27 = vand.u32 15, %v554_v15  ;;  %6941 = vmatpush.bf16.msra.mxu2 %v6887_v34  ;;  %v6883_v62 = vld [vmem:[%s12005_s6 + $0x18] sm:$0xff]  ;;  %vm1065_vm10 = vcmp.lt.s32.totalorder %v691_v41, 15  ;;  %vm12182_vm1 = vmmov %vm12180_vm15 }
 0x270   : > { %v1983_v7 = vmul.f32 %v7373_v57, %v1712_v43  ;;  %vm1988_vm8 = vweird.f32 %v7373_v57  ;;  %v7003_v14 = vpop.permute.xlu0 %7002  ;;  %3046 = vmatpush.bf16.msrb.mxu0 %v6887_v34  ;;  %3172 = vmatpush.bf16.msrb.mxu1 %v6883_v62  ;;  %v6882_v43 = vld [vmem:[%s12005_s6 + $0x10] sm:$0xff]  ;;  %vm2991_vm3 = vcmask 785408   ;;  %vm12184_vm4 = vmmov %vm12182_vm1 }
 0x271   : > { %v7141_v32 = vpack.i.bf16 %v2512_v30, %v2431_v54  ;;  %v6886_v30 = vld [vmem:[%s12005_s6 + $0x30] sm:$0xff]  ;;  %vm1989_vm9 = vmor %vm1987_vm0, %vm1988_vm8  ;;  %v1994_v54 = vor.u32 1.1754944e-38, %v1993_v12  ;;  %vm970_vm13 = vcmp.gt.s32.totalorder %v698_v27, 0  ;;  %v7005_v44 = vunpack.i.h.bf16 %v7003_v14 }
 0x272   : > { %v1984_v18 = vsub.f32 1.0, %v1983_v7  ;;  %v7013_v7 = vpop.permute.xlu1 %7012  ;;  %v9146_v15 = vsel %vm970_vm13, 1.0, %v12151_v39  ;;  %v2772_v12 = vsel %vm12180_vm15, %v2310_v59, %v7000_v8  ;;  %v6999_v27 = vunpack.i.l.bf16 %v9092_v11  ;;  %vm12185_vm6 = vmmov %vm12182_vm1 }
 0x273   : > { %7142 = vrot.lane.b32.xlu2 %v7141_v32, %s7623_s26  ;;  %6942 = vmatpush.bf16.msra.mxu2 %v6886_v30  ;;  %12179 = vst [vmem:[#allocation27_spill] sm:$0xff] %v9146_v15  ;;  %v2805_v0 = vsel %vm2785_vm14, %v2772_v12, %v7005_v44  ;;  %v7004_v62 = vunpack.i.l.bf16 %v7003_v14  ;;  %v6881_v12 = vld [vmem:[%s12005_s6 + $0x8] sm:$0xff]  ;;  %vm12187_vm0 = vmmov %vm12182_vm1 }
 0x274   : > { %v1985_v37 = vmul.f32 %v7373_v57, %v1984_v18  ;;  %3047 = vmatpush.bf16.msrb.mxu0 %v6886_v30  ;;  %v556_v18 = vadd.s32 160, %v8072_v20  ;;  %3173 = vmatpush.bf16.msrb.mxu1 %v6882_v43  ;;  %v12181_v30 = vrot.slane %v8197_v28, 1  ;;  %vm12193_vm13 = vmmov %vm12187_vm0 }
 0x275   : > { %vm12195_vm15 = vmmov %vm12187_vm0 }
 0x276   : > { %v1986_v17 = vadd.f32 %v7373_v57, %v1985_v37 }
 0x277   : > { %3308 = vmatpush.bf16.msrb.mxu2 %v6897_v29  ;;  %v712_v29 = vand.u32 15, %v556_v18 }
 0x278   : > { %v1990_v32 = vsel %vm1989_vm9, %v7373_v57, %v1986_v17  ;;  %v9143_v57 = vsel %vm1065_vm10, 1.0, %v12151_v39  ;;  %v9172_v18 = vpop.permute.xlu0 %7027  ;;  %3174 = vmatpush.bf16.msrb.mxu1 %v6881_v12  ;;  %vm12188_vm9 = vmmov %vm12187_vm0 }
 0x279   : > { %v1995_v53 = vsel %vm1992_vm12, %v1994_v54, %v1990_v32  ;;  %12178 = vst [vmem:[#allocation26_spill] sm:$0xff] %v9143_v57  ;;  %v2837_v32 = vpack.c.bf16 %v2805_v0, %v2805_v0  ;;  %vm972_vm2 = vcmp.gt.s32.totalorder %v712_v29, 0  ;;  %v7009_v0 = vunpack.i.l.bf16 %v9109_v40  ;;  %vm12192_vm12 = vmmov %vm12187_vm0 }
 0x27a   : > { %v9139_v34 = vmul.f32 %v1995_v53, %v9014_v19  ;;  %v9170_v14 = vpop.permute.xlu1 %7032  ;;  %v7029_v3 = vunpack.i.l.bf16 %v9172_v18 }
 0x27c   : > { %v2305_v41 = vrot.slane %v9139_v34, 7  ;;  %v7146_v37 = vpack.i.bf16 %v9139_v34, %v9066_v26  ;;  %v2434_v19 = vrot.slane %v9139_v34, 1 }
 0x27e   : > { %7147 = vrot.lane.b32.xlu0 %v7146_v37, %s7621_s20  ;;  %v2437_v17 = vsel %vm2400_vm11, %v2434_v19, %v12181_v30  ;;  %v2308_v59 = vsel %vm2271_vm5, %v2305_v41, %v2307_v47  ;;  %v2435_v11 = vsel %vm2400_vm11, %v2432_v35, %v2434_v19  ;;  %v2899_v47 = vunpack.c.l.b16 %v2837_v32  ;;  %v6896_v35 = vld [vmem:[%s12005_s6 + $0x80] sm:$0xff] }
 0x27f   : > { %v2514_v54 = vmul.f32 %v9143_v57, %v2437_v17  ;;  %v2386_v8 = vmul.f32 %v9146_v15, %v2308_v59  ;;  %v9181_v37 = vsel %vm972_vm2, 1.0, %v12151_v39  ;;  %3309 = vmatpush.bf16.msrb.mxu2 %v6896_v35  ;;  %v7010_v30 = vunpack.i.h.bf16 %v9109_v40 }
 0x280   : > { %12183 = vst [vmem:[#allocation28_spill] sm:$0xff] %v9181_v37  ;;  %v7014_v17 = vunpack.i.l.bf16 %v7013_v7  ;;  %v2388_v59 = vmul.f32 %v9181_v37, %v9113_v4  ;;  %v558_v35 = vadd.s32 176, %v8072_v20 }
 0x281   : > { %v7151_v44 = vpack.i.bf16 %v2514_v54, %v2435_v11  ;;  %v2771_v28 = vsel %vm12182_vm1, %v2386_v8, %v6999_v27  ;;  %v6880_v27 = vld [vmem:[%s12005_s6] sm:$0xff]  ;;  %v2774_v8 = vsel %vm12185_vm6, %v9118_v48, %v7010_v30  ;;  %v7018_v11 = vpop.permute.xlu2 %7017  ;;  %v12041_v30 = vrot.slane %v8977_v31, 7  ;;  %vm12196_vm1 = vmmov %vm12187_vm0 }
 0x282   : > { %v2804_v43 = vsel %vm2785_vm14, %v2771_v28, %v7004_v62  ;;  %v7015_v62 = vunpack.i.h.bf16 %v7013_v7  ;;  %v2773_v54 = vsel %vm12184_vm4, %v2388_v59, %v7009_v0  ;;  %3175 = vmatpush.bf16.msrb.mxu1 %v6880_v27  ;;  %v9201_v28 = vpop.permute.xlu0 %7042  ;;  %v12039_v0 = vmov 0   ;;  %vm12198_vm4 = vmmov %vm12187_vm0 }
 0x283   : > { %7152 = vrot.lane.b32.xlu1 %v7151_v44, %s7623_s26  ;;  %v2836_v53 = vpack.c.bf16 %v2804_v43, %v2804_v43  ;;  %v2806_v32 = vsel %vm2785_vm14, %v2773_v54, %v7014_v17  ;;  %v9199_v44 = vpop.permute.xlu1 %7047  ;;  %v726_v27 = vand.u32 15, %v558_v35  ;;  %v2299_v17 = vrot.slane %v9036_v38, 7  ;;  %vm12199_vm6 = vmmov %vm12187_vm0 }
 0x284   : > { %v2807_v40 = vsel %vm2785_vm14, %v2774_v8, %v7015_v62  ;;  %v2838_v4 = vpack.c.bf16 %v2806_v32, %v2806_v32  ;;  %v2301_v59 = vrot.slane %v9049_v1, 7  ;;  %v2303_v62 = vrot.slane %v9066_v26, 7 }
 0x285   : > { %v2898_v19 = vunpack.c.l.b16 %v2836_v53  ;;  %v2839_v7 = vpack.c.bf16 %v2807_v40, %v2807_v40  ;;  %3176 = vmatmul.bf16.vlgmr.msrb.gmra.mxu1 %v12039_v0  ;;  %vm974_vm7 = vcmp.gt.s32.totalorder %v726_v27, 0  ;;  %v560_v54 = vadd.s32 192, %v8072_v20 }
 0x286   : > { %v2900_v43 = vunpack.c.l.b16 %v2838_v4  ;;  %v9221_v8 = vsel %vm2271_vm5, %v12041_v30, %v2299_v17  ;;  %v9226_v40 = vsel %vm2271_vm5, %v2299_v17, %v2301_v59  ;;  %v9229_v4 = vsel %vm2271_vm5, %v2301_v59, %v2303_v62 }
 0x287   : > { %v9188_v29 = vpack.c.b16 %v2899_v47, %v2898_v19  ;;  %v2901_v53 = vunpack.c.l.b16 %v2839_v7  ;;  %v572_v26 = vand.u32 15, %v8072_v20  ;;  %v9239_v7 = vsel %vm2271_vm5, %v2303_v62, %v2305_v41 }
 0x288   : > { %v7019_v35 = vunpack.i.l.bf16 %v7018_v11  ;;  %v740_v27 = vand.u32 15, %v560_v54  ;;  %v2272_v0 = vrot.slane %v8789_v23, 7  ;;  %v2319_v41 = vrot.slane %v8240_v52, 7 }
 0x289   : > { %6511 = vmatmul.msk.bf16.vlgmr.msra.gmra.mxu2 %vm2991_vm3, %v9188_v29  ;;  %v9203_v47 = vpack.c.b16 %v2901_v53, %v2900_v43  ;;  %v7023_v12 = vpop.permute.xlu2 %7022  ;;  %v9242_v43 = vsel %vm974_vm7, 1.0, %v12151_v39  ;;  %v7020_v53 = vunpack.i.h.bf16 %v7018_v11  ;;  %vm952_vm8 = vcmp.gt.s32.totalorder %v572_v26, 0 }
 0x28a   : > { %v9208_v48 = vpop.permute.xlu0 %7057  ;;  %12186 = vst [vmem:[#allocation29_spill] sm:$0xff] %v9242_v43  ;;  %v7025_v17 = vunpack.i.h.bf16 %v7023_v12  ;;  %v7024_v59 = vunpack.i.l.bf16 %v7023_v12  ;;  %v2390_v30 = vmul.f32 %v9242_v43, %v9057_v24  ;;  %vm976_vm10 = vcmp.gt.s32.totalorder %v740_v27, 0 }
 0x28b   : > { %v9206_v19 = vpop.permute.xlu1 %7062  ;;  %v2776_v34 = vsel %vm12188_vm9, %v9079_v6, %v7020_v53  ;;  %v9254_v12 = vsel %vm952_vm8, 1.0, %v12151_v39  ;;  %v2367_v23 = vsel %vm2271_vm5, 0.0, %v2272_v0  ;;  %v2273_v24 = vrot.slane %v8798_v49, 7  ;;  %vm12202_vm9 = vmmov %vm12196_vm1 }
 0x28c   : > { %v2775_v37 = vsel %vm12187_vm0, %v2390_v30, %v7019_v35  ;;  %v2809_v11 = vsel %vm2785_vm14, %v2776_v34, %v7025_v17  ;;  %12189 = vst [vmem:[#allocation30_spill] sm:$0xff] %v9254_v12  ;;  %v538_v6 = vadd.s32 16, %v8072_v20  ;;  %v9263_v26 = vsel %vm976_vm10, 1.0, %v12151_v39  ;;  %v6895_v34 = vld [vmem:[%s12005_s6 + $0x78] sm:$0xff]  ;;  %vm12203_vm10 = vmmov %vm12196_vm1 }
 0x28d   : > { %v2808_v62 = vsel %vm2785_vm14, %v2775_v37, %v7024_v59  ;;  %12190 = vst [vmem:[#allocation31_spill] sm:$0xff] %v9263_v26  ;;  %v7030_v52 = vunpack.i.h.bf16 %v9172_v18  ;;  %v12191_v37 = vrot.slane %v8157_v9, 7  ;;  %v2368_v27 = vmul.f32 %v9254_v12, %v2367_v23  ;;  %3310 = vmatpush.bf16.msrb.mxu2 %v6895_v34 }
 0x28e   : > { %v2840_v49 = vpack.c.bf16 %v2808_v62, %v2808_v62  ;;  %v2841_v59 = vpack.c.bf16 %v2809_v11, %v2809_v11  ;;  %v2274_v9 = vsel %vm2271_vm5, %v2272_v0, %v2273_v24  ;;  %v586_v58 = vand.u32 15, %v538_v6 }
 0x28f   : > { %v2320_v53 = vsel %vm2271_vm5, %v12191_v37, %v2319_v41  ;;  %v7035_v23 = vunpack.i.h.bf16 %v9170_v14  ;;  %v7034_v18 = vunpack.i.l.bf16 %v9170_v14  ;;  %v12194_v0 = vrot.slane %v8412_v2, 7 }
 0x290   : > { %v2902_v16 = vunpack.c.l.b16 %v2840_v49  ;;  %v2903_v37 = vunpack.c.l.b16 %v2841_v59  ;;  %v2392_v13 = vmul.f32 %v9263_v26, %v2320_v53  ;;  %vm954_vm2 = vcmp.gt.s32.totalorder %v586_v58, 0 }
 0x291   : > { %v9223_v32 = vpop.permute.xlu2 %7037  ;;  %v2322_v6 = vsel %vm2271_vm5, %v2319_v41, %v12194_v0  ;;  %v2277_v34 = vrot.slane %v8576_v10, 7 }
 0x292   : > { %v9233_v1 = vpop.permute.xlu0 %7072  ;;  %v9281_v15 = vpack.c.b16 %v2903_v37, %v2902_v16  ;;  %v2275_v16 = vrot.slane %v8567_v55, 7 }
 0x293   : > { %v9231_v38 = vpop.permute.xlu1 %7077  ;;  %v7075_v37 = vunpack.i.h.bf16 %v9233_v1 }
 0x294   : > { %v2278_v10 = vsel %vm2271_vm5, %v2275_v16, %v2277_v34 }
 0x299   : > { %6512 = vmatmul.msk.bf16.gmra.mxu2 %vm2991_vm3, %v9203_v47  ;;  %v9259_v30 = vpop.permute.xlu2 %7052 }
 0x2a1   : > { %v7068_v41 = vpop.permute.xlu2 %7067 }
 0x2a2   : > { %v7070_v58 = vunpack.i.h.bf16 %v7068_v41 }
 0x2a7   : > { %v7088_v35 = vpop.permute.xlu0 %7087 }
 0x2a8   : > { %v7090_v54 = vunpack.i.h.bf16 %v7088_v35  ;;  %v7089_v43 = vunpack.i.l.bf16 %v7088_v35 }
 0x2a9   : > { %6513 = vmatmul.msk.bf16.gmra.mxu2 %vm2991_vm3, %v9281_v15 }
 0x2aa   : > { %v2753_v62 = vsel %vm12192_vm12, %v2368_v27, %v7089_v43  ;;  %v2754_v11 = vsel %vm12193_vm13, %v2274_v9, %v7090_v54  ;;  %v2778_v43 = vsel %vm12195_vm15, %v2322_v6, %v7030_v52  ;;  %v2777_v54 = vsel %vm12196_vm1, %v2392_v13, %v7029_v3  ;;  %vm12206_vm13 = vmmov %vm12196_vm1 }
 0x2ab   : > { %v2810_v14 = vsel %vm2785_vm14, %v2777_v54, %v7034_v18  ;;  %v2811_v27 = vsel %vm2785_vm14, %v2778_v43, %v7035_v23  ;;  %v9298_v13 = vsel %vm954_vm2, 1.0, %v12151_v39  ;;  %v2276_v3 = vsel %vm2271_vm5, %v2273_v24, %v2275_v16  ;;  %vm12207_vm15 = vmmov %vm12196_vm1 }
 0x2ac   : > { %v7093_v17 = vpop.permute.xlu1 %7092  ;;  %12197 = vst [vmem:[#allocation32_spill] sm:$0xff] %v9298_v13  ;;  %v2842_v52 = vpack.c.bf16 %v2810_v14, %v2810_v14  ;;  %v2843_v55 = vpack.c.bf16 %v2811_v27, %v2811_v27  ;;  %v7069_v9 = vunpack.i.l.bf16 %v7068_v41  ;;  %v7074_v23 = vunpack.i.l.bf16 %v9233_v1  ;;  %v6894_v1 = vld [vmem:[%s12005_s6 + $0x70] sm:$0xff]  ;;  %vm12211_vm2 = vmmov %vm12198_vm4 }
 0x2ad   : > { %v7095_v57 = vunpack.i.h.bf16 %v7093_v17  ;;  %v7094_v46 = vunpack.i.l.bf16 %v7093_v17  ;;  %v2756_v18 = vsel %vm12199_vm6, %v2278_v10, %v7070_v58  ;;  %v562_v6 = vadd.s32 208, %v8072_v20  ;;  %3311 = vmatpush.bf16.msrb.mxu2 %v6894_v1  ;;  %vm12213_vm6 = vmmov %vm12211_vm2 }
 0x2ae   : > { %v2789_v0 = vsel %vm2785_vm14, %v2756_v18, %v7075_v37  ;;  %v564_v16 = vadd.s32 224, %v8072_v20  ;;  %v540_v14 = vadd.s32 32, %v8072_v20  ;;  %v2323_v27 = vrot.slane %v8323_v51, 7 }
 0x2af   : > { %v2786_v35 = vsel %vm2785_vm14, %v2753_v62, %v7094_v46  ;;  %v2787_v17 = vsel %vm2785_vm14, %v2754_v11, %v7095_v57  ;;  %v2370_v62 = vmul.f32 %v9298_v13, %v2276_v3  ;;  %v2904_v11 = vunpack.c.l.b16 %v2842_v52 }
 0x2b0   : > { %v2818_v49 = vpack.c.bf16 %v2786_v35, %v2786_v35  ;;  %v2819_v59 = vpack.c.bf16 %v2787_v17, %v2787_v17  ;;  %v2905_v35 = vunpack.c.l.b16 %v2843_v55  ;;  %v2821_v43 = vpack.c.bf16 %v2789_v0, %v2789_v0 }
 0x2b1   : > { %v2755_v17 = vsel %vm12198_vm4, %v2370_v62, %v7069_v9  ;;  %v768_v41 = vand.u32 15, %v564_v16  ;;  %v600_v3 = vand.u32 15, %v540_v14  ;;  %v12201_v55 = vrot.slane %v8412_v2, 7  ;;  %vm12212_vm4 = vmmov %vm12211_vm2 }
 0x2b2   : > { %v2880_v46 = vunpack.c.l.b16 %v2818_v49  ;;  %v2881_v53 = vunpack.c.l.b16 %v2819_v59  ;;  %v2788_v24 = vsel %vm2785_vm14, %v2755_v17, %v7074_v23  ;;  %v9310_v49 = vpack.c.b16 %v2905_v35, %v2904_v11 }
 0x2b3   : > { %v2820_v59 = vpack.c.bf16 %v2788_v24, %v2788_v24  ;;  %v2324_v58 = vsel %vm2271_vm5, %v12201_v55, %v2323_v27  ;;  %v2325_v9 = vrot.slane %v8334_v5, 7  ;;  %v7040_v51 = vunpack.i.h.bf16 %v9223_v32  ;;  %v7083_v24 = vpop.permute.xlu2 %7082 }
 0x2b4   : > { %v2910_v57 = vpack.c.b16 %v2881_v53, %v2880_v46  ;;  %v2883_v46 = vunpack.c.l.b16 %v2821_v43  ;;  %v754_v53 = vand.u32 15, %v562_v6  ;;  %v7039_v37 = vunpack.i.l.bf16 %v9223_v32 }
 0x2b5   : > { %v2882_v54 = vunpack.c.l.b16 %v2820_v59  ;;  %v2327_v23 = vrot.slane %v8461_v33, 7  ;;  %vm980_vm8 = vcmp.gt.s32.totalorder %v768_v41, 0  ;;  %v566_v62 = vadd.s32 240, %v8072_v20 }
 0x2b6   : > { %6502 = vmatmul.msk.bf16.vlgmr.msrb.gmra.mxu0 %vm2991_vm3, %v2910_v57  ;;  %6542 = vmatmul.msk.bf16.gmra.mxu1 %vm2991_vm3, %v2910_v57  ;;  %vm978_vm7 = vcmp.gt.s32.totalorder %v754_v53, 0  ;;  %v2279_v10 = vrot.slane %v8676_v42, 7  ;;  %vm956_vm0 = vcmp.gt.s32.totalorder %v600_v3, 0  ;;  %v2281_v2 = vrot.slane %v8679_v56, 7 }
 0x2b7   : > { %v9318_v57 = vpack.c.b16 %v2883_v46, %v2882_v54  ;;  %v9327_v52 = vsel %vm978_vm7, 1.0, %v12151_v39  ;;  %v2326_v35 = vsel %vm2271_vm5, %v2323_v27, %v2325_v9  ;;  %v9344_v32 = vsel %vm980_vm8, 1.0, %v12151_v39  ;;  %vm12214_vm7 = vmmov %vm12211_vm2 }
 0x2b8   : > { %12200 = vst [vmem:[#allocation33_spill] sm:$0xff] %v9327_v52  ;;  %v2394_v11 = vmul.f32 %v9327_v52, %v2324_v58  ;;  %v2780_v5 = vsel %vm12202_vm9, %v2326_v35, %v7040_v51  ;;  %v2328_v18 = vsel %vm2271_vm5, %v2325_v9, %v2327_v23  ;;  %v7045_v42 = vunpack.i.h.bf16 %v9201_v28  ;;  %vm12215_vm8 = vmmov %vm12211_vm2 }
 0x2b9   : > { %6514 = vmatmul.msk.bf16.gmra.mxu2 %vm2991_vm3, %v9310_v49  ;;  %12204 = vst [vmem:[#allocation34_spill] sm:$0xff] %v9344_v32  ;;  %v782_v0 = vand.u32 15, %v566_v62  ;;  %v9351_v6 = vsel %vm956_vm0, 1.0, %v12151_v39  ;;  %v2280_v56 = vsel %vm2271_vm5, %v2277_v34, %v2279_v10  ;;  %v7044_v1 = vunpack.i.l.bf16 %v9201_v28  ;;  %v12208_v62 = vld [vmem:[#allocation17_spill] sm:$0xff]  ;;  %vm12216_vm0 = vmmov %vm12211_vm2 }
 0x2ba   : > { %v2779_v17 = vsel %vm12203_vm10, %v2394_v11, %v7039_v37  ;;  %12205 = vst [vmem:[#allocation35_spill] sm:$0xff] %v9351_v6  ;;  %v542_v59 = vadd.s32 48, %v8072_v20  ;;  %v7080_v43 = vunpack.i.h.bf16 %v9231_v38  ;;  %v7079_v54 = vunpack.i.l.bf16 %v9231_v38  ;;  %vm12218_vm10 = vmmov %vm12216_vm0 }
 0x2bb   : > { %v7055_v46 = vunpack.i.h.bf16 %v9259_v30  ;;  %v7054_v53 = vunpack.i.l.bf16 %v9259_v30  ;;  %v2329_v16 = vrot.slane %v8467_v63, 7  ;;  %v7050_v14 = vunpack.i.h.bf16 %v9199_v44 }
 0x2bc   : > { %v2396_v27 = vmul.f32 %v9344_v32, %v2328_v18  ;;  %v7049_v34 = vunpack.i.l.bf16 %v9199_v44  ;;  %v2331_v28 = vrot.slane %v8478_v21, 7  ;;  %v2372_v41 = vmul.f32 %v9351_v6, %v2280_v56 }
 0x2bd   : > { %v2813_v3 = vsel %vm2785_vm14, %v2780_v5, %v7045_v42  ;;  %v2283_v38 = vrot.slane %v8710_v25, 7  ;;  %vm982_vm12 = vcmp.gt.s32.totalorder %v782_v0, 0  ;;  %v2282_v55 = vsel %vm2271_vm5, %v2279_v10, %v2281_v2 }
 0x2be   : > { %v2812_v58 = vsel %vm2785_vm14, %v2779_v17, %v7044_v1  ;;  %v614_v63 = vand.u32 15, %v542_v59  ;;  %v2757_v9 = vsel %vm12206_vm13, %v2372_v41, %v7079_v54  ;;  %v2758_v51 = vsel %vm12207_vm15, %v2282_v55, %v7080_v43  ;;  %v7098_v43 = vpop.permute.xlu2 %7097 }
 0x2bf   : > { %v7085_v37 = vunpack.i.h.bf16 %v7083_v24  ;;  %v7084_v44 = vunpack.i.l.bf16 %v7083_v24  ;;  %v2285_v21 = vrot.slane %v8755_v22, 7  ;;  %v2333_v11 = vrot.slane %v12208_v62, 7  ;;  %v6893_v24 = vld [vmem:[%s12005_s6 + $0x68] sm:$0xff] }
 0x2c0   : > { %v9375_v35 = vsel %vm982_vm12, 1.0, %v12151_v39  ;;  %v2332_v25 = vsel %vm2271_vm5, %v2329_v16, %v2331_v28  ;;  %v7060_v10 = vunpack.i.h.bf16 %v9208_v48  ;;  %v7059_v5 = vunpack.i.l.bf16 %v9208_v48  ;;  %3312 = vmatpush.bf16.msrb.mxu2 %v6893_v24  ;;  %vm12219_vm12 = vmmov %vm12216_vm0 }
 0x2c1   : > { %12209 = vst [vmem:[#allocation17_spill] sm:$0xff] %v9375_v35  ;;  %v2844_v17 = vpack.c.bf16 %v2812_v58, %v2812_v58  ;;  %v2845_v18 = vpack.c.bf16 %v2813_v3, %v2813_v3  ;;  %v2790_v42 = vsel %vm2785_vm14, %v2757_v9, %v7084_v44  ;;  %v2791_v0 = vsel %vm2785_vm14, %v2758_v51, %v7085_v37  ;;  %v7103_v9 = vpop.permute.xlu0 %7102 }
 0x2c2   : > { %vm958_vm1 = vcmp.gt.s32.totalorder %v614_v63, 0  ;;  %v7065_v56 = vunpack.i.h.bf16 %v9206_v19  ;;  %v2822_v1 = vpack.c.bf16 %v2790_v42, %v2790_v42  ;;  %v2823_v59 = vpack.c.bf16 %v2791_v0, %v2791_v0 }
 0x2c3   : > { %v7064_v54 = vunpack.i.l.bf16 %v9206_v19  ;;  %v2398_v48 = vmul.f32 %v9375_v35, %v2332_v25  ;;  %v2906_v41 = vunpack.c.l.b16 %v2844_v17  ;;  %v2907_v3 = vunpack.c.l.b16 %v2845_v18  ;;  %v6892_v25 = vld [vmem:[%s12005_s6 + $0x60] sm:$0xff] }
 0x2c4   : > { %v2284_v55 = vsel %vm2271_vm5, %v2281_v2, %v2283_v38  ;;  %v2334_v58 = vsel %vm2271_vm5, %v2331_v28, %v2333_v11  ;;  %v2884_v51 = vunpack.c.l.b16 %v2822_v1  ;;  %v2885_v37 = vunpack.c.l.b16 %v2823_v59  ;;  %3313 = vmatpush.bf16.msrb.mxu2 %v6892_v25 }
 0x2c5   : > { %v9391_v63 = vsel %vm958_vm1, 1.0, %v12151_v39  ;;  %v2784_v44 = vsel %vm12211_vm2, %v2334_v58, %v7060_v10  ;;  %v2783_v62 = vsel %vm12212_vm4, %v2398_v48, %v7059_v5  ;;  %v9395_v19 = vpack.c.b16 %v2907_v3, %v2906_v41  ;;  %vm12222_vm1 = vmmov %vm12216_vm0 }
 0x2c6   : > { %6503 = vmatmul.msk.bf16.gmra.mxu0 %vm2991_vm3, %v9318_v57  ;;  %6543 = vmatmul.msk.bf16.gmra.mxu1 %vm2991_vm3, %v9318_v57  ;;  %12210 = vst [vmem:[#allocation36_spill] sm:$0xff] %v9391_v63  ;;  %v2330_v2 = vsel %vm2271_vm5, %v2327_v23, %v2329_v16  ;;  %v7100_v28 = vunpack.i.h.bf16 %v7098_v43  ;;  %v7099_v11 = vunpack.i.l.bf16 %v7098_v43  ;;  %v9403_v17 = vpack.c.b16 %v2885_v37, %v2884_v51  ;;  %vm12223_vm2 = vmmov %vm12216_vm0 }
 0x2c7   : > { %v2782_v18 = vsel %vm12213_vm6, %v2330_v2, %v7050_v14  ;;  %v2781_v10 = vsel %vm12214_vm7, %v2396_v27, %v7049_v34  ;;  %v7105_v42 = vunpack.i.h.bf16 %v7103_v9  ;;  %v7104_v5 = vunpack.i.l.bf16 %v7103_v9  ;;  %vm12225_vm4 = vmmov %vm12216_vm0 }
 0x2c8   : > { %v2374_v0 = vmul.f32 %v9391_v63, %v2284_v55  ;;  %v544_v24 = vadd.s32 64, %v8072_v20  ;;  %v2816_v33 = vsel %vm2785_vm14, %v2783_v62, %v7064_v54  ;;  %v2817_v23 = vsel %vm2785_vm14, %v2784_v44, %v7065_v56  ;;  %vm12226_vm6 = vmmov %vm12216_vm0 }
 0x2c9   : > { %6515 = vmatmul.msk.bf16.gmra.mxu2 %vm2991_vm3, %v9395_v19  ;;  %v2286_v16 = vsel %vm2271_vm5, %v2283_v38, %v2285_v21  ;;  %v2848_v14 = vpack.c.bf16 %v2816_v33, %v2816_v33  ;;  %v2849_v27 = vpack.c.bf16 %v2817_v23, %v2817_v23  ;;  %v2814_v59 = vsel %vm2785_vm14, %v2781_v10, %v7054_v53  ;;  %v7108_v53 = vpop.permute.xlu1 %7107 }
 0x2ca   : > { %v2760_v34 = vsel %vm12215_vm8, %v2286_v16, %v7100_v28  ;;  %v2759_v1 = vsel %vm12216_vm0, %v2374_v0, %v7099_v11  ;;  %v2815_v43 = vsel %vm2785_vm14, %v2782_v18, %v7055_v46  ;;  %v628_v41 = vand.u32 15, %v544_v24  ;;  %v7113_v46 = vpop.permute.xlu2 %7112  ;;  %vm12228_vm8 = vmmov %vm12216_vm0 }
 0x2cb   : > { %v2793_v56 = vsel %vm2785_vm14, %v2760_v34, %v7105_v42  ;;  %v2792_v54 = vsel %vm2785_vm14, %v2759_v1, %v7104_v5  ;;  %v2952_v38 = vunpack.c.l.b16 %v2848_v14  ;;  %v2953_v48 = vunpack.c.l.b16 %v2849_v27 }
 0x2cc   : > { %v2846_v3 = vpack.c.bf16 %v2814_v59, %v2814_v59  ;;  %v2847_v55 = vpack.c.bf16 %v2815_v43, %v2815_v43  ;;  %v2824_v9 = vpack.c.bf16 %v2792_v54, %v2792_v54  ;;  %v2825_v51 = vpack.c.bf16 %v2793_v56, %v2793_v56 }
 0x2cd   : > { %v9430_v58 = vpack.c.b16 %v2953_v48, %v2952_v38  ;;  %v2287_v37 = vrot.slane %v8878_v61, 7  ;;  %vm960_vm9 = vcmp.gt.s32.totalorder %v628_v41, 0  ;;  %v548_v2 = vadd.s32 96, %v8072_v20  ;;  %v7118_v10 = vpop.permute.xlu0 %7117 }
 0x2ce   : > { %v2908_v30 = vunpack.c.l.b16 %v2846_v3  ;;  %v2909_v44 = vunpack.c.l.b16 %v2847_v55  ;;  %v2886_v62 = vunpack.c.l.b16 %v2824_v9  ;;  %v2887_v25 = vunpack.c.l.b16 %v2825_v51 }
 0x2cf   : > { %v9435_v28 = vsel %vm960_vm9, 1.0, %v12151_v39  ;;  %v2288_v11 = vsel %vm2271_vm5, %v2285_v21, %v2287_v37  ;;  %v2289_v18 = vrot.slane %v8896_v36, 7  ;;  %v7110_v61 = vunpack.i.h.bf16 %v7108_v53 }
 0x2d0   : > { %12217 = vst [vmem:[#allocation37_spill] sm:$0xff] %v9435_v28  ;;  %v7109_v42 = vunpack.i.l.bf16 %v7108_v53  ;;  %v9441_v5 = vpack.c.b16 %v2909_v44, %v2908_v30  ;;  %v2376_v0 = vmul.f32 %v9435_v28, %v2288_v11  ;;  %v9444_v24 = vpack.c.b16 %v2887_v25, %v2886_v62 }
 0x2d1   : > { %v656_v33 = vand.u32 15, %v548_v2  ;;  %v2290_v23 = vsel %vm2271_vm5, %v2287_v37, %v2289_v18  ;;  %v546_v36 = vadd.s32 80, %v8072_v20  ;;  %v2293_v16 = vrot.slane %v8981_v60, 7 }
 0x2d2   : > { %v2762_v22 = vsel %vm12218_vm10, %v2290_v23, %v7110_v61  ;;  %v2761_v21 = vsel %vm12219_vm12, %v2376_v0, %v7109_v42  ;;  %v7115_v14 = vunpack.i.h.bf16 %v7113_v46  ;;  %v7114_v27 = vunpack.i.l.bf16 %v7113_v46  ;;  %v7128_v43 = vpop.permute.xlu2 %7127  ;;  %v7123_v11 = vpop.permute.xlu1 %7122  ;;  %vm12230_vm10 = vmmov %vm12216_vm0 }
 0x2d3   : > { %v2295_v34 = vrot.slane %v8965_v50, 7  ;;  %vm964_vm13 = vcmp.gt.s32.totalorder %v656_v33, 0  ;;  %v642_v56 = vand.u32 15, %v546_v36  ;;  %v2291_v41 = vrot.slane %v8909_v45, 7  ;;  %vm12231_vm12 = vmmov %vm12216_vm0 }
 0x2d4   : > { %v2794_v1 = vsel %vm2785_vm14, %v2761_v21, %v7114_v27  ;;  %v2795_v59 = vsel %vm2785_vm14, %v2762_v22, %v7115_v14  ;;  %v9462_v48 = vsel %vm964_vm13, 1.0, %v12151_v39  ;;  %v7130_v55 = vunpack.i.h.bf16 %v7128_v43  ;;  %vm12237_vm13 = vmmov %vm12216_vm0 }
 0x2d5   : > { %v2296_v54 = vsel %vm2271_vm5, %v2293_v16, %v2295_v34  ;;  %12220 = vst [vmem:[#allocation38_spill] sm:$0xff] %v9462_v48  ;;  %v2826_v60 = vpack.c.bf16 %v2794_v1, %v2794_v1  ;;  %v2827_v3 = vpack.c.bf16 %v2795_v59, %v2795_v59  ;;  %v7129_v9 = vunpack.i.l.bf16 %v7128_v43 }
 0x2d6   : > { %6504 = vmatmul.msk.bf16.gmra.mxu0 %vm2991_vm3, %v9403_v17  ;;  %6544 = vmatmul.msk.bf16.gmra.mxu1 %vm2991_vm3, %v9403_v17  ;;  %vm962_vm15 = vcmp.gt.s32.totalorder %v642_v56, 0  ;;  %v2380_v37 = vmul.f32 %v9462_v48, %v2296_v54  ;;  %v12221_v53 = vrot.slane %v8977_v31, 7  ;;  %v2292_v44 = vsel %vm2271_vm5, %v2289_v18, %v2291_v41 }
 0x2d7   : > { %v2888_v46 = vunpack.c.l.b16 %v2826_v60  ;;  %v2889_v62 = vunpack.c.l.b16 %v2827_v3  ;;  %v9473_v2 = vsel %vm962_vm15, 1.0, %v12151_v39  ;;  %v550_v61 = vadd.s32 112, %v8072_v20 }
 0x2d8   : > { %v2298_v30 = vsel %vm2271_vm5, %v2295_v34, %v12221_v53  ;;  %v2765_v45 = vsel %vm12223_vm2, %v2380_v37, %v7129_v9  ;;  %12224 = vst [vmem:[#allocation39_spill] sm:$0xff] %v9473_v2  ;;  %v7120_v42 = vunpack.i.h.bf16 %v7118_v10  ;;  %v7119_v0 = vunpack.i.l.bf16 %v7118_v10 }
 0x2d9   : > { %6516 = vmatmul.msk.bf16.gmra.mxu2 %vm2991_vm3, %v9441_v5  ;;  %v2766_v25 = vsel %vm12222_vm1, %v2298_v30, %v7130_v55  ;;  %v2294_v18 = vsel %vm2271_vm5, %v2291_v41, %v2293_v16  ;;  %v2378_v23 = vmul.f32 %v9473_v2, %v2292_v44  ;;  %v9480_v22 = vpack.c.b16 %v2889_v62, %v2888_v46 }
 0x2da   : > { %v7125_v21 = vunpack.i.h.bf16 %v7123_v11  ;;  %v7124_v36 = vunpack.i.l.bf16 %v7123_v11  ;;  %v2764_v34 = vsel %vm12225_vm4, %v2294_v18, %v7120_v42  ;;  %v670_v1 = vand.u32 15, %v550_v61 }
 0x2db   : > { %v2763_v10 = vsel %vm12226_vm6, %v2378_v23, %v7119_v0 }
 0x2dc   : > { %v2797_v43 = vsel %vm2785_vm14, %v2764_v34, %v7125_v21  ;;  %v2796_v56 = vsel %vm2785_vm14, %v2763_v10, %v7124_v36  ;;  %vm966_vm7 = vcmp.gt.s32.totalorder %v670_v1, 0 }
 0x2dd   : > { %v2828_v41 = vpack.c.bf16 %v2796_v56, %v2796_v56  ;;  %v2829_v60 = vpack.c.bf16 %v2797_v43, %v2797_v43  ;;  %v9495_v3 = vsel %vm966_vm7, 1.0, %v12151_v39 }
 0x2de   : > { %12227 = vst [vmem:[#allocation40_spill] sm:$0xff] %v9495_v3  ;;  %v2382_v37 = vmul.f32 %v9495_v3, %v9221_v8 }
 0x2df   : > { %v2890_v53 = vunpack.c.l.b16 %v2828_v41  ;;  %v2891_v30 = vunpack.c.l.b16 %v2829_v60 }
 0x2e1   : > { %v7133_v38 = vpop.permute.xlu0 %7132  ;;  %v2915_v11 = vpack.c.b16 %v2891_v30, %v2890_v53 }
 0x2e2   : > { %v7135_v50 = vunpack.i.h.bf16 %v7133_v38  ;;  %v7134_v51 = vunpack.i.l.bf16 %v7133_v38  ;;  %v7138_v38 = vpop.permute.xlu1 %7137 }
 0x2e3   : > { %v7140_v55 = vunpack.i.h.bf16 %v7138_v38  ;;  %v7139_v9 = vunpack.i.l.bf16 %v7138_v38 }
 0x2e4   : > { %v2799_v31 = vsel %vm2785_vm14, %v2766_v25, %v7135_v50  ;;  %v2798_v33 = vsel %vm2785_vm14, %v2765_v45, %v7134_v51  ;;  %v552_v50 = vadd.s32 128, %v8072_v20  ;;  %v7143_v51 = vpop.permute.xlu2 %7142 }
 0x2e5   : > { %v2830_v14 = vpack.c.bf16 %v2798_v33, %v2798_v33  ;;  %v2831_v27 = vpack.c.bf16 %v2799_v31, %v2799_v31  ;;  %v2768_v44 = vsel %vm12228_vm8, %v9226_v40, %v7140_v55  ;;  %v2767_v46 = vsel %vm12216_vm0, %v2382_v37, %v7139_v9 }
 0x2e6   : > { %6505 = vmatmul.msk.bf16.gmra.mxu0 %vm2991_vm3, %v9444_v24  ;;  %6545 = vmatmul.msk.bf16.gmra.mxu1 %vm2991_vm3, %v9444_v24  ;;  %v7145_v62 = vunpack.i.h.bf16 %v7143_v51  ;;  %v7144_v25 = vunpack.i.l.bf16 %v7143_v51  ;;  %v684_v45 = vand.u32 15, %v552_v50 }
 0x2e7   : > { %v2892_v16 = vunpack.c.l.b16 %v2830_v14  ;;  %v2893_v59 = vunpack.c.l.b16 %v2831_v27 }
 0x2e8   : > { %v2800_v20 = vsel %vm2785_vm14, %v2767_v46, %v7144_v25  ;;  %v2801_v61 = vsel %vm2785_vm14, %v2768_v44, %v7145_v62  ;;  %vm968_vm9 = vcmp.gt.s32.totalorder %v684_v45, 0 }
 0x2e9   : > { %6517 = vmatmul.msk.bf16.gmra.mxu2 %vm2991_vm3, %v9430_v58  ;;  %v9492_v54 = vpack.c.b16 %v2893_v59, %v2892_v16  ;;  %v2832_v8 = vpack.c.bf16 %v2800_v20, %v2800_v20  ;;  %v2833_v42 = vpack.c.bf16 %v2801_v61, %v2801_v61  ;;  %v9512_v18 = vsel %vm968_vm9, 1.0, %v12151_v39 }
 0x2ea   : > { %12229 = vst [vmem:[#allocation41_spill] sm:$0xff] %v9512_v18  ;;  %v2384_v14 = vmul.f32 %v9512_v18, %v9229_v4 }
 0x2eb   : > { %v2894_v31 = vunpack.c.l.b16 %v2832_v8  ;;  %v2895_v33 = vunpack.c.l.b16 %v2833_v42 }
 0x2f0   : > { %v7148_v40 = vpop.permute.xlu0 %7147 }
 0x2f1   : > { %v7150_v23 = vunpack.i.h.bf16 %v7148_v40  ;;  %v7149_v21 = vunpack.i.l.bf16 %v7148_v40 }
 0x2f3   : > { %v2770_v10 = vsel %vm12230_vm10, %v9239_v7, %v7150_v23  ;;  %v2769_v1 = vsel %vm12231_vm12, %v2384_v14, %v7149_v21  ;;  %v3676_v14 = vld [vmem:[%s12009_s10 + $0x38] sm:$0xff] }
 0x2f4   : > { %3688 = vmatpush.msra.mxu2 %v3676_v14  ;;  %3711 = vmatpush.msra.mxu3 %v3676_v14 }
 0x2f5   : > { %v7153_v36 = vpop.permute.xlu1 %7152 }
 0x2f6   : > { %6506 = vmatmul.msk.bf16.gmra.mxu0 %vm2991_vm3, %v9480_v22  ;;  %6546 = vmatmul.msk.bf16.gmra.mxu1 %vm2991_vm3, %v9480_v22  ;;  %v7155_v27 = vunpack.i.h.bf16 %v7153_v36  ;;  %v7154_v34 = vunpack.i.l.bf16 %v7153_v36 }
 0x2f8   : > { %v2803_v16 = vsel %vm2785_vm14, %v2770_v10, %v7155_v27  ;;  %v2802_v59 = vsel %vm2785_vm14, %v2769_v1, %v7154_v34  ;;  %v9584_v27 = vld [vmem:[%s12006_s7] ss:$0 sm:$0xff] }
 0x2f9   : > { %6593 = vmatmul.msk.bf16.vlgmr.msrb.gmra.mxu2 %vm2991_vm3, %v9318_v57  ;;  %v2917_v57 = vpack.c.b16 %v2895_v33, %v2894_v31  ;;  %v2834_v43 = vpack.c.bf16 %v2802_v59, %v2802_v59  ;;  %v2835_v56 = vpack.c.bf16 %v2803_v16, %v2803_v16  ;;  %v9591_v10 = vld [vmem:[%s533_s27] ss:$0 sm:$0xff] }
 0x2fb   : > { %v2896_v4 = vunpack.c.l.b16 %v2834_v43  ;;  %v2897_v7 = vunpack.c.l.b16 %v2835_v56 }
 0x2fd   : > { %v2918_v38 = vpack.c.b16 %v2897_v7, %v2896_v4 }
 0x302   : > { %v3177_v60 = vpop.f32.mrf.mxu1 }
 0x306   : > { %6507 = vmatmul.msk.bf16.gmra.mxu0 %vm2991_vm3, %v2915_v11  ;;  %6547 = vmatmul.msk.bf16.gmra.mxu1 %vm2991_vm3, %v2915_v11 }
 0x309   : > { %6594 = vmatmul.msk.bf16.gmra.mxu2 %vm2991_vm3, %v9403_v17 }
 0x30a   : > { %v3179_v50 = vpop.f32.mrf.mxu1 }
 0x30c   : > { %v9509_v0 = vpop.f32.mrf.mxu2 }
 0x314   : > { %v9521_v39 = vpop.f32.mrf.mxu2 }
 0x316   : > { %6508 = vmatmul.msk.bf16.gmra.mxu0 %vm2991_vm3, %v9492_v54  ;;  %6548 = vmatmul.msk.bf16.gmra.mxu1 %vm2991_vm3, %v9492_v54 }
 0x319   : > { %6595 = vmatmul.msk.bf16.gmra.mxu2 %vm2991_vm3, %v9444_v24 }
 0x31c   : > { %v9529_v41 = vpop.f32.mrf.mxu2 }
 0x324   : > { %v9535_v17 = vpop.f32.mrf.mxu2 }
 0x326   : > { %6509 = vmatmul.msk.bf16.gmra.mxu0 %vm2991_vm3, %v2917_v57  ;;  %6549 = vmatmul.msk.bf16.gmra.mxu1 %vm2991_vm3, %v2917_v57 }
 0x329   : > { %6596 = vmatmul.msk.bf16.gmra.mxu2 %vm2991_vm3, %v9480_v22 }
 0x32c   : > { %v9537_v51 = vpop.f32.mrf.mxu2 }
 0x333   : > { %v3049_v55 = vpop.f32.mrf.mxu0  ;;  %v3182_v24 = vpop.f32.mrf.mxu1 }
 0x334   : > { %v3178_v9 = vadd.f32 %v3177_v60, %v3049_v55  ;;  %v9543_v53 = vpop.f32.mrf.mxu2 }
 0x336   : > { %6510 = vmatmul.msk.bf16.gmra.mxu0 %vm2991_vm3, %v2918_v38  ;;  %6550 = vmatmul.msk.bf16.gmra.mxu1 %vm2991_vm3, %v2918_v38 }
 0x339   : > { %6597 = vmatmul.msk.bf16.gmra.mxu2 %vm2991_vm3, %v2915_v11 }
 0x33b   : > { %v3051_v37 = vpop.f32.mrf.mxu0  ;;  %v3184_v62 = vpop.f32.mrf.mxu1 }
 0x33c   : > { %v9545_v46 = vpop.f32.mrf.mxu2  ;;  %v3180_v43 = vadd.f32 %v3179_v50, %v3051_v37  ;;  %v3675_v50 = vld [vmem:[%s12009_s10 + $0x30] sm:$0xff] }
 0x33d   : > { %3689 = vmatpush.msra.mxu2 %v3675_v50  ;;  %3712 = vmatpush.msra.mxu3 %v3675_v50  ;;  %v3674_v50 = vld [vmem:[%s12009_s10 + $0x28] sm:$0xff] }
 0x33f   : > { %3690 = vmatpush.msra.mxu2 %v3674_v50  ;;  %3713 = vmatpush.msra.mxu3 %v3674_v50 }
 0x343   : > { %v3054_v30 = vpop.f32.mrf.mxu0  ;;  %v3187_v22 = vpop.f32.mrf.mxu1 }
 0x344   : > { %v3183_v44 = vadd.f32 %v3182_v24, %v3054_v30  ;;  %v9550_v45 = vpop.f32.mrf.mxu2 }
 0x346   : > { %6551 = vmatmul.msk.bf16.gmra.mxu1 %vm2991_vm3, %v9188_v29 }
 0x349   : > { %6598 = vmatmul.msk.bf16.gmra.mxu2 %vm2991_vm3, %v9492_v54 }
 0x34b   : > { %v3056_v25 = vpop.f32.mrf.mxu0  ;;  %v3189_v42 = vpop.f32.mrf.mxu1 }
 0x34c   : > { %v9556_v8 = vpop.f32.mrf.mxu2  ;;  %v3185_v30 = vadd.f32 %v3184_v62, %v3056_v25 }
 0x353   : > { %v3059_v20 = vpop.f32.mrf.mxu0  ;;  %v3192_v31 = vpop.f32.mrf.mxu1 }
 0x354   : > { %v3188_v61 = vadd.f32 %v3187_v22, %v3059_v20  ;;  %v9558_v11 = vpop.f32.mrf.mxu2 }
 0x356   : > { %6552 = vmatmul.msk.bf16.gmra.mxu1 %vm2991_vm3, %v9203_v47 }
 0x359   : > { %6599 = vmatmul.msk.bf16.gmra.mxu2 %vm2991_vm3, %v2917_v57 }
 0x35b   : > { %v3061_v40 = vpop.f32.mrf.mxu0  ;;  %v3194_v16 = vpop.f32.mrf.mxu1 }
 0x35c   : > { %v9563_v21 = vpop.f32.mrf.mxu2  ;;  %v3190_v62 = vadd.f32 %v3189_v42, %v3061_v40 }
 0x363   : > { %v3064_v33 = vpop.f32.mrf.mxu0 }
 0x364   : > { %v3193_v23 = vadd.f32 %v3192_v31, %v3064_v33  ;;  %v9565_v54 = vpop.f32.mrf.mxu2 }
 0x366   : > { %6553 = vmatmul.msk.bf16.gmra.mxu1 %vm2991_vm3, %v9281_v15 }
 0x369   : > { %6600 = vmatmul.msk.bf16.gmra.mxu2 %vm2991_vm3, %v2918_v38  ;;  %v3197_v38 = vpop.f32.mrf.mxu1 }
 0x36c   : > { %v9570_v36 = vpop.f32.mrf.mxu2 }
 0x371   : > { %v3199_v22 = vpop.f32.mrf.mxu1 }
 0x374   : > { %v9575_v57 = vpop.f32.mrf.mxu2 }
 0x376   : > { %6554 = vmatmul.msk.bf16.gmra.mxu1 %vm2991_vm3, %v9310_v49 }
 0x379   : > { %6601 = vmatmul.msk.bf16.gmra.mxu2 %vm2991_vm3, %v9188_v29 }
 0x37c   : > { %v3315_v34 = vpop.f32.mrf.mxu2 }
 0x37d   : > { %v3395_v1 = vadd.f32 %v3315_v34, %v3178_v9  ;;  %v3202_v34 = vpop.f32.mrf.mxu1 }
 0x37f   : > { %v3431_v59 = vadd.f32 %v9584_v27, %v3395_v1 }
 0x381   : > { %v9595_v29 = vadd.f32 %v9591_v10, %v3431_v59 }
 0x383   : > { %v3499_v18 = vsel %vm2785_vm14, %v9595_v29, 0.0 }
 0x384   : > { %v3317_v56 = vpop.f32.mrf.mxu2 }
 0x385   : > { %v3396_v4 = vadd.f32 %v3317_v56, %v3180_v43 }
 0x386   : > { %6555 = vmatmul.msk.bf16.gmra.mxu1 %vm2991_vm3, %v9395_v19 }
 0x387   : > { %v3432_v7 = vadd.f32 %v9584_v27, %v3396_v4 }
 0x389   : > { %v9599_v60 = vadd.f32 %v9591_v10, %v3432_v7  ;;  %6602 = vmatmul.msk.bf16.gmra.mxu2 %vm2991_vm3, %v9203_v47  ;;  %v3204_v7 = vpop.f32.mrf.mxu1 }
 0x38c   : > { %v3320_v55 = vpop.f32.mrf.mxu2 }
 0x38d   : > { %v3397_v9 = vadd.f32 %v3320_v55, %v3183_v44  ;;  %v3066_v44 = vpop.f32.mrf.mxu0 }
 0x38f   : > { %v3433_v37 = vadd.f32 %v9584_v27, %v3397_v9 }
 0x391   : > { %v9610_v24 = vadd.f32 %v9591_v10, %v3433_v37  ;;  %v3207_v37 = vpop.f32.mrf.mxu1 }
 0x393   : > { %v3502_v3 = vsel %vm2785_vm14, %v9610_v24, 0.0 }
 0x394   : > { %v3322_v20 = vpop.f32.mrf.mxu2 }
 0x395   : > { %v3398_v47 = vadd.f32 %v3322_v20, %v3185_v30  ;;  %v3069_v4 = vpop.f32.mrf.mxu0  ;;  %v3195_v20 = vadd.f32 %v3194_v16, %v3066_v44 }
 0x396   : > { %6556 = vmatmul.msk.bf16.gmra.mxu1 %vm2991_vm3, %v9441_v5 }
 0x397   : > { %v3434_v31 = vadd.f32 %v9584_v27, %v3398_v47 }
 0x399   : > { %v9614_v33 = vadd.f32 %v9591_v10, %v3434_v31  ;;  %6603 = vmatmul.msk.bf16.gmra.mxu2 %vm2991_vm3, %v9281_v15 }
 0x39b   : > { %v3504_v35 = vsel %vm2785_vm14, %v9614_v33, 0.0 }
 0x39c   : > { %v3325_v14 = vpop.f32.mrf.mxu2 }
 0x39d   : > { %v3399_v1 = vadd.f32 %v3325_v14, %v3188_v61  ;;  %v3071_v40 = vpop.f32.mrf.mxu0 }
 0x39e   : > { %v3200_v16 = vadd.f32 %v3199_v22, %v3071_v40  ;;  %v3673_v22 = vld [vmem:[%s12009_s10 + $0x20] sm:$0xff] }
 0x39f   : > { %v3435_v59 = vadd.f32 %v9584_v27, %v3399_v1  ;;  %v3198_v1 = vadd.f32 %v3197_v38, %v3069_v4  ;;  %3691 = vmatpush.msra.mxu2 %v3673_v22  ;;  %3714 = vmatpush.msra.mxu3 %v3673_v22 }
 0x3a1   : > { %v9620_v43 = vadd.f32 %v9591_v10, %v3435_v59  ;;  %v3209_v59 = vpop.f32.mrf.mxu1 }
 0x3a3   : > { %v3572_v2 = vmul.f32 %v9620_v43, %v9620_v43  ;;  %v3506_v6 = vsel %vm2785_vm14, %v9620_v43, 0.0 }
 0x3a4   : > { %v3327_v25 = vpop.f32.mrf.mxu2 }
 0x3a5   : > { %v3400_v56 = vadd.f32 %v3327_v25, %v3190_v62  ;;  %v3074_v14 = vpop.f32.mrf.mxu0 }
 0x3a7   : > { %v3436_v55 = vadd.f32 %v9584_v27, %v3400_v56 }
 0x3a9   : > { %v9624_v9 = vadd.f32 %v9591_v10, %v3436_v55  ;;  %6604 = vmatmul.msk.bf16.gmra.mxu2 %vm2991_vm3, %v9310_v49 }
 0x3ab   : > { %v3573_v26 = vmul.f32 %v9624_v9, %v9624_v9 }
 0x3ac   : > { %v3330_v15 = vpop.f32.mrf.mxu2 }
 0x3ad   : > { %v3401_v61 = vadd.f32 %v3330_v15, %v3193_v23  ;;  %v3076_v44 = vpop.f32.mrf.mxu0 }
 0x3af   : > { %v3437_v42 = vadd.f32 %v9584_v27, %v3401_v61  ;;  %v3212_v61 = vpop.f32.mrf.mxu1 }
 0x3b1   : > { %v9633_v30 = vadd.f32 %v9591_v10, %v3437_v42 }
 0x3b3   : > { %12232 = vst [vmem:[#allocation42_spill] sm:$0xff] %v9633_v30  ;;  %v3574_v13 = vmul.f32 %v9633_v30, %v9633_v30 }
 0x3b4   : > { %v3332_v47 = vpop.f32.mrf.mxu2 }
 0x3b5   : > { %v3402_v31 = vadd.f32 %v3332_v47, %v3195_v20  ;;  %v3079_v47 = vpop.f32.mrf.mxu0 }
 0x3b7   : > { %v3438_v49 = vadd.f32 %v9584_v27, %v3402_v31  ;;  %v3214_v40 = vpop.f32.mrf.mxu1 }
 0x3b9   : > { %v9637_v23 = vadd.f32 %v9591_v10, %v3438_v49  ;;  %6605 = vmatmul.msk.bf16.gmra.mxu2 %vm2991_vm3, %v9395_v19  ;;  %v3203_v19 = vadd.f32 %v3202_v34, %v3074_v14 }
 0x3bb   : > { %12233 = vst [vmem:[#allocation43_spill] sm:$0xff] %v9637_v23 }
 0x3bc   : > { %v3335_v62 = vpop.f32.mrf.mxu2 }
 0x3bd   : > { %v3403_v25 = vadd.f32 %v3335_v62, %v3198_v1  ;;  %v3205_v1 = vadd.f32 %v3204_v7, %v3076_v44  ;;  %v3081_v34 = vpop.f32.mrf.mxu0 }
 0x3be   : > { %v3210_v44 = vadd.f32 %v3209_v59, %v3081_v34 }
 0x3bf   : > { %v3439_v56 = vadd.f32 %v9584_v27, %v3403_v25  ;;  %v3217_v14 = vpop.f32.mrf.mxu1 }
 0x3c1   : > { %v9643_v55 = vadd.f32 %v9591_v10, %v3439_v56 }
 0x3c4   : > { %v3337_v15 = vpop.f32.mrf.mxu2 }
 0x3c5   : > { %v3404_v50 = vadd.f32 %v3337_v15, %v3200_v16  ;;  %v3208_v16 = vadd.f32 %v3207_v37, %v3079_v47  ;;  %v3084_v7 = vpop.f32.mrf.mxu0 }
 0x3c7   : > { %v3440_v42 = vadd.f32 %v9584_v27, %v3404_v50 }
 0x3c9   : > { %v9647_v20 = vadd.f32 %v9591_v10, %v3440_v42  ;;  %6606 = vmatmul.msk.bf16.gmra.mxu2 %vm2991_vm3, %v9441_v5 }
 0x3cc   : > { %v3340_v38 = vpop.f32.mrf.mxu2 }
 0x3cd   : > { %v3405_v4 = vadd.f32 %v3340_v38, %v3203_v19  ;;  %v3219_v38 = vpop.f32.mrf.mxu1  ;;  %v3086_v37 = vpop.f32.mrf.mxu0 }
 0x3cf   : > { %v3441_v31 = vadd.f32 %v9584_v27, %v3405_v4 }
 0x3d1   : > { %v9656_v49 = vadd.f32 %v9591_v10, %v3441_v31 }
 0x3d3   : > { %v3578_v12 = vmul.f32 %v9656_v49, %v9656_v49 }
 0x3d4   : > { %v3342_v62 = vpop.f32.mrf.mxu2 }
 0x3d5   : > { %v3406_v25 = vadd.f32 %v3342_v62, %v3205_v1  ;;  %v12235_v62 = vmov 0  }
 0x3d7   : > { %v3442_v5 = vadd.f32 %v9584_v27, %v3406_v25  ;;  %v3222_v25 = vpop.f32.mrf.mxu1 }
 0x3d9   : > { %v9660_v56 = vadd.f32 %v9591_v10, %v3442_v5  ;;  %6607 = vmatmul.msk.bf16.gmra.mxu2 %vm2991_vm3, %v9430_v58  ;;  %v3213_v58 = vadd.f32 %v3212_v61, %v3084_v7  ;;  %vm12236_vm3 = vmmov %vm12216_vm0 }
 0x3db   : > { %12234 = vst [vmem:[#allocation44_spill] sm:$0xff] %v9660_v56 }
 0x3dc   : > { %v3345_v15 = vpop.f32.mrf.mxu2 }
 0x3dd   : > { %v3407_v50 = vadd.f32 %v3345_v15, %v3208_v16  ;;  %v3672_v16 = vld [vmem:[%s12009_s10 + $0x18] sm:$0xff]  ;;  %v3215_v15 = vadd.f32 %v3214_v40, %v3086_v37 }
 0x3de   : > { %3692 = vmatpush.msra.mxu2 %v3672_v16  ;;  %3715 = vmatpush.msra.mxu3 %v3672_v16 }
 0x3df   : > { %v3443_v42 = vadd.f32 %v9584_v27, %v3407_v50  ;;  %v3224_v61 = vpop.f32.mrf.mxu1 }
 0x3e1   : > { %v9666_v19 = vadd.f32 %v9591_v10, %v3443_v42 }
 0x3e4   : > { %v3347_v4 = vpop.f32.mrf.mxu2 }
 0x3e5   : > { %v3408_v22 = vadd.f32 %v3347_v4, %v3210_v44  ;;  %v3089_v44 = vpop.f32.mrf.mxu0 }
 0x3e7   : > { %v3444_v31 = vadd.f32 %v9584_v27, %v3408_v22  ;;  %v3218_v22 = vadd.f32 %v3217_v14, %v3089_v44  ;;  %v3227_v16 = vpop.f32.mrf.mxu1 }
 0x3e9   : > { %v9670_v1 = vadd.f32 %v9591_v10, %v3444_v31  ;;  %3389 = vmatmul.bf16.gmra.mxu2 %v12235_v62  ;;  %v3512_v62 = vsel %vm2785_vm14, %v9637_v23, 0.0 }
 0x3ec   : > { %v3350_v47 = vpop.f32.mrf.mxu2 }
 0x3ed   : > { %v3409_v5 = vadd.f32 %v3350_v47, %v3213_v58 }
 0x3ef   : > { %v3445_v59 = vadd.f32 %v9584_v27, %v3409_v5  ;;  %v3091_v5 = vpop.f32.mrf.mxu0  ;;  %v9693_v14 = vpop.f32.mrf.mxu1 }
 0x3f0   : > { %v3220_v40 = vadd.f32 %v3219_v38, %v3091_v5 }
 0x3f1   : > { %v9678_v34 = vadd.f32 %v9591_v10, %v3445_v59 }
 0x3f4   : > { %v3352_v50 = vpop.f32.mrf.mxu2 }
 0x3f5   : > { %v3410_v42 = vadd.f32 %v3352_v50, %v3215_v15 }
 0x3f7   : > { %v3446_v7 = vadd.f32 %v9584_v27, %v3410_v42 }
 0x3f9   : > { %v9682_v4 = vadd.f32 %v9591_v10, %v3446_v7  ;;  %v3223_v7 = vadd.f32 %v3222_v25, %v9509_v0 }
 0x3fc   : > { %v3355_v31 = vpop.f32.mrf.mxu2 }
 0x3fd   : > { %v3411_v58 = vadd.f32 %v3355_v31, %v3218_v22  ;;  %v3671_v31 = vld [vmem:[%s12009_s10 + $0x10] sm:$0xff] }
 0x3fe   : > { %3693 = vmatpush.msra.mxu2 %v3671_v31  ;;  %3716 = vmatpush.msra.mxu3 %v3671_v31 }
 0x3ff   : > { %v3447_v47 = vadd.f32 %v9584_v27, %v3411_v58 }
 0x401   : > { %v9686_v59 = vadd.f32 %v9591_v10, %v3447_v47  ;;  %v3225_v47 = vadd.f32 %v3224_v61, %v9521_v39 }
 0x404   : > { %v3357_v37 = vpop.f32.mrf.mxu2 }
 0x405   : > { %v3412_v15 = vadd.f32 %v3357_v37, %v3220_v40  ;;  %v9703_v40 = vpop.f32.mrf.mxu1 }
 0x407   : > { %v3448_v50 = vadd.f32 %v9584_v27, %v3412_v15  ;;  %v3228_v15 = vadd.f32 %v3227_v16, %v9529_v41 }
 0x409   : > { %v9690_v42 = vadd.f32 %v9591_v10, %v3448_v50 }
 0x40c   : > { %v3360_v44 = vpop.f32.mrf.mxu2 }
 0x40d   : > { %v3413_v22 = vadd.f32 %v3360_v44, %v3223_v7  ;;  %v9710_v44 = vpop.f32.mrf.mxu1 }
 0x40f   : > { %v3449_v58 = vadd.f32 %v9584_v27, %v3413_v22 }
 0x411   : > { %v9700_v38 = vadd.f32 %v9591_v10, %v3449_v58 }
 0x414   : > { %v3362_v5 = vpop.f32.mrf.mxu2 }
 0x415   : > { %v3414_v0 = vadd.f32 %v3362_v5, %v3225_v47  ;;  %v9718_v61 = vpop.f32.mrf.mxu1  ;;  %v3670_v47 = vld [vmem:[%s12009_s10 + $0x8] sm:$0xff]  ;;  %v3569_v5 = vmul.f32 %v9599_v60, %v9599_v60 }
 0x416   : > { %3694 = vmatpush.msra.mxu2 %v3670_v47  ;;  %3717 = vmatpush.msra.mxu3 %v3670_v47 }
 0x417   : > { %v3450_v25 = vadd.f32 %v9584_v27, %v3414_v0  ;;  %v3568_v0 = vmul.f32 %v9595_v29, %v9595_v29 }
 0x419   : > { %v9707_v37 = vadd.f32 %v9591_v10, %v3450_v25  ;;  %v3570_v25 = vmul.f32 %v9610_v24, %v9610_v24  ;;  %v3600_v32 = vsel %vm2785_vm14, %v3568_v0, 0.0 }
 0x41b   : > { %v3603_v48 = vsel %vm2785_vm14, %v3570_v25, 0.0  ;;  %v3607_v25 = vsel %vm2785_vm14, %v3572_v2, 0.0  ;;  %v3510_v2 = vsel %vm2785_vm14, %v9633_v30, 0.0 }
 0x41c   : > { %v3365_v50 = vpop.f32.mrf.mxu2 }
 0x41d   : > { %v3415_v7 = vadd.f32 %v3365_v50, %v3228_v15  ;;  %v9725_v41 = vpop.f32.mrf.mxu1  ;;  %v3500_v50 = vsel %vm2785_vm14, %v9599_v60, 0.0 }
 0x41e   : > { %v3501_v52 = vadd.f32 %v3500_v50, %v3499_v18 }
 0x41f   : > { %v3451_v22 = vadd.f32 %v9584_v27, %v3415_v7  ;;  %v3601_v7 = vsel %vm2785_vm14, %v3569_v5, 0.0 }
 0x420   : > { %v3602_v5 = vadd.f32 %v3601_v7, %v3600_v32  ;;  %v3503_v63 = vadd.f32 %v3502_v3, %v3501_v52  ;;  %v3508_v7 = vsel %vm2785_vm14, %v9624_v9, 0.0  ;;  %v3575_v52 = vmul.f32 %v9637_v23, %v9637_v23 }
 0x421   : > { %v9714_v31 = vadd.f32 %v9591_v10, %v3451_v22  ;;  %v3571_v22 = vmul.f32 %v9614_v33, %v9614_v33 }
 0x422   : > { %v3604_v0 = vadd.f32 %v3603_v48, %v3602_v5  ;;  %v3505_v18 = vadd.f32 %v3504_v35, %v3503_v63  ;;  %v3611_v5 = vsel %vm2785_vm14, %v3574_v13, 0.0  ;;  %v3576_v35 = vmul.f32 %v9643_v55, %v9643_v55 }
 0x423   : > { %v3605_v28 = vsel %vm2785_vm14, %v3571_v22, 0.0  ;;  %v3609_v22 = vsel %vm2785_vm14, %v3573_v26, 0.0  ;;  %v3613_v26 = vsel %vm2785_vm14, %v3575_v52, 0.0  ;;  %v3516_v52 = vsel %vm2785_vm14, %v9647_v20, 0.0 }
 0x424   : > { %v9716_v39 = vpop.f32.mrf.mxu2  ;;  %v3606_v32 = vadd.f32 %v3605_v28, %v3604_v0  ;;  %v3507_v48 = vadd.f32 %v3506_v6, %v3505_v18  ;;  %v3577_v6 = vmul.f32 %v9647_v20, %v9647_v20  ;;  %v3615_v13 = vsel %vm2785_vm14, %v3576_v35, 0.0  ;;  %v3669_v35 = vld [vmem:[%s12009_s10] sm:$0xff] }
 0x425   : > { %v9742_v47 = vpop.f32.mrf.mxu1  ;;  %3695 = vmatpush.msra.mxu2 %v3669_v35  ;;  %3718 = vmatpush.msra.mxu3 %v3669_v35  ;;  %v3524_v35 = vsel %vm2785_vm14, %v9670_v1, 0.0 }
 0x426   : > { %v3608_v3 = vadd.f32 %v3607_v25, %v3606_v32  ;;  %v3509_v28 = vadd.f32 %v3508_v7, %v3507_v48  ;;  %v3514_v32 = vsel %vm2785_vm14, %v9643_v55, 0.0 }
 0x428   : > { %v3610_v0 = vadd.f32 %v3609_v22, %v3608_v3  ;;  %v3511_v25 = vadd.f32 %v3510_v2, %v3509_v28  ;;  %v3617_v3 = vsel %vm2785_vm14, %v3577_v6, 0.0  ;;  %v3579_v2 = vmul.f32 %v9660_v56, %v9660_v56 }
 0x42a   : > { %v3612_v18 = vadd.f32 %v3611_v5, %v3610_v0  ;;  %v3513_v7 = vadd.f32 %v3512_v62, %v3511_v25  ;;  %v3518_v62 = vsel %vm2785_vm14, %v9656_v49, 0.0  ;;  %v3619_v0 = vsel %vm2785_vm14, %v3578_v12, 0.0 }
 0x42b   : > { %v3522_v12 = vsel %vm2785_vm14, %v9666_v19, 0.0 }
 0x42c   : > { %v9720_v58 = vpop.f32.mrf.mxu2  ;;  %v3614_v22 = vadd.f32 %v3613_v26, %v3612_v18  ;;  %v3515_v5 = vadd.f32 %v3514_v32, %v3513_v7  ;;  %v3580_v26 = vmul.f32 %v9666_v19, %v9666_v19  ;;  %v3520_v18 = vsel %vm2785_vm14, %v9660_v56, 0.0 }
 0x42d   : > { %v3244_v63 = vpop.f32.mrf.mxu1  ;;  %v3621_v32 = vsel %vm2785_vm14, %v3579_v2, 0.0  ;;  %v3233_v56 = vadd.f32 %v9703_v40, %v9537_v51 }
 0x42e   : > { %v3616_v28 = vadd.f32 %v3615_v13, %v3614_v22  ;;  %v3517_v6 = vadd.f32 %v3516_v52, %v3515_v5  ;;  %v3581_v13 = vmul.f32 %v9670_v1, %v9670_v1  ;;  %v3623_v30 = vsel %vm2785_vm14, %v3580_v26, 0.0 }
 0x42f   : > { %v3582_v52 = vmul.f32 %v9678_v34, %v9678_v34  ;;  %v3417_v40 = vadd.f32 %v9720_v58, %v3233_v56 }
 0x430   : > { %v3618_v25 = vadd.f32 %v3617_v3, %v3616_v28  ;;  %v3519_v22 = vadd.f32 %v3518_v62, %v3517_v6  ;;  %v3230_v3 = vadd.f32 %v9693_v14, %v9535_v17  ;;  %v3625_v62 = vsel %vm2785_vm14, %v3581_v13, 0.0 }
 0x431   : > { %v3235_v17 = vadd.f32 %v9710_v44, %v9543_v53  ;;  %v3627_v14 = vsel %vm2785_vm14, %v3582_v52, 0.0  ;;  %v3584_v53 = vmul.f32 %v9686_v59, %v9686_v59 }
 0x432   : > { %v3620_v23 = vadd.f32 %v3619_v0, %v3618_v25  ;;  %v3521_v5 = vadd.f32 %v3520_v18, %v3519_v22  ;;  %v3583_v0 = vmul.f32 %v9682_v4, %v9682_v4  ;;  %v3416_v26 = vadd.f32 %v9716_v39, %v3230_v3 }
 0x433   : > { %v3238_v18 = vadd.f32 %v9718_v61, %v9545_v46  ;;  %v3528_v39 = vsel %vm2785_vm14, %v9682_v4, 0.0  ;;  %v3243_v46 = vadd.f32 %v9742_v47, %v9556_v8  ;;  %v3631_v47 = vsel %vm2785_vm14, %v3584_v53, 0.0 }
 0x434   : > { %v9727_v16 = vpop.f32.mrf.mxu2  ;;  %v3622_v28 = vadd.f32 %v3621_v32, %v3620_v23  ;;  %v3523_v6 = vadd.f32 %v3522_v12, %v3521_v5  ;;  %v3526_v23 = vsel %vm2785_vm14, %v9678_v34, 0.0  ;;  %v3629_v51 = vsel %vm2785_vm14, %v3583_v0, 0.0 }
 0x435   : > { %v3247_v7 = vpop.f32.mrf.mxu1  ;;  %v3452_v61 = vadd.f32 %v9584_v27, %v3416_v26  ;;  %v3245_v12 = vadd.f32 %v3244_v63, %v9558_v11  ;;  %v3418_v3 = vadd.f32 %v9727_v16, %v3235_v17  ;;  %v3532_v11 = vsel %vm2785_vm14, %v9690_v42, 0.0 }
 0x436   : > { %v3624_v25 = vadd.f32 %v3623_v30, %v3622_v28  ;;  %v3525_v32 = vadd.f32 %v3524_v35, %v3523_v6  ;;  %v3240_v30 = vadd.f32 %v9725_v41, %v9550_v45  ;;  %v3530_v45 = vsel %vm2785_vm14, %v9686_v59, 0.0 }
 0x437   : > { %v3585_v41 = vmul.f32 %v9690_v42, %v9690_v42  ;;  %v3248_v58 = vadd.f32 %v3247_v7, %v9563_v21  ;;  %v3586_v63 = vmul.f32 %v9700_v38, %v9700_v38  ;;  %v3453_v35 = vadd.f32 %v9584_v27, %v3417_v40 }
 0x438   : > { %v3626_v13 = vadd.f32 %v3625_v62, %v3624_v25  ;;  %v3527_v44 = vadd.f32 %v3526_v23, %v3525_v32  ;;  %v9853_v0 = vadd.f32 %v9591_v10, %v3452_v61  ;;  %v3534_v7 = vsel %vm2785_vm14, %v9700_v38, 0.0 }
 0x439   : > { %v3587_v6 = vmul.f32 %v9707_v37, %v9707_v37  ;;  %v3454_v25 = vadd.f32 %v9584_v27, %v3418_v3  ;;  %v3538_v40 = vsel %vm2785_vm14, %v9714_v31, 0.0 }
 0x43a   : > { %v3628_v22 = vadd.f32 %v3627_v14, %v3626_v13  ;;  %v3529_v5 = vadd.f32 %v3528_v39, %v3527_v44  ;;  %v3635_v14 = vsel %vm2785_vm14, %v3586_v63, 0.0  ;;  %v3589_v39 = vmul.f32 %v9853_v0, %v9853_v0 }
 0x43b   : > { %v3637_v53 = vsel %vm2785_vm14, %v3587_v6, 0.0  ;;  %v9879_v44 = vadd.f32 %v9591_v10, %v3454_v25 }
 0x43c   : > { %v9735_v15 = vpop.f32.mrf.mxu2  ;;  %v3630_v56 = vadd.f32 %v3629_v51, %v3628_v22  ;;  %v3531_v62 = vadd.f32 %v3530_v45, %v3529_v5 }
 0x43d   : > { %v3249_v52 = vpop.f32.mrf.mxu1  ;;  %v3419_v28 = vadd.f32 %v9735_v15, %v3238_v18  ;;  %v3633_v15 = vsel %vm2785_vm14, %v3585_v41, 0.0  ;;  %v9869_v18 = vadd.f32 %v9591_v10, %v3453_v35  ;;  %v3591_v35 = vmul.f32 %v9879_v44, %v9879_v44 }
 0x43e   : > { %v3250_v16 = vadd.f32 %v3249_v52, %v9565_v54  ;;  %v3632_v26 = vadd.f32 %v3631_v47, %v3630_v56  ;;  %v3533_v17 = vadd.f32 %v3532_v11, %v3531_v62  ;;  %v3588_v54 = vmul.f32 %v9714_v31, %v9714_v31 }
 0x43f   : > { %v3455_v23 = vadd.f32 %v9584_v27, %v3419_v28  ;;  %v3540_v52 = vsel %vm2785_vm14, %v9853_v0, 0.0  ;;  %v3590_v3 = vmul.f32 %v9869_v18, %v9869_v18  ;;  %v3542_v63 = vsel %vm2785_vm14, %v9869_v18, 0.0 }
 0x440   : > { %v3634_v13 = vadd.f32 %v3633_v15, %v3632_v26  ;;  %v3544_v6 = vsel %vm2785_vm14, %v9879_v44, 0.0 }
 0x442   : > { %v3636_v61 = vadd.f32 %v3635_v14, %v3634_v13  ;;  %v3645_v14 = vsel %vm2785_vm14, %v3591_v35, 0.0 }
 0x444   : > { %v9762_v50 = vpop.f32.mrf.mxu2  ;;  %v3638_v47 = vadd.f32 %v3637_v53, %v3636_v61  ;;  %v9922_v53 = vld [vmem:[%s12010_s11 + $0x18] sm:$0xff] }
 0x445   : > { %v3420_v21 = vadd.f32 %v9762_v50, %v3240_v30  ;;  %v3536_v50 = vsel %vm2785_vm14, %v9707_v37, 0.0  ;;  %v3535_v30 = vadd.f32 %v3534_v7, %v3533_v17  ;;  %v3252_v28 = vpop.f32.mrf.mxu1  ;;  %3742 = vmatpush.msrb.mxu3 %v9922_v53 }
 0x446   : > { %v3253_v17 = vadd.f32 %v3252_v28, %v9570_v36 }
 0x447   : > { %v3456_v51 = vadd.f32 %v9584_v27, %v3420_v21  ;;  %v3537_v45 = vadd.f32 %v3536_v50, %v3535_v30 }
 0x449   : > { %v9892_v11 = vadd.f32 %v9591_v10, %v3456_v51 }
 0x44c   : > { %v9784_v48 = vpop.f32.mrf.mxu2 }
 0x44d   : > { %v3421_v32 = vadd.f32 %v9784_v48, %v3243_v46  ;;  %v3639_v48 = vsel %vm2785_vm14, %v3588_v54, 0.0  ;;  %v9883_v46 = vadd.f32 %v9591_v10, %v3455_v23 }
 0x44e   : > { %v3640_v15 = vadd.f32 %v3639_v48, %v3638_v47 }
 0x44f   : > { %v3457_v5 = vadd.f32 %v9584_v27, %v3421_v32  ;;  %v3546_v50 = vsel %vm2785_vm14, %v9883_v46, 0.0 }
 0x451   : > { %v9905_v25 = vadd.f32 %v9591_v10, %v3457_v5  ;;  %v3724_v5 = vld [vmem:[%s12010_s11 + $0x8] sm:$0xff] }
 0x453   : > { %v3594_v61 = vmul.f32 %v9905_v25, %v9905_v25 }
 0x454   : > { %v3382_v2 = vpop.f32.mrf.mxu2 }
 0x455   : > { %v3422_v22 = vadd.f32 %v3382_v2, %v3245_v12  ;;  %v3539_v2 = vadd.f32 %v3538_v40, %v3537_v45  ;;  %v3641_v12 = vsel %vm2785_vm14, %v3589_v39, 0.0  ;;  %v9927_v40 = vld [vmem:[%s12010_s11 + $0x10] sm:$0xff] }
 0x456   : > { %v3642_v54 = vadd.f32 %v3641_v12, %v3640_v15  ;;  %3743 = vmatpush.msrb.mxu3 %v9927_v40  ;;  %v3254_v12 = vpop.f32.mrf.mxu1 }
 0x457   : > { %v3458_v62 = vadd.f32 %v9584_v27, %v3422_v22  ;;  %v3541_v7 = vadd.f32 %v3540_v52, %v3539_v2  ;;  %v3548_v22 = vsel %vm2785_vm14, %v9892_v11, 0.0 }
 0x458   : > { %3744 = vmatpush.msrb.mxu3 %v3724_v5 }
 0x459   : > { %v3543_v23 = vadd.f32 %v3542_v63, %v3541_v7  ;;  %v9915_v32 = vadd.f32 %v9591_v10, %v3458_v62  ;;  %v3723_v62 = vld [vmem:[%s12010_s11] sm:$0xff] }
 0x45a   : > { %3745 = vmatpush.msrb.mxu3 %v3723_v62 }
 0x45b   : > { %v3545_v39 = vadd.f32 %v3544_v6, %v3543_v23  ;;  %v3595_v28 = vmul.f32 %v9915_v32, %v9915_v32  ;;  %v3552_v15 = vsel %vm2785_vm14, %v9915_v32, 0.0 }
 0x45c   : > { %v3385_v8 = vpop.f32.mrf.mxu2 }
 0x45d   : > { %v3423_v56 = vadd.f32 %v3385_v8, %v3248_v58  ;;  %v3592_v58 = vmul.f32 %v9883_v46, %v9883_v46  ;;  %v3643_v8 = vsel %vm2785_vm14, %v3590_v3, 0.0  ;;  %v3547_v52 = vadd.f32 %v3546_v50, %v3545_v39 }
 0x45e   : > { %v3644_v30 = vadd.f32 %v3643_v8, %v3642_v54 }
 0x45f   : > { %v3459_v26 = vadd.f32 %v9584_v27, %v3423_v56  ;;  %v3647_v51 = vsel %vm2785_vm14, %v3592_v58, 0.0  ;;  %v3550_v56 = vsel %vm2785_vm14, %v9905_v25, 0.0  ;;  %v3549_v35 = vadd.f32 %v3548_v22, %v3547_v52 }
 0x461   : > { %v9934_v45 = vadd.f32 %v9591_v10, %v3459_v26  ;;  %v3551_v6 = vadd.f32 %v3550_v56, %v3549_v35  ;;  %v3255_v26 = vadd.f32 %v3254_v12, %v9575_v57 }
 0x463   : > { %v3596_v7 = vmul.f32 %v9934_v45, %v9934_v45  ;;  %v3554_v54 = vsel %vm2785_vm14, %v9934_v45, 0.0 }
 0x464   : > { %v3387_v41 = vpop.f32.mrf.mxu2 }
 0x465   : > { %v3424_v21 = vadd.f32 %v3387_v41, %v3250_v16  ;;  %v3593_v16 = vmul.f32 %v9892_v11, %v9892_v11  ;;  %v3646_v41 = vadd.f32 %v3645_v14, %v3644_v30  ;;  %v3553_v14 = vadd.f32 %v3552_v15, %v3551_v6 }
 0x467   : > { %v3460_v13 = vadd.f32 %v9584_v27, %v3424_v21  ;;  %v3649_v3 = vsel %vm2785_vm14, %v3593_v16, 0.0  ;;  %v3648_v63 = vadd.f32 %v3647_v51, %v3646_v41  ;;  %v3651_v21 = vsel %vm2785_vm14, %v3594_v61, 0.0 }
 0x469   : > { %v9946_v47 = vadd.f32 %v9591_v10, %v3460_v13  ;;  %v3650_v8 = vadd.f32 %v3649_v3, %v3648_v63  ;;  %v3655_v13 = vsel %vm2785_vm14, %v3596_v7, 0.0 }
 0x46b   : > { %v3597_v23 = vmul.f32 %v9946_v47, %v9946_v47  ;;  %v3652_v16 = vadd.f32 %v3651_v21, %v3650_v8  ;;  %v3556_v30 = vsel %vm2785_vm14, %v9946_v47, 0.0 }
 0x46c   : > { %v3390_v36 = vpop.f32.mrf.mxu2 }
 0x46d   : > { %v3425_v48 = vadd.f32 %v3390_v36, %v3253_v17  ;;  %v3653_v17 = vsel %vm2785_vm14, %v3595_v28, 0.0  ;;  %v3555_v36 = vadd.f32 %v3554_v54, %v3553_v14  ;;  %v3657_v22 = vsel %vm2785_vm14, %v3597_v23, 0.0 }
 0x46e   : > { %v3654_v51 = vadd.f32 %v3653_v17, %v3652_v16 }
 0x46f   : > { %v3461_v2 = vadd.f32 %v9584_v27, %v3425_v48  ;;  %v3557_v52 = vadd.f32 %v3556_v30, %v3555_v36 }
 0x470   : > { %v3656_v41 = vadd.f32 %v3655_v13, %v3654_v51 }
 0x471   : > { %v9959_v58 = vadd.f32 %v9591_v10, %v3461_v2 }
 0x472   : > { %v3658_v28 = vadd.f32 %v3657_v22, %v3656_v41 }
 0x473   : > { %v3598_v57 = vmul.f32 %v9959_v58, %v9959_v58  ;;  %v3558_v61 = vsel %vm2785_vm14, %v9959_v58, 0.0 }
 0x474   : > { %v3392_v50 = vpop.f32.mrf.mxu2  ;;  %v3559_v2 = vadd.f32 %v3558_v61, %v3557_v52 }
 0x475   : > { %v3426_v39 = vadd.f32 %v3392_v50, %v3255_v26  ;;  %v3659_v3 = vsel %vm2785_vm14, %v3598_v57, 0.0 }
 0x476   : > { %v3660_v21 = vadd.f32 %v3659_v3, %v3658_v28 }
 0x477   : > { %v3462_v48 = vadd.f32 %v9584_v27, %v3426_v39 }
 0x479   : > { %v9978_v56 = vadd.f32 %v9591_v10, %v3462_v48 }
 0x47b   : > { %v3560_v12 = vsel %vm2785_vm14, %v9978_v56, 0.0  ;;  %v3599_v63 = vmul.f32 %v9978_v56, %v9978_v56 }
 0x47c   : > { %v3561_v35 = vadd.f32 %v3560_v12, %v3559_v2 }
 0x47d   : > { %v3661_v15 = vsel %vm2785_vm14, %v3599_v63, 0.0 }
 0x47e   : > { %v3562_v27 = vrot.slane %v3561_v35, 4  ;;  %v3662_v7 = vadd.f32 %v3661_v15, %v3660_v21 }
 0x480   : > { %v3563_v8 = vadd.f32 %v3562_v27, %v3561_v35  ;;  %v3663_v6 = vrot.slane %v3662_v7, 4 }
 0x482   : > { %v3564_v26 = vrot.slane %v3563_v8, 2  ;;  %v3664_v17 = vadd.f32 %v3663_v6, %v3662_v7 }
 0x484   : > { %v3565_v10 = vadd.f32 %v3564_v26, %v3563_v8  ;;  %v3665_v54 = vrot.slane %v3664_v17, 2 }
 0x486   : > { %v3566_v23 = vrot.slane %v3565_v10, 1  ;;  %v3666_v16 = vadd.f32 %v3665_v54, %v3664_v17  ;;  %v10068_v17 = vld [vmem:[%s12007_s8] ss:$0 sm:$0xff] }
 0x488   : > { %v3567_v14 = vadd.f32 %v3566_v23, %v3565_v10  ;;  %v3667_v50 = vrot.slane %v3666_v16, 1 }
 0x48a   : > { %6608 = vmatmul.msk.f32.vlgmr.msra.gmra.mxu2 %vm2785_vm14, %v3567_v14  ;;  %v3668_v13 = vadd.f32 %v3667_v50, %v3666_v16 }
 0x48c   : > { %6609 = vmatmul.msk.f32.vlgmr.msra.gmra.mxu3 %vm2785_vm14, %v3668_v13 }
 0x48d   : > { %3765 = vmatpush.msra.mxu3 %v9922_v53 }
 0x48f   : > { %3766 = vmatpush.msra.mxu3 %v9927_v40 }
 0x491   : > { %3767 = vmatpush.msra.mxu3 %v3724_v5 }
 0x493   : > { %3768 = vmatpush.msra.mxu3 %v3723_v62 }
 0x50d   : > { %v3697_v30 = vpop.f32.mrf.mxu2 }
 0x50e   : > { %6610 = vmatmul.msk.f32.vlgmr.msrb.gmra.mxu3 %vm12236_vm3, %v3697_v30 }
 0x50f   : > { %v3720_v57 = vpop.f32.mrf.mxu3 }
 0x516   : > { %6611 = vmatmul.msk.f32.vlgmr.msra.gmra.mxu3 %vm12237_vm13, %v3720_v57  ;;  %v10097_v57 = vld [vmem:[%s12008_s9] ss:$0 sm:$0xff] }
 0x591   : > { %v3747_v39 = vpop.f32.mrf.mxu3 }
 0x592   : > { %v3773_v36 = vmul.f32 %v3747_v39, %v3747_v39  ;;  %v9991_v40 = vperm.slane %v3747_v39, 0 }
 0x594   : > { %v3792_v28 = vsub.f32 %v9620_v43, %v9991_v40  ;;  %v3793_v2 = vsub.f32 %v9624_v9, %v9991_v40  ;;  %v3800_v12 = vsub.f32 %v9666_v19, %v9991_v40  ;;  %v3801_v63 = vsub.f32 %v9670_v1, %v9991_v40 }
 0x595   : > { %v3802_v35 = vsub.f32 %v9678_v34, %v9991_v40  ;;  %v3803_v15 = vsub.f32 %v9682_v4, %v9991_v40  ;;  %v3804_v43 = vsub.f32 %v9686_v59, %v9991_v40  ;;  %v3805_v9 = vsub.f32 %v9690_v42, %v9991_v40 }
 0x596   : > { %v3806_v19 = vsub.f32 %v9700_v38, %v9991_v40  ;;  %v3807_v1 = vsub.f32 %v9707_v37, %v9991_v40  ;;  %v3808_v34 = vsub.f32 %v9714_v31, %v9991_v40  ;;  %v3809_v4 = vsub.f32 %v9853_v0, %v9991_v40 }
 0x597   : > { %v3810_v59 = vsub.f32 %v9869_v18, %v9991_v40  ;;  %v3811_v42 = vsub.f32 %v9879_v44, %v9991_v40  ;;  %v3812_v7 = vsub.f32 %v9883_v46, %v9991_v40  ;;  %v3813_v38 = vsub.f32 %v9892_v11, %v9991_v40 }
 0x598   : > { %v3814_v37 = vsub.f32 %v9905_v25, %v9991_v40  ;;  %v3815_v31 = vsub.f32 %v9915_v32, %v9991_v40  ;;  %v3816_v0 = vsub.f32 %v9934_v45, %v9991_v40  ;;  %v3817_v18 = vsub.f32 %v9946_v47, %v9991_v40 }
 0x599   : > { %v3770_v51 = vpop.f32.mrf.mxu3  ;;  %v3818_v44 = vsub.f32 %v9959_v58, %v9991_v40  ;;  %v3819_v46 = vsub.f32 %v9978_v56, %v9991_v40 }
 0x59a   : > { %v3774_v22 = vsub.f32 %v3770_v51, %v3773_v36 }
 0x59c   : > { %v3775_v61 = vmax.f32 %v3774_v22, 0.0 }
 0x59e   : > { %v3776_v48 = vadd.f32 1e-06, %v3775_v61 }
 0x5a0   : > { %7374 = vrsqrt.f32 %v3776_v48  ;;  %vm3783_vm1 = vweird.f32 %v3776_v48 }
 0x5a6   : > { %v7375_v41 = vpop.eup %7374 }
 0x5a7   : > { %v3778_v52 = vmul.f32 %v7375_v41, %v3776_v48  ;;  %vm3784_vm15 = vweird.f32 %v7375_v41 }
 0x5a8   : > { %vm3785_vm2 = vmor %vm3783_vm1, %vm3784_vm15 }
 0x5a9   : > { %v3779_v53 = vmul.f32 %v7375_v41, %v3778_v52  ;;  %v3791_v52 = vsub.f32 %v9614_v33, %v9991_v40 }
 0x5ab   : > { %v3780_v3 = vmul.f32 0.5, %v3779_v53 }
 0x5ad   : > { %v3781_v5 = vsub.f32 1.5, %v3780_v3 }
 0x5af   : > { %v3782_v62 = vmul.f32 %v7375_v41, %v3781_v5 }
 0x5b1   : > { %v3786_v21 = vsel %vm3785_vm2, %v7375_v41, %v3782_v62  ;;  %v3790_v41 = vsub.f32 %v9610_v24, %v9991_v40 }
 0x5b2   : > { %v10009_v27 = vperm.slane %v3786_v21, 0  ;;  %v3789_v21 = vsub.f32 %v9599_v60, %v9991_v40 }
 0x5b4   : > { %v3825_v11 = vmul.f32 %v10009_v27, %v3792_v28  ;;  %v3826_v8 = vmul.f32 %v10009_v27, %v3793_v2  ;;  %v10042_v25 = vmul.f32 %v10009_v27, %v3800_v12  ;;  %v10045_v32 = vmul.f32 %v10009_v27, %v3801_v63 }
 0x5b5   : > { %v10048_v45 = vmul.f32 %v10009_v27, %v3802_v35  ;;  %v10051_v47 = vmul.f32 %v10009_v27, %v3803_v15  ;;  %v10054_v58 = vmul.f32 %v10009_v27, %v3804_v43  ;;  %v10057_v56 = vmul.f32 %v10009_v27, %v3805_v9 }
 0x5b6   : > { %v10060_v6 = vmul.f32 %v10009_v27, %v3806_v19  ;;  %v10063_v26 = vmul.f32 %v10009_v27, %v3807_v1  ;;  %v10071_v10 = vmul.f32 %v10009_v27, %v3808_v34  ;;  %v10074_v54 = vmul.f32 %v10009_v27, %v3809_v4 }
 0x5b7   : > { %v10077_v23 = vmul.f32 %v10009_v27, %v3810_v59  ;;  %v10080_v16 = vmul.f32 %v10009_v27, %v3811_v42  ;;  %v10083_v14 = vmul.f32 %v10009_v27, %v3812_v7  ;;  %v10086_v50 = vmul.f32 %v10009_v27, %v3813_v38 }
 0x5b8   : > { %v10089_v13 = vmul.f32 %v10009_v27, %v3814_v37  ;;  %v10092_v30 = vmul.f32 %v10009_v27, %v3815_v31  ;;  %v10100_v39 = vmul.f32 %v10009_v27, %v3816_v0  ;;  %v10103_v51 = vmul.f32 %v10009_v27, %v3817_v18 }
 0x5b9   : > { %v10106_v36 = vmul.f32 %v10009_v27, %v3818_v44  ;;  %v10109_v22 = vmul.f32 %v10009_v27, %v3819_v46  ;;  %v3861_v61 = vmul.f32 %v10068_v17, %v3825_v11  ;;  %v3862_v48 = vmul.f32 %v10068_v17, %v3826_v8 }
 0x5ba   : > { %v3823_v5 = vmul.f32 %v10009_v27, %v3790_v41  ;;  %v3824_v62 = vmul.f32 %v10009_v27, %v3791_v52  ;;  %v3788_v35 = vsub.f32 %v9595_v29, %v9991_v40  ;;  %v3822_v19 = vmul.f32 %v10009_v27, %v3789_v21  ;;  %v12238_v41 = vld [vmem:[#allocation44_spill] sm:$0xff] }
 0x5bb   : > { %v10118_v53 = vadd.f32 %v10097_v57, %v3861_v61  ;;  %v10121_v3 = vadd.f32 %v10097_v57, %v3862_v48  ;;  %v3796_v18 = vsub.f32 %v9643_v55, %v9991_v40  ;;  %v3797_v46 = vsub.f32 %v9647_v20, %v9991_v40 }
 0x5bc   : > { %v3859_v24 = vmul.f32 %v10068_v17, %v3823_v5  ;;  %v3860_v33 = vmul.f32 %v10068_v17, %v3824_v62  ;;  %v3821_v9 = vmul.f32 %v10009_v27, %v3788_v35  ;;  %v3858_v38 = vmul.f32 %v10068_v17, %v3822_v19 }
 0x5bd   : > { %v3929_v28 = vsub.f32 0.0, %v10118_v53  ;;  %v3930_v2 = vsub.f32 0.0, %v10121_v3  ;;  %v3798_v48 = vsub.f32 %v9656_v49, %v9991_v40  ;;  %v3799_v52 = vsub.f32 %v12238_v41, %v9991_v40 }
 0x5be   : > { %v10134_v15 = vadd.f32 %v10097_v57, %v3859_v24  ;;  %v10137_v43 = vadd.f32 %v10097_v57, %v3860_v33  ;;  %v3857_v7 = vmul.f32 %v10068_v17, %v3821_v9  ;;  %v10149_v0 = vadd.f32 %v10097_v57, %v3858_v38 }
 0x5bf   : > { %v3965_v12 = vmul.f32 1.442695, %v3929_v28  ;;  %v3967_v63 = vmul.f32 1.442695, %v3930_v2  ;;  %v10162_v5 = vmul.f32 %v10009_v27, %v3796_v18  ;;  %v10167_v28 = vmul.f32 %v10009_v27, %v3797_v46 }
 0x5c0   : > { %v3927_v1 = vsub.f32 0.0, %v10134_v15  ;;  %v3928_v34 = vsub.f32 0.0, %v10137_v43  ;;  %v10146_v31 = vadd.f32 %v10097_v57, %v3857_v7  ;;  %v3926_v8 = vsub.f32 0.0, %v10149_v0 }
 0x5c1   : > { %7376 = vpow2.f32 %v3965_v12  ;;  %v3831_v24 = vmul.f32 %v10009_v27, %v3798_v48  ;;  %v3832_v35 = vmul.f32 %v10009_v27, %v3799_v52 }
 0x5c2   : > { %7378 = vpow2.f32 %v3967_v63  ;;  %v3961_v29 = vmul.f32 1.442695, %v3927_v1  ;;  %v3963_v4 = vmul.f32 1.442695, %v3928_v34  ;;  %v3925_v11 = vsub.f32 0.0, %v10146_v31 }
 0x5c3   : > { %v3959_v9 = vmul.f32 1.442695, %v3926_v8  ;;  %v3867_v7 = vmul.f32 %v10068_v17, %v3831_v24  ;;  %v3868_v18 = vmul.f32 %v10068_v17, %v3832_v35 }
 0x5c4   : > { %7380 = vpow2.f32 %v3961_v29  ;;  %v3957_v33 = vmul.f32 1.442695, %v3925_v11 }
 0x5c5   : > { %7382 = vpow2.f32 %v3963_v4  ;;  %v10192_v52 = vadd.f32 %v10097_v57, %v3868_v18 }
 0x5c7   : > { %v7377_v59 = vpop.eup %7376 }
 0x5c8   : > { %v7379_v42 = vpop.eup %7378  ;;  %v4025_v60 = vadd.f32 1.0, %v7377_v59 }
 0x5c9   : > { %v4026_v37 = vadd.f32 1.0, %v7379_v42 }
 0x5ca   : > { %7384 = vrcp.f32 %v4025_v60  ;;  %v7381_v44 = vpop.eup %7380  ;;  %v4122_v20 = vand.u32 2147483647, %v4025_v60  ;;  %v4124_v2 = vand.u32 2147483648, %v4025_v60  ;;  %vm4118_vm4 = vweird.f32 %v4025_v60 }
 0x5cb   : > { %7386 = vrcp.f32 %v4026_v37  ;;  %v7383_v61 = vpop.eup %7382  ;;  %v10164_v62 = vadd.f32 1.0, %v7381_v44  ;;  %v4137_v1 = vand.u32 2147483647, %v4026_v37  ;;  %v4139_v34 = vand.u32 2147483648, %v4026_v37 }
 0x5cc   : > { %v10169_v12 = vadd.f32 1.0, %v7383_v61  ;;  %vm10175_vm6 = vcmp.eq.f32.partialorder %v4122_v20, 8.507059e+37  ;;  %v4125_v4 = vor.u32 1.1754944e-38, %v4124_v2  ;;  %vm4133_vm7 = vweird.f32 %v4026_v37 }
 0x5cd   : > { %7388 = vrcp.f32 %v10164_v62  ;;  %vm10181_vm9 = vcmp.eq.f32.partialorder %v4137_v1, 8.507059e+37  ;;  %v4140_v8 = vor.u32 1.1754944e-38, %v4139_v34  ;;  %v10186_v61 = vadd.f32 %v10097_v57, %v3867_v7 }
 0x5ce   : > { %7390 = vrcp.f32 %v10169_v12  ;;  %vm4088_vm12 = vweird.f32 %v10164_v62  ;;  %v4092_v24 = vand.u32 2147483647, %v10164_v62  ;;  %v3936_v1 = vsub.f32 0.0, %v10192_v52 }
 0x5cf   : > { %7392 = vpow2.f32 %v3957_v33  ;;  %v4109_v7 = vand.u32 2147483648, %v10169_v12  ;;  %vm4103_vm2 = vweird.f32 %v10169_v12 }
 0x5d0   : > { %v7385_v55 = vpop.eup %7384  ;;  %7394 = vpow2.f32 %v3959_v9 }
 0x5d1   : > { %v7387_v63 = vpop.eup %7386  ;;  %v4114_v49 = vmul.f32 %v7385_v55, %v4025_v60  ;;  %vm4119_vm8 = vweird.f32 %v7385_v55  ;;  %v3935_v60 = vsub.f32 0.0, %v10186_v61 }
 0x5d2   : > { %v4129_v21 = vmul.f32 %v7387_v63, %v4026_v37  ;;  %vm4134_vm0 = vweird.f32 %v7387_v63  ;;  %vm4120_vm10 = vmor %vm4118_vm4, %vm4119_vm8  ;;  %vm4093_vm4 = vcmp.eq.f32.partialorder %v4092_v24, 8.507059e+37  ;;  %v3866_v24 = vmul.f32 %v10068_v17, %v10167_v28 }
 0x5d3   : > { %v4115_v19 = vsub.f32 1.0, %v4114_v49  ;;  %v7389_v44 = vpop.eup %7388  ;;  %vm4135_vm3 = vmor %vm4133_vm7, %vm4134_vm0  ;;  %v4094_v49 = vand.u32 2147483648, %v10164_v62  ;;  %v3977_v11 = vmul.f32 1.442695, %v3935_v60  ;;  %v4110_v60 = vor.u32 1.1754944e-38, %v4109_v7 }
 0x5d4   : > { %v4130_v59 = vsub.f32 1.0, %v4129_v21  ;;  %v4084_v41 = vmul.f32 %v7389_v44, %v10164_v62  ;;  %v7391_v20 = vpop.eup %7390  ;;  %vm4089_vm13 = vweird.f32 %v7389_v44  ;;  %v10249_v28 = vadd.f32 %v10097_v57, %v3866_v24 }
 0x5d5   : > { %v4116_v42 = vmul.f32 %v7385_v55, %v4115_v19  ;;  %v4099_v9 = vmul.f32 %v7391_v20, %v10169_v12  ;;  %v7393_v19 = vpop.eup %7392  ;;  %vm4104_vm15 = vweird.f32 %v7391_v20  ;;  %vm4090_vm1 = vmor %vm4088_vm12, %vm4089_vm13 }
 0x5d6   : > { %v4131_v38 = vmul.f32 %v7387_v63, %v4130_v59  ;;  %v4085_v21 = vsub.f32 1.0, %v4084_v41  ;;  %v7395_v34 = vpop.eup %7394 }
 0x5d7   : > { %v4117_v46 = vadd.f32 %v7385_v55, %v4116_v42  ;;  %v4107_v42 = vand.u32 2147483647, %v10169_v12 }
 0x5d8   : > { %v4132_v48 = vadd.f32 %v7387_v63, %v4131_v38  ;;  %v4086_v29 = vmul.f32 %v7389_v44, %v4085_v21  ;;  %v10215_v38 = vadd.f32 1.0, %v7395_v34 }
 0x5d9   : > { %v4121_v2 = vsel %vm4120_vm10, %v7385_v55, %v4117_v46  ;;  %vm4108_vm7 = vcmp.eq.f32.partialorder %v4107_v42, 8.507059e+37 }
 0x5da   : > { %v4126_v33 = vsel %vm10175_vm6, %v4125_v4, %v4121_v2  ;;  %v4136_v35 = vsel %vm4135_vm3, %v7387_v63, %v4132_v48  ;;  %v4100_v4 = vsub.f32 1.0, %v4099_v9  ;;  %v10211_v63 = vadd.f32 1.0, %v7393_v19  ;;  %vm4105_vm6 = vmor %vm4103_vm2, %vm4104_vm15 }
 0x5db   : > { %v4141_v55 = vsel %vm10181_vm9, %v4140_v8, %v4136_v35  ;;  %v10205_v37 = vmul.f32 %v4126_v33, %v10118_v53  ;;  %v4087_v18 = vadd.f32 %v7389_v44, %v4086_v29  ;;  %v3979_v8 = vmul.f32 1.442695, %v3936_v1 }
 0x5dc   : > { %v10209_v59 = vmul.f32 %v4141_v55, %v10121_v3  ;;  %v4101_v46 = vmul.f32 %v7391_v20, %v4100_v4  ;;  %v4095_v3 = vor.u32 1.1754944e-38, %v4094_v49  ;;  %7396 = vrcp.f32 %v10211_v63 }
 0x5dd   : > { %v4091_v48 = vsel %vm4090_vm1, %v7389_v44, %v4087_v18  ;;  %7398 = vrcp.f32 %v10215_v38  ;;  %v3865_v49 = vmul.f32 %v10068_v17, %v10162_v5  ;;  %v12244_v5 = vld [vmem:[#allocation43_spill] sm:$0xff]  ;;  %v4062_v7 = vand.u32 2147483647, %v10211_v63 }
 0x5de   : > { %v7166_v53 = vpack.i.bf16 %v10209_v59, %v10205_v37  ;;  %v4102_v41 = vadd.f32 %v7391_v20, %v4101_v46  ;;  %v4096_v2 = vsel %vm4093_vm4, %v4095_v3, %v4091_v48  ;;  %7400 = vpow2.f32 %v3977_v11 }
 0x5df   : > { %v10228_v62 = vmul.f32 %v4096_v2, %v10134_v15  ;;  %7402 = vpow2.f32 %v3979_v8  ;;  %v10238_v21 = vadd.f32 %v10097_v57, %v3865_v49  ;;  %v12243_v15 = vld [vmem:[#allocation42_spill] sm:$0xff]  ;;  %v4079_v46 = vand.u32 2147483648, %v10215_v38 }
 0x5e0   : > { %7167 = vrot.lane.b32.xlu1 %v7166_v53, %s7623_s26  ;;  %v4106_v33 = vsel %vm4105_vm6, %v7391_v20, %v4102_v41  ;;  %v3794_v9 = vsub.f32 %v12243_v15, %v9991_v40  ;;  %v4064_v53 = vand.u32 2147483648, %v10211_v63  ;;  %v3934_v48 = vsub.f32 0.0, %v10249_v28 }
 0x5e1   : > { %v4111_v12 = vsel %vm4108_vm7, %v4110_v60, %v4106_v33  ;;  %v3933_v34 = vsub.f32 0.0, %v10238_v21  ;;  %v4077_v60 = vand.u32 2147483647, %v10215_v38  ;;  %vm4058_vm9 = vweird.f32 %v10211_v63 }
 0x5e2   : > { %v10233_v44 = vmul.f32 %v4111_v12, %v10137_v43  ;;  %v7397_v35 = vpop.eup %7396  ;;  %v3795_v43 = vsub.f32 %v12244_v5, %v9991_v40  ;;  %v3827_v4 = vmul.f32 %v10009_v27, %v3794_v9  ;;  %vm4063_vm12 = vcmp.eq.f32.partialorder %v4062_v7, 8.507059e+37 }
 0x5e3   : > { %v7399_v20 = vpop.eup %7398  ;;  %v4054_v55 = vmul.f32 %v7397_v35, %v10211_v63  ;;  %vm4059_vm8 = vweird.f32 %v7397_v35  ;;  %v3973_v41 = vmul.f32 1.442695, %v3933_v34  ;;  %v4065_v49 = vor.u32 1.1754944e-38, %v4064_v53 }
 0x5e4   : > { %v7161_v19 = vpack.i.bf16 %v10233_v44, %v10228_v62  ;;  %v4069_v1 = vmul.f32 %v7399_v20, %v10215_v38  ;;  %v7401_v29 = vpop.eup %7400  ;;  %vm4074_vm0 = vweird.f32 %v7399_v20  ;;  %v3828_v33 = vmul.f32 %v10009_v27, %v3795_v43  ;;  %vm4060_vm10 = vmor %vm4058_vm9, %vm4059_vm8 }
 0x5e5   : > { %v4055_v42 = vsub.f32 1.0, %v4054_v55  ;;  %v7403_v18 = vpop.eup %7402  ;;  %v10257_v11 = vadd.f32 1.0, %v7401_v29  ;;  %vm4073_vm3 = vweird.f32 %v10215_v38  ;;  %v4080_v9 = vor.u32 1.1754944e-38, %v4079_v46 }
 0x5e6   : > { %7162 = vrot.lane.b32.xlu0 %v7161_v19, %s7623_s26  ;;  %v4070_v40 = vsub.f32 1.0, %v4069_v1  ;;  %v10259_v8 = vadd.f32 1.0, %v7403_v18  ;;  %vm4075_vm13 = vmor %vm4073_vm3, %vm4074_vm0  ;;  %v3975_v19 = vmul.f32 1.442695, %v3934_v48  ;;  %vm4078_vm15 = vcmp.eq.f32.partialorder %v4077_v60, 8.507059e+37 }
 0x5e7   : > { %v4056_v3 = vmul.f32 %v7397_v35, %v4055_v42  ;;  %7404 = vrcp.f32 %v10257_v11  ;;  %v3863_v43 = vmul.f32 %v10068_v17, %v3827_v4  ;;  %v3864_v38 = vmul.f32 %v10068_v17, %v3828_v33 }
 0x5e8   : > { %v4071_v2 = vmul.f32 %v7399_v20, %v4070_v40  ;;  %7406 = vrcp.f32 %v10259_v8  ;;  %v4214_v18 = vand.u32 2147483648, %v10257_v11  ;;  %v4229_v48 = vand.u32 2147483648, %v10259_v8 }
 0x5e9   : > { %v4057_v12 = vadd.f32 %v7397_v35, %v4056_v3  ;;  %7408 = vpow2.f32 %v3973_v41  ;;  %v10279_v42 = vadd.f32 %v10097_v57, %v3863_v43  ;;  %v10285_v7 = vadd.f32 %v10097_v57, %v3864_v38 }
 0x5ea   : > { %v4072_v24 = vadd.f32 %v7399_v20, %v4071_v2  ;;  %7410 = vpow2.f32 %v3975_v19  ;;  %v4227_v3 = vand.u32 2147483647, %v10259_v8  ;;  %vm4208_vm4 = vweird.f32 %v10257_v11 }
 0x5eb   : > { %v4061_v15 = vsel %vm4060_vm10, %v7397_v35, %v4057_v12  ;;  %v3931_v40 = vsub.f32 0.0, %v10279_v42  ;;  %vm4223_vm7 = vweird.f32 %v10259_v8 }
 0x5ec   : > { %v4066_v55 = vsel %vm4063_vm12, %v4065_v49, %v4061_v15  ;;  %v4076_v5 = vsel %vm4075_vm13, %v7399_v20, %v4072_v24  ;;  %v3932_v24 = vsub.f32 0.0, %v10285_v7  ;;  %vm4228_vm9 = vcmp.eq.f32.partialorder %v4227_v3, 8.507059e+37 }
 0x5ed   : > { %v4081_v27 = vsel %vm4078_vm15, %v4080_v9, %v4076_v5  ;;  %v10270_v63 = vmul.f32 %v4066_v55, %v10146_v31  ;;  %v7405_v1 = vpop.eup %7404  ;;  %v3969_v33 = vmul.f32 1.442695, %v3931_v40  ;;  %v4215_v9 = vor.u32 1.1754944e-38, %v4214_v18 }
 0x5ee   : > { %v10274_v34 = vmul.f32 %v4081_v27, %v10149_v0  ;;  %v7407_v35 = vpop.eup %7406  ;;  %v4204_v29 = vmul.f32 %v7405_v1, %v10257_v11  ;;  %v4212_v0 = vand.u32 2147483647, %v10257_v11  ;;  %vm4209_vm1 = vweird.f32 %v7405_v1 }
 0x5ef   : > { %v4219_v31 = vmul.f32 %v7407_v35, %v10259_v8  ;;  %v7409_v4 = vpop.eup %7408  ;;  %vm4224_vm2 = vweird.f32 %v7407_v35  ;;  %vm4210_vm6 = vmor %vm4208_vm4, %vm4209_vm1  ;;  %v4230_v5 = vor.u32 1.1754944e-38, %v4229_v48  ;;  %v3971_v38 = vmul.f32 1.442695, %v3932_v24 }
 0x5f0   : > { %v7156_v20 = vpack.i.bf16 %v10274_v34, %v10270_v63  ;;  %v4205_v53 = vsub.f32 1.0, %v4204_v29  ;;  %v10293_v41 = vadd.f32 1.0, %v7409_v4  ;;  %v7411_v2 = vpop.eup %7410  ;;  %vm4213_vm8 = vcmp.eq.f32.partialorder %v4212_v0, 8.507059e+37  ;;  %vm4225_vm0 = vmor %vm4223_vm7, %vm4224_vm2 }
 0x5f1   : > { %v4220_v46 = vsub.f32 1.0, %v4219_v31  ;;  %v10295_v49 = vadd.f32 1.0, %v7411_v2 }
 0x5f2   : > { %7157 = vrot.lane.b32.xlu2 %v7156_v20, %s7623_s26  ;;  %v4206_v60 = vmul.f32 %v7405_v1, %v4205_v53  ;;  %7412 = vrcp.f32 %v10293_v41  ;;  %v3873_v20 = vmul.f32 %v10068_v17, %v10054_v58  ;;  %vm4178_vm10 = vweird.f32 %v10293_v41 }
 0x5f3   : > { %v4221_v12 = vmul.f32 %v7407_v35, %v4220_v46  ;;  %7414 = vpow2.f32 %v3969_v33  ;;  %v4182_v46 = vand.u32 2147483647, %v10293_v41  ;;  %v4184_v3 = vand.u32 2147483648, %v10293_v41 }
 0x5f4   : > { %v4207_v15 = vadd.f32 %v7405_v1, %v4206_v60  ;;  %7416 = vrcp.f32 %v10295_v49  ;;  %v10315_v53 = vadd.f32 %v10097_v57, %v3873_v20  ;;  %vm4193_vm3 = vweird.f32 %v10295_v49 }
 0x5f5   : > { %v4222_v19 = vadd.f32 %v7407_v35, %v4221_v12  ;;  %7418 = vpow2.f32 %v3971_v38  ;;  %v4197_v24 = vand.u32 2147483647, %v10295_v49  ;;  %vm4183_vm1 = vcmp.eq.f32.partialorder %v4182_v46, 8.507059e+37 }
 0x5f6   : > { %v4211_v55 = vsel %vm4210_vm6, %v7405_v1, %v4207_v15  ;;  %v3874_v1 = vmul.f32 %v10068_v17, %v10057_v56  ;;  %v3941_v40 = vsub.f32 0.0, %v10315_v53  ;;  %v4199_v15 = vand.u32 2147483648, %v10295_v49 }
 0x5f7   : > { %v4216_v27 = vsel %vm4213_vm8, %v4215_v9, %v4211_v55  ;;  %v4226_v43 = vsel %vm4225_vm0, %v7407_v35, %v4222_v19  ;;  %v3872_v20 = vmul.f32 %v10068_v17, %v10051_v47  ;;  %vm4198_vm4 = vcmp.eq.f32.partialorder %v4197_v24, 8.507059e+37 }
 0x5f8   : > { %v4231_v29 = vsel %vm4228_vm9, %v4230_v5, %v4226_v43  ;;  %v10304_v11 = vmul.f32 %v4216_v27, %v10186_v61  ;;  %v7413_v31 = vpop.eup %7412  ;;  %v10322_v58 = vadd.f32 %v10097_v57, %v3874_v1  ;;  %v3989_v33 = vmul.f32 1.442695, %v3941_v40 }
 0x5f9   : > { %v10309_v8 = vmul.f32 %v4231_v29, %v10192_v52  ;;  %v7415_v4 = vpop.eup %7414  ;;  %v4174_v35 = vmul.f32 %v7413_v31, %v10293_v41  ;;  %vm4179_vm12 = vweird.f32 %v7413_v31  ;;  %v4185_v5 = vor.u32 1.1754944e-38, %v4184_v3 }
 0x5fa   : > { %v7417_v0 = vpop.eup %7416  ;;  %v10319_v18 = vadd.f32 1.0, %v7415_v4  ;;  %v3942_v60 = vsub.f32 0.0, %v10322_v58  ;;  %vm4180_vm15 = vmor %vm4178_vm10, %vm4179_vm12  ;;  %v3871_v43 = vmul.f32 %v10068_v17, %v10048_v45  ;;  %v4200_v41 = vor.u32 1.1754944e-38, %v4199_v15 }
 0x5fb   : > { %v7181_v61 = vpack.i.bf16 %v10309_v8, %v10304_v11  ;;  %v4175_v52 = vsub.f32 1.0, %v4174_v35  ;;  %v4189_v56 = vmul.f32 %v7417_v0, %v10295_v49  ;;  %v7419_v12 = vpop.eup %7418  ;;  %vm4194_vm13 = vweird.f32 %v7417_v0 }
 0x5fc   : > { %7420 = vrcp.f32 %v10319_v18  ;;  %v10335_v55 = vadd.f32 1.0, %v7419_v12  ;;  %v3991_v27 = vmul.f32 1.442695, %v3942_v60  ;;  %vm4195_vm2 = vmor %vm4193_vm3, %vm4194_vm13  ;;  %v10359_v49 = vadd.f32 %v10097_v57, %v3872_v20 }
 0x5fd   : > { %7182 = vrot.lane.b32.xlu1 %v7181_v61, %s7623_s26  ;;  %v4176_v48 = vmul.f32 %v7413_v31, %v4175_v52  ;;  %v4190_v2 = vsub.f32 1.0, %v4189_v56  ;;  %7422 = vpow2.f32 %v3989_v33  ;;  %v10353_v52 = vadd.f32 %v10097_v57, %v3871_v43 }
 0x5fe   : > { %7424 = vrcp.f32 %v10335_v55  ;;  %v3940_v60 = vsub.f32 0.0, %v10359_v49  ;;  %v4152_v33 = vand.u32 2147483647, %v10319_v18  ;;  %vm4148_vm7 = vweird.f32 %v10319_v18 }
 0x5ff   : > { %v4177_v9 = vadd.f32 %v7413_v31, %v4176_v48  ;;  %v4191_v19 = vmul.f32 %v7417_v0, %v4190_v2  ;;  %7426 = vpow2.f32 %v3991_v27  ;;  %vm4163_vm10 = vweird.f32 %v10335_v55 }
 0x600   : > { %v3987_v27 = vmul.f32 1.442695, %v3940_v60  ;;  %vm4153_vm0 = vcmp.eq.f32.partialorder %v4152_v33, 8.507059e+37 }
 0x601   : > { %v4181_v38 = vsel %vm4180_vm15, %v7413_v31, %v4177_v9  ;;  %v4192_v29 = vadd.f32 %v7417_v0, %v4191_v19 }
 0x602   : > { %v7421_v1 = vpop.eup %7420  ;;  %v4186_v4 = vsel %vm4183_vm1, %v4185_v5, %v4181_v38  ;;  %v4167_v38 = vand.u32 2147483647, %v10335_v55 }
 0x603   : > { %v4196_v35 = vsel %vm4195_vm2, %v7417_v0, %v4192_v29  ;;  %v10349_v61 = vmul.f32 %v4186_v4, %v10238_v21  ;;  %v4144_v45 = vmul.f32 %v7421_v1, %v10319_v18  ;;  %v7423_v47 = vpop.eup %7422  ;;  %v4154_v0 = vand.u32 2147483648, %v10319_v18 }
 0x604   : > { %v4201_v31 = vsel %vm4198_vm4, %v4200_v41, %v4196_v35  ;;  %v10362_v46 = vadd.f32 1.0, %v7423_v47  ;;  %v3939_v21 = vsub.f32 0.0, %v10353_v52  ;;  %v7425_v3 = vpop.eup %7424  ;;  %vm4149_vm6 = vweird.f32 %v7421_v1 }
 0x605   : > { %v10356_v56 = vmul.f32 %v4201_v31, %v10249_v28  ;;  %v4145_v40 = vsub.f32 1.0, %v4144_v45  ;;  %v7427_v28 = vpop.eup %7426  ;;  %v4159_v12 = vmul.f32 %v7425_v3, %v10335_v55  ;;  %vm4150_vm8 = vmor %vm4148_vm7, %vm4149_vm6  ;;  %v4155_v9 = vor.u32 1.1754944e-38, %v4154_v0 }
 0x606   : > { %7428 = vrcp.f32 %v10362_v46  ;;  %v10373_v15 = vadd.f32 1.0, %v7427_v28  ;;  %v3985_v5 = vmul.f32 1.442695, %v3939_v21  ;;  %v4169_v29 = vand.u32 2147483648, %v10335_v55 }
 0x607   : > { %v7176_v48 = vpack.i.bf16 %v10356_v56, %v10349_v61  ;;  %v4146_v2 = vmul.f32 %v7421_v1, %v4145_v40  ;;  %v4160_v19 = vsub.f32 1.0, %v4159_v12  ;;  %vm4164_vm9 = vweird.f32 %v7425_v3 }
 0x608   : > { %7430 = vrcp.f32 %v10373_v15  ;;  %v3869_v18 = vmul.f32 %v10068_v17, %v10042_v25  ;;  %v3870_v45 = vmul.f32 %v10068_v17, %v10045_v32  ;;  %vm4165_vm12 = vmor %vm4163_vm10, %vm4164_vm9  ;;  %vm4168_vm3 = vcmp.eq.f32.partialorder %v4167_v38, 8.507059e+37 }
 0x609   : > { %7177 = vrot.lane.b32.xlu0 %v7176_v48, %s7623_s26  ;;  %v4147_v24 = vadd.f32 %v7421_v1, %v4146_v2  ;;  %v4161_v20 = vmul.f32 %v7425_v3, %v4160_v19  ;;  %7432 = vpow2.f32 %v3985_v5  ;;  %v4170_v31 = vor.u32 1.1754944e-38, %v4169_v29 }
 0x60a   : > { %7434 = vpow2.f32 %v3987_v27  ;;  %v10386_v40 = vadd.f32 %v10097_v57, %v3869_v18  ;;  %vm4298_vm13 = vweird.f32 %v10362_v46  ;;  %v10393_v25 = vadd.f32 %v10097_v57, %v3870_v45 }
 0x60b   : > { %v4151_v43 = vsel %vm4150_vm8, %v7421_v1, %v4147_v24  ;;  %v4162_v35 = vadd.f32 %v7425_v3, %v4161_v20  ;;  %v4304_v1 = vand.u32 2147483648, %v10362_v46  ;;  %v4302_v2 = vand.u32 2147483647, %v10362_v46 }
 0x60c   : > { %v4156_v4 = vsel %vm4153_vm0, %v4155_v9, %v4151_v43  ;;  %v7429_v41 = vpop.eup %7428  ;;  %v3937_v60 = vsub.f32 0.0, %v10386_v40  ;;  %v4317_v9 = vand.u32 2147483647, %v10373_v15  ;;  %v4319_v38 = vand.u32 2147483648, %v10373_v15 }
 0x60d   : > { %v4294_v47 = vmul.f32 %v7429_v41, %v10362_v46  ;;  %v4166_v55 = vsel %vm4165_vm12, %v7425_v3, %v4162_v35  ;;  %v10389_v0 = vmul.f32 %v4156_v4, %v10279_v42  ;;  %v4305_v33 = vor.u32 1.1754944e-38, %v4304_v1 }
 0x60e   : > { %v7431_v21 = vpop.eup %7430  ;;  %v4171_v48 = vsel %vm4168_vm3, %v4170_v31, %v4166_v55  ;;  %v3938_v42 = vsub.f32 0.0, %v10393_v25  ;;  %vm4299_vm15 = vweird.f32 %v7429_v41  ;;  %v3981_v19 = vmul.f32 1.442695, %v3937_v60 }
 0x60f   : > { %v4295_v32 = vsub.f32 1.0, %v4294_v47  ;;  %v10398_v28 = vmul.f32 %v4171_v48, %v10285_v7  ;;  %v4309_v3 = vmul.f32 %v7431_v21, %v10373_v15  ;;  %v7433_v12 = vpop.eup %7432  ;;  %vm4300_vm1 = vmor %vm4298_vm13, %vm4299_vm15  ;;  %vm4314_vm2 = vweird.f32 %v7431_v21 }
 0x610   : > { %v7435_v5 = vpop.eup %7434  ;;  %v10406_v7 = vadd.f32 1.0, %v7433_v12  ;;  %7436 = vpow2.f32 %v3981_v19  ;;  %v3983_v4 = vmul.f32 1.442695, %v3938_v42  ;;  %v3879_v35 = vmul.f32 %v10068_v17, %v10077_v23 }
 0x611   : > { %v4296_v24 = vmul.f32 %v7429_v41, %v4295_v32  ;;  %v7171_v27 = vpack.i.bf16 %v10398_v28, %v10389_v0  ;;  %v4310_v43 = vsub.f32 1.0, %v4309_v3  ;;  %v10408_v20 = vadd.f32 1.0, %v7435_v5 }
 0x612   : > { %7438 = vrcp.f32 %v10406_v7  ;;  %vm4303_vm4 = vcmp.eq.f32.partialorder %v4302_v2, 8.507059e+37  ;;  %vm4313_vm6 = vweird.f32 %v10373_v15  ;;  %vm4318_vm8 = vcmp.eq.f32.partialorder %v4317_v9, 8.507059e+37 }
 0x613   : > { %v4297_v29 = vadd.f32 %v7429_v41, %v4296_v24  ;;  %7172 = vrot.lane.b32.xlu2 %v7171_v27, %s7623_s26  ;;  %v4311_v18 = vmul.f32 %v7431_v21, %v4310_v43  ;;  %7440 = vrcp.f32 %v10408_v20  ;;  %vm4315_vm7 = vmor %vm4313_vm6, %vm4314_vm2  ;;  %v4320_v47 = vor.u32 1.1754944e-38, %v4319_v38 }
 0x614   : > { %7442 = vpow2.f32 %v3983_v4  ;;  %v3880_v48 = vmul.f32 %v10068_v17, %v10080_v16  ;;  %v10424_v23 = vadd.f32 %v10097_v57, %v3879_v35  ;;  %v3877_v2 = vmul.f32 %v10068_v17, %v10071_v10 }
 0x615   : > { %v4301_v1 = vsel %vm4300_vm1, %v7429_v41, %v4297_v29  ;;  %v4312_v31 = vadd.f32 %v7431_v21, %v4311_v18  ;;  %v3878_v16 = vmul.f32 %v10068_v17, %v10074_v54  ;;  %vm4268_vm0 = vweird.f32 %v10406_v7 }
 0x616   : > { %v4306_v45 = vsel %vm4303_vm4, %v4305_v33, %v4301_v1  ;;  %v7437_v41 = vpop.eup %7436  ;;  %v3947_v42 = vsub.f32 0.0, %v10424_v23  ;;  %v10442_v10 = vadd.f32 %v10097_v57, %v3877_v2  ;;  %v4272_v12 = vand.u32 2147483647, %v10406_v7 }
 0x617   : > { %v4316_v46 = vsel %vm4315_vm7, %v7431_v21, %v4312_v31  ;;  %v10419_v55 = vmul.f32 %v4306_v45, %v10315_v53  ;;  %v10431_v33 = vadd.f32 1.0, %v7437_v41  ;;  %v10434_v53 = vadd.f32 %v10097_v57, %v3880_v48 }
 0x618   : > { %v4321_v32 = vsel %vm4318_vm8, %v4320_v47, %v4316_v46  ;;  %v7439_v15 = vpop.eup %7438  ;;  %v4274_v24 = vand.u32 2147483648, %v10406_v7  ;;  %v4287_v5 = vand.u32 2147483647, %v10408_v20  ;;  %v4289_v27 = vand.u32 2147483648, %v10408_v20 }
 0x619   : > { %v10429_v60 = vmul.f32 %v4321_v32, %v10322_v58  ;;  %v7441_v21 = vpop.eup %7440  ;;  %v4264_v3 = vmul.f32 %v7439_v15, %v10406_v7  ;;  %7444 = vrcp.f32 %v10431_v33  ;;  %v3948_v29 = vsub.f32 0.0, %v10434_v53 }
 0x61a   : > { %v4279_v9 = vmul.f32 %v7441_v21, %v10408_v20  ;;  %v7443_v54 = vpop.eup %7442  ;;  %v10457_v4 = vadd.f32 %v10097_v57, %v3878_v16  ;;  %vm4269_vm9 = vweird.f32 %v7439_v15  ;;  %v4001_v35 = vmul.f32 1.442695, %v3947_v42 }
 0x61b   : > { %v7196_v58 = vpack.i.bf16 %v10429_v60, %v10419_v55  ;;  %v4265_v19 = vsub.f32 1.0, %v4264_v3  ;;  %v10453_v38 = vadd.f32 1.0, %v7443_v54  ;;  %v3945_v1 = vsub.f32 0.0, %v10442_v10  ;;  %vm4270_vm13 = vmor %vm4268_vm0, %vm4269_vm9 }
 0x61c   : > { %v4280_v43 = vsub.f32 1.0, %v4279_v9  ;;  %vm4283_vm10 = vweird.f32 %v10408_v20  ;;  %vm4284_vm12 = vweird.f32 %v7441_v21  ;;  %vm4273_vm3 = vcmp.eq.f32.partialorder %v4272_v12, 8.507059e+37 }
 0x61d   : > { %7197 = vrot.lane.b32.xlu1 %v7196_v58, %s7623_s26  ;;  %v4266_v18 = vmul.f32 %v7439_v15, %v4265_v19  ;;  %7446 = vrcp.f32 %v10453_v38  ;;  %v4275_v47 = vor.u32 1.1754944e-38, %v4274_v24  ;;  %v4003_v48 = vmul.f32 1.442695, %v3948_v29  ;;  %vm4285_vm15 = vmor %vm4283_vm10, %vm4284_vm12 }
 0x61e   : > { %v4281_v45 = vmul.f32 %v7441_v21, %v4280_v43  ;;  %7448 = vpow2.f32 %v4001_v35  ;;  %v3946_v41 = vsub.f32 0.0, %v10457_v4  ;;  %v3997_v32 = vmul.f32 1.442695, %v3945_v1 }
 0x61f   : > { %v4267_v31 = vadd.f32 %v7439_v15, %v4266_v18  ;;  %v7445_v2 = vpop.eup %7444  ;;  %vm4288_vm1 = vcmp.eq.f32.partialorder %v4287_v5, 8.507059e+37  ;;  %v4290_v20 = vor.u32 1.1754944e-38, %v4289_v27  ;;  %v4242_v3 = vand.u32 2147483647, %v10431_v33 }
 0x620   : > { %v4282_v46 = vadd.f32 %v7441_v21, %v4281_v45  ;;  %v4234_v12 = vmul.f32 %v7445_v2, %v10431_v33  ;;  %v4244_v24 = vand.u32 2147483648, %v10431_v33  ;;  %7450 = vpow2.f32 %v4003_v48 }
 0x621   : > { %v4271_v16 = vsel %vm4270_vm13, %v7439_v15, %v4267_v31  ;;  %v3999_v54 = vmul.f32 1.442695, %v3946_v41  ;;  %v4257_v27 = vand.u32 2147483647, %v10453_v38  ;;  %7452 = vpow2.f32 %v3997_v32 }
 0x622   : > { %v4276_v42 = vsel %vm4273_vm3, %v4275_v47, %v4271_v16  ;;  %v4286_v58 = vsel %vm4285_vm15, %v7441_v21, %v4282_v46  ;;  %v4235_v5 = vsub.f32 1.0, %v4234_v12  ;;  %vm4239_vm2 = vweird.f32 %v7445_v2 }
 0x623   : > { %v4291_v7 = vsel %vm4288_vm1, %v4290_v20, %v4286_v58  ;;  %v10469_v9 = vmul.f32 %v4276_v42, %v10353_v52  ;;  %v7447_v19 = vpop.eup %7446  ;;  %7454 = vpow2.f32 %v3999_v54  ;;  %v3875_v29 = vmul.f32 %v10068_v17, %v10060_v6 }
 0x624   : > { %v10472_v15 = vmul.f32 %v4291_v7, %v10359_v49  ;;  %v7449_v43 = vpop.eup %7448  ;;  %v4249_v21 = vmul.f32 %v7447_v19, %v10453_v38  ;;  %v4236_v18 = vmul.f32 %v7445_v2, %v4235_v5  ;;  %v3876_v49 = vmul.f32 %v10068_v17, %v10063_v26  ;;  %v10553_v26 = vld [vmem:[%s12008_s9] ss:$0 sm:$0xff] }
 0x625   : > { %v10480_v35 = vadd.f32 1.0, %v7449_v43  ;;  %vm4238_vm4 = vweird.f32 %v10431_v33  ;;  %vm10485_vm6 = vcmp.eq.f32.partialorder %v4242_v3, 8.507059e+37  ;;  %v4245_v6 = vor.u32 1.1754944e-38, %v4244_v24 }
 0x626   : > { %12245 = vst [vmem:[#allocation44_spill] sm:$0xff] %v10472_v15  ;;  %v7191_v52 = vpack.i.bf16 %v10472_v15, %v10469_v9  ;;  %v4250_v45 = vsub.f32 1.0, %v4249_v21  ;;  %v4237_v31 = vadd.f32 %v7445_v2, %v4236_v18  ;;  %v4259_v47 = vand.u32 2147483648, %v10453_v38  ;;  %v7451_v46 = vpop.eup %7450  ;;  %vm4240_vm7 = vmor %vm4238_vm4, %vm4239_vm2 }
 0x627   : > { %7456 = vrcp.f32 %v10480_v35  ;;  %vm4253_vm8 = vweird.f32 %v10453_v38  ;;  %vm4254_vm0 = vweird.f32 %v7447_v19  ;;  %vm10494_vm9 = vcmp.eq.f32.partialorder %v4257_v27, 8.507059e+37  ;;  %v7453_v33 = vpop.eup %7452 }
 0x628   : > { %7192 = vrot.lane.b32.xlu0 %v7191_v52, %s7623_s26  ;;  %v4251_v48 = vmul.f32 %v7447_v19, %v4250_v45  ;;  %v4241_v41 = vsel %vm4240_vm7, %v7445_v2, %v4237_v31  ;;  %v10498_v32 = vadd.f32 1.0, %v7451_v46  ;;  %v10501_v16 = vadd.f32 %v10097_v57, %v3875_v29  ;;  %vm4255_vm10 = vmor %vm4253_vm8, %vm4254_vm0 }
 0x629   : > { %v10504_v20 = vadd.f32 %v10097_v57, %v3876_v49  ;;  %v7455_v3 = vpop.eup %7454  ;;  %v4246_v42 = vsel %vm10485_vm6, %v4245_v6, %v4241_v41  ;;  %v4392_v58 = vand.u32 2147483647, %v10480_v35  ;;  %v10509_v12 = vadd.f32 1.0, %v7453_v33 }
 0x62a   : > { %v4252_v38 = vadd.f32 %v7447_v19, %v4251_v48  ;;  %v4260_v24 = vor.u32 1.1754944e-38, %v4259_v47  ;;  %v4394_v2 = vand.u32 2147483648, %v10480_v35  ;;  %7458 = vrcp.f32 %v10498_v32 }
 0x62b   : > { %v3885_v7 = vmul.f32 %v10068_v17, %v10100_v39  ;;  %v10516_v54 = vmul.f32 %v4246_v42, %v10386_v40  ;;  %v10518_v5 = vadd.f32 1.0, %v7455_v3  ;;  %7460 = vrcp.f32 %v10509_v12 }
 0x62c   : > { %v4256_v57 = vsel %vm4255_vm10, %v7447_v19, %v4252_v38  ;;  %vm4388_vm12 = vweird.f32 %v10480_v35  ;;  %v3943_v21 = vsub.f32 0.0, %v10501_v16  ;;  %v3944_v29 = vsub.f32 0.0, %v10504_v20 }
 0x62d   : > { %v7457_v27 = vpop.eup %7456  ;;  %v4261_v43 = vsel %vm10494_vm9, %v4260_v24, %v4256_v57  ;;  %vm10530_vm3 = vcmp.eq.f32.partialorder %v4392_v58, 8.507059e+37  ;;  %v4407_v19 = vand.u32 2147483647, %v10498_v32  ;;  %v4409_v52 = vand.u32 2147483648, %v10498_v32 }
 0x62e   : > { %v10527_v17 = vmul.f32 %v4261_v43, %v10393_v25  ;;  %v4384_v39 = vmul.f32 %v7457_v27, %v10480_v35  ;;  %v4362_v18 = vand.u32 2147483647, %v10509_v12  ;;  %v4364_v49 = vand.u32 2147483648, %v10509_v12  ;;  %v10542_v25 = vld [vmem:[%s12007_s8] ss:$0 sm:$0xff] }
 0x62f   : > { %7462 = vrcp.f32 %v10518_v5  ;;  %v3886_v1 = vmul.f32 %v10542_v25, %v10103_v51  ;;  %v4395_v6 = vor.u32 1.1754944e-38, %v4394_v2  ;;  %vm4403_vm13 = vweird.f32 %v10498_v32 }
 0x630   : > { %v7186_v45 = vpack.i.bf16 %v10527_v17, %v10516_v54  ;;  %v4385_v31 = vsub.f32 1.0, %v4384_v39  ;;  %v7459_v47 = vpop.eup %7458  ;;  %vm4389_vm15 = vweird.f32 %v7457_v27  ;;  %vm4358_vm1 = vweird.f32 %v10509_v12 }
 0x631   : > { %v3993_v46 = vmul.f32 1.442695, %v3943_v21  ;;  %v3995_v48 = vmul.f32 1.442695, %v3944_v29  ;;  %v10556_v51 = vadd.f32 %v10553_v26, %v3885_v7  ;;  %v7461_v33 = vpop.eup %7460  ;;  %v4399_v3 = vmul.f32 %v7459_v47, %v10498_v32  ;;  %vm4390_vm7 = vmor %vm4388_vm12, %vm4389_vm15 }
 0x632   : > { %7187 = vrot.lane.b32.xlu2 %v7186_v45, %s7623_s26  ;;  %v4386_v41 = vmul.f32 %v7457_v27, %v4385_v31  ;;  %vm10560_vm2 = vcmp.eq.f32.partialorder %v4407_v19, 8.507059e+37  ;;  %v4410_v38 = vor.u32 1.1754944e-38, %v4409_v52  ;;  %v4377_v58 = vand.u32 2147483647, %v10518_v5 }
 0x633   : > { %v4354_v24 = vmul.f32 %v7461_v33, %v10509_v12  ;;  %vm10566_vm4 = vcmp.eq.f32.partialorder %v4362_v18, 8.507059e+37  ;;  %v4365_v7 = vor.u32 1.1754944e-38, %v4364_v49  ;;  %v4379_v57 = vand.u32 2147483648, %v10518_v5 }
 0x634   : > { %7464 = vpow2.f32 %v3993_v46  ;;  %v4387_v43 = vadd.f32 %v7457_v27, %v4386_v41  ;;  %v4400_v21 = vsub.f32 1.0, %v4399_v3  ;;  %vm4373_vm6 = vweird.f32 %v10518_v5 }
 0x635   : > { %7466 = vpow2.f32 %v3995_v48  ;;  %v10573_v29 = vadd.f32 %v10553_v26, %v3886_v1  ;;  %v7463_v39 = vpop.eup %7462  ;;  %vm4404_vm8 = vweird.f32 %v7459_v47  ;;  %v4355_v19 = vsub.f32 1.0, %v4354_v24 }
 0x636   : > { %v3953_v52 = vsub.f32 0.0, %v10556_v51  ;;  %v3883_v18 = vmul.f32 %v10542_v25, %v10089_v13  ;;  %v4391_v49 = vsel %vm4390_vm7, %v7457_v27, %v4387_v43  ;;  %v4401_v45 = vmul.f32 %v7459_v47, %v4400_v21  ;;  %vm4405_vm10 = vmor %vm4403_vm13, %vm4404_vm8 }
 0x637   : > { %vm4359_vm0 = vweird.f32 %v7461_v33  ;;  %v4369_v31 = vmul.f32 %v7463_v39, %v10518_v5  ;;  %v4396_v1 = vsel %vm10530_vm3, %v4395_v6, %v4391_v49  ;;  %v4356_v46 = vmul.f32 %v7461_v33, %v4355_v19 }
 0x638   : > { %v3954_v48 = vsub.f32 0.0, %v10573_v29  ;;  %v4013_v35 = vmul.f32 1.442695, %v3953_v52  ;;  %v4402_v41 = vadd.f32 %v7459_v47, %v4401_v45  ;;  %vm4374_vm9 = vweird.f32 %v7463_v39  ;;  %vm4360_vm12 = vmor %vm4358_vm1, %vm4359_vm0 }
 0x639   : > { %v4370_v3 = vsub.f32 1.0, %v4369_v31  ;;  %v3884_v24 = vmul.f32 %v10542_v25, %v10092_v30  ;;  %v4357_v13 = vadd.f32 %v7461_v33, %v4356_v46  ;;  %v10591_v40 = vadd.f32 %v10553_v26, %v3883_v18  ;;  %vm4375_vm3 = vmor %vm4373_vm6, %vm4374_vm9 }
 0x63a   : > { %v7465_v15 = vpop.eup %7464  ;;  %7468 = vpow2.f32 %v4013_v35  ;;  %v4015_v27 = vmul.f32 1.442695, %v3954_v48  ;;  %v4406_v43 = vsel %vm4405_vm10, %v7459_v47, %v4402_v41  ;;  %v10594_v21 = vmul.f32 %v4396_v1, %v10424_v23 }
 0x63b   : > { %v7467_v6 = vpop.eup %7466  ;;  %v4371_v30 = vmul.f32 %v7463_v39, %v4370_v3  ;;  %v10599_v19 = vadd.f32 1.0, %v7465_v15  ;;  %v4411_v32 = vsel %vm10560_vm2, %v4410_v38, %v4406_v43  ;;  %v4361_v52 = vsel %vm4360_vm12, %v7461_v33, %v4357_v13 }
 0x63c   : > { %v10603_v49 = vadd.f32 1.0, %v7467_v6  ;;  %7470 = vpow2.f32 %v4015_v27  ;;  %v10606_v18 = vmul.f32 %v4411_v32, %v10434_v53  ;;  %v4366_v23 = vsel %vm10566_vm4, %v4365_v7, %v4361_v52 }
 0x63d   : > { %v4372_v47 = vadd.f32 %v7463_v39, %v4371_v30  ;;  %7472 = vrcp.f32 %v10599_v19  ;;  %vm4378_vm13 = vcmp.eq.f32.partialorder %v4377_v58, 8.507059e+37  ;;  %v4380_v15 = vor.u32 1.1754944e-38, %v4379_v57 }
 0x63e   : > { %v3951_v12 = vsub.f32 0.0, %v10591_v40  ;;  %v7211_v33 = vpack.i.bf16 %v10606_v18, %v10594_v21  ;;  %v10618_v53 = vmul.f32 %v4366_v23, %v10442_v10  ;;  %7474 = vrcp.f32 %v10603_v49 }
 0x63f   : > { %v4376_v42 = vsel %vm4375_vm3, %v7463_v39, %v4372_v47  ;;  %v10622_v7 = vadd.f32 %v10553_v26, %v3884_v24  ;;  %v4332_v58 = vand.u32 2147483647, %v10599_v19  ;;  %v4334_v39 = vand.u32 2147483648, %v10599_v19 }
 0x640   : > { %v7469_v38 = vpop.eup %7468  ;;  %v4381_v2 = vsel %vm4378_vm13, %v4380_v15, %v4376_v42  ;;  %7212 = vrot.lane.b32.xlu1 %v7211_v33, %s7623_s26  ;;  %v4009_v10 = vmul.f32 1.442695, %v3951_v12  ;;  %vm4328_vm15 = vweird.f32 %v10599_v19  ;;  %v4347_v46 = vand.u32 2147483647, %v10603_v49 }
 0x641   : > { %v10626_v5 = vmul.f32 %v4381_v2, %v10457_v4  ;;  %v10630_v45 = vadd.f32 1.0, %v7469_v38  ;;  %v3952_v35 = vsub.f32 0.0, %v10622_v7  ;;  %vm10642_vm1 = vcmp.eq.f32.partialorder %v4332_v58, 8.507059e+37 }
 0x642   : > { %v7471_v57 = vpop.eup %7470  ;;  %v4349_v24 = vand.u32 2147483648, %v10603_v49  ;;  %v3881_v13 = vmul.f32 %v10542_v25, %v10083_v14  ;;  %v4335_v6 = vor.u32 1.1754944e-38, %v4334_v39  ;;  %vm4343_vm2 = vweird.f32 %v10603_v49 }
 0x643   : > { %v7473_v31 = vpop.eup %7472  ;;  %v7206_v1 = vpack.i.bf16 %v10626_v5, %v10618_v53  ;;  %v10637_v4 = vadd.f32 1.0, %v7471_v57  ;;  %7476 = vrcp.f32 %v10630_v45  ;;  %vm10652_vm4 = vcmp.eq.f32.partialorder %v4347_v46, 8.507059e+37 }
 0x644   : > { %v4324_v48 = vmul.f32 %v7473_v31, %v10599_v19  ;;  %v7475_v41 = vpop.eup %7474  ;;  %7478 = vpow2.f32 %v4009_v10  ;;  %v4482_v32 = vand.u32 2147483647, %v10630_v45  ;;  %v4484_v52 = vand.u32 2147483648, %v10630_v45 }
 0x645   : > { %7207 = vrot.lane.b32.xlu0 %v7206_v1, %s7623_s26  ;;  %v4339_v43 = vmul.f32 %v7475_v41, %v10603_v49  ;;  %7480 = vrcp.f32 %v10637_v4  ;;  %vm4329_vm6 = vweird.f32 %v7473_v31  ;;  %v4011_v14 = vmul.f32 1.442695, %v3952_v35 }
 0x646   : > { %v4325_v27 = vsub.f32 1.0, %v4324_v48  ;;  %v4350_v15 = vor.u32 1.1754944e-38, %v4349_v24  ;;  %vm4478_vm7 = vweird.f32 %v10630_v45  ;;  %v3882_v12 = vmul.f32 %v10542_v25, %v10086_v50  ;;  %vm4330_vm0 = vmor %vm4328_vm15, %vm4329_vm6 }
 0x647   : > { %v4340_v47 = vsub.f32 1.0, %v4339_v43  ;;  %v10662_v33 = vadd.f32 %v10553_v26, %v3881_v13  ;;  %vm4344_vm8 = vweird.f32 %v7475_v41  ;;  %7482 = vpow2.f32 %v4011_v14 }
 0x648   : > { %v4326_v23 = vmul.f32 %v7473_v31, %v4325_v27  ;;  %vm10667_vm9 = vcmp.eq.f32.partialorder %v4482_v32, 8.507059e+37  ;;  %v4485_v10 = vor.u32 1.1754944e-38, %v4484_v52  ;;  %v10672_v50 = vadd.f32 %v10553_v26, %v3882_v12  ;;  %vm4345_vm10 = vmor %vm4343_vm2, %vm4344_vm8 }
 0x649   : > { %v7477_v42 = vpop.eup %7476  ;;  %v4341_v2 = vmul.f32 %v7475_v41, %v4340_v47  ;;  %v3949_v24 = vsub.f32 0.0, %v10662_v33  ;;  %vm4493_vm12 = vweird.f32 %v10637_v4  ;;  %v4499_v47 = vand.u32 2147483648, %v10637_v4 }
 0x64a   : > { %v4327_v38 = vadd.f32 %v7473_v31, %v4326_v23  ;;  %v7479_v58 = vpop.eup %7478  ;;  %v4474_v57 = vmul.f32 %v7477_v42, %v10630_v45  ;;  %vm4479_vm3 = vweird.f32 %v7477_v42 }
 0x64b   : > { %v7481_v1 = vpop.eup %7480  ;;  %v4342_v48 = vadd.f32 %v7475_v41, %v4341_v2  ;;  %v10674_v35 = vadd.f32 1.0, %v7479_v58  ;;  %vm4480_vm15 = vmor %vm4478_vm7, %vm4479_vm3  ;;  %v4500_v45 = vor.u32 1.1754944e-38, %v4499_v47 }
 0x64c   : > { %v4331_v46 = vsel %vm4330_vm0, %v7473_v31, %v4327_v38  ;;  %v4475_v13 = vsub.f32 1.0, %v4474_v57  ;;  %v4489_v27 = vmul.f32 %v7481_v1, %v10637_v4  ;;  %v4497_v31 = vand.u32 2147483647, %v10637_v4 }
 0x64d   : > { %v4336_v19 = vsel %vm10642_vm1, %v4335_v6, %v4331_v46  ;;  %v4346_v43 = vsel %vm4345_vm10, %v7475_v41, %v4342_v48  ;;  %7484 = vrcp.f32 %v10674_v35  ;;  %v7483_v52 = vpop.eup %7482  ;;  %v3950_v41 = vsub.f32 0.0, %v10672_v50 }
 0x64e   : > { %v10684_v32 = vmul.f32 %v4336_v19, %v10501_v16  ;;  %v4351_v3 = vsel %vm10652_vm4, %v4350_v15, %v4346_v43  ;;  %v4476_v6 = vmul.f32 %v7477_v42, %v4475_v13  ;;  %v4490_v49 = vsub.f32 1.0, %v4489_v27 }
 0x64f   : > { %v10691_v23 = vmul.f32 %v4351_v3, %v10504_v20  ;;  %v4005_v16 = vmul.f32 1.442695, %v3949_v24  ;;  %vm4494_vm13 = vweird.f32 %v7481_v1  ;;  %v10695_v38 = vadd.f32 1.0, %v7483_v52 }
 0x650   : > { %v4477_v14 = vadd.f32 %v7477_v42, %v4476_v6  ;;  %v4491_v12 = vmul.f32 %v7481_v1, %v4490_v49  ;;  %v4007_v15 = vmul.f32 1.442695, %v3950_v41  ;;  %v3887_v20 = vmul.f32 %v10542_v25, %v10106_v36  ;;  %vm4495_vm1 = vmor %vm4493_vm12, %vm4494_vm13 }
 0x651   : > { %v7201_v30 = vpack.i.bf16 %v10691_v23, %v10684_v32  ;;  %7486 = vpow2.f32 %v4005_v16  ;;  %v3888_v57 = vmul.f32 %v10542_v25, %v10109_v22  ;;  %vm4498_vm2 = vcmp.eq.f32.partialorder %v4497_v31, 8.507059e+37 }
 0x652   : > { %v4481_v2 = vsel %vm4480_vm15, %v7477_v42, %v4477_v14  ;;  %v4492_v58 = vadd.f32 %v7481_v1, %v4491_v12  ;;  %7488 = vrcp.f32 %v10695_v38  ;;  %v10716_v22 = vadd.f32 %v10553_v26, %v3887_v20 }
 0x653   : > { %v7485_v46 = vpop.eup %7484  ;;  %7202 = vrot.lane.b32.xlu2 %v7201_v30, %s7623_s26  ;;  %v4486_v48 = vsel %vm10667_vm9, %v4485_v10, %v4481_v2  ;;  %7490 = vpow2.f32 %v4007_v15  ;;  %v10722_v4 = vadd.f32 %v10553_v26, %v3888_v57  ;;  %vm4448_vm6 = vweird.f32 %v10674_v35  ;;  %v10744_v2 = vld [vmem:[%s12011_s12 + $0x38] sm:$0xff] }
 0x654   : > { %v4496_v24 = vsel %vm4495_vm1, %v7481_v1, %v4492_v58  ;;  %v10712_v36 = vmul.f32 %v4486_v48, %v10556_v51  ;;  %v4444_v42 = vmul.f32 %v7485_v46, %v10674_v35  ;;  %v4454_v1 = vand.u32 2147483648, %v10674_v35  ;;  %v6917_v48 = vld [vmem:[%s12011_s12 + $0x98] sm:$0xff]  ;;  %5578 = vmatpush.bf16.msra.mxu1 %v10744_v2 }
 0x655   : > { %v4501_v19 = vsel %vm4498_vm2, %v4500_v45, %v4496_v24  ;;  %v3955_v13 = vsub.f32 0.0, %v10716_v22  ;;  %vm4449_vm4 = vweird.f32 %v7485_v46  ;;  %v3956_v47 = vsub.f32 0.0, %v10722_v4  ;;  %5326 = vmatpush.bf16.msrb.mxu3 %v6917_v48  ;;  %v6915_v48 = vld [vmem:[%s12011_s12 + $0x88] sm:$0xff] }
 0x656   : > { %v10719_v25 = vmul.f32 %v4501_v19, %v10573_v29  ;;  %v4445_v39 = vsub.f32 1.0, %v4444_v42  ;;  %v4452_v29 = vand.u32 2147483647, %v10674_v35  ;;  %vm4450_vm7 = vmor %vm4448_vm6, %vm4449_vm4  ;;  %v4467_v16 = vand.u32 2147483647, %v10695_v38 }
 0x657   : > { %v7487_v10 = vpop.eup %7486  ;;  %v4017_v6 = vmul.f32 1.442695, %v3955_v13  ;;  %v4455_v12 = vor.u32 1.1754944e-38, %v4454_v1  ;;  %v4469_v35 = vand.u32 2147483648, %v10695_v38  ;;  %v4019_v20 = vmul.f32 1.442695, %v3956_v47 }
 0x658   : > { %v7489_v51 = vpop.eup %7488  ;;  %v7226_v27 = vpack.i.bf16 %v10719_v25, %v10712_v36  ;;  %v4446_v43 = vmul.f32 %v7485_v46, %v4445_v39  ;;  %v10728_v31 = vadd.f32 1.0, %v7487_v10  ;;  %vm4453_vm8 = vcmp.eq.f32.partialorder %v4452_v29, 8.507059e+37  ;;  %v6909_v39 = vld [vmem:[%s12011_s12 + $0x58] sm:$0xff] }
 0x659   : > { %v7491_v3 = vpop.eup %7490  ;;  %v4459_v26 = vmul.f32 %v7489_v51, %v10695_v38  ;;  %vm4464_vm0 = vweird.f32 %v7489_v51  ;;  %v4728_v58 = vrot.slane %v10228_v62, 1  ;;  %vm4463_vm9 = vweird.f32 %v10695_v38  ;;  %v10767_v38 = vld [vmem:[%s12011_s12 + $0x30] sm:$0xff]  ;;  %5671 = vmatpush.bf16.msrb.mxu2 %v6909_v39  ;;  %v6907_v39 = vld [vmem:[%s12011_s12 + $0x48] sm:$0xff] }
 0x65a   : > { %7227 = vrot.lane.b32.xlu1 %v7226_v27, %s7623_s26  ;;  %v4447_v49 = vadd.f32 %v7485_v46, %v4446_v43  ;;  %v10734_v52 = vadd.f32 1.0, %v7491_v3  ;;  %7492 = vrcp.f32 %v10728_v31  ;;  %vm10748_vm10 = vcmp.eq.f32.partialorder %v4467_v16, 8.507059e+37  ;;  %vm10757_vm12 = vmor %vm4463_vm9, %vm4464_vm0  ;;  %v6916_v3 = vld [vmem:[%s12011_s12 + $0x90] sm:$0xff]  ;;  %v7158_v16 = vpop.permute.xlu2 %7157  ;;  %5579 = vmatpush.bf16.msra.mxu1 %v10767_v38 }
 0x65b   : > { %v4460_v41 = vsub.f32 1.0, %v4459_v26  ;;  %7494 = vpow2.f32 %v4017_v6  ;;  %v4470_v42 = vor.u32 1.1754944e-38, %v4469_v35  ;;  %vm4418_vm3 = vweird.f32 %v10728_v31  ;;  %v6908_v6 = vld [vmem:[%s12011_s12 + $0x50] sm:$0xff]  ;;  %v6921_v35 = vld [vmem:[%s12011_s12 + $0xb8] sm:$0xff]  ;;  %5327 = vmatpush.bf16.msrb.mxu3 %v6916_v3 }
 0x65c   : > { %v4451_v14 = vsel %vm4450_vm7, %v7485_v46, %v4447_v49  ;;  %7496 = vrcp.f32 %v10734_v52  ;;  %v4422_v19 = vand.u32 2147483647, %v10728_v31  ;;  %v4424_v43 = vand.u32 2147483648, %v10728_v31  ;;  %5419 = vmatpush.bf16.msra.mxu0 %v6921_v35 }
 0x65d   : > { %v4461_v30 = vmul.f32 %v7489_v51, %v4460_v41  ;;  %v4456_v15 = vsel %vm4453_vm8, %v4455_v12, %v4451_v14  ;;  %7498 = vpow2.f32 %v4019_v20  ;;  %vm4433_vm13 = vweird.f32 %v10734_v52  ;;  %5672 = vmatpush.bf16.msrb.mxu2 %v6908_v6  ;;  %v6919_v12 = vld [vmem:[%s12011_s12 + $0xa8] sm:$0xff] }
 0x65e   : > { %v10775_v13 = vmul.f32 %v4456_v15, %v10591_v40  ;;  %v4437_v40 = vand.u32 2147483647, %v10734_v52  ;;  %v4597_v14 = vrot.slane %v10270_v63, 7  ;;  %vm10800_vm15 = vcmp.eq.f32.partialorder %v4422_v19, 8.507059e+37 }
 0x65f   : > { %v4462_v57 = vadd.f32 %v7489_v51, %v4461_v30  ;;  %v4598_v30 = vrot.slane %v10274_v34, 7  ;;  %v4726_v15 = vrot.slane %v10274_v34, 1  ;;  %v4439_v19 = vand.u32 2147483648, %v10734_v52  ;;  %5328 = vmatpush.bf16.msrb.mxu3 %v6915_v48  ;;  %v12270_v48 = vld [vmem:[#allocation30_spill] sm:$0xff] }
 0x660   : > { %v10755_v45 = vpop.eup %7492  ;;  %vm10841_vm6 = vcmp.eq.f32.partialorder %v4437_v40, 8.507059e+37  ;;  %v7159_v35 = vunpack.i.l.bf16 %v7158_v16 }
 0x661   : > { %v7495_v10 = vpop.eup %7494  ;;  %v4466_v1 = vsel %vm10757_vm12, %v7489_v51, %v4462_v57  ;;  %v4414_v27 = vmul.f32 %v10755_v45, %v10728_v31  ;;  %vm4419_vm1 = vweird.f32 %v10755_v45  ;;  %5673 = vmatpush.bf16.msrb.mxu2 %v6907_v39  ;;  %v12271_v39 = vld [vmem:[#allocation20_spill] sm:$0xff] }
 0x662   : > { %v10783_v29 = vpop.eup %7496  ;;  %v4471_v26 = vsel %vm10748_vm10, %v4470_v42, %v4466_v1  ;;  %v10789_v51 = vadd.f32 1.0, %v7495_v10  ;;  %v4425_v42 = vor.u32 1.1754944e-38, %v4424_v43  ;;  %v6920_v10 = vld [vmem:[%s12011_s12 + $0xb0] sm:$0xff]  ;;  %v7160_v1 = vunpack.i.h.bf16 %v7158_v16  ;;  %vm4420_vm4 = vmor %vm4418_vm3, %vm4419_vm1 }
 0x663   : > { %v10795_v49 = vmul.f32 %v4471_v26, %v10622_v7  ;;  %v4415_v47 = vsub.f32 1.0, %v4414_v27  ;;  %v4429_v41 = vmul.f32 %v10783_v29, %v10734_v52  ;;  %v10809_v7 = vld [vmem:[%s12011_s12 + $0x28] sm:$0xff]  ;;  %v7499_v24 = vpop.eup %7498  ;;  %vm4434_vm2 = vweird.f32 %v10783_v29  ;;  %5420 = vmatpush.bf16.msra.mxu0 %v6920_v10 }
 0x664   : > { %7500 = vrcp.f32 %v10789_v51  ;;  %v10834_v3 = vadd.f32 1.0, %v7499_v24  ;;  %v4692_v26 = vsel %vm2271_vm5, 0.0, %v4597_v14  ;;  %5580 = vmatpush.bf16.msra.mxu1 %v10809_v7  ;;  %vm4435_vm7 = vmor %vm4433_vm13, %vm4434_vm2  ;;  %v4514_v6 = vand.u32 2147483648, %v10789_v51 }
 0x665   : > { %v7221_v20 = vpack.i.bf16 %v10795_v49, %v10775_v13  ;;  %v4416_v57 = vmul.f32 %v10755_v45, %v4415_v47  ;;  %v4430_v46 = vsub.f32 1.0, %v4429_v41  ;;  %v10849_v47 = vld [vmem:[%s12011_s12 + $0x20] sm:$0xff]  ;;  %v4729_v41 = vsel %vm2400_vm11, %v4726_v15, %v4728_v58 }
 0x666   : > { %7502 = vrcp.f32 %v10834_v3  ;;  %vm4508_vm0 = vweird.f32 %v10789_v51  ;;  %vm4523_vm3 = vweird.f32 %v10834_v3 }
 0x667   : > { %7222 = vrot.lane.b32.xlu0 %v7221_v20, %s7623_s26  ;;  %v4417_v27 = vadd.f32 %v10755_v45, %v4416_v57  ;;  %v4431_v43 = vmul.f32 %v10783_v29, %v4430_v46  ;;  %v4725_v20 = vrot.slane %v10270_v63, 1  ;;  %v6914_v57 = vld [vmem:[%s12011_s12 + $0x80] sm:$0xff]  ;;  %v4599_v46 = vsel %vm2271_vm5, %v4597_v14, %v4598_v30  ;;  %5421 = vmatpush.bf16.msra.mxu0 %v6919_v12 }
 0x668   : > { %v4440_v63 = vor.u32 1.1754944e-38, %v4439_v19  ;;  %v4950_v14 = vsel %vm2785_vm14, %v4599_v46, %v7160_v1  ;;  %5581 = vmatpush.bf16.msra.mxu1 %v10849_v47  ;;  %v10890_v1 = vld [vmem:[%s12011_s12 + $0x18] sm:$0xff]  ;;  %5329 = vmatpush.bf16.msrb.mxu3 %v6914_v57  ;;  %v4632_v12 = vrot.slane %v10684_v32, 7 }
 0x669   : > { %v4421_v31 = vsel %vm4420_vm4, %v10755_v45, %v4417_v27  ;;  %v4432_v40 = vadd.f32 %v10783_v29, %v4431_v43  ;;  %v6906_v45 = vld [vmem:[%s12011_s12 + $0x40] sm:$0xff]  ;;  %v4693_v27 = vmul.f32 %v12270_v48, %v4692_v26  ;;  %v4822_v43 = vmul.f32 %v12271_v39, %v4729_v41  ;;  %v6913_v46 = vld [vmem:[%s12011_s12 + $0x78] sm:$0xff] }
 0x66a   : > { %v7501_v24 = vpop.eup %7500  ;;  %v4426_v16 = vsel %vm10800_vm15, %v4425_v42, %v4421_v31  ;;  %v4727_v26 = vsel %vm2400_vm11, %v4725_v20, %v4726_v15  ;;  %5674 = vmatpush.bf16.msrb.mxu2 %v6906_v45  ;;  %v6918_v15 = vld [vmem:[%s12011_s12 + $0xa0] sm:$0xff]  ;;  %v10912_v45 = vld [vmem:[%s12011_s12 + $0x10] sm:$0xff] }
 0x66b   : > { %v4436_v42 = vsel %vm4435_vm7, %v10783_v29, %v4432_v40  ;;  %v10880_v52 = vmul.f32 %v4426_v16, %v10662_v33  ;;  %v4504_v19 = vmul.f32 %v7501_v24, %v10789_v51  ;;  %v4949_v29 = vsel %vm2785_vm14, %v4693_v27, %v7159_v35  ;;  %5422 = vmatpush.bf16.msra.mxu0 %v6918_v15 }
 0x66c   : > { %v4441_v10 = vsel %vm10841_vm6, %v4440_v63, %v4436_v42  ;;  %v4981_v41 = vpack.c.bf16 %v4727_v26, %v4949_v29  ;;  %v4982_v40 = vpack.c.bf16 %v4822_v43, %v4950_v14  ;;  %v7503_v35 = vpop.eup %7502  ;;  %vm4509_vm8 = vweird.f32 %v7501_v24  ;;  %5582 = vmatpush.bf16.msra.mxu1 %v10890_v1  ;;  %5330 = vmatpush.bf16.msrb.mxu3 %v6913_v46 }
 0x66d   : > { %v10895_v33 = vmul.f32 %v4441_v10, %v10672_v50  ;;  %v4505_v31 = vsub.f32 1.0, %v4504_v19  ;;  %v4512_v16 = vand.u32 2147483647, %v10789_v51  ;;  %v4519_v63 = vmul.f32 %v7503_v35, %v10834_v3  ;;  %vm10917_vm9 = vmor %vm4508_vm0, %vm4509_vm8  ;;  %v6912_v19 = vld [vmem:[%s12011_s12 + $0x70] sm:$0xff] }
 0x66e   : > { %v5044_v57 = vunpack.c.h.b16 %v4981_v41  ;;  %v5046_v48 = vunpack.c.h.b16 %v4982_v40  ;;  %v12272_v14 = vmov 0   ;;  %v4515_v10 = vor.u32 1.1754944e-38, %v4514_v6 }
 0x66f   : > { %v7216_v50 = vpack.i.bf16 %v10895_v33, %v10880_v52  ;;  %v4506_v20 = vmul.f32 %v7501_v24, %v4505_v31  ;;  %5675 = vmatmul.bf16.vlgmr.msrb.gmra.mxu2 %v12272_v14  ;;  %v4520_v42 = vsub.f32 1.0, %v4519_v63  ;;  %v4529_v51 = vand.u32 2147483648, %v10834_v3  ;;  %v6899_v31 = vld [vmem:[%s12011_s12 + $0x8] sm:$0xff] }
 0x670   : > { %v5104_v39 = vpack.c.b16 %v5046_v48, %v5044_v57  ;;  %vm4513_vm10 = vcmp.eq.f32.partialorder %v4512_v16, 8.507059e+37  ;;  %vm4524_vm12 = vweird.f32 %v7503_v35  ;;  %v4527_v29 = vand.u32 2147483647, %v10834_v3  ;;  %5583 = vmatpush.bf16.msra.mxu1 %v10912_v45  ;;  %5331 = vmatpush.bf16.msrb.mxu3 %v6912_v19  ;;  %v6898_v57 = vld [vmem:[%s12011_s12] sm:$0xff] }
 0x671   : > { %7217 = vrot.lane.b32.xlu2 %v7216_v50, %s7623_s26  ;;  %v4507_v27 = vadd.f32 %v7501_v24, %v4506_v20  ;;  %v4521_v26 = vmul.f32 %v7503_v35, %v4520_v42  ;;  %vm4525_vm13 = vmor %vm4523_vm3, %vm4524_vm12  ;;  %v4530_v6 = vor.u32 1.1754944e-38, %v4529_v51  ;;  %v5043_v63 = vunpack.c.l.b16 %v4981_v41 }
 0x672   : > { %6684 = vmatmul.msk.bf16.vlgmr.msra.gmra.mxu0 %vm2785_vm14, %v5104_v39  ;;  %vm4528_vm15 = vcmp.eq.f32.partialorder %v4527_v29, 8.507059e+37  ;;  %v5045_v3 = vunpack.c.l.b16 %v4982_v40  ;;  %v12071_v40 = vrot.slane %v10684_v32, 1  ;;  %v4762_v42 = vrot.slane %v10691_v23, 1 }
 0x673   : > { %v4511_v43 = vsel %vm10917_vm9, %v7501_v24, %v4507_v27  ;;  %v4522_v15 = vadd.f32 %v7503_v35, %v4521_v26  ;;  %v6911_v24 = vld [vmem:[%s12011_s12 + $0x68] sm:$0xff]  ;;  %v4774_v51 = vrot.slane %v10895_v33, 1 }
 0x674   : > { %v4516_v46 = vsel %vm4513_vm10, %v4515_v10, %v4511_v43  ;;  %5584 = vmatpush.bf16.msra.mxu1 %v6899_v31  ;;  %5332 = vmatpush.bf16.msrb.mxu3 %v6911_v24  ;;  %v5103_v27 = vpack.c.b16 %v5045_v3, %v5043_v63  ;;  %v4763_v19 = vsel %vm2400_vm11, %v12071_v40, %v4762_v42  ;;  %v4646_v43 = vrot.slane %v10895_v33, 7 }
 0x675   : > { %v4526_v50 = vsel %vm4525_vm13, %v7503_v35, %v4522_v15  ;;  %v10938_v20 = vmul.f32 %v4516_v46, %v10716_v22  ;;  %v6910_v35 = vld [vmem:[%s12011_s12 + $0x60] sm:$0xff]  ;;  %v12069_v10 = vrot.slane %v10880_v52, 1 }
 0x676   : > { %v4531_v16 = vsel %vm4528_vm15, %v4530_v6, %v4526_v50  ;;  %v12073_v6 = vrot.slane %v10795_v49, 7  ;;  %v4648_v50 = vrot.slane %v10775_v13, 7 }
 0x677   : > { %v10944_v48 = vmul.f32 %v4531_v16, %v10722_v4  ;;  %v12070_v4 = vrot.slane %v10691_v23, 7  ;;  %v10980_v26 = vsel %vm2400_vm11, %v12069_v10, %v4774_v51  ;;  %v12076_v29 = vrot.slane %v10938_v20, 7 }
 0x678   : > { %5585 = vmatpush.bf16.msra.mxu1 %v6898_v57  ;;  %5333 = vmatpush.bf16.msrb.mxu3 %v6910_v35  ;;  %v12072_v46 = vrot.slane %v10938_v20, 1  ;;  %v12074_v16 = vrot.slane %v10795_v49, 1  ;;  %v11010_v63 = vsel %vm2271_vm5, %v4646_v43, %v4648_v50  ;;  %v11015_v3 = vsel %vm2271_vm5, %v4648_v50, %v12073_v6 }
 0x679   : > { %v7231_v22 = vpack.i.bf16 %v10944_v48, %v10938_v20  ;;  %v4635_v41 = vsel %vm2271_vm5, %v4632_v12, %v12070_v4  ;;  %v4658_v33 = vrot.slane %v10944_v48, 7  ;;  %v12075_v15 = vrot.slane %v10944_v48, 1  ;;  %v12275_v4 = vld [vmem:[#allocation32_spill] sm:$0xff] }
 0x67a   : > { %v4732_v35 = vrot.slane %v10205_v37, 1  ;;  %v12079_v50 = vrot.slane %v10618_v53, 1 }
 0x67b   : > { %7232 = vrot.lane.b32.xlu2 %v7231_v22, %s7623_s26  ;;  %5586 = vmatmul.bf16.vlgmr.msra.gmra.mxu1 %v12272_v14  ;;  %v10994_v24 = vsel %vm2271_vm5, %v12076_v29, %v4658_v33  ;;  %v4730_v22 = vrot.slane %v10233_v44, 1  ;;  %s523_s26 = sand.u32 1, %s7611_s22  }
 0x67c   : > { %6943 = vmatpush.bf16.msra.mxu3 %v10744_v2  ;;  %v4776_v2 = vrot.slane %v10775_v13, 1  ;;  %v7163_v13 = vpop.permute.xlu0 %7162  ;;  %s6427_s28 = sshll.u32 %s523_s26, 8  ;;  %s6337_s17 = scalar_lea.sflag [#allocation3], %s523_s26 }
 0x67d   : > { %5334 = vmatmul.bf16.vlgmr.msrb.gmra.mxu3 %v5103_v27  ;;  %v7164_v33 = vunpack.i.l.bf16 %v7163_v13  ;;  %v4733_v10 = vsel %vm2400_vm11, %v4730_v22, %v4732_v35  ;;  %s11733_s27 = scalar_lea.vmem [#allocation2], %s6427_s28 }
 0x67e   : > { %s6349_s23 = sshll.u32 %s11733_s27, 4  ;;  %s6350_s23 = int_to_ptr.vmem [resolvable:$true] %s6349_s23 }
 0x67f   : > { %6748 = vmatmul.msk.bf16.gmra.mxu2 %vm2785_vm14, %v5104_v39  ;;  %v4644_v39 = vrot.slane %v10880_v52, 7 }
 0x680   : > { %6944 = vmatpush.bf16.msra.mxu3 %v10767_v38 }
 0x681   : > { %v10975_v38 = vsel %vm2271_vm5, %v4644_v39, %v4646_v43 }
 0x684   : > { %6945 = vmatpush.bf16.msra.mxu3 %v10809_v7  ;;  %v10983_v7 = vsel %vm2400_vm11, %v4774_v51, %v4776_v2  ;;  %v7165_v51 = vunpack.i.h.bf16 %v7163_v13  ;;  %v4731_v13 = vsel %vm2400_vm11, %v4728_v58, %v4730_v22  ;;  %v7168_v58 = vpop.permute.xlu1 %7167 }
 0x688   : > { %6946 = vmatpush.bf16.msra.mxu3 %v10849_v47  ;;  %v11001_v47 = vsel %vm2400_vm11, %v12072_v46, %v12075_v15 }
 0x68b   : > { %5591 = vmatmul.bf16.gmra.mxu1 %v5103_v27  ;;  %v4602_v27 = vrot.slane %v10233_v44, 7 }
 0x68c   : > { %6947 = vmatpush.bf16.msra.mxu3 %v10890_v1  ;;  %v11004_v1 = vpop.permute.xlu2 %7172 }
 0x690   : > { %6948 = vmatpush.bf16.msra.mxu3 %v10912_v45  ;;  %v11020_v45 = vsel %vm2400_vm11, %v4776_v2, %v12074_v16  ;;  %v12077_v2 = vrot.slane %v10429_v60, 7  ;;  %v12276_v16 = vld [vmem:[#allocation19_spill] sm:$0xff] }
 0x691   : > { %v4824_v34 = vmul.f32 %v12276_v16, %v4733_v10  ;;  %v4604_v10 = vrot.slane %v10205_v37, 7  ;;  %v12278_v16 = vld [vmem:[#allocation11_spill] sm:$0xff]  ;;  %v4606_v37 = vrot.slane %v10209_v59, 7 }
 0x694   : > { %6949 = vmatpush.bf16.msra.mxu3 %v6899_v31  ;;  %v4600_v31 = vrot.slane %v10228_v62, 7 }
 0x696   : > { %v4601_v43 = vsel %vm2271_vm5, %v4598_v30, %v4600_v31  ;;  %v4603_v46 = vsel %vm2271_vm5, %v4600_v31, %v4602_v27  ;;  %v4633_v30 = vsel %vm2271_vm5, %v12077_v2, %v4632_v12 }
 0x697   : > { %v4695_v40 = vmul.f32 %v12275_v4, %v4601_v43  ;;  %v4952_v44 = vsel %vm2785_vm14, %v4603_v46, %v7165_v51  ;;  %v4765_v4 = vsel %vm2400_vm11, %v4762_v42, %v12079_v50 }
 0x698   : > { %6950 = vmatpush.bf16.msra.mxu3 %v6898_v57  ;;  %v11023_v57 = vpop.permute.xlu2 %7187  ;;  %v4984_v31 = vpack.c.bf16 %v4824_v34, %v4952_v44  ;;  %v4840_v29 = vmul.f32 %v12278_v16, %v4765_v4  ;;  %v4736_v44 = vrot.slane %v10389_v0, 1  ;;  %v4734_v34 = vrot.slane %v10209_v59, 1 }
 0x699   : > { %v4951_v6 = vsel %vm2785_vm14, %v4695_v40, %v7164_v33  ;;  %v12277_v40 = vld [vmem:[#allocation27_spill] sm:$0xff]  ;;  %v7170_v4 = vunpack.i.h.bf16 %v7168_v58  ;;  %v4607_v59 = vsel %vm2271_vm5, %v4604_v10, %v4606_v37 }
 0x69a   : > { %v4983_v43 = vpack.c.bf16 %v4731_v13, %v4951_v6  ;;  %v4711_v33 = vmul.f32 %v12277_v40, %v4633_v30  ;;  %v5049_v6 = vunpack.c.l.b16 %v4984_v31  ;;  %v5050_v30 = vunpack.c.h.b16 %v4984_v31  ;;  %v12280_v31 = vld [vmem:[#allocation18_spill] sm:$0xff] }
 0x69b   : > { %v4605_v13 = vsel %vm2271_vm5, %v4602_v27, %v4604_v10  ;;  %v7169_v40 = vunpack.i.l.bf16 %v7168_v58  ;;  %v4735_v16 = vsel %vm2400_vm11, %v4732_v35, %v4734_v34  ;;  %v11078_v58 = vpop.permute.xlu0 %7177  ;;  %v4740_v10 = vrot.slane %v10349_v61, 1 }
 0x69c   : > { %v5047_v42 = vunpack.c.l.b16 %v4983_v43  ;;  %v7175_v35 = vunpack.i.h.bf16 %v11004_v1 }
 0x6ad   : > { %v7203_v15 = vpop.permute.xlu2 %7202 }
 0x6ae   : > { %v7205_v46 = vunpack.i.h.bf16 %v7203_v15  ;;  %v7204_v51 = vunpack.i.l.bf16 %v7203_v15  ;;  %v5048_v15 = vunpack.c.h.b16 %v4983_v43  ;;  %v4954_v43 = vsel %vm2785_vm14, %v4607_v59, %v7170_v4  ;;  %v11092_v59 = vpop.permute.xlu0 %7192 }
 0x6b0   : > { %v4968_v12 = vsel %vm2785_vm14, %v4635_v41, %v7205_v46  ;;  %v4967_v62 = vsel %vm2785_vm14, %v4711_v33, %v7204_v51  ;;  %v11061_v41 = vpack.c.b16 %v5049_v6, %v5047_v42  ;;  %v12279_v33 = vld [vmem:[#allocation35_spill] sm:$0xff]  ;;  %v4608_v42 = vrot.slane %v10389_v0, 7 }
 0x6b1   : > { %v11053_v22 = vpack.c.bf16 %v4840_v29, %v4968_v12  ;;  %v11055_v2 = vpack.c.bf16 %v4763_v19, %v4967_v62  ;;  %v11063_v29 = vpack.c.b16 %v5050_v30, %v5048_v15  ;;  %v4737_v19 = vsel %vm2400_vm11, %v4734_v34, %v4736_v44 }
 0x6b2   : > { %5339 = vmatmul.bf16.gmra.mxu3 %v11061_v41  ;;  %5596 = vmatmul.bf16.gmra.mxu1 %v11061_v41  ;;  %v4697_v46 = vmul.f32 %v12279_v33, %v4605_v13  ;;  %v4826_v51 = vmul.f32 %v12280_v31, %v4737_v19  ;;  %v4609_v4 = vsel %vm2271_vm5, %v4606_v37, %v4608_v42  ;;  %v4610_v19 = vrot.slane %v10398_v28, 7 }
 0x6b3   : > { %6685 = vmatmul.msk.bf16.gmra.mxu0 %vm2785_vm14, %v11063_v29  ;;  %6749 = vmatmul.msk.bf16.gmra.mxu2 %vm2785_vm14, %v11063_v29  ;;  %v7174_v34 = vunpack.i.l.bf16 %v11004_v1  ;;  %v12078_v0 = vrot.slane %v10606_v18, 7 }
 0x6b4   : > { %v4953_v27 = vsel %vm2785_vm14, %v4697_v46, %v7169_v40  ;;  %v4986_v62 = vpack.c.bf16 %v4826_v51, %v4954_v43  ;;  %v4738_v40 = vrot.slane %v10398_v28, 1  ;;  %v4611_v1 = vsel %vm2271_vm5, %v4608_v42, %v4610_v19  ;;  %v12282_v51 = vld [vmem:[#allocation21_spill] sm:$0xff] }
 0x6b5   : > { %v4985_v12 = vpack.c.bf16 %v4735_v16, %v4953_v27  ;;  %v12281_v27 = vld [vmem:[#allocation36_spill] sm:$0xff]  ;;  %v4956_v43 = vsel %vm2785_vm14, %v4611_v1, %v7175_v35  ;;  %v12284_v35 = vld [vmem:[#allocation13_spill] sm:$0xff] }
 0x6b6   : > { %v5053_v15 = vunpack.c.l.b16 %v4986_v62  ;;  %v5054_v13 = vunpack.c.h.b16 %v4986_v62  ;;  %v4699_v37 = vmul.f32 %v12281_v27, %v4609_v4  ;;  %v4741_v28 = vsel %vm2400_vm11, %v4738_v40, %v4740_v10 }
 0x6b7   : > { %v5051_v6 = vunpack.c.l.b16 %v4985_v12  ;;  %v5052_v30 = vunpack.c.h.b16 %v4985_v12  ;;  %v4828_v16 = vmul.f32 %v12282_v51, %v4741_v28  ;;  %v4645_v12 = vsel %vm2271_vm5, %v12078_v0, %v4644_v39 }
 0x6b8   : > { %v4955_v31 = vsel %vm2785_vm14, %v4699_v37, %v7174_v34  ;;  %v4739_v62 = vsel %vm2400_vm11, %v4736_v44, %v4738_v40  ;;  %v4846_v34 = vmul.f32 %v12284_v35, %v10983_v7  ;;  %v4612_v37 = vrot.slane %v10349_v61, 7  ;;  %v11124_v40 = vpop.permute.xlu0 %7207 }
 0x6b9   : > { %v11085_v33 = vpack.c.b16 %v5053_v15, %v5051_v6  ;;  %v11089_v46 = vpack.c.b16 %v5054_v13, %v5052_v30  ;;  %v4988_v6 = vpack.c.bf16 %v4828_v16, %v4956_v43  ;;  %v4987_v15 = vpack.c.bf16 %v4739_v62, %v4955_v31  ;;  %v12283_v13 = vld [vmem:[#allocation31_spill] sm:$0xff] }
 0x6ba   : > { %v4717_v4 = vmul.f32 %v12283_v13, %v4645_v12  ;;  %v4744_v7 = vrot.slane %v10304_v11, 1  ;;  %v4742_v61 = vrot.slane %v10356_v56, 1  ;;  %v4614_v12 = vrot.slane %v10356_v56, 7 }
 0x6bb   : > { %v5055_v43 = vunpack.c.l.b16 %v4987_v15  ;;  %v5057_v31 = vunpack.c.l.b16 %v4988_v6  ;;  %v5058_v51 = vunpack.c.h.b16 %v4988_v6  ;;  %v5056_v16 = vunpack.c.h.b16 %v4987_v15 }
 0x6bc   : > { %v4613_v62 = vsel %vm2271_vm5, %v4610_v19, %v4612_v37  ;;  %v7179_v13 = vunpack.i.l.bf16 %v11078_v58  ;;  %v4745_v15 = vsel %vm2400_vm11, %v4742_v61, %v4744_v7  ;;  %v4615_v56 = vsel %vm2271_vm5, %v4612_v37, %v4614_v12  ;;  %v12285_v19 = vld [vmem:[#allocation37_spill] sm:$0xff] }
 0x6bd   : > { %v11136_v6 = vpack.c.b16 %v5058_v51, %v5056_v16  ;;  %v12287_v35 = vrot.slane %v10944_v48, 1  ;;  %v12289_v48 = vrot.slane %v10795_v49, 1 }
 0x6c2   : > { %5344 = vmatmul.bf16.gmra.mxu3 %v11085_v33  ;;  %5601 = vmatmul.bf16.gmra.mxu1 %v11085_v33 }
 0x6c3   : > { %6686 = vmatmul.msk.bf16.gmra.mxu0 %vm2785_vm14, %v11089_v46  ;;  %6750 = vmatmul.msk.bf16.gmra.mxu2 %vm2785_vm14, %v11089_v46 }
 0x6cb   : > { %v7218_v30 = vpop.permute.xlu2 %7217 }
 0x6cc   : > { %v7220_v42 = vunpack.i.h.bf16 %v7218_v30  ;;  %v7219_v27 = vunpack.i.l.bf16 %v7218_v30  ;;  %v7180_v30 = vunpack.i.h.bf16 %v11078_v58 }
 0x6ce   : > { %v4974_v28 = vsel %vm2785_vm14, %v10975_v38, %v7220_v42  ;;  %v4973_v1 = vsel %vm2785_vm14, %v4717_v4, %v7219_v27  ;;  %v12080_v38 = vrot.slane %v10719_v25, 7  ;;  %v12081_v4 = vrot.slane %v10712_v36, 1 }
 0x6cf   : > { %v11119_v39 = vpack.c.bf16 %v4846_v34, %v4974_v28  ;;  %v11122_v44 = vpack.c.bf16 %v10980_v26, %v4973_v1  ;;  %v11132_v26 = vpack.c.b16 %v5057_v31, %v5055_v43  ;;  %v4701_v42 = vmul.f32 %v12285_v19, %v4613_v62  ;;  %v12288_v1 = vld [vmem:[#allocation22_spill] sm:$0xff]  ;;  %v12290_v62 = vld [vmem:[#allocation17_spill] sm:$0xff] }
 0x6d0   : > { %v12286_v27 = vrot.slane %v10938_v20, 7  ;;  %v4820_v34 = vsel %vm2400_vm11, %v12287_v35, 0.0  ;;  %v4958_v37 = vsel %vm2785_vm14, %v4615_v56, %v7180_v30  ;;  %v4743_v28 = vsel %vm2400_vm11, %v4740_v10, %v4742_v61  ;;  %v12292_v10 = vld [vmem:[#allocation33_spill] sm:$0xff] }
 0x6d1   : > { %v4830_v43 = vmul.f32 %v12288_v1, %v4745_v15  ;;  %v4957_v31 = vsel %vm2785_vm14, %v4701_v42, %v7179_v13  ;;  %v4781_v16 = vsel %vm2400_vm11, %v12289_v48, %v12081_v4  ;;  %v4719_v61 = vmul.f32 %v12292_v10, %v11010_v63  ;;  %v12293_v48 = vld [vmem:[#allocation15_spill] sm:$0xff] }
 0x6d2   : > { %5349 = vmatmul.bf16.gmra.mxu3 %v11132_v26  ;;  %5606 = vmatmul.bf16.gmra.mxu1 %v11132_v26  ;;  %v4657_v58 = vsel %vm2271_vm5, %v12080_v38, %v12286_v27  ;;  %v12291_v27 = vld [vmem:[#allocation16_spill] sm:$0xff]  ;;  %v4989_v42 = vpack.c.bf16 %v4743_v28, %v4957_v31  ;;  %v4848_v4 = vmul.f32 %v12293_v48, %v4781_v16  ;;  %v7183_v16 = vpop.permute.xlu1 %7182  ;;  %v4620_v48 = vrot.slane %v10516_v54, 7 }
 0x6d3   : > { %6687 = vmatmul.msk.bf16.gmra.mxu0 %vm2785_vm14, %v11136_v6  ;;  %6751 = vmatmul.msk.bf16.gmra.mxu2 %vm2785_vm14, %v11136_v6  ;;  %v4723_v19 = vmul.f32 %v12290_v62, %v4657_v58  ;;  %v4852_v35 = vmul.f32 %v12291_v27, %v4820_v34  ;;  %v4990_v56 = vpack.c.bf16 %v4830_v43, %v4958_v37 }
 0x6d5   : > { %v7233_v51 = vpop.permute.xlu2 %7232  ;;  %v5062_v31 = vunpack.c.h.b16 %v4990_v56 }
 0x6d6   : > { %v7235_v0 = vunpack.i.h.bf16 %v7233_v51  ;;  %v7234_v50 = vunpack.i.l.bf16 %v7233_v51  ;;  %v5060_v51 = vunpack.c.h.b16 %v4989_v42 }
 0x6d8   : > { %v4980_v1 = vsel %vm2785_vm14, %v10994_v24, %v7235_v0  ;;  %v4979_v38 = vsel %vm2785_vm14, %v4723_v19, %v7234_v50  ;;  %v4616_v24 = vrot.slane %v10304_v11, 7  ;;  %v5059_v50 = vunpack.c.l.b16 %v4989_v42 }
 0x6d9   : > { %v7223_v30 = vpop.permute.xlu0 %7222  ;;  %v11174_v58 = vpack.c.bf16 %v4852_v35, %v4980_v1  ;;  %v11177_v34 = vpack.c.bf16 %v11001_v47, %v4979_v38  ;;  %v5061_v0 = vunpack.c.l.b16 %v4990_v56  ;;  %v4748_v47 = vrot.slane %v10516_v54, 1  ;;  %v12294_v35 = vld [vmem:[#allocation39_spill] sm:$0xff] }
 0x6da   : > { %v7225_v15 = vunpack.i.h.bf16 %v7223_v30  ;;  %v7224_v13 = vunpack.i.l.bf16 %v7223_v30  ;;  %v4746_v38 = vrot.slane %v10309_v8, 1  ;;  %v4617_v62 = vsel %vm2271_vm5, %v4614_v12, %v4616_v24 }
 0x6db   : > { %v7185_v19 = vunpack.i.h.bf16 %v7183_v16  ;;  %v11194_v27 = vpack.c.b16 %v5062_v31, %v5060_v51  ;;  %v4703_v30 = vmul.f32 %v12294_v35, %v4617_v62  ;;  %v4750_v31 = vrot.slane %v10527_v17, 1 }
 0x6dc   : > { %v4976_v37 = vsel %vm2785_vm14, %v11015_v3, %v7225_v15  ;;  %v4975_v63 = vsel %vm2785_vm14, %v4719_v61, %v7224_v13  ;;  %v4618_v3 = vrot.slane %v10309_v8, 7  ;;  %v4749_v56 = vsel %vm2400_vm11, %v4746_v38, %v4748_v47  ;;  %v12295_v61 = vld [vmem:[#allocation23_spill] sm:$0xff] }
 0x6dd   : > { %v11182_v43 = vpack.c.bf16 %v4848_v4, %v4976_v37  ;;  %v11185_v28 = vpack.c.bf16 %v11020_v45, %v4975_v63  ;;  %v11192_v4 = vpack.c.b16 %v5061_v0, %v5059_v50  ;;  %v7184_v45 = vunpack.i.l.bf16 %v7183_v16 }
 0x6de   : > { %v4619_v8 = vsel %vm2271_vm5, %v4616_v24, %v4618_v3  ;;  %v4832_v15 = vmul.f32 %v12295_v61, %v4749_v56  ;;  %v4747_v13 = vsel %vm2400_vm11, %v4744_v7, %v4746_v38  ;;  %v4752_v24 = vrot.slane %v10469_v9, 1  ;;  %v11220_v38 = vpop.permute.xlu1 %7197  ;;  %v12297_v61 = vld [vmem:[#allocation24_spill] sm:$0xff] }
 0x6df   : > { %v4960_v12 = vsel %vm2785_vm14, %v4619_v8, %v7185_v19  ;;  %v4959_v10 = vsel %vm2785_vm14, %v4703_v30, %v7184_v45  ;;  %v4621_v51 = vsel %vm2271_vm5, %v4618_v3, %v4620_v48  ;;  %v4622_v16 = vrot.slane %v10527_v17, 7  ;;  %v12296_v19 = vld [vmem:[#allocation38_spill] sm:$0xff] }
 0x6e0   : > { %v4992_v42 = vpack.c.bf16 %v4832_v15, %v4960_v12  ;;  %v4991_v1 = vpack.c.bf16 %v4747_v13, %v4959_v10  ;;  %v7190_v11 = vunpack.i.h.bf16 %v11023_v57  ;;  %v7189_v7 = vunpack.i.l.bf16 %v11023_v57  ;;  %v6933_v57 = vld [vmem:[%s12011_s12 + $0x118] sm:$0xff] }
 0x6e1   : > { %v4705_v45 = vmul.f32 %v12296_v19, %v4621_v51  ;;  %v4753_v17 = vsel %vm2400_vm11, %v4750_v31, %v4752_v24  ;;  %v5082_v3 = vunpack.c.h.b16 %v11053_v22  ;;  %v5080_v35 = vunpack.c.h.b16 %v11055_v2  ;;  %5946 = vmatpush.bf16.msrb.mxu0 %v6933_v57 }
 0x6e2   : > { %5354 = vmatmul.bf16.gmra.mxu3 %v11192_v4  ;;  %5611 = vmatmul.bf16.gmra.mxu1 %v11192_v4  ;;  %v5063_v37 = vunpack.c.l.b16 %v4991_v1  ;;  %v5065_v63 = vunpack.c.l.b16 %v4992_v42  ;;  %v5066_v50 = vunpack.c.h.b16 %v4992_v42  ;;  %v5064_v0 = vunpack.c.h.b16 %v4991_v1 }
 0x6e3   : > { %6688 = vmatmul.msk.bf16.gmra.mxu0 %vm2785_vm14, %v11194_v27  ;;  %6752 = vmatmul.msk.bf16.gmra.mxu2 %vm2785_vm14, %v11194_v27  ;;  %v4623_v30 = vsel %vm2271_vm5, %v4620_v48, %v4622_v16  ;;  %v4961_v8 = vsel %vm2785_vm14, %v4705_v45, %v7189_v7  ;;  %v5079_v12 = vunpack.c.l.b16 %v11055_v2  ;;  %v5081_v10 = vunpack.c.l.b16 %v11053_v22 }
 0x6e4   : > { %v11216_v62 = vpack.c.b16 %v5065_v63, %v5063_v37  ;;  %v11222_v54 = vpack.c.b16 %v5066_v50, %v5064_v0  ;;  %v4962_v56 = vsel %vm2785_vm14, %v4623_v30, %v7190_v11  ;;  %v4834_v15 = vmul.f32 %v12297_v61, %v4753_v17  ;;  %v12298_v17 = vld [vmem:[#allocation44_spill] sm:$0xff] }
 0x6e5   : > { %v4751_v13 = vsel %vm2400_vm11, %v4748_v47, %v4750_v31  ;;  %v11246_v42 = vpack.c.b16 %v5081_v10, %v5079_v12  ;;  %v11248_v1 = vpack.c.b16 %v5082_v3, %v5080_v35  ;;  %v5094_v48 = vunpack.c.h.b16 %v11119_v39  ;;  %v12299_v61 = vld [vmem:[#allocation40_spill] sm:$0xff] }
 0x6e6   : > { %v4994_v37 = vpack.c.bf16 %v4834_v15, %v4962_v56  ;;  %v4993_v63 = vpack.c.bf16 %v4751_v13, %v4961_v8  ;;  %v5092_v50 = vunpack.c.h.b16 %v11122_v44  ;;  %v4624_v0 = vrot.slane %v10469_v9, 7  ;;  %v11253_v51 = vpop.permute.xlu1 %7212 }
 0x6e7   : > { %v5091_v47 = vunpack.c.l.b16 %v11122_v44  ;;  %v5093_v31 = vunpack.c.l.b16 %v11119_v39  ;;  %v4756_v19 = vrot.slane %v10419_v55, 1  ;;  %v4754_v3 = vrot.slane %v12298_v17, 1 }
 0x6e8   : > { %v5067_v2 = vunpack.c.l.b16 %v4993_v63  ;;  %v5069_v22 = vunpack.c.l.b16 %v4994_v37  ;;  %v5070_v11 = vunpack.c.h.b16 %v4994_v37  ;;  %v5068_v7 = vunpack.c.h.b16 %v4993_v63 }
 0x6e9   : > { %v4625_v45 = vsel %vm2271_vm5, %v4622_v16, %v4624_v0  ;;  %v11260_v35 = vpack.c.b16 %v5093_v31, %v5091_v47  ;;  %v11262_v57 = vpack.c.b16 %v5094_v48, %v5092_v50  ;;  %v4626_v30 = vrot.slane %v12298_v17, 7 }
 0x6ea   : > { %v11265_v56 = vpack.c.b16 %v5069_v22, %v5067_v2  ;;  %v7195_v8 = vunpack.i.h.bf16 %v11092_v59  ;;  %v7194_v44 = vunpack.i.l.bf16 %v11092_v59  ;;  %v11269_v12 = vpack.c.b16 %v5070_v11, %v5068_v7 }
 0x6eb   : > { %v4707_v16 = vmul.f32 %v12299_v61, %v4625_v45  ;;  %v4757_v13 = vsel %vm2400_vm11, %v4754_v3, %v4756_v19  ;;  %v5202_v37 = vunpack.c.h.b16 %v11174_v58  ;;  %v5200_v63 = vunpack.c.h.b16 %v11177_v34  ;;  %v12300_v45 = vld [vmem:[#allocation25_spill] sm:$0xff] }
 0x6ec   : > { %v4652_v59 = vrot.slane %v10712_v36, 7  ;;  %v4627_v50 = vsel %vm2271_vm5, %v4624_v0, %v4626_v30  ;;  %v5199_v47 = vunpack.c.l.b16 %v11177_v34  ;;  %v5201_v31 = vunpack.c.l.b16 %v11174_v58 }
 0x6ed   : > { %v4964_v22 = vsel %vm2785_vm14, %v4627_v50, %v7195_v8  ;;  %v4963_v11 = vsel %vm2785_vm14, %v4707_v16, %v7194_v44  ;;  %v4836_v17 = vmul.f32 %v12300_v45, %v4757_v13  ;;  %v12301_v0 = vrot.slane %v10795_v49, 7 }
 0x6ee   : > { %v7228_v7 = vpop.permute.xlu1 %7227  ;;  %v11299_v8 = vpack.c.b16 %v5201_v31, %v5199_v47  ;;  %v11301_v44 = vpack.c.b16 %v5202_v37, %v5200_v63  ;;  %v12304_v50 = vrot.slane %v10938_v20, 1  ;;  %v12305_v49 = vrot.slane %v10719_v25, 7  ;;  %v12306_v31 = vld [vmem:[#allocation14_spill] sm:$0xff] }
 0x6ef   : > { %v5424_v39 = vpop.f32.mrf.mxu0  ;;  %v4653_v61 = vsel %vm2271_vm5, %v12301_v0, %v4652_v59  ;;  %v4996_v16 = vpack.c.bf16 %v4836_v17, %v4964_v22  ;;  %v7229_v58 = vunpack.i.l.bf16 %v7228_v7  ;;  %v4758_v20 = vrot.slane %v10429_v60, 1 }
 0x6f0   : > { %12302 = vst [vmem:[#allocation42_spill] sm:$0xff] %v11299_v8  ;;  %v12307_v17 = vrot.slane %v10712_v36, 1 }
 0x6f1   : > { %v5073_v22 = vunpack.c.l.b16 %v4996_v16 }
 0x6f2   : > { %5359 = vmatmul.bf16.gmra.mxu3 %v11216_v62  ;;  %5616 = vmatmul.bf16.gmra.mxu1 %v11216_v62 }
 0x6f3   : > { %6689 = vmatmul.msk.bf16.gmra.mxu0 %vm2785_vm14, %v11222_v54  ;;  %6753 = vmatmul.msk.bf16.gmra.mxu2 %vm2785_vm14, %v11222_v54 }
 0x6f8   : > { %v5587_v48 = vpop.f32.mrf.mxu1 }
 0x700   : > { %v5335_v10 = vpop.f32.mrf.mxu3 }
 0x701   : > { %v5425_v15 = vadd.f32 %v5424_v39, %v5335_v10  ;;  %v4782_v39 = vrot.slane %v10719_v25, 1  ;;  %v4755_v10 = vsel %vm2400_vm11, %v4752_v24, %v4754_v3  ;;  %v4628_v24 = vrot.slane %v10419_v55, 7 }
 0x702   : > { %5364 = vmatmul.bf16.gmra.mxu3 %v11265_v56  ;;  %5621 = vmatmul.bf16.gmra.mxu1 %v11265_v56  ;;  %v4995_v34 = vpack.c.bf16 %v4755_v10, %v4963_v11  ;;  %v4655_v3 = vsel %vm2271_vm5, %v4652_v59, %v12305_v49  ;;  %v5074_v11 = vunpack.c.h.b16 %v4996_v16  ;;  %v5096_v49 = vunpack.c.h.b16 %v11185_v28 }
 0x703   : > { %6690 = vmatmul.msk.bf16.gmra.mxu0 %vm2785_vm14, %v11269_v12  ;;  %6754 = vmatmul.msk.bf16.gmra.mxu2 %vm2785_vm14, %v11269_v12  ;;  %v11285_v2 = vadd.f32 %v5587_v48, %v5425_v15  ;;  %v7230_v15 = vunpack.i.h.bf16 %v7228_v7  ;;  %v12303_v48 = vld [vmem:[#allocation34_spill] sm:$0xff]  ;;  %v4785_v9 = vsel %vm2400_vm11, %v4782_v39, %v12304_v50  ;;  %v4783_v10 = vsel %vm2400_vm11, %v12307_v17, %v4782_v39 }
 0x704   : > { %v4721_v13 = vmul.f32 %v12303_v48, %v4653_v61  ;;  %v5071_v63 = vunpack.c.l.b16 %v4995_v34  ;;  %v5072_v7 = vunpack.c.h.b16 %v4995_v34  ;;  %v4850_v45 = vmul.f32 %v12306_v31, %v4785_v9 }
 0x705   : > { %v4978_v47 = vsel %vm2785_vm14, %v4655_v3, %v7230_v15  ;;  %v4629_v25 = vsel %vm2271_vm5, %v4626_v30, %v4628_v24  ;;  %v7200_v61 = vunpack.i.h.bf16 %v11220_v38  ;;  %v7199_v15 = vunpack.i.l.bf16 %v11220_v38  ;;  %v11336_v3 = vpop.f32.mrf.mxu1 }
 0x706   : > { %v4977_v37 = vsel %vm2785_vm14, %v4721_v13, %v7229_v58  ;;  %v5010_v0 = vpack.c.bf16 %v4850_v45, %v4978_v47  ;;  %v11321_v58 = vpack.c.b16 %v5073_v22, %v5071_v63  ;;  %v11323_v16 = vpack.c.b16 %v5074_v11, %v5072_v7  ;;  %v12309_v13 = vld [vmem:[#allocation41_spill] sm:$0xff]  ;;  %v12311_v11 = vld [vmem:[#allocation26_spill] sm:$0xff] }
 0x707   : > { %v5009_v59 = vpack.c.bf16 %v4783_v10, %v4977_v37  ;;  %v12308_v34 = vrot.slane %v10429_v60, 7  ;;  %v4709_v36 = vmul.f32 %v12309_v13, %v4629_v25  ;;  %v12310_v39 = vrot.slane %v10684_v32, 1 }
 0x708   : > { %v5102_v50 = vunpack.c.h.b16 %v5010_v0  ;;  %v5098_v9 = vunpack.c.h.b16 %v11182_v43  ;;  %v5097_v47 = vunpack.c.l.b16 %v11182_v43  ;;  %v5101_v63 = vunpack.c.l.b16 %v5010_v0  ;;  %v11372_v13 = vpop.f32.mrf.mxu3 }
 0x709   : > { %v4631_v48 = vsel %vm2271_vm5, %v4628_v24, %v12308_v34  ;;  %v4761_v30 = vsel %vm2400_vm11, %v4758_v20, %v12310_v39  ;;  %v5100_v38 = vunpack.c.h.b16 %v5009_v59  ;;  %v4965_v32 = vsel %vm2785_vm14, %v4709_v36, %v7199_v15  ;;  %v11369_v34 = vpop.f32.mrf.mxu0 }
 0x70a   : > { %v4966_v60 = vsel %vm2785_vm14, %v4631_v48, %v7200_v61  ;;  %v5095_v24 = vunpack.c.l.b16 %v11185_v28  ;;  %v5099_v37 = vunpack.c.l.b16 %v5009_v59  ;;  %v4759_v22 = vsel %vm2400_vm11, %v4756_v19, %v4758_v20 }
 0x70b   : > { %v4838_v7 = vmul.f32 %v12311_v11, %v4761_v30  ;;  %v11352_v45 = vpack.c.b16 %v5098_v9, %v5096_v49  ;;  %v11356_v10 = vpack.c.b16 %v5102_v50, %v5100_v38  ;;  %v4997_v28 = vpack.c.bf16 %v4759_v22, %v4965_v32 }
 0x70c   : > { %v11350_v31 = vpack.c.b16 %v5097_v47, %v5095_v24  ;;  %v11354_v17 = vpack.c.b16 %v5101_v63, %v5099_v37  ;;  %v4636_v48 = vrot.slane %v10618_v53, 7  ;;  %v4768_v36 = vrot.slane %v10594_v21, 1  ;;  %v12314_v24 = vld [vmem:[#allocation28_spill] sm:$0xff] }
 0x70d   : > { %v4998_v25 = vpack.c.bf16 %v4838_v7, %v4966_v60  ;;  %v5075_v61 = vunpack.c.l.b16 %v4997_v28  ;;  %v5076_v0 = vunpack.c.h.b16 %v4997_v28  ;;  %v5592_v15 = vpop.f32.mrf.mxu1  ;;  %v4766_v39 = vrot.slane %v10626_v5, 1 }
 0x70e   : > { %12312 = vst [vmem:[#allocation43_spill] sm:$0xff] %v11354_v17  ;;  %v4638_v50 = vrot.slane %v10626_v5, 7  ;;  %v12313_v38 = vrot.slane %v10691_v23, 7  ;;  %v7210_v60 = vunpack.i.h.bf16 %v11124_v40  ;;  %v7209_v32 = vunpack.i.l.bf16 %v11124_v40  ;;  %v12315_v40 = vld [vmem:[#allocation10_spill] sm:$0xff] }
 0x70f   : > { %v5077_v43 = vunpack.c.l.b16 %v4998_v25  ;;  %v5078_v59 = vunpack.c.h.b16 %v4998_v25  ;;  %v4769_v37 = vsel %vm2400_vm11, %v4766_v39, %v4768_v36  ;;  %v12316_v25 = vrot.slane %v10618_v53, 1 }
 0x710   : > { %v4637_v9 = vsel %vm2271_vm5, %v12313_v38, %v4636_v48  ;;  %v4639_v5 = vsel %vm2271_vm5, %v4636_v48, %v4638_v50  ;;  %v4842_v11 = vmul.f32 %v12315_v40, %v4769_v37  ;;  %v6932_v48 = vld [vmem:[%s12011_s12 + $0x110] sm:$0xff]  ;;  %v12317_v40 = vld [vmem:[#allocation29_spill] sm:$0xff] }
 0x711   : > { %v11358_v55 = vpack.c.b16 %v5077_v43, %v5075_v61  ;;  %v11360_v19 = vpack.c.b16 %v5078_v59, %v5076_v0  ;;  %v4713_v47 = vmul.f32 %v12314_v24, %v4637_v9  ;;  %v4970_v23 = vsel %vm2785_vm14, %v4639_v5, %v7210_v60  ;;  %5947 = vmatpush.bf16.msrb.mxu0 %v6932_v48  ;;  %v12320_v48 = vld [vmem:[#allocation12_spill] sm:$0xff] }
 0x712   : > { %5369 = vmatmul.bf16.gmra.mxu3 %v11321_v58  ;;  %5626 = vmatmul.bf16.gmra.mxu1 %v11321_v58  ;;  %v4767_v28 = vsel %vm2400_vm11, %v12316_v25, %v4766_v39  ;;  %v5002_v61 = vpack.c.bf16 %v4842_v11, %v4970_v23  ;;  %v4640_v9 = vrot.slane %v10594_v21, 7  ;;  %v7214_v21 = vunpack.i.l.bf16 %v11253_v51 }
 0x713   : > { %6691 = vmatmul.msk.bf16.gmra.mxu0 %vm2785_vm14, %v11323_v16  ;;  %6755 = vmatmul.msk.bf16.gmra.mxu2 %vm2785_vm14, %v11323_v16  ;;  %v4969_v63 = vsel %vm2785_vm14, %v4713_v47, %v7209_v32  ;;  %v11407_v47 = vpop.f32.mrf.mxu2 }
 0x714   : > { %v5001_v43 = vpack.c.bf16 %v4767_v28, %v4969_v63  ;;  %v5086_v32 = vunpack.c.h.b16 %v5002_v61  ;;  %v4641_v37 = vsel %vm2271_vm5, %v4638_v50, %v4640_v9  ;;  %v7215_v63 = vunpack.i.h.bf16 %v11253_v51 }
 0x715   : > { %v11367_v20 = vpop.f32.mrf.mxu1  ;;  %v4715_v11 = vmul.f32 %v12317_v40, %v4641_v37  ;;  %v12319_v50 = vrot.slane %v10606_v18, 7 }
 0x716   : > { %v5083_v60 = vunpack.c.l.b16 %v5001_v43  ;;  %v5084_v53 = vunpack.c.h.b16 %v5001_v43 }
 0x717   : > { %v4643_v51 = vsel %vm2271_vm5, %v4640_v9, %v12319_v50  ;;  %v4971_v43 = vsel %vm2785_vm14, %v4715_v11, %v7214_v21 }
 0x71b   : > { %v11434_v40 = vpop.f32.mrf.mxu2 }
 0x722   : > { %5374 = vmatmul.bf16.gmra.mxu3 %v11358_v55 }
 0x723   : > { %6692 = vmatmul.msk.bf16.gmra.mxu0 %vm2785_vm14, %v11360_v19  ;;  %6756 = vmatmul.msk.bf16.gmra.mxu2 %vm2785_vm14, %v11360_v19 }
 0x72f   : > { %v5597_v30 = vpop.f32.mrf.mxu1 }
 0x730   : > { %v5429_v49 = vpop.f32.mrf.mxu0 }
 0x732   : > { %5379 = vmatmul.bf16.gmra.mxu3 %v11246_v42 }
 0x733   : > { %6693 = vmatmul.msk.bf16.gmra.mxu0 %vm2785_vm14, %v11248_v1  ;;  %6757 = vmatmul.msk.bf16.gmra.mxu2 %vm2785_vm14, %v11248_v1 }
 0x735   : > { %v5340_v22 = vpop.f32.mrf.mxu3 }
 0x736   : > { %v5430_v7 = vadd.f32 %v5429_v49, %v5340_v22  ;;  %v5085_v49 = vunpack.c.l.b16 %v5002_v61  ;;  %v11414_v22 = vpack.c.b16 %v5086_v32, %v5084_v53  ;;  %v4972_v61 = vsel %vm2785_vm14, %v4643_v51, %v7215_v63 }
 0x737   : > { %v11401_v38 = vpop.f32.mrf.mxu1 }
 0x738   : > { %v11396_v59 = vadd.f32 %v5592_v15, %v5430_v7  ;;  %v5431_v0 = vpop.f32.mrf.mxu0  ;;  %v4770_v15 = vrot.slane %v10606_v18, 1  ;;  %v11410_v23 = vpack.c.b16 %v5085_v49, %v5083_v60  ;;  %v12318_v7 = vrot.slane %v10880_v52, 1 }
 0x73a   : > { %v4773_v25 = vsel %vm2400_vm11, %v4770_v15, %v12318_v7  ;;  %v4771_v49 = vsel %vm2400_vm11, %v4768_v36, %v4770_v15  ;;  %vm12336_vm11 = vcmask 261120  }
 0x73b   : > { %v4844_v52 = vmul.f32 %v12320_v48, %v4773_v25  ;;  %v5003_v53 = vpack.c.bf16 %v4771_v49, %v4971_v43  ;;  %vm12337_vm5 = vmmov %vm12336_vm11 }
 0x73c   : > { %vm12338_vm1 = vmmov %vm12337_vm5 }
 0x73d   : > { %v5342_v24 = vpop.f32.mrf.mxu3  ;;  %v5004_v32 = vpack.c.bf16 %v4844_v52, %v4972_v61  ;;  %v5087_v18 = vunpack.c.l.b16 %v5003_v53  ;;  %v5088_v50 = vunpack.c.h.b16 %v5003_v53  ;;  %vm12339_vm2 = vmmov %vm12338_vm1 }
 0x73e   : > { %v11404_v39 = vadd.f32 %v5431_v0, %v5342_v24  ;;  %vm12340_vm4 = vmmov %vm12338_vm1 }
 0x73f   : > { %v5602_v28 = vpop.f32.mrf.mxu1  ;;  %v5089_v7 = vunpack.c.l.b16 %v5004_v32  ;;  %v5090_v9 = vunpack.c.h.b16 %v5004_v32  ;;  %vm12341_vm6 = vmmov %vm12338_vm1 }
 0x740   : > { %v5434_v5 = vpop.f32.mrf.mxu0  ;;  %vm12342_vm7 = vmmov %vm12338_vm1 }
 0x741   : > { %v11442_v36 = vpack.c.b16 %v5090_v9, %v5088_v50  ;;  %v6935_v9 = vld [vmem:[%s12013_s14 + $0x8] sm:$0xff]  ;;  %vm12343_vm8 = vmmov %vm12338_vm1 }
 0x742   : > { %5384 = vmatmul.bf16.gmra.mxu3 %v11410_v23  ;;  %6189 = vmatpush.bf16.msrb.mxu1 %v6935_v9  ;;  %vm12344_vm0 = vmmov %vm12338_vm1 }
 0x743   : > { %6694 = vmatmul.msk.bf16.gmra.mxu0 %vm2785_vm14, %v11414_v22  ;;  %6758 = vmatmul.msk.bf16.gmra.mxu2 %vm2785_vm14, %v11414_v22  ;;  %vm12345_vm9 = vmmov %vm12344_vm0 }
 0x744   : > { %vm12346_vm10 = vmmov %vm12344_vm0 }
 0x745   : > { %v5345_v0 = vpop.f32.mrf.mxu3  ;;  %vm12347_vm12 = vmmov %vm12344_vm0 }
 0x746   : > { %v5435_v60 = vadd.f32 %v5434_v5, %v5345_v0  ;;  %v11440_v5 = vpack.c.b16 %v5089_v7, %v5087_v18  ;;  %vm12348_vm3 = vmmov %vm12344_vm0 }
 0x747   : > { %v11436_v63 = vpop.f32.mrf.mxu1  ;;  %vm12349_vm13 = vmmov %vm12344_vm0 }
 0x748   : > { %v11432_v24 = vadd.f32 %v5597_v30, %v5435_v60  ;;  %v5436_v37 = vpop.f32.mrf.mxu0  ;;  %v11445_v30 = vpop.f32.mrf.mxu2  ;;  %vm12352_vm15 = vmmov %vm12344_vm0 }
 0x74d   : > { %v5347_v21 = vpop.f32.mrf.mxu3 }
 0x74e   : > { %v11438_v11 = vadd.f32 %v5436_v37, %v5347_v21 }
 0x74f   : > { %v5607_v61 = vpop.f32.mrf.mxu1 }
 0x750   : > { %v5439_v25 = vpop.f32.mrf.mxu0  ;;  %v11453_v48 = vpop.f32.mrf.mxu2 }
 0x752   : > { %5389 = vmatmul.bf16.gmra.mxu3 %v11440_v5 }
 0x753   : > { %6695 = vmatmul.msk.bf16.gmra.mxu0 %vm2785_vm14, %v11442_v36  ;;  %6759 = vmatmul.msk.bf16.gmra.mxu2 %vm2785_vm14, %v11442_v36 }
 0x755   : > { %v5350_v15 = vpop.f32.mrf.mxu3 }
 0x756   : > { %v5440_v51 = vadd.f32 %v5439_v25, %v5350_v15 }
 0x757   : > { %v11457_v32 = vpop.f32.mrf.mxu1 }
 0x758   : > { %v11451_v43 = vadd.f32 %v5602_v28, %v5440_v51  ;;  %v5441_v0 = vpop.f32.mrf.mxu0  ;;  %12321 = vst [vmem:[#allocation30_spill] sm:$0xff] %v11457_v32  ;;  %v11464_v53 = vpop.f32.mrf.mxu2 }
 0x75d   : > { %v5352_v52 = vpop.f32.mrf.mxu3 }
 0x75e   : > { %v11455_v60 = vadd.f32 %v5441_v0, %v5352_v52 }
 0x75f   : > { %v5612_v50 = vpop.f32.mrf.mxu1 }
 0x760   : > { %v5444_v49 = vpop.f32.mrf.mxu0  ;;  %v11473_v15 = vpop.f32.mrf.mxu2 }
 0x762   : > { %5394 = vmatmul.bf16.gmra.mxu3 %v11260_v35 }
 0x763   : > { %6696 = vmatmul.msk.bf16.gmra.mxu0 %vm2785_vm14, %v11262_v57  ;;  %6760 = vmatmul.msk.bf16.gmra.mxu2 %vm2785_vm14, %v11262_v57 }
 0x765   : > { %v5355_v28 = vpop.f32.mrf.mxu3 }
 0x766   : > { %v5445_v37 = vadd.f32 %v5444_v49, %v5355_v28 }
 0x768   : > { %v11466_v18 = vadd.f32 %v5607_v61, %v5445_v37  ;;  %v5446_v7 = vpop.f32.mrf.mxu0  ;;  %v11480_v61 = vpop.f32.mrf.mxu1  ;;  %v6931_v37 = vld [vmem:[%s12011_s12 + $0x108] sm:$0xff] }
 0x769   : > { %12324 = vst [vmem:[#allocation19_spill] sm:$0xff] %v11480_v61  ;;  %5948 = vmatpush.bf16.msrb.mxu0 %v6931_v37  ;;  %v6930_v61 = vld [vmem:[%s12011_s12 + $0x100] sm:$0xff] }
 0x76a   : > { %12322 = vst [vmem:[#allocation20_spill] sm:$0xff] %v11466_v18  ;;  %v6928_v18 = vld [vmem:[%s12011_s12 + $0xf0] sm:$0xff] }
 0x76d   : > { %v5357_v21 = vpop.f32.mrf.mxu3  ;;  %5949 = vmatpush.bf16.msrb.mxu0 %v6930_v61 }
 0x76e   : > { %v11471_v25 = vadd.f32 %v5446_v7, %v5357_v21  ;;  %v11487_v7 = vpop.f32.mrf.mxu2 }
 0x770   : > { %12323 = vst [vmem:[#allocation32_spill] sm:$0xff] %v11471_v25  ;;  %v5449_v51 = vpop.f32.mrf.mxu0  ;;  %v5617_v32 = vpop.f32.mrf.mxu1 }
 0x772   : > { %5399 = vmatmul.bf16.gmra.mxu3 %v11350_v31 }
 0x773   : > { %6697 = vmatmul.msk.bf16.gmra.mxu0 %vm2785_vm14, %v11352_v45  ;;  %6761 = vmatmul.msk.bf16.gmra.mxu2 %vm2785_vm14, %v11352_v45 }
 0x775   : > { %v5360_v0 = vpop.f32.mrf.mxu3 }
 0x776   : > { %v5450_v52 = vadd.f32 %v5449_v51, %v5360_v0  ;;  %v11498_v51 = vpop.f32.mrf.mxu2 }
 0x777   : > { %12327 = vst [vmem:[#allocation35_spill] sm:$0xff] %v11498_v51 }
 0x778   : > { %v11482_v49 = vadd.f32 %v5612_v50, %v5450_v52  ;;  %v5451_v28 = vpop.f32.mrf.mxu0  ;;  %v6929_v50 = vld [vmem:[%s12011_s12 + $0xf8] sm:$0xff] }
 0x779   : > { %5853 = vmatpush.bf16.msrb.mxu3 %v6929_v50 }
 0x77a   : > { %12325 = vst [vmem:[#allocation27_spill] sm:$0xff] %v11482_v49 }
 0x77d   : > { %v5362_v9 = vpop.f32.mrf.mxu3  ;;  %5854 = vmatpush.bf16.msrb.mxu3 %v6928_v18 }
 0x77e   : > { %v11489_v21 = vadd.f32 %v5451_v28, %v5362_v9  ;;  %v11506_v9 = vpop.f32.mrf.mxu1 }
 0x77f   : > { %12329 = vst [vmem:[#allocation36_spill] sm:$0xff] %v11506_v9  ;;  %v6927_v9 = vld [vmem:[%s12011_s12 + $0xe8] sm:$0xff] }
 0x780   : > { %12326 = vst [vmem:[#allocation11_spill] sm:$0xff] %v11489_v21  ;;  %v5454_v25 = vpop.f32.mrf.mxu0 }
 0x781   : > { %5855 = vmatpush.bf16.msrb.mxu3 %v6927_v9 }
 0x782   : > { %5404 = vmatmul.bf16.gmra.mxu3 %v11354_v17 }
 0x783   : > { %6698 = vmatmul.msk.bf16.gmra.mxu0 %vm2785_vm14, %v11356_v10  ;;  %6762 = vmatmul.msk.bf16.gmra.mxu2 %vm2785_vm14, %v11356_v10 }
 0x785   : > { %v5365_v0 = vpop.f32.mrf.mxu3 }
 0x786   : > { %v5455_v52 = vadd.f32 %v5454_v25, %v5365_v0  ;;  %v5622_v51 = vpop.f32.mrf.mxu1 }
 0x788   : > { %v11504_v28 = vadd.f32 %v5617_v32, %v5455_v52  ;;  %v5456_v37 = vpop.f32.mrf.mxu0 }
 0x78a   : > { %12328 = vst [vmem:[#allocation18_spill] sm:$0xff] %v11504_v28 }
 0x78d   : > { %v5367_v61 = vpop.f32.mrf.mxu3 }
 0x78e   : > { %v11508_v21 = vadd.f32 %v5456_v37, %v5367_v61  ;;  %v11518_v52 = vpop.f32.mrf.mxu1 }
 0x78f   : > { %12332 = vst [vmem:[#allocation13_spill] sm:$0xff] %v11518_v52 }
 0x790   : > { %12330 = vst [vmem:[#allocation21_spill] sm:$0xff] %v11508_v21  ;;  %v5459_v49 = vpop.f32.mrf.mxu0 }
 0x792   : > { %5409 = vmatmul.bf16.gmra.mxu3 %v11299_v8  ;;  %v7528_v8 = vld [vmem:[%s7784_s21 + $0x18] sm:$0xff] }
 0x793   : > { %6699 = vmatmul.msk.bf16.gmra.mxu0 %vm2785_vm14, %v11301_v44 }
 0x795   : > { %v5370_v32 = vpop.f32.mrf.mxu3 }
 0x796   : > { %v5460_v25 = vadd.f32 %v5459_v49, %v5370_v32 }
 0x798   : > { %v11516_v50 = vadd.f32 %v5622_v51, %v5460_v25  ;;  %v5461_v0 = vpop.f32.mrf.mxu0  ;;  %v5627_v51 = vpop.f32.mrf.mxu1 }
 0x79a   : > { %12331 = vst [vmem:[#allocation31_spill] sm:$0xff] %v11516_v50 }
 0x79d   : > { %v5372_v37 = vpop.f32.mrf.mxu3 }
 0x79e   : > { %v11520_v61 = vadd.f32 %v5461_v0, %v5372_v37  ;;  %v6926_v0 = vld [vmem:[%s12011_s12 + $0xe0] sm:$0xff] }
 0x79f   : > { %5856 = vmatpush.bf16.msrb.mxu3 %v6926_v0 }
 0x7a0   : > { %12333 = vst [vmem:[#allocation37_spill] sm:$0xff] %v11520_v61  ;;  %v5464_v21 = vpop.f32.mrf.mxu0 }
 0x7a2   : > { %5631 = vmatmul.bf16.vlgmr.msra.gmra.mxu3 %v11358_v55 }
 0x7a3   : > { %6835 = vmatmul.msk.bf16.vlgmr.msrb.gmra.mxu0 %vm2785_vm14, %v11063_v29  ;;  %v6934_v29 = vld [vmem:[%s12013_s14] sm:$0xff] }
 0x7a4   : > { %6190 = vmatpush.bf16.msrb.mxu1 %v6934_v29  ;;  %v6924_v29 = vld [vmem:[%s12011_s12 + $0xd0] sm:$0xff] }
 0x7a5   : > { %v5375_v18 = vpop.f32.mrf.mxu3 }
 0x7a6   : > { %v5465_v49 = vadd.f32 %v5464_v21, %v5375_v18 }
 0x7a8   : > { %v11528_v32 = vadd.f32 %v5627_v51, %v5465_v49  ;;  %v5466_v25 = vpop.f32.mrf.mxu0  ;;  %v6925_v51 = vld [vmem:[%s12011_s12 + $0xd8] sm:$0xff] }
 0x7a9   : > { %5857 = vmatpush.bf16.msrb.mxu3 %v6925_v51 }
 0x7aa   : > { %12334 = vst [vmem:[#allocation22_spill] sm:$0xff] %v11528_v32 }
 0x7ad   : > { %v5377_v37 = vpop.f32.mrf.mxu3  ;;  %5858 = vmatpush.bf16.msrb.mxu3 %v6924_v29 }
 0x7ae   : > { %v11533_v52 = vadd.f32 %v5466_v25, %v5377_v37 }
 0x7b0   : > { %12335 = vst [vmem:[#allocation17_spill] sm:$0xff] %v11533_v52  ;;  %v5469_v9 = vpop.f32.mrf.mxu0 }
 0x7b2   : > { %5636 = vmatmul.bf16.gmra.mxu3 %v11246_v42 }
 0x7b3   : > { %6836 = vmatmul.msk.bf16.gmra.mxu0 %vm2785_vm14, %v11089_v46 }
 0x7b5   : > { %v5380_v21 = vpop.f32.mrf.mxu3 }
 0x7b6   : > { %v11541_v18 = vadd.f32 %v5469_v9, %v5380_v21 }
 0x7b8   : > { %v5471_v49 = vpop.f32.mrf.mxu0 }
 0x7bd   : > { %v5382_v25 = vpop.f32.mrf.mxu3 }
 0x7be   : > { %v11546_v0 = vadd.f32 %v5471_v49, %v5382_v25 }
 0x7c0   : > { %v5474_v37 = vpop.f32.mrf.mxu0 }
 0x7c2   : > { %5641 = vmatmul.bf16.gmra.mxu3 %v11410_v23 }
 0x7c3   : > { %6837 = vmatmul.msk.bf16.gmra.mxu0 %vm2785_vm14, %v11136_v6 }
 0x7c5   : > { %v5385_v46 = vpop.f32.mrf.mxu3 }
 0x7c6   : > { %v11551_v52 = vadd.f32 %v5474_v37, %v5385_v46  ;;  %v6923_v37 = vld [vmem:[%s12011_s12 + $0xc8] sm:$0xff] }
 0x7c7   : > { %5859 = vmatpush.bf16.msrb.mxu3 %v6923_v37 }
 0x7c8   : > { %v5476_v9 = vpop.f32.mrf.mxu0 }
 0x7cd   : > { %v5387_v21 = vpop.f32.mrf.mxu3 }
 0x7ce   : > { %v11556_v51 = vadd.f32 %v5476_v9, %v5387_v21 }
 0x7d0   : > { %v5479_v49 = vpop.f32.mrf.mxu0 }
 0x7d2   : > { %5646 = vmatmul.bf16.gmra.mxu3 %v11440_v5 }
 0x7d3   : > { %6838 = vmatmul.msk.bf16.gmra.mxu0 %vm2785_vm14, %v11194_v27  ;;  %v6922_v27 = vld [vmem:[%s12011_s12 + $0xc0] sm:$0xff] }
 0x7d4   : > { %5860 = vmatpush.bf16.msrb.mxu3 %v6922_v27 }
 0x7d5   : > { %v5390_v25 = vpop.f32.mrf.mxu3 }
 0x7d6   : > { %v11561_v6 = vadd.f32 %v5479_v49, %v5390_v25 }
 0x7d8   : > { %v5481_v46 = vpop.f32.mrf.mxu0 }
 0x7dd   : > { %v5392_v29 = vpop.f32.mrf.mxu3 }
 0x7de   : > { %v11566_v9 = vadd.f32 %v5481_v46, %v5392_v29  ;;  %v7526_v29 = vld [vmem:[%s7784_s21 + $0x8] sm:$0xff] }
 0x7e0   : > { %v5484_v21 = vpop.f32.mrf.mxu0 }
 0x7e2   : > { %5651 = vmatmul.bf16.gmra.mxu3 %v11260_v35 }
 0x7e3   : > { %6839 = vmatmul.msk.bf16.gmra.mxu0 %vm2785_vm14, %v11222_v54  ;;  %v7525_v54 = vld [vmem:[%s7784_s21] sm:$0xff] }
 0x7e4   : > { %v6099_v50 = vpack.c.bf16 %v7526_v29, %v7525_v54 }
 0x7e5   : > { %v5395_v49 = vpop.f32.mrf.mxu3 }
 0x7e6   : > { %v11574_v25 = vadd.f32 %v5484_v21, %v5395_v49  ;;  %6858 = vmatmul.msk.bf16.vlgmr.msrb.gmra.mxu1 %vm12336_vm11, %v6099_v50  ;;  %vm12357_vm11 = vmmov %vm12344_vm0 }
 0x7e8   : > { %v5486_v37 = vpop.f32.mrf.mxu0 }
 0x7ed   : > { %v5397_v32 = vpop.f32.mrf.mxu3 }
 0x7ee   : > { %v11576_v61 = vadd.f32 %v5486_v37, %v5397_v32 }
 0x7f0   : > { %v5489_v46 = vpop.f32.mrf.mxu0 }
 0x7f2   : > { %5656 = vmatmul.bf16.gmra.mxu3 %v11350_v31 }
 0x7f3   : > { %6840 = vmatmul.msk.bf16.gmra.mxu0 %vm2785_vm14, %v11269_v12  ;;  %v7527_v12 = vld [vmem:[%s7784_s21 + $0x10] sm:$0xff] }
 0x7f4   : > { %v6100_v54 = vpack.c.bf16 %v7528_v8, %v7527_v12 }
 0x7f5   : > { %v5400_v28 = vpop.f32.mrf.mxu3 }
 0x7f6   : > { %v11584_v21 = vadd.f32 %v5489_v46, %v5400_v28  ;;  %6859 = vmatmul.msk.bf16.gmra.mxu1 %vm12337_vm5, %v6100_v54 }
 0x7f8   : > { %v5491_v27 = vpop.f32.mrf.mxu0 }
 0x7fd   : > { %v5402_v49 = vpop.f32.mrf.mxu3 }
 0x7fe   : > { %v11586_v32 = vadd.f32 %v5491_v27, %v5402_v49 }
 0x800   : > { %v5494_v37 = vpop.f32.mrf.mxu0 }
 0x802   : > { %5661 = vmatmul.bf16.gmra.mxu3 %v11354_v17  ;;  %v7530_v17 = vld [vmem:[%s7784_s21 + $0x28] sm:$0xff] }
 0x803   : > { %6841 = vmatmul.msk.bf16.gmra.mxu0 %vm2785_vm14, %v11323_v16  ;;  %v7529_v16 = vld [vmem:[%s7784_s21 + $0x20] sm:$0xff] }
 0x804   : > { %v6101_v8 = vpack.c.bf16 %v7530_v17, %v7529_v16 }
 0x805   : > { %v5405_v29 = vpop.f32.mrf.mxu3 }
 0x806   : > { %v11594_v28 = vadd.f32 %v5494_v37, %v5405_v29  ;;  %6860 = vmatmul.msk.bf16.gmra.mxu1 %vm12338_vm1, %v6101_v8 }
 0x808   : > { %v5496_v50 = vpop.f32.mrf.mxu0 }
 0x80d   : > { %v5407_v46 = vpop.f32.mrf.mxu3 }
 0x80e   : > { %v11596_v27 = vadd.f32 %v5496_v50, %v5407_v46 }
 0x810   : > { %v5499_v49 = vpop.f32.mrf.mxu0 }
 0x812   : > { %5861 = vmatmul.bf16.vlgmr.msrb.gmra.mxu3 %v11061_v41  ;;  %v7531_v41 = vld [vmem:[%s7784_s21 + $0x30] sm:$0xff] }
 0x813   : > { %6842 = vmatmul.msk.bf16.gmra.mxu0 %vm2785_vm14, %v11360_v19  ;;  %v7532_v19 = vld [vmem:[%s7784_s21 + $0x38] sm:$0xff] }
 0x814   : > { %v6102_v46 = vpack.c.bf16 %v7532_v19, %v7531_v41 }
 0x815   : > { %v5410_v12 = vpop.f32.mrf.mxu3 }
 0x816   : > { %v11604_v37 = vadd.f32 %v5499_v49, %v5410_v12  ;;  %6861 = vmatmul.msk.bf16.gmra.mxu1 %vm12339_vm2, %v6102_v46 }
 0x818   : > { %v5501_v54 = vpop.f32.mrf.mxu0 }
 0x81d   : > { %v5412_v29 = vpop.f32.mrf.mxu3 }
 0x81e   : > { %v11606_v50 = vadd.f32 %v5501_v54, %v5412_v29 }
 0x820   : > { %v5951_v46 = vpop.f32.mrf.mxu0 }
 0x822   : > { %5866 = vmatmul.bf16.gmra.mxu3 %v11085_v33  ;;  %v7533_v33 = vld [vmem:[%s7784_s21 + $0x40] sm:$0xff] }
 0x823   : > { %6843 = vmatmul.msk.bf16.gmra.mxu0 %vm2785_vm14, %v11248_v1  ;;  %v7534_v1 = vld [vmem:[%s7784_s21 + $0x48] sm:$0xff] }
 0x824   : > { %v6103_v12 = vpack.c.bf16 %v7534_v1, %v7533_v33 }
 0x825   : > { %v5632_v17 = vpop.f32.mrf.mxu3 }
 0x826   : > { %v11615_v49 = vadd.f32 %v5632_v17, %v11541_v18  ;;  %6862 = vmatmul.msk.bf16.gmra.mxu1 %vm12340_vm4, %v6103_v12 }
 0x828   : > { %v11653_v1 = vpop.f32.mrf.mxu0 }
 0x82d   : > { %v5634_v16 = vpop.f32.mrf.mxu3 }
 0x82e   : > { %v11618_v8 = vadd.f32 %v5634_v16, %v11546_v0 }
 0x832   : > { %5871 = vmatmul.bf16.gmra.mxu3 %v11132_v26  ;;  %v7535_v26 = vld [vmem:[%s7784_s21 + $0x50] sm:$0xff] }
 0x833   : > { %6844 = vmatmul.msk.bf16.gmra.mxu0 %vm2785_vm14, %v11414_v22  ;;  %v7536_v22 = vld [vmem:[%s7784_s21 + $0x58] sm:$0xff] }
 0x834   : > { %v6104_v41 = vpack.c.bf16 %v7536_v22, %v7535_v26 }
 0x835   : > { %v5637_v54 = vpop.f32.mrf.mxu3 }
 0x836   : > { %v11627_v29 = vadd.f32 %v5637_v54, %v11551_v52  ;;  %6863 = vmatmul.msk.bf16.gmra.mxu1 %vm12341_vm6, %v6104_v41  ;;  %v7540_v54 = vld [vmem:[%s7784_s21 + $0x78] sm:$0xff] }
 0x83d   : > { %v5639_v18 = vpop.f32.mrf.mxu3 }
 0x83e   : > { %v11630_v0 = vadd.f32 %v5639_v18, %v11556_v51 }
 0x842   : > { %5876 = vmatmul.bf16.gmra.mxu3 %v11192_v4  ;;  %v7537_v4 = vld [vmem:[%s7784_s21 + $0x60] sm:$0xff] }
 0x843   : > { %6845 = vmatmul.msk.bf16.gmra.mxu0 %vm2785_vm14, %v11442_v36  ;;  %v7538_v36 = vld [vmem:[%s7784_s21 + $0x68] sm:$0xff] }
 0x844   : > { %v6105_v16 = vpack.c.bf16 %v7538_v36, %v7537_v4 }
 0x845   : > { %v5642_v19 = vpop.f32.mrf.mxu3 }
 0x846   : > { %v11639_v52 = vadd.f32 %v5642_v19, %v11561_v6  ;;  %6864 = vmatmul.msk.bf16.gmra.mxu1 %vm12342_vm7, %v6105_v16 }
 0x84d   : > { %v5644_v17 = vpop.f32.mrf.mxu3 }
 0x84e   : > { %v11642_v51 = vadd.f32 %v5644_v17, %v11566_v9 }
 0x852   : > { %5881 = vmatmul.bf16.gmra.mxu3 %v11216_v62  ;;  %v11658_v62 = vpop.f32.mrf.mxu0 }
 0x853   : > { %6846 = vmatmul.msk.bf16.gmra.mxu0 %vm2785_vm14, %v11262_v57  ;;  %v7539_v57 = vld [vmem:[%s7784_s21 + $0x70] sm:$0xff] }
 0x854   : > { %v6106_v18 = vpack.c.bf16 %v7540_v54, %v7539_v57 }
 0x855   : > { %v5647_v33 = vpop.f32.mrf.mxu3 }
 0x856   : > { %v11651_v6 = vadd.f32 %v5647_v33, %v11574_v25  ;;  %6865 = vmatmul.msk.bf16.gmra.mxu1 %vm12343_vm8, %v6106_v18  ;;  %v7544_v18 = vld [vmem:[%s7784_s21 + $0x98] sm:$0xff] }
 0x85a   : > { %v11669_v22 = vpop.f32.mrf.mxu0 }
 0x85d   : > { %v5649_v12 = vpop.f32.mrf.mxu3 }
 0x85e   : > { %v11656_v9 = vadd.f32 %v5649_v12, %v11576_v61  ;;  %v11671_v61 = vpop.f32.mrf.mxu1 }
 0x862   : > { %5886 = vmatmul.bf16.gmra.mxu3 %v11265_v56  ;;  %v7541_v56 = vld [vmem:[%s7784_s21 + $0x80] sm:$0xff]  ;;  %v11681_v4 = vpop.f32.mrf.mxu0 }
 0x863   : > { %6847 = vmatmul.msk.bf16.gmra.mxu0 %vm2785_vm14, %v11352_v45  ;;  %v7542_v45 = vld [vmem:[%s7784_s21 + $0x88] sm:$0xff] }
 0x864   : > { %v6107_v17 = vpack.c.bf16 %v7542_v45, %v7541_v56  ;;  %v11713_v56 = vld [vmem:[%s12014_s15] ss:$0 sm:$0xff] }
 0x865   : > { %v5652_v25 = vpop.f32.mrf.mxu3 }
 0x866   : > { %v11667_v26 = vadd.f32 %v5652_v25, %v11584_v21  ;;  %v6192_v21 = vpop.f32.mrf.mxu1  ;;  %6866 = vmatmul.msk.bf16.gmra.mxu1 %vm12344_vm0, %v6107_v17  ;;  %v5427_v17 = vadd.f32 %v11369_v34, %v11372_v13 }
 0x868   : > { %v5590_v34 = vadd.f32 %v11336_v3, %v5427_v17 }
 0x86a   : > { %v11690_v12 = vpop.f32.mrf.mxu0 }
 0x86d   : > { %v5654_v41 = vpop.f32.mrf.mxu3 }
 0x86e   : > { %v11674_v19 = vadd.f32 %v5654_v41, %v11586_v32  ;;  %v6194_v33 = vpop.f32.mrf.mxu1 }
 0x86f   : > { %v6195_v3 = vadd.f32 %v11713_v56, %v6194_v33 }
 0x872   : > { %5891 = vmatmul.bf16.gmra.mxu3 %v11321_v58 }
 0x873   : > { %6848 = vmatmul.msk.bf16.gmra.mxu0 %vm2785_vm14, %v11356_v10 }
 0x875   : > { %v5657_v36 = vpop.f32.mrf.mxu3 }
 0x876   : > { %v11685_v16 = vadd.f32 %v5657_v36, %v11594_v28  ;;  %v6197_v54 = vpop.f32.mrf.mxu1  ;;  %v7543_v28 = vld [vmem:[%s7784_s21 + $0x90] sm:$0xff] }
 0x877   : > { %v6108_v25 = vpack.c.bf16 %v7544_v18, %v7543_v28  ;;  %v7546_v28 = vld [vmem:[%s7784_s21 + $0xa8] sm:$0xff] }
 0x879   : > { %6867 = vmatmul.msk.bf16.gmra.mxu1 %vm12345_vm9, %v6108_v25  ;;  %v6193_v25 = vadd.f32 %v11713_v56, %v6192_v21 }
 0x87d   : > { %v5659_v32 = vpop.f32.mrf.mxu3 }
 0x87e   : > { %v11688_v58 = vadd.f32 %v5659_v32, %v11596_v27  ;;  %v11701_v27 = vpop.f32.mrf.mxu0 }
 0x882   : > { %5896 = vmatmul.bf16.gmra.mxu3 %v11358_v55 }
 0x883   : > { %6849 = vmatmul.msk.bf16.gmra.mxu0 %vm2785_vm14, %v11301_v44  ;;  %v6199_v44 = vpop.f32.mrf.mxu1 }
 0x885   : > { %v5662_v10 = vpop.f32.mrf.mxu3 }
 0x886   : > { %v11696_v57 = vadd.f32 %v5662_v10, %v11604_v37  ;;  %v11707_v37 = vpop.f32.mrf.mxu0  ;;  %v7545_v10 = vld [vmem:[%s7784_s21 + $0xa0] sm:$0xff] }
 0x887   : > { %v6109_v18 = vpack.c.bf16 %v7546_v28, %v7545_v10  ;;  %v11742_v28 = vpop.f32.mrf.mxu2 }
 0x889   : > { %6868 = vmatmul.msk.bf16.gmra.mxu1 %vm12346_vm10, %v6109_v18 }
 0x88b   : > { %v6202_v32 = vpop.f32.mrf.mxu1 }
 0x88d   : > { %v5664_v41 = vpop.f32.mrf.mxu3 }
 0x88e   : > { %v11704_v55 = vadd.f32 %v5664_v41, %v11606_v50  ;;  %v5677_v50 = vadd.f32 %v11407_v47, %v11285_v2 }
 0x892   : > { %5901 = vmatmul.bf16.gmra.mxu3 %v11246_v42  ;;  %v11723_v42 = vld [vmem:[%s12012_s13] ss:$0 sm:$0xff] }
 0x893   : > { %6025 = vmatmul.bf16.gmra.mxu0 %v12272_v14 }
 0x895   : > { %v5862_v45 = vpop.f32.mrf.mxu3 }
 0x896   : > { %v5952_v36 = vadd.f32 %v5951_v46, %v5862_v45  ;;  %v5679_v46 = vadd.f32 %v11434_v40, %v5590_v34  ;;  %v6204_v45 = vpop.f32.mrf.mxu1  ;;  %v5682_v40 = vadd.f32 %v11445_v30, %v11396_v59  ;;  %v11751_v34 = vpop.f32.mrf.mxu0 }
 0x898   : > { %v6031_v41 = vadd.f32 %v5952_v36, %v5677_v50 }
 0x89a   : > { %v6067_v2 = vadd.f32 %v11723_v42, %v6031_v41  ;;  %v7548_v41 = vld [vmem:[%s7784_s21 + $0xb8] sm:$0xff] }
 0x89c   : > { %v6272_v13 = vadd.f32 %v6193_v25, %v6067_v2  ;;  %v7547_v25 = vld [vmem:[%s7784_s21 + $0xb0] sm:$0xff] }
 0x89d   : > { %v5864_v47 = vpop.f32.mrf.mxu3  ;;  %v6110_v33 = vpack.c.bf16 %v7548_v41, %v7547_v25 }
 0x89e   : > { %6304 = vst.msk [vmem:[%s11733_s27] sm:$0xff] %vm2785_vm14, %v6272_v13  ;;  %v5954_v21 = vadd.f32 %v11653_v1, %v5864_v47  ;;  %v6207_v18 = vpop.f32.mrf.mxu1  ;;  %v5595_v13 = vadd.f32 %v11367_v20, %v11404_v39  ;;  %v6200_v20 = vadd.f32 %v11713_v56, %v6199_v44  ;;  %v6203_v44 = vadd.f32 %v11713_v56, %v6202_v32 }
 0x89f   : > { %6869 = vmatmul.msk.bf16.gmra.mxu1 %vm12347_vm12, %v6110_v33 }
 0x8a0   : > { %v6032_v50 = vadd.f32 %v5954_v21, %v5679_v46  ;;  %v11762_v21 = vpop.f32.mrf.mxu2 }
 0x8a2   : > { %v6068_v17 = vadd.f32 %v11723_v42, %v6032_v50  ;;  %5906 = vmatmul.bf16.gmra.mxu3 %v11410_v23  ;;  %v6198_v23 = vadd.f32 %v11713_v56, %v6197_v54 }
 0x8a4   : > { %v6273_v36 = vadd.f32 %v6195_v3, %v6068_v17  ;;  %v11764_v3 = vpop.f32.mrf.mxu0 }
 0x8a5   : > { %v5867_v10 = vpop.f32.mrf.mxu3 }
 0x8a6   : > { %6305 = vst.msk [vmem:[%s11733_s27 + $0x8] sm:$0xff] %vm2785_vm14, %v6273_v36  ;;  %v5957_v1 = vadd.f32 %v11658_v62, %v5867_v10  ;;  %v5684_v62 = vadd.f32 %v11453_v48, %v5595_v13  ;;  %v6209_v54 = vpop.f32.mrf.mxu1  ;;  %v5687_v48 = vadd.f32 %v11464_v53, %v11432_v24 }
 0x8a8   : > { %v6033_v2 = vadd.f32 %v5957_v1, %v5682_v40  ;;  %v7549_v40 = vld [vmem:[%s7784_s21 + $0xc0] sm:$0xff]  ;;  %v7550_v1 = vld [vmem:[%s7784_s21 + $0xc8] sm:$0xff]  ;;  %v11780_v33 = vpop.f32.mrf.mxu2 }
 0x8a9   : > { %v6111_v25 = vpack.c.bf16 %v7550_v1, %v7549_v40 }
 0x8aa   : > { %v6069_v47 = vadd.f32 %v11723_v42, %v6033_v2 }
 0x8ac   : > { %v6274_v59 = vadd.f32 %v6198_v23, %v6069_v47  ;;  %v11783_v24 = vpop.f32.mrf.mxu0 }
 0x8ad   : > { %v5869_v30 = vpop.f32.mrf.mxu3 }
 0x8ae   : > { %6306 = vst.msk [vmem:[%s11733_s27 + $0x10] sm:$0xff] %vm2785_vm14, %v6274_v59  ;;  %v5959_v46 = vadd.f32 %v11669_v22, %v5869_v30  ;;  %v6212_v10 = vpop.f32.mrf.mxu1 }
 0x8af   : > { %6870 = vmatmul.msk.bf16.gmra.mxu1 %vm12348_vm3, %v6111_v25 }
 0x8b0   : > { %v6034_v50 = vadd.f32 %v5959_v46, %v5684_v62  ;;  %v11792_v59 = vpop.f32.mrf.mxu2 }
 0x8b2   : > { %v6070_v39 = vadd.f32 %v11723_v42, %v6034_v50  ;;  %5911 = vmatmul.bf16.gmra.mxu3 %v11440_v5  ;;  %v5600_v5 = vadd.f32 %v11401_v38, %v11438_v11  ;;  %v6205_v38 = vadd.f32 %v11713_v56, %v6204_v45  ;;  %v7551_v45 = vld [vmem:[%s7784_s21 + $0xd0] sm:$0xff] }
 0x8b4   : > { %v6275_v17 = vadd.f32 %v6200_v20, %v6070_v39  ;;  %v5689_v32 = vadd.f32 %v11473_v15, %v5600_v5  ;;  %v11794_v46 = vpop.f32.mrf.mxu0  ;;  %v5692_v15 = vadd.f32 %v11487_v7, %v11451_v43  ;;  %v7552_v20 = vld [vmem:[%s7784_s21 + $0xd8] sm:$0xff]  ;;  %v12350_v7 = vld [vmem:[#allocation35_spill] sm:$0xff] }
 0x8b5   : > { %v5872_v36 = vpop.f32.mrf.mxu3  ;;  %v6112_v39 = vpack.c.bf16 %v7552_v20, %v7551_v45 }
 0x8b6   : > { %6307 = vst.msk [vmem:[%s11733_s27 + $0x18] sm:$0xff] %vm2785_vm14, %v6275_v17  ;;  %v5962_v22 = vadd.f32 %v11681_v4, %v5872_v36  ;;  %v6214_v13 = vpop.f32.mrf.mxu1  ;;  %v5605_v36 = vadd.f32 %v11436_v63, %v11455_v60  ;;  %v6210_v63 = vadd.f32 %v11713_v56, %v6209_v54  ;;  %v6213_v54 = vadd.f32 %v11713_v56, %v6212_v10 }
 0x8b8   : > { %v6035_v41 = vadd.f32 %v5962_v22, %v5687_v48  ;;  %v11808_v43 = vpop.f32.mrf.mxu2 }
 0x8ba   : > { %v6071_v23 = vadd.f32 %v11723_v42, %v6035_v41 }
 0x8bc   : > { %v6276_v53 = vadd.f32 %v6203_v44, %v6071_v23  ;;  %v11814_v25 = vpop.f32.mrf.mxu0  ;;  %v12351_v23 = vld [vmem:[#allocation20_spill] sm:$0xff] }
 0x8bd   : > { %v5874_v4 = vpop.f32.mrf.mxu3 }
 0x8be   : > { %6308 = vst.msk [vmem:[%s11733_s27 + $0x20] sm:$0xff] %vm2785_vm14, %v6276_v53  ;;  %v5964_v2 = vadd.f32 %v11690_v12, %v5874_v4  ;;  %v6217_v50 = vpop.f32.mrf.mxu1  ;;  %v5697_v53 = vadd.f32 %v11742_v28, %v12351_v23  ;;  %v12359_v23 = vld [vmem:[#allocation19_spill] sm:$0xff] }
 0x8bf   : > { %6871 = vmatmul.msk.bf16.gmra.mxu1 %vm12349_vm13, %v6112_v39 }
 0x8c0   : > { %v6036_v47 = vadd.f32 %v5964_v2, %v5689_v32  ;;  %v7553_v32 = vld [vmem:[%s7784_s21 + $0xe0] sm:$0xff]  ;;  %v7554_v2 = vld [vmem:[%s7784_s21 + $0xe8] sm:$0xff] }
 0x8c2   : > { %v6072_v11 = vadd.f32 %v11723_v42, %v6036_v47  ;;  %5916 = vmatmul.bf16.gmra.mxu3 %v11260_v35  ;;  %v6208_v35 = vadd.f32 %v11713_v56, %v6207_v18  ;;  %v6113_v47 = vpack.c.bf16 %v7554_v2, %v7553_v32 }
 0x8c4   : > { %v6277_v30 = vadd.f32 %v6205_v38, %v6072_v11  ;;  %v5708_v38 = vpop.f32.mrf.mxu2 }
 0x8c5   : > { %v5877_v62 = vpop.f32.mrf.mxu3 }
 0x8c6   : > { %6309 = vst.msk [vmem:[%s11733_s27 + $0x28] sm:$0xff] %vm2785_vm14, %v6277_v30  ;;  %v5967_v12 = vadd.f32 %v11701_v27, %v5877_v62  ;;  %v5694_v27 = vadd.f32 %v12350_v7, %v5605_v36  ;;  %v6219_v1 = vpop.f32.mrf.mxu1  ;;  %v12354_v30 = vld [vmem:[#allocation30_spill] sm:$0xff] }
 0x8c8   : > { %v6037_v17 = vadd.f32 %v5967_v12, %v5692_v15  ;;  %v5983_v15 = vpop.f32.mrf.mxu0 }
 0x8ca   : > { %v6073_v48 = vadd.f32 %v11723_v42, %v6037_v17  ;;  %v6215_v17 = vadd.f32 %v11713_v56, %v6214_v13  ;;  %v6218_v13 = vadd.f32 %v11713_v56, %v6217_v50 }
 0x8cc   : > { %v6278_v22 = vadd.f32 %v6208_v35, %v6073_v48  ;;  %v5711_v35 = vpop.f32.mrf.mxu2  ;;  %v12355_v48 = vld [vmem:[#allocation43_spill] sm:$0xff] }
 0x8cd   : > { %v5879_v40 = vpop.f32.mrf.mxu3 }
 0x8ce   : > { %6310 = vst.msk [vmem:[%s11733_s27 + $0x30] sm:$0xff] %vm2785_vm14, %v6278_v22  ;;  %v5969_v18 = vadd.f32 %v11707_v37, %v5879_v40  ;;  %v6222_v4 = vpop.f32.mrf.mxu1 }
 0x8cf   : > { %6872 = vmatmul.msk.bf16.gmra.mxu1 %vm12352_vm15, %v6113_v47 }
 0x8d0   : > { %v6038_v44 = vadd.f32 %v5969_v18, %v5694_v27  ;;  %v5986_v22 = vpop.f32.mrf.mxu0  ;;  %v12356_v27 = vld [vmem:[#allocation27_spill] sm:$0xff] }
 0x8d2   : > { %v6074_v60 = vadd.f32 %v11723_v42, %v6038_v44  ;;  %5921 = vmatmul.bf16.gmra.mxu3 %v11350_v31  ;;  %v12353_v31 = vld [vmem:[#allocation32_spill] sm:$0xff] }
 0x8d3   : > { %v5610_v62 = vadd.f32 %v12354_v30, %v12353_v31  ;;  %v7555_v44 = vld [vmem:[%s7784_s21 + $0xf0] sm:$0xff]  ;;  %v6220_v31 = vadd.f32 %v11713_v56, %v6219_v1 }
 0x8d4   : > { %v6279_v41 = vadd.f32 %v6210_v63, %v6074_v60  ;;  %v7556_v63 = vld [vmem:[%s7784_s21 + $0xf8] sm:$0xff]  ;;  %v5713_v32 = vpop.f32.mrf.mxu2  ;;  %s6936_s21 = sshll.u32 %s7733_s25, 8 }
 0x8d5   : > { %v5882_v5 = vpop.f32.mrf.mxu3  ;;  %v6114_v60 = vpack.c.bf16 %v7556_v63, %v7555_v44  ;;  %s6348_s20 = scalar_lea.hbm %s12015_s16, %s6936_s21 }
 0x8d6   : > { %6311 = vst.msk [vmem:[%s11733_s27 + $0x38] sm:$0xff] %vm2785_vm14, %v6279_v41  ;;  %v5972_v37 = vadd.f32 %v11751_v34, %v5882_v5  ;;  %v5699_v34 = vadd.f32 %v11762_v21, %v5610_v62  ;;  %v6224_v20 = vpop.f32.mrf.mxu1  ;;  %v5702_v21 = vadd.f32 %v11780_v33, %v12356_v27  ;;  %v12358_v5 = vld [vmem:[#allocation11_spill] sm:$0xff]  ;;  %v12360_v62 = vld [vmem:[#allocation42_spill] sm:$0xff]  ;;  %s6351_s25 = sshll.u32 %s6348_s20, 4  ;;  %s6352_s25 = int_to_ptr.hbm [resolvable:$true] %s6351_s25 }
 0x8d7   : > { %s7571_s18 = sshra.s32 %s6352_s25, 4  ;;  %s7572_s18 = int_to_ptr.hbm [resolvable:$true] %s7571_s18 }
 0x8d8   : > { %v6039_v11 = vadd.f32 %v5972_v37, %v5697_v53  ;;  %v5615_v53 = vadd.f32 %v12359_v23, %v12358_v5  ;;  %v5988_v47 = vpop.f32.mrf.mxu0  ;;  %v12364_v23 = vld [vmem:[#allocation31_spill] sm:$0xff]  ;;  %s7573_s19 = scalar_lea.hbm %s7572_s18, 256  ;;  %p7578_p0 = scmp.lt.s32.totalorder %s7572_s18, %s12015_s16 }
 0x8d9   : > { %p7574_p11 = scmp.ne.s32.totalorder %s7572_s18, %s7573_s19  ;;  %p7579_p1 = scmp.lt.s32.totalorder %s7577_s30, %s7573_s19 }
 0x8da   : > { %v6075_v12 = vadd.f32 %v11723_v42, %v6039_v11 }
 0x8db   : > { %p7575_p12 = pnand %p7574_p11, %p7750_p5  ;;  %p7580_p2 = por %p7579_p1, %p7578_p0 }
 0x8dc   : > { %v6280_v28 = vadd.f32 %v6213_v54, %v6075_v12 }
 0x8dd   : > { %v5884_v45 = vpop.f32.mrf.mxu3  ;;  %p7576_p13 = pneg %p7575_p12 }
 0x8de   : > { %6312 = vst.msk [vmem:[%s11733_s27 + $0x40] sm:$0xff] %vm2785_vm14, %v6280_v28  ;;  %v5974_v10 = vadd.f32 %v11764_v3, %v5884_v45  ;;  %v6227_v18 = vpop.f32.mrf.mxu1  ;;  %v5716_v45 = vpop.f32.mrf.mxu2 }
 0x8df   : > { %6873 = vmatmul.msk.bf16.gmra.mxu1 %vm12357_vm11, %v6114_v60  ;;  %v6225_v60 = vadd.f32 %v11713_v56, %v6224_v20  ;;  %p7581_p3 = pnand %p7580_p2, %p7576_p13 }
 0x8e0   : > { %v6040_v39 = vadd.f32 %v5974_v10, %v5699_v34  ;;  %v12361_v34 = vld [vmem:[#allocation18_spill] sm:$0xff] }
 0x8e1   : > { %v5707_v10 = vadd.f32 %v11808_v43, %v12361_v34 }
 0x8e2   : > { %v6076_v36 = vadd.f32 %v11723_v42, %v6040_v39  ;;  %5926 = vmatmul.bf16.gmra.mxu3 %v12355_v48  ;;  %v6223_v39 = vadd.f32 %v11713_v56, %v6222_v4  ;;  %v12363_v48 = vld [vmem:[#allocation36_spill] sm:$0xff] }
 0x8e4   : > { %v6281_v40 = vadd.f32 %v6215_v17, %v6076_v36  ;;  %v12362_v36 = vld [vmem:[#allocation21_spill] sm:$0xff] }
 0x8e5   : > { %v5887_v7 = vpop.f32.mrf.mxu3 }
 0x8e6   : > { %6313 = vst.msk [vmem:[%s11733_s27 + $0x48] sm:$0xff] %vm2785_vm14, %v6281_v40  ;;  %v5977_v3 = vadd.f32 %v11783_v24, %v5887_v7  ;;  %v5704_v24 = vadd.f32 %v11792_v59, %v5615_v53  ;;  %v6229_v50 = vpop.f32.mrf.mxu1  ;;  %v5620_v40 = vadd.f32 %v12363_v48, %v12362_v36  ;;  %v5718_v43 = vpop.f32.mrf.mxu2  ;;  %v5712_v53 = vadd.f32 %v5711_v35, %v12364_v23 }
 0x8e8   : > { %v6041_v41 = vadd.f32 %v5977_v3, %v5702_v21  ;;  %v5709_v3 = vadd.f32 %v5708_v38, %v5620_v40  ;;  %v6228_v38 = vadd.f32 %v11713_v56, %v6227_v18 }
 0x8ea   : > { %v6077_v37 = vadd.f32 %v11723_v42, %v6041_v41 }
 0x8ec   : > { %v6282_v2 = vadd.f32 %v6218_v13, %v6077_v37 }
 0x8ed   : > { %v5889_v33 = vpop.f32.mrf.mxu3 }
 0x8ee   : > { %6314 = vst.msk [vmem:[%s11733_s27 + $0x50] sm:$0xff] %vm2785_vm14, %v6282_v2  ;;  %v5979_v54 = vadd.f32 %v11794_v46, %v5889_v33  ;;  %v5991_v46 = vpop.f32.mrf.mxu0  ;;  %v6232_v1 = vpop.f32.mrf.mxu1  ;;  %v12365_v2 = vld [vmem:[#allocation37_spill] sm:$0xff] }
 0x8ef   : > { %v12366_v33 = vld [vmem:[#allocation13_spill] sm:$0xff]  ;;  %v5721_v20 = vpop.f32.mrf.mxu2  ;;  %v6233_v40 = vadd.f32 %v11713_v56, %v6232_v1 }
 0x8f0   : > { %v6042_v11 = vadd.f32 %v5979_v54, %v5704_v24  ;;  %v5625_v24 = vadd.f32 %v12366_v33, %v12365_v2 }
 0x8f2   : > { %v6078_v30 = vadd.f32 %v11723_v42, %v6042_v11  ;;  %5931 = vmatmul.bf16.gmra.mxu3 %v12360_v62  ;;  %v5714_v62 = vadd.f32 %v5713_v32, %v5625_v24 }
 0x8f4   : > { %v6283_v12 = vadd.f32 %v6220_v31, %v6078_v30 }
 0x8f5   : > { %v5892_v28 = vpop.f32.mrf.mxu3 }
 0x8f6   : > { %6315 = vst.msk [vmem:[%s11733_s27 + $0x58] sm:$0xff] %vm2785_vm14, %v6283_v12  ;;  %v5982_v59 = vadd.f32 %v11814_v25, %v5892_v28  ;;  %v5993_v25 = vpop.f32.mrf.mxu0  ;;  %v6234_v13 = vpop.f32.mrf.mxu1 }
 0x8f7   : > { %v5723_v28 = vpop.f32.mrf.mxu2 }
 0x8f8   : > { %v6043_v17 = vadd.f32 %v5982_v59, %v5707_v10  ;;  %v5724_v33 = vadd.f32 %v5723_v28, %v11618_v8 }
 0x8fa   : > { %v6079_v7 = vadd.f32 %v11723_v42, %v6043_v17 }
 0x8fc   : > { %v6284_v27 = vadd.f32 %v6223_v39, %v6079_v7  ;;  %v12367_v39 = vld [vmem:[#allocation22_spill] sm:$0xff] }
 0x8fd   : > { %v5894_v21 = vpop.f32.mrf.mxu3  ;;  %v5717_v17 = vadd.f32 %v5716_v45, %v12367_v39 }
 0x8fe   : > { %6316 = vst.msk [vmem:[%s11733_s27 + $0x60] sm:$0xff] %vm2785_vm14, %v6284_v27  ;;  %v5984_v44 = vadd.f32 %v5983_v15, %v5894_v21  ;;  %v6237_v30 = vpop.f32.mrf.mxu1 }
 0x900   : > { %v6044_v63 = vadd.f32 %v5984_v44, %v5709_v3  ;;  %v5726_v3 = vpop.f32.mrf.mxu2 }
 0x902   : > { %v6080_v4 = vadd.f32 %v11723_v42, %v6044_v63  ;;  %5936 = vmatmul.bf16.gmra.mxu3 %v12272_v14  ;;  %v5996_v14 = vpop.f32.mrf.mxu0 }
 0x904   : > { %v6285_v41 = vadd.f32 %v6225_v60, %v6080_v4  ;;  %v6235_v4 = vadd.f32 %v11713_v56, %v6234_v13 }
 0x905   : > { %v5897_v5 = vpop.f32.mrf.mxu3 }
 0x906   : > { %6317 = vst.msk [vmem:[%s11733_s27 + $0x68] sm:$0xff] %vm2785_vm14, %v6285_v41  ;;  %v5987_v37 = vadd.f32 %v5986_v22, %v5897_v5  ;;  %v6230_v22 = vadd.f32 %v11713_v56, %v6229_v50  ;;  %v6239_v48 = vpop.f32.mrf.mxu1  ;;  %v5722_v5 = vadd.f32 %v5721_v20, %v11615_v49 }
 0x908   : > { %v6045_v15 = vadd.f32 %v5987_v37, %v5712_v53  ;;  %v5728_v53 = vpop.f32.mrf.mxu2  ;;  %v6238_v37 = vadd.f32 %v11713_v56, %v6237_v30 }
 0x90a   : > { %v6081_v54 = vadd.f32 %v11723_v42, %v6045_v15  ;;  %v5998_v59 = vpop.f32.mrf.mxu0 }
 0x90c   : > { %v6286_v11 = vadd.f32 %v6228_v38, %v6081_v54  ;;  %v6240_v54 = vadd.f32 %v11713_v56, %v6239_v48 }
 0x90d   : > { %v5899_v31 = vpop.f32.mrf.mxu3 }
 0x90e   : > { %6318 = vst.msk [vmem:[%s11733_s27 + $0x70] sm:$0xff] %vm2785_vm14, %v6286_v11  ;;  %v5989_v12 = vadd.f32 %v5988_v47, %v5899_v31  ;;  %v12368_v47 = vld [vmem:[#allocation17_spill] sm:$0xff] }
 0x90f   : > { %v5630_v7 = vadd.f32 %v11671_v61, %v12368_v47 }
 0x910   : > { %v6046_v35 = vadd.f32 %v5989_v12, %v5714_v62  ;;  %v5731_v20 = vpop.f32.mrf.mxu2  ;;  %v5727_v12 = vadd.f32 %v5726_v3, %v11627_v29 }
 0x911   : > { %v5719_v44 = vadd.f32 %v5718_v43, %v5630_v7 }
 0x912   : > { %v6082_v18 = vadd.f32 %v11723_v42, %v6046_v35  ;;  %v6001_v60 = vpop.f32.mrf.mxu0 }
 0x914   : > { %v6287_v34 = vadd.f32 %v6230_v22, %v6082_v18 }
 0x915   : > { %v5902_v10 = vpop.f32.mrf.mxu3 }
 0x916   : > { %6319 = vst.msk [vmem:[%s11733_s27 + $0x78] sm:$0xff] %vm2785_vm14, %v6287_v34  ;;  %v5992_v36 = vadd.f32 %v5991_v46, %v5902_v10  ;;  %v6242_v46 = vpop.f32.mrf.mxu1 }
 0x917   : > { %v6243_v8 = vadd.f32 %v11713_v56, %v6242_v46 }
 0x918   : > { %v6047_v32 = vadd.f32 %v5992_v36, %v5717_v17  ;;  %v5733_v28 = vpop.f32.mrf.mxu2 }
 0x919   : > { %v5734_v46 = vadd.f32 %v5733_v28, %v11642_v51 }
 0x91a   : > { %v6083_v50 = vadd.f32 %v11723_v42, %v6047_v32 }
 0x91c   : > { %v6288_v27 = vadd.f32 %v6233_v40, %v6083_v50  ;;  %v5732_v50 = vadd.f32 %v5731_v20, %v11639_v52 }
 0x91d   : > { %v5904_v21 = vpop.f32.mrf.mxu3 }
 0x91e   : > { %6320 = vst.msk [vmem:[%s11733_s27 + $0x80] sm:$0xff] %vm2785_vm14, %v6288_v27  ;;  %v5994_v63 = vadd.f32 %v5993_v25, %v5904_v21  ;;  %v6003_v25 = vpop.f32.mrf.mxu0  ;;  %v6244_v15 = vpop.f32.mrf.mxu1 }
 0x91f   : > { %v6245_v48 = vadd.f32 %v11713_v56, %v6244_v15 }
 0x920   : > { %v6048_v45 = vadd.f32 %v5994_v63, %v5719_v44  ;;  %v5736_v7 = vpop.f32.mrf.mxu2 }
 0x922   : > { %v6084_v1 = vadd.f32 %v11723_v42, %v6048_v45 }
 0x924   : > { %v6289_v41 = vadd.f32 %v6235_v4, %v6084_v1 }
 0x925   : > { %v5907_v61 = vpop.f32.mrf.mxu3 }
 0x926   : > { %6321 = vst.msk [vmem:[%s11733_s27 + $0x88] sm:$0xff] %vm2785_vm14, %v6289_v41  ;;  %v5997_v23 = vadd.f32 %v5996_v14, %v5907_v61  ;;  %v6006_v11 = vpop.f32.mrf.mxu0  ;;  %v6247_v62 = vpop.f32.mrf.mxu1 }
 0x927   : > { %v6248_v21 = vadd.f32 %v11713_v56, %v6247_v62 }
 0x928   : > { %v6049_v43 = vadd.f32 %v5997_v23, %v5722_v5  ;;  %v5738_v1 = vpop.f32.mrf.mxu2 }
 0x929   : > { %v5739_v20 = vadd.f32 %v5738_v1, %v11656_v9 }
 0x92a   : > { %v6085_v38 = vadd.f32 %v11723_v42, %v6049_v43  ;;  %v5737_v43 = vadd.f32 %v5736_v7, %v11651_v6 }
 0x92c   : > { %v6290_v13 = vadd.f32 %v6238_v37, %v6085_v38 }
 0x92d   : > { %v5909_v2 = vpop.f32.mrf.mxu3 }
 0x92e   : > { %6322 = vst.msk [vmem:[%s11733_s27 + $0x90] sm:$0xff] %vm2785_vm14, %v6290_v13  ;;  %v5999_v24 = vadd.f32 %v5998_v59, %v5909_v2  ;;  %v5729_v59 = vadd.f32 %v5728_v53, %v11630_v0  ;;  %v6008_v39 = vpop.f32.mrf.mxu0  ;;  %v6249_v36 = vpop.f32.mrf.mxu1 }
 0x92f   : > { %v6250_v61 = vadd.f32 %v11713_v56, %v6249_v36 }
 0x930   : > { %v6050_v49 = vadd.f32 %v5999_v24, %v5724_v33  ;;  %v5741_v15 = vpop.f32.mrf.mxu2 }
 0x932   : > { %v6086_v14 = vadd.f32 %v11723_v42, %v6050_v49 }
 0x934   : > { %v6291_v31 = vadd.f32 %v6240_v54, %v6086_v14 }
 0x935   : > { %v5912_v30 = vpop.f32.mrf.mxu3 }
 0x936   : > { %6323 = vst.msk [vmem:[%s11733_s27 + $0x98] sm:$0xff] %vm2785_vm14, %v6291_v31  ;;  %v6002_v35 = vadd.f32 %v6001_v60, %v5912_v30  ;;  %v6011_v0 = vpop.f32.mrf.mxu0  ;;  %v6252_v44 = vpop.f32.mrf.mxu1 }
 0x937   : > { %v6253_v51 = vadd.f32 %v11713_v56, %v6252_v44 }
 0x938   : > { %v6051_v22 = vadd.f32 %v6002_v35, %v5727_v12  ;;  %v5743_v31 = vpop.f32.mrf.mxu2  ;;  %v5742_v12 = vadd.f32 %v5741_v15, %v11667_v26 }
 0x93a   : > { %v6087_v18 = vadd.f32 %v11723_v42, %v6051_v22 }
 0x93c   : > { %v6292_v34 = vadd.f32 %v6243_v8, %v6087_v18 }
 0x93d   : > { %v5914_v10 = vpop.f32.mrf.mxu3 }
 0x93e   : > { %6324 = vst.msk [vmem:[%s11733_s27 + $0xa0] sm:$0xff] %vm2785_vm14, %v6292_v34  ;;  %v6004_v17 = vadd.f32 %v6003_v25, %v5914_v10  ;;  %v6013_v41 = vpop.f32.mrf.mxu0  ;;  %v6254_v23 = vpop.f32.mrf.mxu1 }
 0x93f   : > { %v6255_v14 = vadd.f32 %v11713_v56, %v6254_v23 }
 0x940   : > { %v6052_v29 = vadd.f32 %v6004_v17, %v5729_v59  ;;  %v5746_v59 = vpop.f32.mrf.mxu2 }
 0x941   : > { %v5747_v7 = vadd.f32 %v5746_v59, %v11685_v16 }
 0x942   : > { %v6088_v40 = vadd.f32 %v11723_v42, %v6052_v29 }
 0x944   : > { %v6293_v32 = vadd.f32 %v6245_v48, %v6088_v40 }
 0x945   : > { %v5917_v47 = vpop.f32.mrf.mxu3 }
 0x946   : > { %6325 = vst.msk [vmem:[%s11733_s27 + $0xa8] sm:$0xff] %vm2785_vm14, %v6293_v32  ;;  %v6007_v27 = vadd.f32 %v6006_v11, %v5917_v47  ;;  %v6016_v2 = vpop.f32.mrf.mxu0  ;;  %v6257_v49 = vpop.f32.mrf.mxu1 }
 0x947   : > { %v6258_v9 = vadd.f32 %v11713_v56, %v6257_v49 }
 0x948   : > { %v6053_v3 = vadd.f32 %v6007_v27, %v5732_v50  ;;  %v5748_v27 = vpop.f32.mrf.mxu2 }
 0x94a   : > { %v6089_v63 = vadd.f32 %v11723_v42, %v6053_v3 }
 0x94c   : > { %v6294_v60 = vadd.f32 %v6248_v21, %v6089_v63 }
 0x94d   : > { %v5919_v45 = vpop.f32.mrf.mxu3 }
 0x94e   : > { %6326 = vst.msk [vmem:[%s11733_s27 + $0xb0] sm:$0xff] %vm2785_vm14, %v6294_v60  ;;  %v6009_v4 = vadd.f32 %v6008_v39, %v5919_v45  ;;  %v6018_v8 = vpop.f32.mrf.mxu0  ;;  %v6259_v22 = vpop.f32.mrf.mxu1  ;;  %v5744_v39 = vadd.f32 %v5743_v31, %v11674_v19  ;;  %v5749_v45 = vadd.f32 %v5748_v27, %v11688_v58 }
 0x94f   : > { %v6260_v48 = vadd.f32 %v11713_v56, %v6259_v22 }
 0x950   : > { %v6054_v52 = vadd.f32 %v6009_v4, %v5734_v46  ;;  %v5751_v4 = vpop.f32.mrf.mxu2 }
 0x952   : > { %v6090_v5 = vadd.f32 %v11723_v42, %v6054_v52 }
 0x954   : > { %v6295_v53 = vadd.f32 %v6250_v61, %v6090_v5 }
 0x955   : > { %v5922_v37 = vpop.f32.mrf.mxu3 }
 0x956   : > { %6327 = vst.msk [vmem:[%s11733_s27 + $0xb8] sm:$0xff] %vm2785_vm14, %v6295_v53  ;;  %v6012_v25 = vadd.f32 %v6011_v0, %v5922_v37  ;;  %v6021_v36 = vpop.f32.mrf.mxu0  ;;  %v6262_v29 = vpop.f32.mrf.mxu1  ;;  %v5752_v53 = vadd.f32 %v5751_v4, %v11696_v57 }
 0x957   : > { %v6263_v19 = vadd.f32 %v11713_v56, %v6262_v29 }
 0x958   : > { %v6055_v38 = vadd.f32 %v6012_v25, %v5737_v43 }
 0x95a   : > { %v6091_v13 = vadd.f32 %v11723_v42, %v6055_v38 }
 0x95c   : > { %v6296_v33 = vadd.f32 %v6253_v51, %v6091_v13  ;;  %v5753_v51 = vpop.f32.mrf.mxu2 }
 0x95d   : > { %v5924_v24 = vpop.f32.mrf.mxu3  ;;  %v5754_v57 = vadd.f32 %v5753_v51, %v11704_v55 }
 0x95e   : > { %6328 = vst.msk [vmem:[%s11733_s27 + $0xc0] sm:$0xff] %vm2785_vm14, %v6296_v33  ;;  %v6014_v54 = vadd.f32 %v6013_v41, %v5924_v24  ;;  %v6023_v3 = vpop.f32.mrf.mxu0  ;;  %v6264_v44 = vpop.f32.mrf.mxu1 }
 0x95f   : > { %v6265_v1 = vadd.f32 %v11713_v56, %v6264_v44 }
 0x960   : > { %v6056_v6 = vadd.f32 %v6014_v54, %v5739_v20 }
 0x962   : > { %v6092_v11 = vadd.f32 %v11723_v42, %v6056_v6 }
 0x964   : > { %v6297_v30 = vadd.f32 %v6255_v14, %v6092_v11 }
 0x965   : > { %v5927_v62 = vpop.f32.mrf.mxu3 }
 0x966   : > { %6329 = vst.msk [vmem:[%s11733_s27 + $0xc8] sm:$0xff] %vm2785_vm14, %v6297_v30  ;;  %v6017_v35 = vadd.f32 %v6016_v2, %v5927_v62  ;;  %v6026_v41 = vpop.f32.mrf.mxu0  ;;  %v6267_v5 = vpop.f32.mrf.mxu1 }
 0x967   : > { %v6268_v37 = vadd.f32 %v11713_v56, %v6267_v5 }
 0x968   : > { %v6057_v18 = vadd.f32 %v6017_v35, %v5742_v12 }
 0x96a   : > { %v6093_v28 = vadd.f32 %v11723_v42, %v6057_v18 }
 0x96c   : > { %v6298_v34 = vadd.f32 %v6258_v9, %v6093_v28 }
 0x96d   : > { %v5929_v10 = vpop.f32.mrf.mxu3 }
 0x96e   : > { %6330 = vst.msk [vmem:[%s11733_s27 + $0xd0] sm:$0xff] %vm2785_vm14, %v6298_v34  ;;  %v6019_v17 = vadd.f32 %v6018_v8, %v5929_v10  ;;  %v6028_v15 = vpop.f32.mrf.mxu0  ;;  %v6269_v33 = vpop.f32.mrf.mxu1 }
 0x96f   : > { %v6270_v49 = vadd.f32 %v11713_v56, %v6269_v33 }
 0x970   : > { %v6058_v26 = vadd.f32 %v6019_v17, %v5744_v39 }
 0x972   : > { %v6094_v40 = vadd.f32 %v11723_v42, %v6058_v26 }
 0x974   : > { %v6299_v32 = vadd.f32 %v6260_v48, %v6094_v40 }
 0x975   : > { %v5932_v47 = vpop.f32.mrf.mxu3 }
 0x976   : > { %6331 = vst.msk [vmem:[%s11733_s27 + $0xd8] sm:$0xff] %vm2785_vm14, %v6299_v32  ;;  %v6022_v50 = vadd.f32 %v6021_v36, %v5932_v47 }
 0x978   : > { %v6059_v0 = vadd.f32 %v6022_v50, %v5747_v7 }
 0x97a   : > { %v6095_v21 = vadd.f32 %v11723_v42, %v6059_v0 }
 0x97c   : > { %v6300_v63 = vadd.f32 %v6263_v19, %v6095_v21 }
 0x97d   : > { %v5934_v60 = vpop.f32.mrf.mxu3 }
 0x97e   : > { %6332 = vst.msk [vmem:[%s11733_s27 + $0xe0] sm:$0xff] %vm2785_vm14, %v6300_v63  ;;  %v6024_v16 = vadd.f32 %v6023_v3, %v5934_v60 }
 0x980   : > { %v6060_v46 = vadd.f32 %v6024_v16, %v5749_v45 }
 0x982   : > { %v6096_v52 = vadd.f32 %v11723_v42, %v6060_v46 }
 0x984   : > { %v6301_v61 = vadd.f32 %v6265_v1, %v6096_v52 }
 0x985   : > { %v5937_v23 = vpop.f32.mrf.mxu3 }
 0x986   : > { %6333 = vst.msk [vmem:[%s11733_s27 + $0xe8] sm:$0xff] %vm2785_vm14, %v6301_v61  ;;  %v6027_v58 = vadd.f32 %v6026_v41, %v5937_v23 }
 0x988   : > { %v6061_v43 = vadd.f32 %v6027_v58, %v5752_v53 }
 0x98a   : > { %v6097_v25 = vadd.f32 %v11723_v42, %v6061_v43 }
 0x98c   : > { %v6302_v38 = vadd.f32 %v6268_v37, %v6097_v25 }
 0x98d   : > { %v5939_v13 = vpop.f32.mrf.mxu3 }
 0x98e   : > { %6334 = vst.msk [vmem:[%s11733_s27 + $0xf0] sm:$0xff] %vm2785_vm14, %v6302_v38  ;;  %v6029_v2 = vadd.f32 %v6028_v15, %v5939_v13 }
 0x990   : > { %v6062_v24 = vadd.f32 %v6029_v2, %v5754_v57 }
 0x992   : > { %v6098_v20 = vadd.f32 %v11723_v42, %v6062_v24 }
 0x994   : > { %v6303_v54 = vadd.f32 %v6270_v49, %v6098_v20 }
 0x996   : > { %6335 = vst.msk [vmem:[%s11733_s27 + $0xf8] sm:$0xff] %vm2785_vm14, %v6303_v54 }
 0x997   : > { %7584 = shalt.err (!%p7581_p3)
}
 0x998   : > { %s7625_s26 = smov 128   ;;  %s7626_s27 = smov 8  }
 0x999   : > { %6951 = dma.vmem_to_hbm [thread:$0]  (%p7750_p5), %s6350_s23, 4096, %s6352_s25, %s6337_s17, %s7625_s26, %s7625_s26, %s7626_s27  }
 0x99a PF: > { %s12369_s1 = sld [smem:[#allocation5_spill]]  ;;  %p6957_p4 = scmp.ge.s32.totalorder %s7619_s24, 2 }
 0x99c   : > { %p6954_p7 = pnand %p6957_p4, %p7754_p6 }
 0x99e   : > { %p6955_p8 = pneg %p6954_p7 }
 0x9a0   : > { %s6366_s28 = sand.u32 1, %s12369_s1  }
 0x9a1   : > { %s6367_s21 = scalar_lea.sflag [#allocation3], %s6366_s28 }
 0x9a2   : > { %7602 = dma.done.wait (%p6955_p8), %s6367_s21, 4096  }
 0x9a3   : > { %7604 = vsyncadd (%p6955_p8), %s6367_s21, 4294963200  ;;  %s12371_s24 = sld [smem:[#allocation7_spill]]  ;;  %s12374_s21 = smov %s7611_s22 }
 0x9a4   : > { %s12372_s18 = sld [smem:[#allocation6_spill]] }
 0x9a5   : > { %s12373_s23 = sld [smem:[#allocation8_spill]] }
 0x9a9   : > { %p26_p9 = scmp.ge.s32.totalorder %s12371_s24, 4  }
 0x9aa   : > { %s12375_s22 = smov %s12372_s18 }
 0x9ab   :  { %28 = sbr.rel (!%p26_p9) target bundleno = 7 (0x7), region = 126 }
 0x9b0   :  { %6373 = vsyncpa [#allocation3], 1 }
 0x9b1   :  { %6375 = vsyncpa [#allocation3 + $0x1], 1 }

</bundles_post_ra>
